<compile_context>
chip_gen: v5e
topology: v5e:2x2
jax: 0.10.0
libtpu: 0.0.40
codegen_flags: <defaults>
</compile_context>

<pallas_src>
import functools

import jax
import jax.numpy as jnp
from jax.experimental import pallas as pl
from jax.experimental.pallas import tpu as pltpu


# ---------------------------------------------------------------------------
# Kernel
# ---------------------------------------------------------------------------
def _pcn_encoder_kernel(x_ref, w1_ref, b1_ref, w2_ref, b2_ref,
                        w3a_ref, w3b_ref, b3_ref, w4_ref, b4_ref, out_ref,
                        *, bt, n_pts, i_num, aorb, compute_dtype):
    """One grid step processes `bt` batch elements packed along the row axis."""

    def mm(a, w_ref):
        # MXU operands optionally bf16; always accumulate in f32.
        return jnp.dot(a.astype(compute_dtype), w_ref[...],
                       preferred_element_type=jnp.float32)

    c_in = x_ref.shape[-1]                          # 8 (zero-padded from 3)
    x = x_ref[...].reshape(bt * n_pts, c_in)        # [Bt*N, 8]

    # conv1 (1x1) + ReLU : [Bt*N, 8] @ [8, 128]
    h1 = jnp.maximum(mm(x, w1_ref) + b1_ref[...], 0.0)
    # conv2 (1x1)        : [Bt*N, 128] @ [128, 256]
    h2 = mm(h1, w2_ref) + b2_ref[...]

    h2_3d = h2.reshape(bt, n_pts, 256)
    # Global feature over ALL N points (per batch element); kept in f32.
    gf1 = jnp.max(h2_3d, axis=1)                    # [Bt, 256]

    # Select the AorB half BEFORE conv3/conv4 (exact: 1x1 convs are per-point
    # and only these rows feed the final max).  i_num % 8 == 0 is enforced in
    # the wrapper, so this slice is sublane-aligned (no relayout copy).
    if aorb == 'a':
        h2_sel = h2_3d[:, :i_num, :]
    else:
        h2_sel = h2_3d[:, n_pts - i_num:, :]
    h2_sel = h2_sel.reshape(bt * i_num, 256)

    # conv3 via split weight: cat([h2, gf1]) @ W3 == h2 @ W3a + gf1 @ W3b.
    # gf1 branch is tiny ([Bt,256]@[256,512]) and follows a global max -> f32.
    bias3 = jnp.dot(gf1, w3b_ref[...],
                    preferred_element_type=jnp.float32) + b3_ref[...]   # [Bt, 512]
    h3 = mm(h2_sel, w3a_ref).reshape(bt, i_num, 512) + bias3[:, None, :]
    h3 = jnp.maximum(h3, 0.0).reshape(bt * i_num, 512)

    # conv4 (1x1)        : [Bt*i_num, 512] @ [512, 512]
    h4 = (mm(h3, w4_ref) + b4_ref[...]).reshape(bt, i_num, 512)

    # Sublane/lane-dense output block: [1, Bt, 512].
    out_ref[...] = jnp.max(h4, axis=1)[None, :, :]


# ---------------------------------------------------------------------------
# Wrapper
# ---------------------------------------------------------------------------
def _step_vmem_bytes(bt, n_pts, i_num, w_bytes, weight_bufs):
    """Conservative per-grid-step VMEM working-set estimate (bytes)."""
    lane = 128
    # x tile is lane-sparse (only 8 of 128 lanes used) -> budget full 128
    # lanes, double buffered.  TODO(synk): channels-on-sublane x for big N.
    x_tile = bt * n_pts * lane * 4 * 2
    h12 = bt * n_pts * (128 + 256) * 4                      # h1 + h2 (f32)
    h34 = bt * i_num * (512 + 512) * 4                      # h3 + h4 (f32)
    casts = (bt * n_pts * (128 + 256) + bt * i_num * 512) * (2 if w_bytes == 2 else 0)
    out_tile = bt * 512 * 4 * 2
    weights = ((8 * 128 + 128 * 256 + 256 * 512 + 512 * 512) * w_bytes
               + 256 * 512 * 4) * weight_bufs               # W3b kept f32
    biases = (128 + 256 + 512 + 512) * 4 * weight_bufs
    return x_tile + h12 + h34 + casts + out_tile + weights + biases


def pcn_encoder_forward(x_ncl, params, *, i_num, aorb,
                        use_bf16=True, batch_tile=None):
    """x_ncl: [B, 3, 2*i_num] (PyTorch NCL layout). Returns [B, 512, 1]."""
    w1, b1, w2, b2, w3, b3, w4, b4 = params
    B, c_in, N = x_ncl.shape
    assert c_in == 3 and N == 2 * i_num
    assert aorb in ('a', 'b')
    # Keeps the AorB sublane slice and (bt,N)->(bt*N) reshapes tile-aligned.
    assert N % 8 == 0 and i_num % 8 == 0, "i_num must be a multiple of 8"

    # NCL -> NLC; pad channels 3 -> 8 (zero weight rows keep this exact).
    x_nlc = jnp.transpose(x_ncl, (0, 2, 1)).astype(jnp.float32)
    x_nlc = jnp.pad(x_nlc, ((0, 0), (0, 0), (0, 5)))
    w1p = jnp.pad(w1, ((0, 5), (0, 0)))

    # Split conv3 weight: rows 0..255 act on h2, rows 256..511 act on gf1
    # (torch.cat puts the point features first, global feature second).
    w3a, w3b = w3[:256, :], w3[256:, :]

    compute_dtype = jnp.bfloat16 if use_bf16 else jnp.float32
    w_bytes = 2 if use_bf16 else 4
    cast_w = (lambda w: w.astype(compute_dtype))   # biases stay f32 (VPU path)

    # --- generation-keyed VMEM budget & batch-tile choice -------------------
    try:
        vmem_cap = int(pltpu.get_tpu_info().vmem_capacity_bytes)
    except Exception:
        vmem_cap = 64 << 20                       # conservative (v7x-sized)
    if vmem_cap >= (100 << 20):                   # v5e / v6e: 128 MiB physical
        vmem_limit = 64 << 20
    else:                                         # v7x: 64 MiB physical
        vmem_limit = 32 << 20
    vmem_budget = vmem_limit - (8 << 20)          # headroom for compiler scratch

    if batch_tile is not None:
        bt = max(1, min(B, batch_tile))
    else:
        # Target >= ~1024 MXU rows per step (per-step pipeline overhead ~600
        # cycles), then shrink until the working set fits the VMEM budget.
        bt = max(1, min(B, max(1, 1024 // N)))
        while bt > 1 and _step_vmem_bytes(bt, N, i_num, w_bytes, 1) > vmem_budget:
            bt -= 1
        # Give the "parallel" grid axis at least two steps so v7x's second
        # TensorCore has work; negligible cost on single-TC v5e/v6e.
        if -(-B // bt) < 2 and B > 1:
            bt = -(-B // 2)

    n_tiles = -(-B // bt)
    Bp = n_tiles * bt
    if Bp != B:
        # Padded rows compute garbage and are sliced off below (keep slice!).
        x_nlc = jnp.pad(x_nlc, ((0, Bp - B), (0, 0), (0, 0)))

    kernel = functools.partial(
        _pcn_encoder_kernel, bt=bt, n_pts=N, i_num=i_num, aorb=aorb,
        compute_dtype=compute_dtype)

    flops = 2 * Bp * (N * 8 * 128 + N * 128 * 256
                      + i_num * 256 * 512 + 256 * 512 + i_num * 512 * 512)
    bytes_accessed = int(
        x_nlc.size * 4 + Bp * 512 * 4
        + (w1p.size + w2.size + w3a.size + w4.size) * w_bytes + w3b.size * 4
        + (128 + 256 + 512 + 512) * 4)

    # TODO(synk): for production N add an N-tile ("arbitrary") grid axis:
    # phase 1 running-max gf1 in VMEM scratch, phase 2 conv3/conv4 over i_num
    # tiles, so whole-N intermediates stop limiting bt on v7x's 64 MiB.
    def build_call(single_buffer_weights):
        # Weights/biases use constant index maps (DMA'd once across the grid);
        # request single buffering so the never-used second buffer doesn't eat
        # VMEM that should go into a larger batch tile.
        wkw = ({'pipeline_mode': pl.Buffered(1)}
               if single_buffer_weights else {})

        def w_spec(shape):
            return pl.BlockSpec(shape, lambda b: (0, 0), **wkw)

        return pl.pallas_call(
            kernel,
            out_shape=jax.ShapeDtypeStruct((n_tiles, bt, 512), jnp.float32),
            grid_spec=pltpu.PrefetchScalarGridSpec(
                num_scalar_prefetch=0,
                grid=(n_tiles,),
                in_specs=[
                    # TODO(synk): x tile is lane-sparse (8/128 lanes); switch
                    # to a channels-on-sublane layout for production N.
                    pl.BlockSpec((bt, N, 8), lambda b: (b, 0, 0)),   # x tile
                    w_spec((8, 128)),      # W1 (padded 3->8)
                    w_spec((1, 128)),      # b1
                    w_spec((128, 256)),    # W2
                    w_spec((1, 256)),      # b2
                    w_spec((256, 512)),    # W3a (h2 part)
                    w_spec((256, 512)),    # W3b (gf1 part, kept f32)
                    w_spec((1, 512)),      # b3
                    w_spec((512, 512)),    # W4
                    w_spec((1, 512)),      # b4
                ],
                out_specs=pl.BlockSpec((1, bt, 512), lambda b: (b, 0, 0)),
            ),
            compiler_params=pltpu.CompilerParams(
                dimension_semantics=("parallel",),
                vmem_limit_bytes=vmem_limit),
            cost_estimate=pl.CostEstimate(
                flops=flops, transcendentals=0,
                bytes_accessed=bytes_accessed),
        )

    args = (x_nlc, cast_w(w1p), b1, cast_w(w2), b2,
            cast_w(w3a), w3b, b3, cast_w(w4), b4)
    try:
        out = build_call(True)(*args)
    except Exception:
        # Lowering paths that reject Buffered(1) on the top-level pipeline:
        # rebuild with default (double-buffered) weight specs.
        out = build_call(False)(*args)

    # [n_tiles, bt, 512] -> [B, 512, 1] (PyTorch output layout)
    return out.reshape(Bp, 512)[:B][:, :, None]


# ---------------------------------------------------------------------------
# Params / reference
# ---------------------------------------------------------------------------
def init_params(key):
    """Deterministic init mimicking PyTorch Conv1d default (uniform ±1/sqrt(fan_in)).
    Weights are stored as [Cin, Cout] (transposed vs PyTorch [Cout, Cin, 1])."""
    ks = jax.random.split(key, 8)

    def conv_params(kw, kb, cin, cout):
        bound = 1.0 / jnp.sqrt(cin)
        w = jax.random.uniform(kw, (cin, cout), jnp.float32, -bound, bound)
        b = jax.random.uniform(kb, (1, cout), jnp.float32, -bound, bound)
        return w, b

    w1, b1 = conv_params(ks[0], ks[1], 3, 128)
    w2, b2 = conv_params(ks[2], ks[3], 128, 256)
    w3, b3 = conv_params(ks[4], ks[5], 512, 512)
    w4, b4 = conv_params(ks[6], ks[7], 512, 512)
    return (w1, b1, w2, b2, w3, b3, w4, b4)


def reference_forward(x_ncl, params, *, i_num, aorb):
    """Pure-JAX reference matching the PyTorch forward (concat form, full N)."""
    w1, b1, w2, b2, w3, b3, w4, b4 = params
    x = jnp.transpose(x_ncl, (0, 2, 1)).astype(jnp.float32)    # [B, N, 3]
    h1 = jax.nn.relu(x @ w1 + b1)                              # [B, N, 128]
    h2 = h1 @ w2 + b2                                          # [B, N, 256]
    gf1 = jnp.max(h2, axis=1, keepdims=True)                   # [B, 1, 256]
    cat = jnp.concatenate(
        [h2, jnp.broadcast_to(gf1, h2.shape)], axis=2)         # [B, N, 512]
    h3 = jax.nn.relu(cat @ w3 + b3)
    h4 = h3 @ w4 + b4                                          # [B, N, 512]
    sel = h4[:, :i_num, :] if aorb == 'a' else h4[:, -i_num:, :]
    gf2 = jnp.max(sel, axis=1, keepdims=True)                  # [B, 1, 512]
    return jnp.transpose(gf2, (0, 2, 1))                       # [B, 512, 1]


if __name__ == "__main__":
    key = jax.random.PRNGKey(0)
    k_x1, k_p1, k_x2, k_p2 = jax.random.split(key, 4)

    # Config 1: AorB='b' (TopNet_path2.topnet1), default bf16 MXU operands.
    B1, i1 = 8, 16
    x1 = jax.random.normal(k_x1, (B1, 3, 2 * i1), dtype=jnp.float32)
    p1 = init_params(k_p1)
    ref1 = reference_forward(x1, p1, i_num=i1, aorb='b')

    out1 = jax.block_until_ready(
        pcn_encoder_forward(x1, p1, i_num=i1, aorb='b'))       # bf16 default
    assert out1.shape == (B1, 512, 1), out1.shape
    assert jnp.allclose(out1, ref1, rtol=5e-2, atol=5e-2), \
        float(jnp.max(jnp.abs(out1 - ref1)))

    # Same config with f32 MXU operands (tight tolerance).
    out1f = jax.block_until_ready(
        pcn_encoder_forward(x1, p1, i_num=i1, aorb='b', use_bf16=False))
    assert jnp.allclose(out1f, ref1, rtol=2e-3, atol=2e-3), \
        float(jnp.max(jnp.abs(out1f - ref1)))

    # Config 2: AorB='a' (topnet2), batch not a multiple of the batch tile
    # (exercises the batch-padding path), f32 MXU operands.
    B2, i2 = 3, 8
    x2 = jax.random.normal(k_x2, (B2, 3, 2 * i2), dtype=jnp.float32)
    p2 = init_params(k_p2)
    ref2 = reference_forward(x2, p2, i_num=i2, aorb='a')
    out2 = jax.block_until_ready(
        pcn_encoder_forward(x2, p2, i_num=i2, aorb='a',
                            batch_tile=2, use_bf16=False))
    assert out2.shape == (B2, 512, 1), out2.shape
    assert jnp.allclose(out2, ref2, rtol=2e-3, atol=2e-3), \
        float(jnp.max(jnp.abs(out2 - ref2)))

    print("KERNEL_OK")
</pallas_src>

<mosaic_0001>
module attributes {stable_mosaic.version = 11 : i64} {
  func.func @_pcn_encoder_kernel(%arg0: i32, %arg1: memref<4x32x8xf32, #tpu.memory_space<vmem>>, %arg2: memref<8x128xbf16, #tpu.memory_space<vmem>>, %arg3: memref<1x128xf32, #tpu.memory_space<vmem>>, %arg4: memref<128x256xbf16, #tpu.memory_space<vmem>>, %arg5: memref<1x256xf32, #tpu.memory_space<vmem>>, %arg6: memref<256x512xbf16, #tpu.memory_space<vmem>>, %arg7: memref<256x512xf32, #tpu.memory_space<vmem>>, %arg8: memref<1x512xf32, #tpu.memory_space<vmem>>, %arg9: memref<512x512xbf16, #tpu.memory_space<vmem>>, %arg10: memref<1x512xf32, #tpu.memory_space<vmem>>, %arg11: memref<1x4x512xf32, #tpu.memory_space<vmem>>) attributes {dimension_semantics = [#tpu.dimension_semantics<parallel>], iteration_bounds = array<i64: 2>, scalar_prefetch = 0 : i64, scratch_operands = 0 : i64, tpu.core_type = #tpu.core_type<tc>, window_params = [{transform_indices = @transform_0, window_bounds = array<i64: 4, 32, 8>}, {pipeline_mode = #tpu.pipeline_mode<synchronous>, transform_indices = @transform_1, window_bounds = array<i64: 8, 128>}, {pipeline_mode = #tpu.pipeline_mode<synchronous>, transform_indices = @transform_2, window_bounds = array<i64: 1, 128>}, {pipeline_mode = #tpu.pipeline_mode<synchronous>, transform_indices = @transform_3, window_bounds = array<i64: 128, 256>}, {pipeline_mode = #tpu.pipeline_mode<synchronous>, transform_indices = @transform_4, window_bounds = array<i64: 1, 256>}, {pipeline_mode = #tpu.pipeline_mode<synchronous>, transform_indices = @transform_5, window_bounds = array<i64: 256, 512>}, {pipeline_mode = #tpu.pipeline_mode<synchronous>, transform_indices = @transform_6, window_bounds = array<i64: 256, 512>}, {pipeline_mode = #tpu.pipeline_mode<synchronous>, transform_indices = @transform_7, window_bounds = array<i64: 1, 512>}, {pipeline_mode = #tpu.pipeline_mode<synchronous>, transform_indices = @transform_8, window_bounds = array<i64: 512, 512>}, {pipeline_mode = #tpu.pipeline_mode<synchronous>, transform_indices = @transform_9, window_bounds = array<i64: 1, 512>}, {transform_indices = @transform_10, window_bounds = array<i64: 1, 4, 512>}]} {
    %c0 = arith.constant 0 : index
    %c0_0 = arith.constant 0 : index
    %c0_1 = arith.constant 0 : index
    %0 = vector.load %arg1[%c0, %c0_0, %c0_1] : memref<4x32x8xf32, #tpu.memory_space<vmem>>, vector<4x32x8xf32>
    %1 = vector.shape_cast %0 : vector<4x32x8xf32> to vector<128x8xf32>
    %2 = arith.truncf %1 : vector<128x8xf32> to vector<128x8xbf16>
    %c0_2 = arith.constant 0 : index
    %c0_3 = arith.constant 0 : index
    %3 = vector.load %arg2[%c0_2, %c0_3] : memref<8x128xbf16, #tpu.memory_space<vmem>>, vector<8x128xbf16>
    %cst = arith.constant dense<0.000000e+00> : vector<128x128xf32>
    %4 = tpu.matmul %2, %3, %cst {dimension_numbers = #tpu.dot_dimension_numbers<[1], [0], [0], [1], [0, 0, 1, 1], [], []>} : vector<128x8xbf16>, vector<8x128xbf16>, vector<128x128xf32> -> vector<128x128xf32>
    %c0_4 = arith.constant 0 : index
    %c0_5 = arith.constant 0 : index
    %5 = vector.load %arg3[%c0_4, %c0_5] : memref<1x128xf32, #tpu.memory_space<vmem>>, vector<1x128xf32>
    %6 = vector.broadcast %5 : vector<1x128xf32> to vector<128x128xf32>
    %7 = arith.addf %4, %6 : vector<128x128xf32>
    %cst_6 = arith.constant 0.000000e+00 : f32
    %8 = vector.broadcast %cst_6 : f32 to vector<128x128xf32>
    %9 = arith.maximumf %7, %8 : vector<128x128xf32>
    %10 = arith.truncf %9 : vector<128x128xf32> to vector<128x128xbf16>
    %c0_7 = arith.constant 0 : index
    %c0_8 = arith.constant 0 : index
    %11 = vector.load %arg4[%c0_7, %c0_8] : memref<128x256xbf16, #tpu.memory_space<vmem>>, vector<128x256xbf16>
    %cst_9 = arith.constant dense<0.000000e+00> : vector<128x256xf32>
    %12 = tpu.matmul %10, %11, %cst_9 {dimension_numbers = #tpu.dot_dimension_numbers<[1], [0], [0], [1], [0, 0, 1, 1], [], []>} : vector<128x128xbf16>, vector<128x256xbf16>, vector<128x256xf32> -> vector<128x256xf32>
    %c0_10 = arith.constant 0 : index
    %c0_11 = arith.constant 0 : index
    %13 = vector.load %arg5[%c0_10, %c0_11] : memref<1x256xf32, #tpu.memory_space<vmem>>, vector<1x256xf32>
    %14 = vector.broadcast %13 : vector<1x256xf32> to vector<128x256xf32>
    %15 = arith.addf %12, %14 : vector<128x256xf32>
    %16 = vector.shape_cast %15 : vector<128x256xf32> to vector<4x32x256xf32>
    %cst_12 = arith.constant dense<0xFF800000> : vector<4x256xf32>
    %17 = vector.multi_reduction <maximumf>, %16, %cst_12 [1] : vector<4x32x256xf32> to vector<4x256xf32>
    %18 = vector.extract_strided_slice %16 {offsets = [0, 16, 0], sizes = [4, 16, 256], strides = [1, 1, 1]} : vector<4x32x256xf32> to vector<4x16x256xf32>
    %19 = vector.shape_cast %18 : vector<4x16x256xf32> to vector<64x256xf32>
    %c0_13 = arith.constant 0 : index
    %c0_14 = arith.constant 0 : index
    %20 = vector.load %arg7[%c0_13, %c0_14] : memref<256x512xf32, #tpu.memory_space<vmem>>, vector<256x512xf32>
    %cst_15 = arith.constant dense<0.000000e+00> : vector<4x512xf32>
    %21 = tpu.matmul %17, %20, %cst_15 {dimension_numbers = #tpu.dot_dimension_numbers<[1], [0], [0], [1], [0, 0, 1, 1], [], []>} : vector<4x256xf32>, vector<256x512xf32>, vector<4x512xf32> -> vector<4x512xf32>
    %c0_16 = arith.constant 0 : index
    %c0_17 = arith.constant 0 : index
    %22 = vector.load %arg8[%c0_16, %c0_17] : memref<1x512xf32, #tpu.memory_space<vmem>>, vector<1x512xf32>
    %23 = vector.broadcast %22 : vector<1x512xf32> to vector<4x512xf32>
    %24 = arith.addf %21, %23 : vector<4x512xf32>
    %25 = arith.truncf %19 : vector<64x256xf32> to vector<64x256xbf16>
    %c0_18 = arith.constant 0 : index
    %c0_19 = arith.constant 0 : index
    %26 = vector.load %arg6[%c0_18, %c0_19] : memref<256x512xbf16, #tpu.memory_space<vmem>>, vector<256x512xbf16>
    %cst_20 = arith.constant dense<0.000000e+00> : vector<64x512xf32>
    %27 = tpu.matmul %25, %26, %cst_20 {dimension_numbers = #tpu.dot_dimension_numbers<[1], [0], [0], [1], [0, 0, 1, 1], [], []>} : vector<64x256xbf16>, vector<256x512xbf16>, vector<64x512xf32> -> vector<64x512xf32>
    %28 = vector.shape_cast %27 : vector<64x512xf32> to vector<4x16x512xf32>
    %29 = vector.shape_cast %24 : vector<4x512xf32> to vector<4x1x512xf32>
    %30 = vector.broadcast %29 : vector<4x1x512xf32> to vector<4x16x512xf32>
    %31 = arith.addf %28, %30 : vector<4x16x512xf32>
    %cst_21 = arith.constant 0.000000e+00 : f32
    %32 = vector.broadcast %cst_21 : f32 to vector<4x16x512xf32>
    %33 = arith.maximumf %31, %32 : vector<4x16x512xf32>
    %34 = vector.shape_cast %33 : vector<4x16x512xf32> to vector<64x512xf32>
    %35 = arith.truncf %34 : vector<64x512xf32> to vector<64x512xbf16>
    %c0_22 = arith.constant 0 : index
    %c0_23 = arith.constant 0 : index
    %36 = vector.load %arg9[%c0_22, %c0_23] : memref<512x512xbf16, #tpu.memory_space<vmem>>, vector<512x512xbf16>
    %cst_24 = arith.constant dense<0.000000e+00> : vector<64x512xf32>
    %37 = tpu.matmul %35, %36, %cst_24 {dimension_numbers = #tpu.dot_dimension_numbers<[1], [0], [0], [1], [0, 0, 1, 1], [], []>} : vector<64x512xbf16>, vector<512x512xbf16>, vector<64x512xf32> -> vector<64x512xf32>
    %c0_25 = arith.constant 0 : index
    %c0_26 = arith.constant 0 : index
    %38 = vector.load %arg10[%c0_25, %c0_26] : memref<1x512xf32, #tpu.memory_space<vmem>>, vector<1x512xf32>
    %39 = vector.broadcast %38 : vector<1x512xf32> to vector<64x512xf32>
    %40 = arith.addf %37, %39 : vector<64x512xf32>
    %41 = vector.shape_cast %40 : vector<64x512xf32> to vector<4x16x512xf32>
    %cst_27 = arith.constant dense<0xFF800000> : vector<4x512xf32>
    %42 = vector.multi_reduction <maximumf>, %41, %cst_27 [1] : vector<4x16x512xf32> to vector<4x512xf32>
    %43 = vector.shape_cast %42 : vector<4x512xf32> to vector<1x4x512xf32>
    %c0_28 = arith.constant 0 : index
    %c0_29 = arith.constant 0 : index
    %c0_30 = arith.constant 0 : index
    %44 = vector.load %arg11[%c0_28, %c0_29, %c0_30] : memref<1x4x512xf32, #tpu.memory_space<vmem>>, vector<1x4x512xf32>
    tpu.vector_store %arg11[%c0_28, %c0_29, %c0_30], %43 {strides = array<i32>} : memref<1x4x512xf32, #tpu.memory_space<vmem>>, vector<1x4x512xf32>,
    return
  }
  func.func @transform_0(%arg0: i32) -> (i32, i32, i32) {
    %c0_i32 = arith.constant 0 : i32
    %c0_i32_0 = arith.constant 0 : i32
    %c0_i32_1 = arith.constant 0 : i32
    return %arg0, %c0_i32, %c0_i32_0 : i32, i32, i32
  }
  func.func @transform_1(%arg0: i32) -> (i32, i32) {
    %c0_i32 = arith.constant 0 : i32
    %c0_i32_0 = arith.constant 0 : i32
    %c0_i32_1 = arith.constant 0 : i32
    return %c0_i32, %c0_i32_0 : i32, i32
  }
  func.func @transform_2(%arg0: i32) -> (i32, i32) {
    %c0_i32 = arith.constant 0 : i32
    %c0_i32_0 = arith.constant 0 : i32
    %c0_i32_1 = arith.constant 0 : i32
    return %c0_i32, %c0_i32_0 : i32, i32
  }
  func.func @transform_3(%arg0: i32) -> (i32, i32) {
    %c0_i32 = arith.constant 0 : i32
    %c0_i32_0 = arith.constant 0 : i32
    %c0_i32_1 = arith.constant 0 : i32
    return %c0_i32, %c0_i32_0 : i32, i32
  }
  func.func @transform_4(%arg0: i32) -> (i32, i32) {
    %c0_i32 = arith.constant 0 : i32
    %c0_i32_0 = arith.constant 0 : i32
    %c0_i32_1 = arith.constant 0 : i32
    return %c0_i32, %c0_i32_0 : i32, i32
  }
  func.func @transform_5(%arg0: i32) -> (i32, i32) {
    %c0_i32 = arith.constant 0 : i32
    %c0_i32_0 = arith.constant 0 : i32
    %c0_i32_1 = arith.constant 0 : i32
    return %c0_i32, %c0_i32_0 : i32, i32
  }
  func.func @transform_6(%arg0: i32) -> (i32, i32) {
    %c0_i32 = arith.constant 0 : i32
    %c0_i32_0 = arith.constant 0 : i32
    %c0_i32_1 = arith.constant 0 : i32
    return %c0_i32, %c0_i32_0 : i32, i32
  }
  func.func @transform_7(%arg0: i32) -> (i32, i32) {
    %c0_i32 = arith.constant 0 : i32
    %c0_i32_0 = arith.constant 0 : i32
    %c0_i32_1 = arith.constant 0 : i32
    return %c0_i32, %c0_i32_0 : i32, i32
  }
  func.func @transform_8(%arg0: i32) -> (i32, i32) {
    %c0_i32 = arith.constant 0 : i32
    %c0_i32_0 = arith.constant 0 : i32
    %c0_i32_1 = arith.constant 0 : i32
    return %c0_i32, %c0_i32_0 : i32, i32
  }
  func.func @transform_9(%arg0: i32) -> (i32, i32) {
    %c0_i32 = arith.constant 0 : i32
    %c0_i32_0 = arith.constant 0 : i32
    %c0_i32_1 = arith.constant 0 : i32
    return %c0_i32, %c0_i32_0 : i32, i32
  }
  func.func @transform_10(%arg0: i32) -> (i32, i32, i32) {
    %c0_i32 = arith.constant 0 : i32
    %c0_i32_0 = arith.constant 0 : i32
    %c0_i32_1 = arith.constant 0 : i32
    return %arg0, %c0_i32, %c0_i32_0 : i32, i32, i32
  }
}

module attributes {stable_mosaic.version = 11 : i64} {
  func.func @_pcn_encoder_kernel(%arg0: i32, %arg1: memref<4x32x8xf32, #tpu.memory_space<vmem>>, %arg2: memref<8x128xbf16, #tpu.memory_space<vmem>>, %arg3: memref<1x128xf32, #tpu.memory_space<vmem>>, %arg4: memref<128x256xbf16, #tpu.memory_space<vmem>>, %arg5: memref<1x256xf32, #tpu.memory_space<vmem>>, %arg6: memref<256x512xbf16, #tpu.memory_space<vmem>>, %arg7: memref<256x512xf32, #tpu.memory_space<vmem>>, %arg8: memref<1x512xf32, #tpu.memory_space<vmem>>, %arg9: memref<512x512xbf16, #tpu.memory_space<vmem>>, %arg10: memref<1x512xf32, #tpu.memory_space<vmem>>, %arg11: memref<1x4x512xf32, #tpu.memory_space<vmem>>) attributes {dimension_semantics = [#tpu.dimension_semantics<parallel>], iteration_bounds = array<i64: 2>, scalar_prefetch = 0 : i64, scratch_operands = 0 : i64, tpu.core_type = #tpu.core_type<tc>, window_params = [{transform_indices = @transform_0, window_bounds = array<i64: 4, 32, 8>}, {pipeline_mode = #tpu.pipeline_mode<synchronous>, transform_indices = @transform_1, window_bounds = array<i64: 8, 128>}, {pipeline_mode = #tpu.pipeline_mode<synchronous>, transform_indices = @transform_2, window_bounds = array<i64: 1, 128>}, {pipeline_mode = #tpu.pipeline_mode<synchronous>, transform_indices = @transform_3, window_bounds = array<i64: 128, 256>}, {pipeline_mode = #tpu.pipeline_mode<synchronous>, transform_indices = @transform_4, window_bounds = array<i64: 1, 256>}, {pipeline_mode = #tpu.pipeline_mode<synchronous>, transform_indices = @transform_5, window_bounds = array<i64: 256, 512>}, {pipeline_mode = #tpu.pipeline_mode<synchronous>, transform_indices = @transform_6, window_bounds = array<i64: 256, 512>}, {pipeline_mode = #tpu.pipeline_mode<synchronous>, transform_indices = @transform_7, window_bounds = array<i64: 1, 512>}, {pipeline_mode = #tpu.pipeline_mode<synchronous>, transform_indices = @transform_8, window_bounds = array<i64: 512, 512>}, {pipeline_mode = #tpu.pipeline_mode<synchronous>, transform_indices = @transform_9, window_bounds = array<i64: 1, 512>}, {transform_indices = @transform_10, window_bounds = array<i64: 1, 4, 512>}]} {
    %c0 = arith.constant 0 : index
    %c0_0 = arith.constant 0 : index
    %c0_1 = arith.constant 0 : index
    %0 = vector.load %arg1[%c0, %c0_0, %c0_1] : memref<4x32x8xf32, #tpu.memory_space<vmem>>, vector<4x32x8xf32>
    %1 = vector.shape_cast %0 : vector<4x32x8xf32> to vector<128x8xf32>
    %2 = arith.truncf %1 : vector<128x8xf32> to vector<128x8xbf16>
    %c0_2 = arith.constant 0 : index
    %c0_3 = arith.constant 0 : index
    %3 = vector.load %arg2[%c0_2, %c0_3] : memref<8x128xbf16, #tpu.memory_space<vmem>>, vector<8x128xbf16>
    %cst = arith.constant dense<0.000000e+00> : vector<128x128xf32>
    %4 = tpu.matmul %2, %3, %cst {dimension_numbers = #tpu.dot_dimension_numbers<[1], [0], [0], [1], [0, 0, 1, 1], [], []>} : vector<128x8xbf16>, vector<8x128xbf16>, vector<128x128xf32> -> vector<128x128xf32>
    %c0_4 = arith.constant 0 : index
    %c0_5 = arith.constant 0 : index
    %5 = vector.load %arg3[%c0_4, %c0_5] : memref<1x128xf32, #tpu.memory_space<vmem>>, vector<1x128xf32>
    %6 = vector.broadcast %5 : vector<1x128xf32> to vector<128x128xf32>
    %7 = arith.addf %4, %6 : vector<128x128xf32>
    %cst_6 = arith.constant 0.000000e+00 : f32
    %8 = vector.broadcast %cst_6 : f32 to vector<128x128xf32>
    %9 = arith.maximumf %7, %8 : vector<128x128xf32>
    %10 = arith.truncf %9 : vector<128x128xf32> to vector<128x128xbf16>
    %c0_7 = arith.constant 0 : index
    %c0_8 = arith.constant 0 : index
    %11 = vector.load %arg4[%c0_7, %c0_8] : memref<128x256xbf16, #tpu.memory_space<vmem>>, vector<128x256xbf16>
    %cst_9 = arith.constant dense<0.000000e+00> : vector<128x256xf32>
    %12 = tpu.matmul %10, %11, %cst_9 {dimension_numbers = #tpu.dot_dimension_numbers<[1], [0], [0], [1], [0, 0, 1, 1], [], []>} : vector<128x128xbf16>, vector<128x256xbf16>, vector<128x256xf32> -> vector<128x256xf32>
    %c0_10 = arith.constant 0 : index
    %c0_11 = arith.constant 0 : index
    %13 = vector.load %arg5[%c0_10, %c0_11] : memref<1x256xf32, #tpu.memory_space<vmem>>, vector<1x256xf32>
    %14 = vector.broadcast %13 : vector<1x256xf32> to vector<128x256xf32>
    %15 = arith.addf %12, %14 : vector<128x256xf32>
    %16 = vector.shape_cast %15 : vector<128x256xf32> to vector<4x32x256xf32>
    %cst_12 = arith.constant dense<0xFF800000> : vector<4x256xf32>
    %17 = vector.multi_reduction <maximumf>, %16, %cst_12 [1] : vector<4x32x256xf32> to vector<4x256xf32>
    %18 = vector.extract_strided_slice %16 {offsets = [0, 16, 0], sizes = [4, 16, 256], strides = [1, 1, 1]} : vector<4x32x256xf32> to vector<4x16x256xf32>
    %19 = vector.shape_cast %18 : vector<4x16x256xf32> to vector<64x256xf32>
    %c0_13 = arith.constant 0 : index
    %c0_14 = arith.constant 0 : index
    %20 = vector.load %arg7[%c0_13, %c0_14] : memref<256x512xf32, #tpu.memory_space<vmem>>, vector<256x512xf32>
    %cst_15 = arith.constant dense<0.000000e+00> : vector<4x512xf32>
    %21 = tpu.matmul %17, %20, %cst_15 {dimension_numbers = #tpu.dot_dimension_numbers<[1], [0], [0], [1], [0, 0, 1, 1], [], []>} : vector<4x256xf32>, vector<256x512xf32>, vector<4x512xf32> -> vector<4x512xf32>
    %c0_16 = arith.constant 0 : index
    %c0_17 = arith.constant 0 : index
    %22 = vector.load %arg8[%c0_16, %c0_17] : memref<1x512xf32, #tpu.memory_space<vmem>>, vector<1x512xf32>
    %23 = vector.broadcast %22 : vector<1x512xf32> to vector<4x512xf32>
    %24 = arith.addf %21, %23 : vector<4x512xf32>
    %25 = arith.truncf %19 : vector<64x256xf32> to vector<64x256xbf16>
    %c0_18 = arith.constant 0 : index
    %c0_19 = arith.constant 0 : index
    %26 = vector.load %arg6[%c0_18, %c0_19] : memref<256x512xbf16, #tpu.memory_space<vmem>>, vector<256x512xbf16>
    %cst_20 = arith.constant dense<0.000000e+00> : vector<64x512xf32>
    %27 = tpu.matmul %25, %26, %cst_20 {dimension_numbers = #tpu.dot_dimension_numbers<[1], [0], [0], [1], [0, 0, 1, 1], [], []>} : vector<64x256xbf16>, vector<256x512xbf16>, vector<64x512xf32> -> vector<64x512xf32>
    %28 = vector.shape_cast %27 : vector<64x512xf32> to vector<4x16x512xf32>
    %29 = vector.shape_cast %24 : vector<4x512xf32> to vector<4x1x512xf32>
    %30 = vector.broadcast %29 : vector<4x1x512xf32> to vector<4x16x512xf32>
    %31 = arith.addf %28, %30 : vector<4x16x512xf32>
    %cst_21 = arith.constant 0.000000e+00 : f32
    %32 = vector.broadcast %cst_21 : f32 to vector<4x16x512xf32>
    %33 = arith.maximumf %31, %32 : vector<4x16x512xf32>
    %34 = vector.shape_cast %33 : vector<4x16x512xf32> to vector<64x512xf32>
    %35 = arith.truncf %34 : vector<64x512xf32> to vector<64x512xbf16>
    %c0_22 = arith.constant 0 : index
    %c0_23 = arith.constant 0 : index
    %36 = vector.load %arg9[%c0_22, %c0_23] : memref<512x512xbf16, #tpu.memory_space<vmem>>, vector<512x512xbf16>
    %cst_24 = arith.constant dense<0.000000e+00> : vector<64x512xf32>
    %37 = tpu.matmul %35, %36, %cst_24 {dimension_numbers = #tpu.dot_dimension_numbers<[1], [0], [0], [1], [0, 0, 1, 1], [], []>} : vector<64x512xbf16>, vector<512x512xbf16>, vector<64x512xf32> -> vector<64x512xf32>
    %c0_25 = arith.constant 0 : index
    %c0_26 = arith.constant 0 : index
    %38 = vector.load %arg10[%c0_25, %c0_26] : memref<1x512xf32, #tpu.memory_space<vmem>>, vector<1x512xf32>
    %39 = vector.broadcast %38 : vector<1x512xf32> to vector<64x512xf32>
    %40 = arith.addf %37, %39 : vector<64x512xf32>
    %41 = vector.shape_cast %40 : vector<64x512xf32> to vector<4x16x512xf32>
    %cst_27 = arith.constant dense<0xFF800000> : vector<4x512xf32>
    %42 = vector.multi_reduction <maximumf>, %41, %cst_27 [1] : vector<4x16x512xf32> to vector<4x512xf32>
    %43 = vector.shape_cast %42 : vector<4x512xf32> to vector<1x4x512xf32>
    %c0_28 = arith.constant 0 : index
    %c0_29 = arith.constant 0 : index
    %c0_30 = arith.constant 0 : index
    %44 = vector.load %arg11[%c0_28, %c0_29, %c0_30] : memref<1x4x512xf32, #tpu.memory_space<vmem>>, vector<1x4x512xf32>
    tpu.vector_store %arg11[%c0_28, %c0_29, %c0_30], %43 {strides = array<i32>} : memref<1x4x512xf32, #tpu.memory_space<vmem>>, vector<1x4x512xf32>,
    return
  }
  func.func @transform_0(%arg0: i32) -> (i32, i32, i32) {
    %c0_i32 = arith.constant 0 : i32
    %c0_i32_0 = arith.constant 0 : i32
    %c0_i32_1 = arith.constant 0 : i32
    return %arg0, %c0_i32, %c0_i32_0 : i32, i32, i32
  }
  func.func @transform_1(%arg0: i32) -> (i32, i32) {
    %c0_i32 = arith.constant 0 : i32
    %c0_i32_0 = arith.constant 0 : i32
    %c0_i32_1 = arith.constant 0 : i32
    return %c0_i32, %c0_i32_0 : i32, i32
  }
  func.func @transform_2(%arg0: i32) -> (i32, i32) {
    %c0_i32 = arith.constant 0 : i32
    %c0_i32_0 = arith.constant 0 : i32
    %c0_i32_1 = arith.constant 0 : i32
    return %c0_i32, %c0_i32_0 : i32, i32
  }
  func.func @transform_3(%arg0: i32) -> (i32, i32) {
    %c0_i32 = arith.constant 0 : i32
    %c0_i32_0 = arith.constant 0 : i32
    %c0_i32_1 = arith.constant 0 : i32
    return %c0_i32, %c0_i32_0 : i32, i32
  }
  func.func @transform_4(%arg0: i32) -> (i32, i32) {
    %c0_i32 = arith.constant 0 : i32
    %c0_i32_0 = arith.constant 0 : i32
    %c0_i32_1 = arith.constant 0 : i32
    return %c0_i32, %c0_i32_0 : i32, i32
  }
  func.func @transform_5(%arg0: i32) -> (i32, i32) {
    %c0_i32 = arith.constant 0 : i32
    %c0_i32_0 = arith.constant 0 : i32
    %c0_i32_1 = arith.constant 0 : i32
    return %c0_i32, %c0_i32_0 : i32, i32
  }
  func.func @transform_6(%arg0: i32) -> (i32, i32) {
    %c0_i32 = arith.constant 0 : i32
    %c0_i32_0 = arith.constant 0 : i32
    %c0_i32_1 = arith.constant 0 : i32
    return %c0_i32, %c0_i32_0 : i32, i32
  }
  func.func @transform_7(%arg0: i32) -> (i32, i32) {
    %c0_i32 = arith.constant 0 : i32
    %c0_i32_0 = arith.constant 0 : i32
    %c0_i32_1 = arith.constant 0 : i32
    return %c0_i32, %c0_i32_0 : i32, i32
  }
  func.func @transform_8(%arg0: i32) -> (i32, i32) {
    %c0_i32 = arith.constant 0 : i32
    %c0_i32_0 = arith.constant 0 : i32
    %c0_i32_1 = arith.constant 0 : i32
    return %c0_i32, %c0_i32_0 : i32, i32
  }
  func.func @transform_9(%arg0: i32) -> (i32, i32) {
    %c0_i32 = arith.constant 0 : i32
    %c0_i32_0 = arith.constant 0 : i32
    %c0_i32_1 = arith.constant 0 : i32
    return %c0_i32, %c0_i32_0 : i32, i32
  }
  func.func @transform_10(%arg0: i32) -> (i32, i32, i32) {
    %c0_i32 = arith.constant 0 : i32
    %c0_i32_0 = arith.constant 0 : i32
    %c0_i32_1 = arith.constant 0 : i32
    return %arg0, %c0_i32, %c0_i32_0 : i32, i32, i32
  }
}

</mosaic_0001>

<bundles_post_ra>
// kernel: tpu_custom_call.1
= control target key start
LH: loop header
LB: loop body
LE: loop exit
PB: predicated region body
PF: predicated region fallthrough
CT: control target
= control target key end

     0   :  { %s5760_s0 = inlined_call_operand.vmem [shape: f32[8,32,8], index: 0, kind: input, shape index: {}]   ;;  %s5761_s1 = inlined_call_operand.vmem [shape: bf16[8,128], index: 1, kind: input, shape index: {}]   ;;  %s5762_s2 = inlined_call_operand.vmem [shape: f32[1,128], index: 2, kind: input, shape index: {}]   ;;  %s5763_s3 = inlined_call_operand.vmem [shape: bf16[128,256], index: 3, kind: input, shape index: {}]   ;;  %s5764_s4 = inlined_call_operand.vmem [shape: f32[1,256], index: 4, kind: input, shape index: {}]   ;;  %s5765_s5 = inlined_call_operand.hbm [shape: bf16[256,512], index: 5, kind: input, shape index: {}]   ;;  %s5766_s6 = inlined_call_operand.hbm [shape: f32[256,512], index: 6, kind: input, shape index: {}]   ;;  %s5767_s7 = inlined_call_operand.vmem [shape: f32[1,512], index: 7, kind: input, shape index: {}]   ;;  %s5768_s8 = inlined_call_operand.hbm [shape: bf16[512,512], index: 8, kind: input, shape index: {}]   ;;  %s5769_s9 = inlined_call_operand.vmem [shape: f32[1,512], index: 9, kind: input, shape index: {}]   ;;  %s5770_s10 = inlined_call_operand.hbm [shape: f32[2,4,512], index: 10, kind: output, shape index: {}]  }
   0x1   :  { %5774 = sst [smem:[#allocation15_spill]] %s5765_s5 }
   0x2   :  { %5775 = sst [smem:[#allocation16_spill]] %s5766_s6 }
   0x3   :  { %15 = vsyncpa [#allocation3], 0 }
   0x4   :  { %16 = vsyncpa [#allocation6], 0 }
   0x5   :  { %17 = vsyncpa [#allocation4], 0 }
   0x6   :  { %19 = vsyncpa [#allocation4 + $0x1], 0  ;;  %s4784_s13 = smov 0   ;;  %s4786_s14 = smov 0  }
   0x7   :  { %s4788_s15 = smov 0   ;;  %s4790_s16 = smov 0  }
   0x8 LB: > { %5776 = sst [smem:[#allocation12_spill]] %s4716_s15  ;;  %s4805_s17 = sadd.s32 4294967295, %s4720_s16   ;;  %s4720_s16 = sphi %s4790_s16, %s5785_s16   ;;  %s4716_s15 = sphi %s4788_s15, %s5787_s15   ;;  %s4712_s14 = sphi %s4786_s14, %s5789_s14   ;;  %s4708_s13 = sphi %s4784_s13, %s5788_s13  }
   0x9   : > { %s3416_s18 = sadd.s32 4294967294, %s4720_s16   ;;  %s4809_s19 = sadd.s32 1, %s4720_s16  }
   0xa   : > { %5777 = sst [smem:[#allocation13_spill]] %s4809_s19  ;;  %s247_s20 = sadd.s32 1, %s4716_s15 }
   0xb   : > { %s244_s21 = ssub.s32 %s4720_s16, %s4809_s19  ;;  %p257_p0 = scmp.ne.s32.totalorder %s4716_s15, %s4712_s14 }
   0xc   : > { %p245_p1 = scmp.eq.s32.totalorder %s244_s21, 0  ;;  %p258_p2 = scmp.eq.s32.totalorder %s4805_s17, 1 }
   0xd   : > { %p263_p3 = scmp.ne.s32.totalorder %s4712_s14, %s4708_s13  ;;  %p264_p4 = scmp.eq.s32.totalorder %s3416_s18, 1 }
   0xe   : > { %s4820_s22 = scalar_select %p245_p1, %s4716_s15, %s247_s20  }
   0xf   : > { %p4822_p5 = por %p258_p2, %p257_p0  ;;  %p4826_p6 = por %p264_p4, %p263_p3 }
  0x10   : > { %5778 = sst [smem:[#allocation14_spill]] %s4820_s22  ;;  %p3417_p7 = scmp.ge.s32.totalorder %s4720_s16, 1 }
  0x11   : > { %p271_p8 = scmp.lt.s32.totalorder %s4720_s16, 3  ;;  %p4513_p9 = scmp.eq.s32.totalorder %s4805_s17, 0 }
  0x12   : > { %s5782_s6 = sld [smem:[#allocation16_spill]]  ;;  %s4722_s29 = smov [#allocation5]  }
  0x13   : > { %p4833_p10 = pnand %p3417_p7, %p271_p8  ;;  %s310_s30 = sshll.u32 %s4722_s29, 4  ;;  %s311_s30 = int_to_ptr.vmem [resolvable:$true] %s310_s30 }
  0x14   : > { %s5784_s5 = sld [smem:[#allocation15_spill]]  ;;  %s4723_s21 = smov 512  }
  0x15   : > { %p4499_p11 = pneg %p4833_p10  ;;  %s4724_s26 = smov 32  }
  0x16   : > { %s4725_s27 = smov [#allocation2]   ;;  %s4727_s22 = smov 16  }
  0x17   : > { %p4844_p12 = pnand %p4513_p9, %p4499_p11  ;;  %s296_s29 = sshll.u32 %s4725_s27, 4  ;;  %s297_s29 = int_to_ptr.vmem [resolvable:$true] %s296_s29 }
  0x18   : > { %s308_s28 = sshll.u32 %s5782_s6, 4  ;;  %s4726_s6 = smov 256   ;;  %s309_s28 = int_to_ptr.hbm [resolvable:$true] %s308_s28 }
  0x19   : > { %4505 = dma.hbm_to_vmem [thread:$0]  (!%p4844_p12), %s309_s28, 16384, %s311_s30, [#allocation6], %s4723_s21, %s4723_s21, %s4724_s26  }
  0x1a   : > { %s294_s20 = sshll.u32 %s5784_s5, 4  ;;  %s325_s12 = sshll.u32 %s5768_s8, 4  ;;  %s295_s20 = int_to_ptr.hbm [resolvable:$true] %s294_s20  ;;  %s326_s12 = int_to_ptr.hbm [resolvable:$true] %s325_s12 }
  0x1b   : > { %4502 = dma.hbm_to_vmem [thread:$0]  (!%p4844_p12), %s295_s20, 8192, %s297_s29, [#allocation3], %s4726_s6, %s4726_s6, %s4727_s22  }
  0x1c   : > { %s4728_s18 = smov [#allocation7]   ;;  %356 = sbr.rel (%p4833_p10) target bundleno = 1194 (0x4aa), region = 60 }
  0x1d   : > { %s327_s5 = sshll.u32 %s4728_s18, 4  ;;  %s328_s5 = int_to_ptr.vmem [resolvable:$true] %s327_s5 }
  0x1e   : > { %4508 = dma.hbm_to_vmem [thread:$0]  (!%p4844_p12), %s326_s12, 16384, %s328_s5, [#allocation6], %s4726_s6, %s4726_s6, %s4727_s22  }
  0x21   : > { %4695 = dma.done.wait (%p4513_p9), [#allocation3], 8192  }
  0x22   : > { %4697 = vsyncadd (%p4513_p9), [#allocation3], 4294959104 }
  0x23   : > { %4699 = dma.done.wait (%p4513_p9), [#allocation6], 32768  }
  0x24   : > { %4701 = vsyncadd (%p4513_p9), [#allocation6], 4294934528  ;;  %s3427_s15 = sshll.u32 %s4805_s17, 2  ;;  %vm468_vm0 = vcmask 1043456   ;;  %v438_v0 = vld [vmem:[%s5761_s1] sm:$0xf] }
  0x25   : > { %p407_p13 = scmp.lt.s32.totalorder %s3427_s15, 7  ;;  %v470_v3 = vsel %vm468_vm0, %v438_v0, 0  ;;  %vm443_vm1 = vcmask 64512   ;;  %v3496_v17 = vld [vmem:[%s5763_s3 + $0x70] sm:$0xf]  ;;  %vm963_vm2 = vcmask 1041409  }
  0x26   : > { %479 = vmatpush.bf16.msra.mxu0 %v470_v3  ;;  %v4291_v18 = vld [vmem:[%s5763_s3 + $0x74] sm:$0xf0]  ;;  %v4290_v19 = vld [vmem:[%s5763_s3 + $0x74] sm:$0xf]  ;;  %v3498_v21 = vld [vmem:[%s5763_s3 + $0x78] sm:$0xf0] }
  0x27   : > { %s5791_s15 = smov (!%p407_p13, %s3427_s15), 7  ;;  %v3497_v20 = vor.u32 %v4291_v18, %v3496_v17  ;;  %v3501_v22 = vor.u32 %v4290_v19, %v3498_v21  ;;  %v3488_v26 = vld [vmem:[%s5763_s3 + $0x60] sm:$0xf]  ;;  %v4289_v27 = vld [vmem:[%s5763_s3 + $0x64] sm:$0xf0]  ;;  %vm965_vm3 = vcmask 1042434  }
  0x28   : > { %s4275_s5 = sshll.u32 %s5791_s15, 5  ;;  %v4288_v28 = vld [vmem:[%s5763_s3 + $0x64] sm:$0xf]  ;;  %v3489_v29 = vor.u32 %v4289_v27, %v3488_v26  ;;  %v3490_v30 = vld [vmem:[%s5763_s3 + $0x68] sm:$0xf0]  ;;  %vm967_vm4 = vcmask 1043459  }
  0x29   : > { %s4874_s22 = scalar_lea.vmem %s5760_s0, %s4275_s5  ;;  %647 = vmatpush.bf16.msra.mxu1 %v3497_v20  ;;  %696 = vmatpush.bf16.msra.mxu2 %v3501_v22  ;;  %v3493_v31 = vor.u32 %v4288_v28, %v3490_v30  ;;  %v3480_v32 = vld [vmem:[%s5763_s3 + $0x50] sm:$0xf]  ;;  %v4287_v33 = vld [vmem:[%s5763_s3 + $0x54] sm:$0xf0]  ;;  %v4286_v34 = vld [vmem:[%s5763_s3 + $0x54] sm:$0xf] }
  0x2a   : > { %v414_v1 = vld [vmem:[%s4874_s22] sm:$0xff]  ;;  %v415_v2 = vld [vmem:[%s4874_s22 + $0x8] sm:$0xff]  ;;  %v416_v5 = vld [vmem:[%s4874_s22 + $0x10] sm:$0xff]  ;;  %v3481_v35 = vor.u32 %v4287_v33, %v3480_v32  ;;  %vm1765_vm5 = vcmask 1040384   ;;  %vm1768_vm6 = vcmask 1041408   ;;  %vm1772_vm7 = vcmask 1042433  }
  0x2b   : > { %v430_v4 = vpack.c.bf16 %v415_v2, %v414_v1  ;;  %v417_v6 = vld [vmem:[%s4874_s22 + $0x18] sm:$0xff]  ;;  %v418_v8 = vld [vmem:[%s4874_s22 + $0x20] sm:$0xff]  ;;  %v419_v9 = vld [vmem:[%s4874_s22 + $0x28] sm:$0xff]  ;;  %vm1776_vm8 = vcmask 1044484   ;;  %vm1778_vm9 = vcmask 1043458   ;;  %vm1782_vm10 = vcmask 1045509  }
  0x2c   : > { %v431_v7 = vpack.c.bf16 %v417_v6, %v416_v5  ;;  %v432_v10 = vpack.c.bf16 %v419_v9, %v418_v8  ;;  %v420_v11 = vld [vmem:[%s4874_s22 + $0x30] sm:$0xff]  ;;  %v421_v12 = vld [vmem:[%s4874_s22 + $0x38] sm:$0xff]  ;;  %v422_v14 = vld [vmem:[%s4874_s22 + $0x40] sm:$0xff]  ;;  %vm1784_vm11 = vcmask 1044483   ;;  %vm3290_vm12 = vcmask 1046534   ;;  %s403_s6 = sand.u32 1, %s4712_s14  }
  0x2d   : > { %3430 = vmatmul.msk.bf16.vlgmr.msra.gmra.mxu0 %vm443_vm1, %v430_v4  ;;  %v433_v13 = vpack.c.bf16 %v421_v12, %v420_v11  ;;  %v423_v15 = vld [vmem:[%s4874_s22 + $0x48] sm:$0xff]  ;;  %v424_v23 = vld [vmem:[%s4874_s22 + $0x50] sm:$0xff]  ;;  %v425_v24 = vld [vmem:[%s4874_s22 + $0x58] sm:$0xff]  ;;  %648 = vmatpush.bf16.msra.mxu1 %v3489_v29  ;;  %s3426_s19 = sshll.u32 %s403_s6, 4  ;;  %vm3294_vm13 = vcmask 1047559   ;;  %s4484_s28 = sshll.u32 %s4805_s17, 4 }
  0x2e   : > { %v434_v16 = vpack.c.bf16 %v423_v15, %v422_v14  ;;  %v435_v25 = vpack.c.bf16 %v425_v24, %v424_v23  ;;  %v3482_v36 = vld [vmem:[%s5763_s3 + $0x58] sm:$0xf0]  ;;  %697 = vmatpush.bf16.msra.mxu2 %v3493_v31  ;;  %v3472_v38 = vld [vmem:[%s5763_s3 + $0x40] sm:$0xf]  ;;  %v4285_v39 = vld [vmem:[%s5763_s3 + $0x44] sm:$0xf0]  ;;  %s3321_s20 = scalar_lea.hbm %s5770_s10, %s4484_s28 }
  0x2f   : > { %v3485_v37 = vor.u32 %v4286_v34, %v3482_v36  ;;  %v4284_v40 = vld [vmem:[%s5763_s3 + $0x44] sm:$0xf]  ;;  %v3474_v41 = vld [vmem:[%s5763_s3 + $0x48] sm:$0xf0]  ;;  %v3473_v42 = vor.u32 %v4285_v39, %v3472_v38  ;;  %v3464_v46 = vld [vmem:[%s5763_s3 + $0x30] sm:$0xf] }
  0x30   : > { %v3477_v43 = vor.u32 %v4284_v40, %v3474_v41  ;;  %v426_v44 = vld [vmem:[%s4874_s22 + $0x60] sm:$0xff]  ;;  %v427_v45 = vld [vmem:[%s4874_s22 + $0x68] sm:$0xff]  ;;  %v4283_v47 = vld [vmem:[%s5763_s3 + $0x34] sm:$0xf0]  ;;  %s5686_s25 = scalar_lea.vmem [#allocation8], %s3426_s19  ;;  %s3325_s26 = sshll.u32 %s3321_s20, 4  ;;  %s3326_s26 = int_to_ptr.hbm [resolvable:$true] %s3325_s26 }
  0x31   : > { %649 = vmatpush.bf16.msra.mxu1 %v3481_v35  ;;  %v4282_v48 = vld [vmem:[%s5763_s3 + $0x34] sm:$0xf]  ;;  %v3465_v49 = vor.u32 %v4283_v47, %v3464_v46  ;;  %v3466_v50 = vld [vmem:[%s5763_s3 + $0x38] sm:$0xf0]  ;;  %v436_v51 = vpack.c.bf16 %v427_v45, %v426_v44  ;;  %v3456_v53 = vld [vmem:[%s5763_s3 + $0x20] sm:$0xf] }
  0x32   : > { %698 = vmatpush.bf16.msra.mxu2 %v3485_v37  ;;  %v3469_v52 = vor.u32 %v4282_v48, %v3466_v50  ;;  %v4281_v54 = vld [vmem:[%s5763_s3 + $0x24] sm:$0xf0]  ;;  %v4280_v55 = vld [vmem:[%s5763_s3 + $0x24] sm:$0xf]  ;;  %v3458_v57 = vld [vmem:[%s5763_s3 + $0x28] sm:$0xf0] }
  0x33   : > { %v3457_v56 = vor.u32 %v4281_v54, %v3456_v53  ;;  %v3461_v58 = vor.u32 %v4280_v55, %v3458_v57  ;;  %v3448_v59 = vld [vmem:[%s5763_s3 + $0x10] sm:$0xf]  ;;  %v4279_v60 = vld [vmem:[%s5763_s3 + $0x14] sm:$0xf0]  ;;  %v4278_v61 = vld [vmem:[%s5763_s3 + $0x14] sm:$0xf] }
  0x34   : > { %v3449_v62 = vor.u32 %v4279_v60, %v3448_v59  ;;  %v3450_v63 = vld [vmem:[%s5763_s3 + $0x18] sm:$0xf0]  ;;  %v3440_v1 = vld [vmem:[%s5763_s3] sm:$0xf]  ;;  %v4277_v2 = vld [vmem:[%s5763_s3 + $0x4] sm:$0xf0] }
  0x35   : > { %650 = vmatpush.bf16.msra.mxu1 %v3473_v42  ;;  %v3453_v0 = vor.u32 %v4278_v61, %v3450_v63  ;;  %v4276_v3 = vld [vmem:[%s5763_s3 + $0x4] sm:$0xf]  ;;  %v3441_v4 = vor.u32 %v4277_v2, %v3440_v1  ;;  %v3442_v5 = vld [vmem:[%s5763_s3 + $0x8] sm:$0xf0]  ;;  %v429_v8 = vld [vmem:[%s4874_s22 + $0x78] sm:$0xff]  ;;  %s3323_s21 = sshll.u32 %s5686_s25, 4  ;;  %s3324_s21 = int_to_ptr.vmem [resolvable:$true] %s3323_s21 }
  0x36   : > { %699 = vmatpush.bf16.msra.mxu2 %v3477_v43  ;;  %v3445_v6 = vor.u32 %v4276_v3, %v3442_v5  ;;  %v5003_v11 = vld [vmem:[%s5762_s2] ss:$0 sm:$0xff]  ;;  %s3310_s17 = scalar_lea.sflag [#allocation4], %s403_s6  ;;  %s4664_s27 = sshra.s32 %s3326_s26, 4  ;;  %s4665_s27 = int_to_ptr.hbm [resolvable:$true] %s4664_s27 }
  0x37   : > { %s4670_s18 = scalar_lea.hbm %s5770_s10, 32  ;;  %p4671_p3 = scmp.lt.s32.totalorder %s4665_s27, %s5770_s10 }
  0x39   : > { %651 = vmatpush.bf16.msra.mxu1 %v3465_v49 }
  0x3a   : > { %700 = vmatpush.bf16.msra.mxu2 %v3469_v52 }
  0x3d   : > { %3431 = vmatmul.msk.bf16.gmra.mxu0 %vm443_vm1, %v431_v7  ;;  %652 = vmatpush.bf16.msra.mxu1 %v3457_v56  ;;  %v428_v7 = vld [vmem:[%s4874_s22 + $0x70] sm:$0xff]  ;;  %s4666_s22 = scalar_lea.hbm %s4665_s27, 16 }
  0x3e   : > { %701 = vmatpush.bf16.msra.mxu2 %v3461_v58  ;;  %v437_v9 = vpack.c.bf16 %v429_v8, %v428_v7  ;;  %p4667_p0 = scmp.ne.s32.totalorder %s4665_s27, %s4666_s22  ;;  %p4672_p4 = scmp.lt.s32.totalorder %s4670_s18, %s4666_s22 }
  0x40   : > { %p4668_p1 = pnand %p4667_p0, %p4822_p5  ;;  %p4673_p7 = por %p4672_p4, %p4671_p3 }
  0x41   : > { %653 = vmatpush.bf16.msra.mxu1 %v3449_v62 }
  0x42   : > { %702 = vmatpush.bf16.msra.mxu2 %v3453_v0  ;;  %p4669_p2 = pneg %p4668_p1 }
  0x44   : > { %p4674_p8 = pnand %p4673_p7, %p4669_p2 }
  0x45   : > { %654 = vmatpush.bf16.msra.mxu1 %v3441_v4 }
  0x46   : > { %703 = vmatpush.bf16.msra.mxu2 %v3445_v6  ;;  %v561_v6 = vld [vmem:[%s5764_s4] sm:$0x3] }
  0x4d   : > { %3432 = vmatmul.msk.bf16.gmra.mxu0 %vm443_vm1, %v432_v10 }
  0x5d   : > { %3433 = vmatmul.msk.bf16.gmra.mxu0 %vm443_vm1, %v433_v13 }
  0x6d   : > { %3434 = vmatmul.msk.bf16.gmra.mxu0 %vm443_vm1, %v434_v16 }
  0x7d   : > { %3435 = vmatmul.msk.bf16.gmra.mxu0 %vm443_vm1, %v435_v25 }
  0x8d   : > { %3436 = vmatmul.msk.bf16.gmra.mxu0 %vm443_vm1, %v436_v51 }
  0x9d   : > { %3437 = vmatmul.msk.bf16.gmra.mxu0 %vm443_vm1, %v437_v9  ;;  %v5024_v9 = vperm.slane %v561_v6, 0 }
  0xaa   : > { %v481_v10 = vpop.f32.mrf.mxu0 }
  0xab   : > { %v482_v12 = vadd.f32 %v5003_v11, %v481_v10 }
  0xad   : > { %v521_v15 = vmax.f32 %v482_v12, 0.0 }
  0xb2   : > { %v483_v13 = vpop.f32.mrf.mxu0 }
  0xb3   : > { %v484_v14 = vadd.f32 %v5003_v11, %v483_v13 }
  0xb5   : > { %v522_v16 = vmax.f32 %v484_v14, 0.0  ;;  %v5031_v14 = vperm.slane %v561_v6, 1 }
  0xb7   : > { %v537_v17 = vpack.c.bf16 %v522_v16, %v521_v15 }
  0xb9   : > { %655 = vmatmul.bf16.vlgmr.msra.gmra.mxu1 %v537_v17  ;;  %704 = vmatmul.bf16.vlgmr.msra.gmra.mxu2 %v537_v17 }
  0xba   : > { %v486_v18 = vpop.f32.mrf.mxu0 }
  0xbb   : > { %v487_v19 = vadd.f32 %v5003_v11, %v486_v18 }
  0xbd   : > { %v523_v22 = vmax.f32 %v487_v19, 0.0 }
  0xc2   : > { %v488_v20 = vpop.f32.mrf.mxu0 }
  0xc3   : > { %v489_v21 = vadd.f32 %v5003_v11, %v488_v20 }
  0xc5   : > { %v524_v23 = vmax.f32 %v489_v21, 0.0 }
  0xc7   : > { %v538_v24 = vpack.c.bf16 %v524_v23, %v523_v22 }
  0xc9   : > { %660 = vmatmul.bf16.gmra.mxu1 %v538_v24  ;;  %709 = vmatmul.bf16.gmra.mxu2 %v538_v24 }
  0xca   : > { %v491_v25 = vpop.f32.mrf.mxu0 }
  0xcb   : > { %v492_v26 = vadd.f32 %v5003_v11, %v491_v25 }
  0xcd   : > { %v525_v29 = vmax.f32 %v492_v26, 0.0 }
  0xd2   : > { %v493_v27 = vpop.f32.mrf.mxu0 }
  0xd3   : > { %v494_v28 = vadd.f32 %v5003_v11, %v493_v27 }
  0xd5   : > { %v526_v30 = vmax.f32 %v494_v28, 0.0 }
  0xd7   : > { %v539_v31 = vpack.c.bf16 %v526_v30, %v525_v29 }
  0xd9   : > { %665 = vmatmul.bf16.gmra.mxu1 %v539_v31  ;;  %714 = vmatmul.bf16.gmra.mxu2 %v539_v31  ;;  %v877_v31 = vld [vmem:[#allocation5 + $0x1e0] sm:$0xff] }
  0xda   : > { %v496_v32 = vpop.f32.mrf.mxu0  ;;  %974 = vmatpush.msra.mxu3 %v877_v31 }
  0xdb   : > { %v497_v33 = vadd.f32 %v5003_v11, %v496_v32  ;;  %v873_v32 = vld [vmem:[#allocation5 + $0x1c0] sm:$0xff] }
  0xdc   : > { %975 = vmatpush.msra.mxu3 %v873_v32  ;;  %v833_v32 = vld [vmem:[#allocation5 + $0x80] sm:$0xff] }
  0xdd   : > { %v527_v36 = vmax.f32 %v497_v33, 0.0 }
  0xe2   : > { %v498_v34 = vpop.f32.mrf.mxu0 }
  0xe3   : > { %v499_v35 = vadd.f32 %v5003_v11, %v498_v34  ;;  %v869_v34 = vld [vmem:[#allocation5 + $0x1a0] sm:$0xff] }
  0xe4   : > { %976 = vmatpush.msra.mxu3 %v869_v34  ;;  %v927_v34 = vld [vmem:[#allocation5 + $0x370] sm:$0xff] }
  0xe5   : > { %v528_v37 = vmax.f32 %v499_v35, 0.0 }
  0xe7   : > { %v540_v38 = vpack.c.bf16 %v528_v37, %v527_v36  ;;  %v865_v36 = vld [vmem:[#allocation5 + $0x180] sm:$0xff] }
  0xe8   : > { %977 = vmatpush.msra.mxu3 %v865_v36 }
  0xe9   : > { %670 = vmatmul.bf16.gmra.mxu1 %v540_v38  ;;  %719 = vmatmul.bf16.gmra.mxu2 %v540_v38 }
  0xea   : > { %v501_v39 = vpop.f32.mrf.mxu0 }
  0xeb   : > { %v502_v40 = vadd.f32 %v5003_v11, %v501_v39  ;;  %v861_v39 = vld [vmem:[#allocation5 + $0x160] sm:$0xff] }
  0xec   : > { %978 = vmatpush.msra.mxu3 %v861_v39  ;;  %v829_v39 = vld [vmem:[#allocation5 + $0x60] sm:$0xff] }
  0xed   : > { %v529_v43 = vmax.f32 %v502_v40, 0.0  ;;  %v879_v40 = vld [vmem:[#allocation5 + $0x1f0] sm:$0xff] }
  0xee   : > { %1054 = vmatpush.msrb.mxu0 %v879_v40  ;;  %v847_v40 = vld [vmem:[#allocation5 + $0xf0] sm:$0xff] }
  0xf2   : > { %v503_v41 = vpop.f32.mrf.mxu0 }
  0xf3   : > { %v504_v42 = vadd.f32 %v5003_v11, %v503_v41  ;;  %v880_v41 = vld [vmem:[#allocation5 + $0x1f8] sm:$0xff] }
  0xf4   : > { %1094 = vmatpush.msrb.mxu2 %v880_v41  ;;  %v923_v41 = vld [vmem:[#allocation5 + $0x350] sm:$0xff] }
  0xf5   : > { %v530_v44 = vmax.f32 %v504_v42, 0.0 }
  0xf7   : > { %v541_v45 = vpack.c.bf16 %v530_v44, %v529_v43  ;;  %v857_v44 = vld [vmem:[#allocation5 + $0x140] sm:$0xff] }
  0xf8   : > { %979 = vmatpush.msra.mxu3 %v857_v44 }
  0xf9   : > { %675 = vmatmul.bf16.gmra.mxu1 %v541_v45  ;;  %724 = vmatmul.bf16.gmra.mxu2 %v541_v45  ;;  %v875_v45 = vld [vmem:[#allocation5 + $0x1d0] sm:$0xff] }
  0xfa   : > { %v506_v46 = vpop.f32.mrf.mxu0  ;;  %1055 = vmatpush.msrb.mxu0 %v875_v45 }
  0xfb   : > { %v507_v47 = vadd.f32 %v5003_v11, %v506_v46  ;;  %v876_v46 = vld [vmem:[#allocation5 + $0x1d8] sm:$0xff] }
  0xfc   : > { %1095 = vmatpush.msrb.mxu2 %v876_v46 }
  0xfd   : > { %v531_v50 = vmax.f32 %v507_v47, 0.0 }
 0x102   : > { %v508_v48 = vpop.f32.mrf.mxu0 }
 0x103   : > { %v509_v49 = vadd.f32 %v5003_v11, %v508_v48 }
 0x105   : > { %v532_v51 = vmax.f32 %v509_v49, 0.0 }
 0x107   : > { %v542_v52 = vpack.c.bf16 %v532_v51, %v531_v50  ;;  %v853_v50 = vld [vmem:[#allocation5 + $0x120] sm:$0xff]  ;;  %v871_v51 = vld [vmem:[#allocation5 + $0x1b0] sm:$0xff] }
 0x108   : > { %980 = vmatpush.msra.mxu3 %v853_v50  ;;  %1056 = vmatpush.msrb.mxu0 %v871_v51  ;;  %v844_v51 = vld [vmem:[#allocation5 + $0xd8] sm:$0xff] }
 0x109   : > { %680 = vmatmul.bf16.gmra.mxu1 %v542_v52  ;;  %729 = vmatmul.bf16.gmra.mxu2 %v542_v52  ;;  %v872_v52 = vld [vmem:[#allocation5 + $0x1b8] sm:$0xff] }
 0x10a   : > { %v511_v53 = vpop.f32.mrf.mxu0  ;;  %1096 = vmatpush.msrb.mxu2 %v872_v52 }
 0x10b   : > { %v512_v54 = vadd.f32 %v5003_v11, %v511_v53 }
 0x10d   : > { %v533_v57 = vmax.f32 %v512_v54, 0.0 }
 0x112   : > { %v513_v55 = vpop.f32.mrf.mxu0 }
 0x113   : > { %v514_v56 = vadd.f32 %v5003_v11, %v513_v55 }
 0x115   : > { %v534_v58 = vmax.f32 %v514_v56, 0.0 }
 0x117   : > { %v543_v59 = vpack.c.bf16 %v534_v58, %v533_v57  ;;  %v849_v58 = vld [vmem:[#allocation5 + $0x100] sm:$0xff] }
 0x118   : > { %981 = vmatpush.msra.mxu3 %v849_v58  ;;  %v915_v58 = vld [vmem:[#allocation5 + $0x310] sm:$0xff] }
 0x119   : > { %685 = vmatmul.bf16.gmra.mxu1 %v543_v59  ;;  %734 = vmatmul.bf16.gmra.mxu2 %v543_v59  ;;  %v867_v59 = vld [vmem:[#allocation5 + $0x190] sm:$0xff] }
 0x11a   : > { %v516_v60 = vpop.f32.mrf.mxu0  ;;  %1057 = vmatpush.msrb.mxu0 %v867_v59 }
 0x11b   : > { %v517_v61 = vadd.f32 %v5003_v11, %v516_v60  ;;  %v943_v60 = vld [vmem:[#allocation5 + $0x3f0] sm:$0xff] }
 0x11c   : > { %1074 = vmatpush.msrb.mxu1 %v943_v60  ;;  %v840_v60 = vld [vmem:[#allocation5 + $0xb8] sm:$0xff] }
 0x11d   : > { %v535_v0 = vmax.f32 %v517_v61, 0.0 }
 0x122   : > { %v518_v62 = vpop.f32.mrf.mxu0 }
 0x123   : > { %v519_v63 = vadd.f32 %v5003_v11, %v518_v62  ;;  %v868_v62 = vld [vmem:[#allocation5 + $0x198] sm:$0xff] }
 0x124   : > { %1097 = vmatpush.msrb.mxu2 %v868_v62 }
 0x125   : > { %v536_v1 = vmax.f32 %v519_v63, 0.0 }
 0x127   : > { %v544_v2 = vpack.c.bf16 %v536_v1, %v535_v0 }
 0x129   : > { %690 = vmatmul.bf16.gmra.mxu1 %v544_v2  ;;  %739 = vmatmul.bf16.gmra.mxu2 %v544_v2  ;;  %v845_v2 = vld [vmem:[#allocation5 + $0xe0] sm:$0xff] }
 0x12a   : > { %982 = vmatpush.msra.mxu3 %v845_v2  ;;  %v911_v2 = vld [vmem:[#allocation5 + $0x2f0] sm:$0xff] }
 0x136   : > { %v656_v3 = vpop.f32.mrf.mxu1 }
 0x137   : > { %v657_v11 = vadd.f32 %v656_v3, %v5024_v9  ;;  %v863_v3 = vld [vmem:[#allocation5 + $0x170] sm:$0xff] }
 0x138   : > { %1058 = vmatpush.msrb.mxu0 %v863_v3 }
 0x13c   : > { %v705_v4 = vpop.f32.mrf.mxu2 }
 0x13d   : > { %v706_v20 = vadd.f32 %v705_v4, %v5031_v14  ;;  %v939_v4 = vld [vmem:[#allocation5 + $0x3d0] sm:$0xff] }
 0x13e   : > { %v658_v5 = vpop.f32.mrf.mxu1  ;;  %1075 = vmatpush.msrb.mxu1 %v939_v4  ;;  %v836_v4 = vld [vmem:[#allocation5 + $0x98] sm:$0xff] }
 0x13f   : > { %v659_v10 = vadd.f32 %v658_v5, %v5024_v9  ;;  %v864_v5 = vld [vmem:[#allocation5 + $0x178] sm:$0xff] }
 0x140   : > { %1098 = vmatpush.msrb.mxu2 %v864_v5  ;;  %v941_v5 = vld [vmem:[#allocation5 + $0x3e0] sm:$0xff] }
 0x141   : > { %v745_v15 = vmax.f32 %v657_v11, %v659_v10  ;;  %v841_v10 = vld [vmem:[#allocation5 + $0xc0] sm:$0xff]  ;;  %v859_v11 = vld [vmem:[#allocation5 + $0x150] sm:$0xff] }
 0x142   : > { %983 = vmatpush.msra.mxu3 %v841_v10  ;;  %1059 = vmatpush.msrb.mxu0 %v859_v11  ;;  %v832_v10 = vld [vmem:[#allocation5 + $0x78] sm:$0xff]  ;;  %v937_v11 = vld [vmem:[#allocation5 + $0x3c0] sm:$0xff] }
 0x144   : > { %v707_v7 = vpop.f32.mrf.mxu2 }
 0x145   : > { %v708_v17 = vadd.f32 %v707_v7, %v5031_v14 }
 0x146   : > { %v661_v8 = vpop.f32.mrf.mxu1 }
 0x147   : > { %v5029_v12 = vadd.f32 %v661_v8, %v5024_v9  ;;  %v754_v23 = vmax.f32 %v706_v20, %v708_v17  ;;  %v860_v17 = vld [vmem:[#allocation5 + $0x158] sm:$0xff] }
 0x148   : > { %1099 = vmatpush.msrb.mxu2 %v860_v17  ;;  %v903_v17 = vld [vmem:[#allocation5 + $0x2b0] sm:$0xff] }
 0x149   : > { %v746_v18 = vmax.f32 %v745_v15, %v5029_v12 }
 0x14c   : > { %v710_v13 = vpop.f32.mrf.mxu2 }
 0x14d   : > { %v5040_v21 = vadd.f32 %v710_v13, %v5031_v14  ;;  %v935_v13 = vld [vmem:[#allocation5 + $0x3b0] sm:$0xff] }
 0x14e   : > { %v663_v16 = vpop.f32.mrf.mxu1  ;;  %1076 = vmatpush.msrb.mxu1 %v935_v13 }
 0x14f   : > { %v5036_v19 = vadd.f32 %v663_v16, %v5024_v9  ;;  %v755_v25 = vmax.f32 %v754_v23, %v5040_v21  ;;  %v837_v23 = vld [vmem:[#allocation5 + $0xa0] sm:$0xff] }
 0x150   : > { %984 = vmatpush.msra.mxu3 %v837_v23  ;;  %v933_v23 = vld [vmem:[#allocation5 + $0x3a0] sm:$0xff] }
 0x151   : > { %v747_v22 = vmax.f32 %v746_v18, %v5036_v19 }
 0x152   : > { %985 = vmatpush.msra.mxu3 %v833_v32  ;;  %v3616_v32 = vld [vmem:[#allocation2 + $0xe0] sm:$0xf] }
 0x153   : > { %v748_v37 = vrot.slane %v747_v22, 4 }
 0x154   : > { %v712_v24 = vpop.f32.mrf.mxu2  ;;  %986 = vmatpush.msra.mxu3 %v829_v39  ;;  %v4320_v39 = vld [vmem:[#allocation2 + $0xe4] sm:$0xf] }
 0x155   : > { %v5045_v26 = vadd.f32 %v712_v24, %v5031_v14  ;;  %v749_v47 = vmax.f32 %v747_v22, %v748_v37  ;;  %v855_v24 = vld [vmem:[#allocation5 + $0x130] sm:$0xff] }
 0x156   : > { %v666_v27 = vpop.f32.mrf.mxu1  ;;  %1060 = vmatpush.msrb.mxu0 %v855_v24  ;;  %v823_v24 = vld [vmem:[#allocation5 + $0x30] sm:$0xff] }
 0x157   : > { %v756_v28 = vmax.f32 %v755_v25, %v5045_v26  ;;  %v667_v42 = vadd.f32 %v666_v27, %v5024_v9  ;;  %v750_v61 = vrot.slane %v749_v47, 2  ;;  %v931_v25 = vld [vmem:[#allocation5 + $0x390] sm:$0xff] }
 0x158   : > { %1077 = vmatpush.msrb.mxu1 %v931_v25  ;;  %v899_v25 = vld [vmem:[#allocation5 + $0x290] sm:$0xff] }
 0x159   : > { %v757_v54 = vrot.slane %v756_v28, 4  ;;  %v751_v15 = vmax.f32 %v749_v47, %v750_v61  ;;  %v825_v47 = vld [vmem:[#allocation5 + $0x40] sm:$0xff] }
 0x15a   : > { %1078 = vmatpush.msrb.mxu1 %v927_v34  ;;  %987 = vmatpush.msra.mxu3 %v825_v47  ;;  %v819_v34 = vld [vmem:[#allocation5 + $0x10] sm:$0xff]  ;;  %v4316_v47 = vld [vmem:[#allocation2 + $0xc4] sm:$0xf] }
 0x15b   : > { %v758_v6 = vmax.f32 %v756_v28, %v757_v54  ;;  %v856_v28 = vld [vmem:[#allocation5 + $0x138] sm:$0xff]  ;;  %v752_v36 = vrot.slane %v751_v15, 1 }
 0x15c   : > { %v715_v29 = vpop.f32.mrf.mxu2  ;;  %1100 = vmatpush.msrb.mxu2 %v856_v28  ;;  %1079 = vmatpush.msrb.mxu1 %v923_v41  ;;  %v824_v28 = vld [vmem:[#allocation5 + $0x38] sm:$0xff] }
 0x15d   : > { %v716_v63 = vadd.f32 %v715_v29, %v5031_v14  ;;  %v759_v29 = vrot.slane %v758_v6, 2  ;;  %v753_v52 = vmax.f32 %v751_v15, %v752_v36  ;;  %v820_v36 = vld [vmem:[#allocation5 + $0x18] sm:$0xff] }
 0x15e   : > { %v668_v30 = vpop.f32.mrf.mxu1 }
 0x15f   : > { %v669_v38 = vadd.f32 %v668_v30, %v5024_v9  ;;  %v760_v44 = vmax.f32 %v758_v6, %v759_v29 }
 0x161   : > { %v763_v49 = vmax.f32 %v667_v42, %v669_v38  ;;  %v848_v42 = vld [vmem:[#allocation5 + $0xf8] sm:$0xff]  ;;  %v761_v61 = vrot.slane %v760_v44, 1 }
 0x163   : > { %v762_v13 = vmax.f32 %v760_v44, %v761_v61  ;;  %v921_v44 = vld [vmem:[#allocation5 + $0x340] sm:$0xff] }
 0x164   : > { %v717_v33 = vpop.f32.mrf.mxu2 }
 0x165   : > { %v718_v55 = vadd.f32 %v717_v33, %v5031_v14  ;;  %v851_v33 = vld [vmem:[#allocation5 + $0x110] sm:$0xff] }
 0x166   : > { %v671_v35 = vpop.f32.mrf.mxu1  ;;  %1061 = vmatpush.msrb.mxu0 %v851_v33  ;;  %v4322_v33 = vld [vmem:[#allocation2 + $0xec] sm:$0xf0] }
 0x167   : > { %v5051_v43 = vadd.f32 %v671_v35, %v5024_v9  ;;  %v772_v7 = vmax.f32 %v716_v63, %v718_v55  ;;  %v852_v35 = vld [vmem:[#allocation5 + $0x118] sm:$0xff]  ;;  %v821_v55 = vld [vmem:[#allocation5 + $0x20] sm:$0xff] }
 0x168   : > { %1101 = vmatpush.msrb.mxu2 %v852_v35  ;;  %1062 = vmatpush.msrb.mxu0 %v847_v40  ;;  %v817_v63 = vld [vmem:[#allocation5] sm:$0xff]  ;;  %v895_v35 = vld [vmem:[#allocation5 + $0x270] sm:$0xff] }
 0x169   : > { %v764_v56 = vmax.f32 %v763_v49, %v5051_v43  ;;  %v919_v49 = vld [vmem:[#allocation5 + $0x330] sm:$0xff]  ;;  %988 = vmatpush.msra.mxu3 %v821_v55  ;;  %v3744_v55 = vld [vmem:[#allocation2 + $0x1e0] sm:$0xf] }
 0x16a   : > { %1102 = vmatpush.msrb.mxu2 %v848_v42  ;;  %1080 = vmatpush.msrb.mxu1 %v919_v49  ;;  %v3618_v40 = vld [vmem:[#allocation2 + $0xf0] sm:$0xf0] }
 0x16b   : > { %989 = vmatpush.msra.mxu3 %v817_v63  ;;  %v3621_v41 = vor.u32 %v4320_v39, %v3618_v40  ;;  %v891_v42 = vld [vmem:[#allocation5 + $0x250] sm:$0xff]  ;;  %v3584_v63 = vld [vmem:[#allocation2 + $0xa0] sm:$0xf] }
 0x16c   : > { %v720_v48 = vpop.f32.mrf.mxu2  ;;  %1103 = vmatpush.msrb.mxu2 %v844_v51  ;;  %1081 = vmatpush.msrb.mxu1 %v915_v58  ;;  %v3602_v51 = vld [vmem:[#allocation2 + $0xd0] sm:$0xf0]  ;;  %v893_v40 = vld [vmem:[#allocation5 + $0x260] sm:$0xff] }
 0x16d   : > { %v5060_v0 = vadd.f32 %v720_v48, %v5031_v14  ;;  %v843_v48 = vld [vmem:[#allocation5 + $0xd0] sm:$0xff]  ;;  %994 = vmatpush.msrb.mxu3 %v941_v5 }
 0x16e   : > { %v673_v53 = vpop.f32.mrf.mxu1  ;;  %1063 = vmatpush.msrb.mxu0 %v843_v48  ;;  %1104 = vmatpush.msrb.mxu2 %v840_v60  ;;  %v887_v48 = vld [vmem:[#allocation5 + $0x230] sm:$0xff] }
 0x16f   : > { %v5056_v57 = vadd.f32 %v673_v53, %v5024_v9  ;;  %v773_v18 = vmax.f32 %v772_v7, %v5060_v0  ;;  %1082 = vmatpush.msrb.mxu1 %v911_v2  ;;  %v831_v7 = vld [vmem:[#allocation5 + $0x70] sm:$0xff]  ;;  %995 = vmatpush.msrb.mxu3 %v937_v11 }
 0x170   : > { %1105 = vmatpush.msrb.mxu2 %v836_v4  ;;  %v883_v58 = vld [vmem:[#allocation5 + $0x210] sm:$0xff]  ;;  %v4312_v4 = vld [vmem:[#allocation2 + $0xa4] sm:$0xf] }
 0x171   : > { %v765_v1 = vmax.f32 %v764_v56, %v5056_v57  ;;  %v839_v56 = vld [vmem:[#allocation5 + $0xb0] sm:$0xff]  ;;  %996 = vmatpush.msrb.mxu3 %v933_v23 }
 0x172   : > { %1064 = vmatpush.msrb.mxu0 %v839_v56  ;;  %1106 = vmatpush.msrb.mxu2 %v832_v10  ;;  %v4354_v56 = vld [vmem:[#allocation2 + $0x1ec] sm:$0xf0]  ;;  %v3586_v5 = vld [vmem:[#allocation2 + $0xb0] sm:$0xf0] }
 0x173   : > { %v766_v8 = vrot.slane %v765_v1, 4  ;;  %v3745_v60 = vor.u32 %v4354_v56, %v3744_v55  ;;  %v4350_v10 = vld [vmem:[#allocation2 + $0x1cc] sm:$0xf0]  ;;  %v3570_v23 = vld [vmem:[#allocation2 + $0x90] sm:$0xf0] }
 0x174   : > { %v722_v16 = vpop.f32.mrf.mxu2  ;;  %v3554_v39 = vld [vmem:[#allocation2 + $0x70] sm:$0xf0] }
 0x175   : > { %v767_v20 = vmax.f32 %v765_v1, %v766_v8  ;;  %v5065_v22 = vadd.f32 %v722_v16, %v5031_v14  ;;  %v835_v1 = vld [vmem:[#allocation5 + $0x90] sm:$0xff] }
 0x176   : > { %v5067_v27 = vpop.f32.mrf.mxu1  ;;  %1065 = vmatpush.msrb.mxu0 %v835_v1  ;;  %v907_v8 = vld [vmem:[#allocation5 + $0x2d0] sm:$0xff] }
 0x177   : > { %v768_v30 = vrot.slane %v767_v20, 2  ;;  %v774_v31 = vmax.f32 %v773_v18, %v5065_v22  ;;  %1083 = vmatpush.msrb.mxu1 %v907_v8  ;;  %v827_v16 = vld [vmem:[#allocation5 + $0x50] sm:$0xff]  ;;  %v828_v18 = vld [vmem:[#allocation5 + $0x58] sm:$0xff]  ;;  %v3728_v8 = vld [vmem:[#allocation2 + $0x1c0] sm:$0xf]  ;;  %v677_v56 = vadd.f32 %v5067_v27, %v5024_v9 }
 0x178   : > { %1066 = vmatpush.msrb.mxu0 %v831_v7  ;;  %1107 = vmatpush.msrb.mxu2 %v828_v18  ;;  %v4314_v1 = vld [vmem:[#allocation2 + $0xac] sm:$0xf0]  ;;  %v3589_v7 = vor.u32 %v4312_v4, %v3586_v5  ;;  %v3729_v11 = vor.u32 %v4350_v10, %v3728_v8  ;;  %v4308_v18 = vld [vmem:[#allocation2 + $0x84] sm:$0xf]  ;;  %v3538_v55 = vld [vmem:[#allocation2 + $0x50] sm:$0xf0] }
 0x179   : > { %v769_v37 = vmax.f32 %v767_v20, %v768_v30  ;;  %v775_v38 = vrot.slane %v774_v31, 4  ;;  %1084 = vmatpush.msrb.mxu1 %v903_v17  ;;  %v3585_v2 = vor.u32 %v4314_v1, %v3584_v63  ;;  %v3680_v63 = vld [vmem:[#allocation2 + $0x160] sm:$0xf]  ;;  %v4338_v1 = vld [vmem:[#allocation2 + $0x16c] sm:$0xf0] }
 0x17a   : > { %1067 = vmatpush.msrb.mxu0 %v827_v16  ;;  %1108 = vmatpush.msrb.mxu2 %v824_v28  ;;  %v4310_v16 = vld [vmem:[#allocation2 + $0x8c] sm:$0xf0]  ;;  %v3573_v28 = vor.u32 %v4308_v18, %v3570_v23  ;;  %v881_v27 = vld [vmem:[#allocation5 + $0x200] sm:$0xff] }
 0x17b   : > { %v770_v45 = vrot.slane %v769_v37, 1  ;;  %v776_v46 = vmax.f32 %v774_v31, %v775_v38  ;;  %v929_v31 = vld [vmem:[#allocation5 + $0x380] sm:$0xff]  ;;  %1085 = vmatpush.msrb.mxu1 %v899_v25 }
 0x17c   : > { %v5070_v50 = vpop.f32.mrf.mxu2  ;;  %1068 = vmatpush.msrb.mxu0 %v823_v24  ;;  %997 = vmatpush.msrb.mxu3 %v929_v31  ;;  %v925_v38 = vld [vmem:[#allocation5 + $0x360] sm:$0xff] }
 0x17d   : > { %v771_v53 = vmax.f32 %v769_v37, %v770_v45  ;;  %v777_v54 = vrot.slane %v776_v46, 2  ;;  %v3617_v37 = vor.u32 %v4322_v33, %v3616_v32  ;;  %1086 = vmatpush.msrb.mxu1 %v895_v35  ;;  %1109 = vmatpush.msrb.mxu2 %v820_v36  ;;  %v3600_v45 = vld [vmem:[#allocation2 + $0xc0] sm:$0xf]  ;;  %v4346_v32 = vld [vmem:[#allocation2 + $0x1ac] sm:$0xf0]  ;;  %v726_v18 = vadd.f32 %v5070_v50, %v5031_v14 }
 0x17e   : > { %v5072_v59 = vpop.f32.mrf.mxu1  ;;  %1069 = vmatpush.msrb.mxu0 %v819_v34  ;;  %998 = vmatpush.msrb.mxu3 %v925_v38  ;;  %v901_v25 = vld [vmem:[#allocation5 + $0x2a0] sm:$0xff] }
 0x17f   : > { %v778_v62 = vmax.f32 %v776_v46, %v777_v54  ;;  %v5075_v3 = vsel %vm963_vm2, %v771_v53, %v753_v52  ;;  %v4318_v46 = vld [vmem:[#allocation2 + $0xcc] sm:$0xf0]  ;;  %1584 = vmatpush.bf16.msra.mxu2 %v3621_v41  ;;  %1087 = vmatpush.msrb.mxu1 %v891_v42  ;;  %v917_v53 = vld [vmem:[#allocation5 + $0x320] sm:$0xff]  ;;  %v3605_v54 = vor.u32 %v4316_v47, %v3602_v51 }
 0x180   : > { %1526 = vmatpush.bf16.msra.mxu0 %v3617_v37  ;;  %v3601_v49 = vor.u32 %v4318_v46, %v3600_v45  ;;  %999 = vmatpush.msrb.mxu3 %v921_v44  ;;  %v3712_v31 = vld [vmem:[#allocation2 + $0x1a0] sm:$0xf]  ;;  %v4306_v37 = vld [vmem:[#allocation2 + $0x6c] sm:$0xf0]  ;;  %v4304_v38 = vld [vmem:[#allocation2 + $0x64] sm:$0xf]  ;;  %v679_v47 = vadd.f32 %v5072_v59, %v5024_v9 }
 0x181   : > { %v779_v6 = vrot.slane %v778_v62, 1  ;;  %1088 = vmatpush.msrb.mxu1 %v887_v48  ;;  %v3713_v33 = vor.u32 %v4346_v32, %v3712_v31  ;;  %v897_v35 = vld [vmem:[#allocation5 + $0x280] sm:$0xff]  ;;  %v3557_v42 = vor.u32 %v4304_v38, %v3554_v39  ;;  %v4342_v45 = vld [vmem:[#allocation2 + $0x18c] sm:$0xf0] }
 0x182   : > { %1000 = vmatpush.msrb.mxu3 %v917_v53  ;;  %v3552_v36 = vld [vmem:[#allocation2 + $0x60] sm:$0xf]  ;;  %v4302_v51 = vld [vmem:[#allocation2 + $0x4c] sm:$0xf0]  ;;  %v781_v4 = vmax.f32 %v677_v56, %v679_v47  ;;  %v4292_v50 = vld [vmem:[#allocation2 + $0x4] sm:$0xf] }
 0x183   : > { %v780_v15 = vmax.f32 %v778_v62, %v779_v6  ;;  %v913_v62 = vld [vmem:[#allocation5 + $0x300] sm:$0xff]  ;;  %1585 = vmatpush.bf16.msra.mxu2 %v3605_v54  ;;  %1089 = vmatpush.msrb.mxu1 %v883_v58  ;;  %v3553_v41 = vor.u32 %v4306_v37, %v3552_v36  ;;  %v4294_v31 = vld [vmem:[#allocation2 + $0xc] sm:$0xf0]  ;;  %v3506_v37 = vld [vmem:[#allocation2 + $0x10] sm:$0xf0] }
 0x184   : > { %v5077_v20 = vpop.f32.mrf.mxu2  ;;  %1527 = vmatpush.bf16.msra.mxu0 %v3601_v49  ;;  %1001 = vmatpush.msrb.mxu3 %v913_v62  ;;  %v909_v6 = vld [vmem:[#allocation5 + $0x2e0] sm:$0xff]  ;;  %v3509_v38 = vor.u32 %v4292_v50, %v3506_v37  ;;  %v4330_v39 = vld [vmem:[#allocation2 + $0x12c] sm:$0xf0] }
 0x185   : > { %v5080_v29 = vsel %vm963_vm2, %v780_v15, %v762_v13  ;;  %1555 = vmatpush.bf16.msra.mxu1 %v3745_v60  ;;  %v905_v13 = vld [vmem:[#allocation5 + $0x2c0] sm:$0xff]  ;;  %v728_v8 = vadd.f32 %v5077_v20, %v5031_v14  ;;  %v4326_v47 = vld [vmem:[#allocation2 + $0x10c] sm:$0xf0] }
 0x186   : > { %v5082_v30 = vpop.f32.mrf.mxu1  ;;  %1002 = vmatpush.msrb.mxu3 %v909_v6  ;;  %v3568_v15 = vld [vmem:[#allocation2 + $0x80] sm:$0xf]  ;;  %v4300_v54 = vld [vmem:[#allocation2 + $0x44] sm:$0xf] }
 0x187   : > { %1586 = vmatpush.bf16.msra.mxu2 %v3589_v7  ;;  %v3569_v17 = vor.u32 %v4310_v16, %v3568_v15  ;;  %v3696_v44 = vld [vmem:[#allocation2 + $0x180] sm:$0xf]  ;;  %v5098_v58 = vadd.f32 %v5082_v30, %v5024_v9  ;;  %v3541_v62 = vor.u32 %v4300_v54, %v3538_v55  ;;  %v4298_v7 = vld [vmem:[#allocation2 + $0x2c] sm:$0xf0]  ;;  %v3522_v15 = vld [vmem:[#allocation2 + $0x30] sm:$0xf0]  ;;  %v790_v32 = vmax.f32 %v726_v18, %v728_v8 }
 0x188   : > { %1528 = vmatpush.bf16.msra.mxu0 %v3585_v2  ;;  %1003 = vmatpush.msrb.mxu3 %v905_v13  ;;  %v3697_v46 = vor.u32 %v4342_v45, %v3696_v44  ;;  %v889_v48 = vld [vmem:[#allocation5 + $0x240] sm:$0xff]  ;;  %v3681_v2 = vor.u32 %v4338_v1, %v3680_v63 }
 0x189   : > { %1556 = vmatpush.bf16.msra.mxu1 %v3729_v11  ;;  %v3536_v49 = vld [vmem:[#allocation2 + $0x40] sm:$0xf]  ;;  %v782_v10 = vmax.f32 %v781_v4, %v5098_v58  ;;  %v4296_v13 = vld [vmem:[#allocation2 + $0x24] sm:$0xf] }
 0x18a   : > { %1004 = vmatpush.msrb.mxu3 %v901_v25  ;;  %v3537_v53 = vor.u32 %v4302_v51, %v3536_v49  ;;  %v885_v59 = vld [vmem:[#allocation5 + $0x220] sm:$0xff]  ;;  %v3525_v16 = vor.u32 %v4296_v13, %v3522_v15 }
 0x18b   : > { %1587 = vmatpush.bf16.msra.mxu2 %v3573_v28  ;;  %v3520_v30 = vld [vmem:[#allocation2 + $0x20] sm:$0xf] }
 0x18c   : > { %v5084_v52 = vpop.f32.mrf.mxu2  ;;  %1529 = vmatpush.bf16.msra.mxu0 %v3569_v17  ;;  %1005 = vmatpush.msrb.mxu3 %v897_v35  ;;  %v3521_v11 = vor.u32 %v4298_v7, %v3520_v30  ;;  %v4334_v17 = vld [vmem:[#allocation2 + $0x14c] sm:$0xf0]  ;;  %v3504_v28 = vld [vmem:[#allocation2] sm:$0xf] }
 0x18d   : > { %1557 = vmatpush.bf16.msra.mxu1 %v3713_v33  ;;  %v5113_v23 = vadd.f32 %v5084_v52, %v5031_v14  ;;  %v3505_v36 = vor.u32 %v4294_v31, %v3504_v28  ;;  %v3648_v52 = vld [vmem:[#allocation2 + $0x120] sm:$0xf] }
 0x18e   : > { %v5086_v61 = vpop.f32.mrf.mxu1  ;;  %1006 = vmatpush.msrb.mxu3 %v893_v40  ;;  %v3649_v44 = vor.u32 %v4330_v39, %v3648_v52 }
 0x18f   : > { %1588 = vmatpush.bf16.msra.mxu2 %v3557_v42  ;;  %v5104_v5 = vadd.f32 %v5086_v61, %v5024_v9  ;;  %v3664_v61 = vld [vmem:[#allocation2 + $0x140] sm:$0xf]  ;;  %v791_v40 = vmax.f32 %v790_v32, %v5113_v23 }
 0x190   : > { %1530 = vmatpush.bf16.msra.mxu0 %v3553_v41  ;;  %1007 = vmatpush.msrb.mxu3 %v889_v48  ;;  %v3665_v20 = vor.u32 %v4334_v17, %v3664_v61 }
 0x191   : > { %1558 = vmatpush.bf16.msra.mxu1 %v3697_v46  ;;  %v783_v25 = vmax.f32 %v782_v10, %v5104_v5  ;;  %v3632_v46 = vld [vmem:[#allocation2 + $0x100] sm:$0xf] }
 0x192   : > { %1008 = vmatpush.msrb.mxu3 %v885_v59  ;;  %v3633_v49 = vor.u32 %v4326_v47, %v3632_v46  ;;  %v5151_v47 = vpack.c.bf16 %v5036_v19, %v5029_v12  ;;  %v850_v19 = vld [vmem:[#allocation5 + $0x108] sm:$0xff] }
 0x193   : > { %1589 = vmatpush.bf16.msra.mxu2 %v3541_v62  ;;  %v784_v41 = vrot.slane %v783_v25, 4 }
 0x194   : > { %v5088_v24 = vpop.f32.mrf.mxu2  ;;  %1531 = vmatpush.bf16.msra.mxu0 %v3537_v53  ;;  %1009 = vmatpush.msrb.mxu3 %v881_v27 }
 0x195   : > { %1559 = vmatpush.bf16.msra.mxu1 %v3681_v2  ;;  %v5118_v33 = vadd.f32 %v5088_v24, %v5031_v14  ;;  %v785_v48 = vmax.f32 %v783_v25, %v784_v41  ;;  %v874_v41 = vld [vmem:[#allocation5 + $0x1c8] sm:$0xff] }
 0x196   : > { %v5090_v34 = vpop.f32.mrf.mxu1 }
 0x197   : > { %1590 = vmatpush.bf16.msra.mxu2 %v3525_v16  ;;  %v792_v45 = vmax.f32 %v791_v40, %v5118_v33  ;;  %v687_v51 = vadd.f32 %v5090_v34, %v5024_v9  ;;  %v786_v59 = vrot.slane %v785_v48, 2 }
 0x198   : > { %1532 = vmatpush.bf16.msra.mxu0 %v3521_v11 }
 0x199   : > { %1560 = vmatpush.bf16.msra.mxu1 %v3665_v20  ;;  %v793_v54 = vrot.slane %v792_v45, 4  ;;  %v787_v7 = vmax.f32 %v785_v48, %v786_v59  ;;  %v862_v48 = vld [vmem:[#allocation5 + $0x168] sm:$0xff]  ;;  %v5159_v59 = vpack.c.bf16 %v5045_v26, %v5040_v21  ;;  %v4315_v26 = vld [vmem:[#allocation2 + $0xb4] sm:$0xf0] }
 0x19a   : > { %v3592_v21 = vld [vmem:[#allocation2 + $0xa8] sm:$0xf] }
 0x19b   : > { %1591 = vmatpush.bf16.msra.mxu2 %v3509_v38  ;;  %v794_v4 = vmax.f32 %v792_v45, %v793_v54  ;;  %v788_v17 = vrot.slane %v787_v7, 1 }
 0x19c   : > { %v5100_v60 = vpop.f32.mrf.mxu2  ;;  %1533 = vmatpush.bf16.msra.mxu0 %v3505_v36 }
 0x19d   : > { %1561 = vmatpush.bf16.msra.mxu1 %v3649_v44  ;;  %v795_v11 = vrot.slane %v794_v4, 2  ;;  %v789_v31 = vmax.f32 %v787_v7, %v788_v17  ;;  %v870_v44 = vld [vmem:[#allocation5 + $0x1a8] sm:$0xff]  ;;  %v4355_v7 = vld [vmem:[#allocation2 + $0x1f4] sm:$0xf0] }
 0x19e   : > { %v688_v6 = vpop.f32.mrf.mxu1  ;;  %v3736_v17 = vld [vmem:[#allocation2 + $0x1c8] sm:$0xf] }
 0x19f   : > { %v689_v24 = vadd.f32 %v688_v6, %v5024_v9  ;;  %v736_v6 = vadd.f32 %v5100_v60, %v5031_v14  ;;  %v796_v60 = vmax.f32 %v794_v4, %v795_v11  ;;  %v966_v38 = vsel %vm965_vm3, %v789_v31, %v5075_v3  ;;  %v3610_v4 = vld [vmem:[#allocation2 + $0xd8] sm:$0xf0]  ;;  %v4313_v11 = vld [vmem:[#allocation2 + $0xac] sm:$0xf] }
 0x1a0   : > { %v4309_v31 = vld [vmem:[#allocation2 + $0x8c] sm:$0xf] }
 0x1a1   : > { %1562 = vmatpush.bf16.msra.mxu1 %v3633_v49  ;;  %v799_v56 = vmax.f32 %v687_v51, %v689_v24  ;;  %v797_v36 = vrot.slane %v796_v60, 1  ;;  %v866_v24 = vld [vmem:[#allocation5 + $0x188] sm:$0xff] }
 0x1a2   : > { %v858_v49 = vld [vmem:[#allocation5 + $0x148] sm:$0xff] }
 0x1a3   : > { %v798_v40 = vmax.f32 %v796_v60, %v797_v36  ;;  %v3624_v51 = vld [vmem:[#allocation2 + $0xe8] sm:$0xf]  ;;  %v5164_v36 = vpack.c.bf16 %v5056_v57, %v5051_v43  ;;  %v3562_v43 = vld [vmem:[#allocation2 + $0x78] sm:$0xf0] }
 0x1a4   : > { %v737_v35 = vpop.f32.mrf.mxu2  ;;  %v822_v57 = vld [vmem:[#allocation5 + $0x28] sm:$0xff] }
 0x1a5   : > { %v738_v63 = vadd.f32 %v737_v35, %v5031_v14  ;;  %v970_v3 = vsel %vm965_vm3, %v798_v40, %v5080_v29  ;;  %v4321_v29 = vld [vmem:[#allocation2 + $0xec] sm:$0xf] }
 0x1a6   : > { %v691_v42 = vpop.f32.mrf.mxu1 }
 0x1a7   : > { %v692_v53 = vadd.f32 %v691_v42, %v5024_v9  ;;  %v808_v8 = vmax.f32 %v736_v6, %v738_v63  ;;  %v4319_v63 = vld [vmem:[#allocation2 + $0xd4] sm:$0xf0]  ;;  %v846_v6 = vld [vmem:[#allocation5 + $0xe8] sm:$0xff] }
 0x1a9   : > { %v800_v1 = vmax.f32 %v799_v56, %v692_v53  ;;  %v854_v56 = vld [vmem:[#allocation5 + $0x128] sm:$0xff] }
 0x1ac   : > { %v740_v55 = vpop.f32.mrf.mxu2 }
 0x1ad   : > { %v741_v27 = vadd.f32 %v740_v55, %v5031_v14  ;;  %v3626_v55 = vld [vmem:[#allocation2 + $0xf8] sm:$0xf0] }
 0x1ae   : > { %v693_v62 = vpop.f32.mrf.mxu1  ;;  %v3629_v12 = vor.u32 %v4321_v29, %v3626_v55  ;;  %v3544_v29 = vld [vmem:[#allocation2 + $0x48] sm:$0xf]  ;;  %v4301_v55 = vld [vmem:[#allocation2 + $0x4c] sm:$0xf] }
 0x1af   : > { %v694_v2 = vadd.f32 %v693_v62, %v5024_v9  ;;  %v809_v15 = vmax.f32 %v808_v8, %v741_v27  ;;  %v3608_v62 = vld [vmem:[#allocation2 + $0xc8] sm:$0xf] }
 0x1b0   : > { %v842_v8 = vld [vmem:[#allocation5 + $0xc8] sm:$0xff] }
 0x1b1   : > { %v801_v34 = vmax.f32 %v800_v1, %v694_v2  ;;  %v5131_v30 = vpack.c.bf16 %v694_v2, %v692_v53  ;;  %v4323_v53 = vld [vmem:[#allocation2 + $0xf4] sm:$0xf0]  ;;  %v4317_v1 = vld [vmem:[#allocation2 + $0xcc] sm:$0xf]  ;;  %v3609_v2 = vor.u32 %v4319_v63, %v3608_v62  ;;  %v3688_v63 = vld [vmem:[#allocation2 + $0x168] sm:$0xf] }
 0x1b2   : > { %v3625_v54 = vor.u32 %v4323_v53, %v3624_v51  ;;  %v5170_v53 = vpack.c.bf16 %v5065_v22, %v5060_v0  ;;  %v3528_v22 = vld [vmem:[#allocation2 + $0x28] sm:$0xf] }
 0x1b3   : > { %v802_v10 = vrot.slane %v801_v34, 4 }
 0x1b4   : > { %v742_v13 = vpop.f32.mrf.mxu2 }
 0x1b5   : > { %v803_v16 = vmax.f32 %v801_v34, %v802_v10  ;;  %v743_v61 = vadd.f32 %v742_v13, %v5031_v14  ;;  %v878_v14 = vld [vmem:[#allocation5 + $0x1e8] sm:$0xff]  ;;  %v3593_v13 = vor.u32 %v4315_v26, %v3592_v21  ;;  %v4335_v21 = vld [vmem:[#allocation2 + $0x154] sm:$0xf0] }
 0x1b6   : > { %v3752_v34 = vld [vmem:[#allocation2 + $0x1e8] sm:$0xf] }
 0x1b7   : > { %v804_v9 = vrot.slane %v803_v16, 2  ;;  %v810_v18 = vmax.f32 %v809_v15, %v743_v61  ;;  %v5134_v25 = vpack.c.bf16 %v743_v61, %v741_v27  ;;  %v3613_v27 = vor.u32 %v4317_v1, %v3610_v4  ;;  %v3594_v15 = vld [vmem:[#allocation2 + $0xb8] sm:$0xf0]  ;;  %v4339_v1 = vld [vmem:[#allocation2 + $0x174] sm:$0xf0]  ;;  %v930_v26 = vld [vmem:[#allocation5 + $0x388] sm:$0xff] }
 0x1b8   : > { %v3753_v10 = vor.u32 %v4355_v7, %v3752_v34  ;;  %v3597_v61 = vor.u32 %v4313_v11, %v3594_v15  ;;  %v3689_v0 = vor.u32 %v4339_v1, %v3688_v63  ;;  %v4299_v4 = vld [vmem:[#allocation2 + $0x34] sm:$0xf0]  ;;  %v4297_v34 = vld [vmem:[#allocation2 + $0x2c] sm:$0xf]  ;;  %v3530_v7 = vld [vmem:[#allocation2 + $0x38] sm:$0xf0]  ;;  %v5176_v15 = vpack.c.bf16 %v5104_v5, %v5098_v58 }
 0x1b9   : > { %v805_v20 = vmax.f32 %v803_v16, %v804_v9  ;;  %v811_v28 = vrot.slane %v810_v18, 4  ;;  %v838_v16 = vld [vmem:[#allocation5 + $0xa8] sm:$0xff]  ;;  %v4351_v9 = vld [vmem:[#allocation2 + $0x1d4] sm:$0xf0] }
 0x1ba   : > { %v3737_v60 = vor.u32 %v4351_v9, %v3736_v17  ;;  %v4293_v17 = vld [vmem:[#allocation2 + $0xc] sm:$0xf]  ;;  %v3514_v9 = vld [vmem:[#allocation2 + $0x18] sm:$0xf0]  ;;  %v3640_v58 = vld [vmem:[#allocation2 + $0x108] sm:$0xf] }
 0x1bb   : > { %v806_v32 = vrot.slane %v805_v20, 1  ;;  %v812_v35 = vmax.f32 %v810_v18, %v811_v28  ;;  %v834_v18 = vld [vmem:[#allocation5 + $0x88] sm:$0xff]  ;;  %v4311_v28 = vld [vmem:[#allocation2 + $0x94] sm:$0xf0] }
 0x1bc   : > { %v4327_v5 = vld [vmem:[#allocation2 + $0x114] sm:$0xf0] }
 0x1bd   : > { %v813_v50 = vrot.slane %v812_v35, 2  ;;  %v807_v37 = vmax.f32 %v805_v20, %v806_v32  ;;  %v3576_v20 = vld [vmem:[#allocation2 + $0x88] sm:$0xf]  ;;  %v884_v63 = vld [vmem:[#allocation5 + $0x218] sm:$0xff] }
 0x1be   : > { %v3577_v32 = vor.u32 %v4311_v28, %v3576_v20  ;;  %v4331_v20 = vld [vmem:[#allocation2 + $0x134] sm:$0xf0]  ;;  %v922_v28 = vld [vmem:[#allocation5 + $0x348] sm:$0xff] }
 0x1bf   : > { %v814_v52 = vmax.f32 %v812_v35, %v813_v50  ;;  %v5139_v39 = vsel %vm967_vm4, %v807_v37, %v966_v38  ;;  %v3578_v35 = vld [vmem:[#allocation2 + $0x98] sm:$0xf0]  ;;  %v830_v50 = vld [vmem:[#allocation5 + $0x68] sm:$0xff] }
 0x1c0   : > { %990 = vmatmul.f32.vlgmr.msra.gmra.mxu3 %v5139_v39  ;;  %1070 = vmatmul.f32.vlgmr.msrb.gmra.mxu0 %v5139_v39  ;;  %v3581_v37 = vor.u32 %v4309_v31, %v3578_v35  ;;  %v3720_v38 = vld [vmem:[#allocation2 + $0x1a8] sm:$0xf]  ;;  %v5182_v35 = vpack.c.bf16 %v5118_v33, %v5113_v23 }
 0x1c1   : > { %v815_v42 = vrot.slane %v814_v52, 1  ;;  %1014 = vmatpush.msra.mxu3 %v878_v14  ;;  %1110 = vmatmul.f32.vlgmr.msrb.gmra.mxu2 %v5139_v39  ;;  %v4347_v14 = vld [vmem:[#allocation2 + $0x1b4] sm:$0xf0]  ;;  %v890_v23 = vld [vmem:[#allocation5 + $0x248] sm:$0xff] }
 0x1c2   : > { %1642 = vmatpush.bf16.msrb.mxu0 %v3625_v54  ;;  %1700 = vmatpush.bf16.msrb.mxu2 %v3629_v12  ;;  %v3721_v40 = vor.u32 %v4347_v14, %v3720_v38  ;;  %v4303_v54 = vld [vmem:[#allocation2 + $0x54] sm:$0xf0]  ;;  %v3546_v12 = vld [vmem:[#allocation2 + $0x58] sm:$0xf0]  ;;  %v910_v38 = vld [vmem:[#allocation5 + $0x2e8] sm:$0xff] }
 0x1c3   : > { %1015 = vmatpush.msra.mxu3 %v874_v41  ;;  %v816_v45 = vmax.f32 %v814_v52, %v815_v42  ;;  %v826_v52 = vld [vmem:[#allocation5 + $0x48] sm:$0xff]  ;;  %v4307_v42 = vld [vmem:[#allocation2 + $0x74] sm:$0xf0]  ;;  %v3549_v62 = vor.u32 %v4301_v55, %v3546_v12 }
 0x1c4   : > { %v3560_v41 = vld [vmem:[#allocation2 + $0x68] sm:$0xf]  ;;  %v900_v55 = vld [vmem:[#allocation5 + $0x298] sm:$0xff] }
 0x1c5   : > { %1016 = vmatpush.msra.mxu3 %v870_v44  ;;  %v5147_v46 = vsel %vm967_vm4, %v816_v45, %v970_v3  ;;  %v4305_v44 = vld [vmem:[#allocation2 + $0x6c] sm:$0xf]  ;;  %v3561_v45 = vor.u32 %v4307_v42, %v3560_v41  ;;  %v3704_v3 = vld [vmem:[#allocation2 + $0x188] sm:$0xf]  ;;  %v892_v12 = vld [vmem:[#allocation5 + $0x258] sm:$0xff] }
 0x1c6   : > { %1090 = vmatmul.f32.vlgmr.msrb.gmra.mxu1 %v5147_v46  ;;  %1643 = vmatpush.bf16.msrb.mxu0 %v3609_v2  ;;  %v938_v2 = vld [vmem:[#allocation5 + $0x3c8] sm:$0xff] }
 0x1c7   : > { %1017 = vmatpush.msra.mxu3 %v866_v24  ;;  %1701 = vmatpush.bf16.msrb.mxu2 %v3613_v27  ;;  %v3565_v24 = vor.u32 %v4305_v44, %v3562_v43  ;;  %v3529_v27 = vor.u32 %v4299_v4, %v3528_v22  ;;  %v906_v14 = vld [vmem:[#allocation5 + $0x2c8] sm:$0xff]  ;;  %v944_v44 = vld [vmem:[#allocation5 + $0x3f8] sm:$0xff]  ;;  %v4344_v4 = vld [vmem:[#allocation2 + $0x1a4] sm:$0xf] }
 0x1c8   : > { %1010 = vmatmul.f32.vlgmr.msrb.gmra.mxu3 %v5147_v46  ;;  %1534 = vmatmul.bf16.vlgmr.msra.gmra.mxu0 %v5151_v47  ;;  %v894_v41 = vld [vmem:[#allocation5 + $0x268] sm:$0xff]  ;;  %v936_v43 = vld [vmem:[#allocation5 + $0x3b8] sm:$0xff] }
 0x1c9   : > { %1018 = vmatpush.msra.mxu3 %v862_v48  ;;  %1592 = vmatmul.bf16.vlgmr.msra.gmra.mxu2 %v5151_v47  ;;  %v4343_v48 = vld [vmem:[#allocation2 + $0x194] sm:$0xf0]  ;;  %v886_v33 = vld [vmem:[#allocation5 + $0x228] sm:$0xff] }
 0x1ca   : > { %1671 = vmatpush.bf16.msrb.mxu1 %v3753_v10  ;;  %1644 = vmatpush.bf16.msrb.mxu0 %v3593_v13  ;;  %v3705_v51 = vor.u32 %v4343_v48, %v3704_v3  ;;  %v3672_v10 = vld [vmem:[#allocation2 + $0x148] sm:$0xf]  ;;  %v4295_v13 = vld [vmem:[#allocation2 + $0x14] sm:$0xf0] }
 0x1cb   : > { %1019 = vmatpush.msra.mxu3 %v858_v49  ;;  %1702 = vmatpush.bf16.msrb.mxu2 %v3597_v61  ;;  %v818_v49 = vld [vmem:[#allocation5 + $0x8] sm:$0xff]  ;;  %v3673_v11 = vor.u32 %v4335_v21, %v3672_v10  ;;  %v924_v3 = vld [vmem:[#allocation5 + $0x358] sm:$0xff]  ;;  %v3682_v10 = vld [vmem:[#allocation2 + $0x170] sm:$0xf0] }
 0x1cc   : > { %v882_v42 = vld [vmem:[#allocation5 + $0x208] sm:$0xff]  ;;  %v920_v48 = vld [vmem:[#allocation5 + $0x338] sm:$0xff] }
 0x1cd   : > { %1020 = vmatpush.msra.mxu3 %v854_v56  ;;  %v3545_v56 = vor.u32 %v4303_v54, %v3544_v29  ;;  %v908_v29 = vld [vmem:[#allocation5 + $0x2d8] sm:$0xff] }
 0x1ce   : > { %1563 = vmatmul.bf16.vlgmr.msra.gmra.mxu1 %v5159_v59  ;;  %1645 = vmatpush.bf16.msrb.mxu0 %v3577_v32  ;;  %v918_v32 = vld [vmem:[#allocation5 + $0x328] sm:$0xff]  ;;  %v904_v54 = vld [vmem:[#allocation5 + $0x2b8] sm:$0xff] }
 0x1cf   : > { %1021 = vmatpush.msra.mxu3 %v850_v19  ;;  %1672 = vmatpush.bf16.msrb.mxu1 %v3737_v60  ;;  %v942_v19 = vld [vmem:[#allocation5 + $0x3e8] sm:$0xff] }
 0x1d0   : > { %1703 = vmatpush.bf16.msrb.mxu2 %v3581_v37  ;;  %v3656_v60 = vld [vmem:[#allocation2 + $0x128] sm:$0xf]  ;;  %v3641_v37 = vor.u32 %v4327_v5, %v3640_v58  ;;  %v4345_v58 = vld [vmem:[#allocation2 + $0x1ac] sm:$0xf]  ;;  %v3722_v5 = vld [vmem:[#allocation2 + $0x1b8] sm:$0xf0] }
 0x1d1   : > { %1022 = vmatpush.msra.mxu3 %v846_v6  ;;  %v934_v6 = vld [vmem:[#allocation5 + $0x3a8] sm:$0xff]  ;;  %v3657_v31 = vor.u32 %v4331_v20, %v3656_v60 }
 0x1d2   : > { %1646 = vmatpush.bf16.msrb.mxu0 %v3561_v45  ;;  %v940_v45 = vld [vmem:[#allocation5 + $0x3d8] sm:$0xff]  ;;  %v4349_v20 = vld [vmem:[#allocation2 + $0x1cc] sm:$0xf] }
 0x1d3   : > { %1023 = vmatpush.msra.mxu3 %v842_v8  ;;  %1673 = vmatpush.bf16.msrb.mxu1 %v3721_v40  ;;  %v3533_v8 = vor.u32 %v4297_v34, %v3530_v7  ;;  %v898_v40 = vld [vmem:[#allocation5 + $0x288] sm:$0xff]  ;;  %v3698_v34 = vld [vmem:[#allocation2 + $0x190] sm:$0xf0] }
 0x1d4   : > { %1704 = vmatpush.bf16.msrb.mxu2 %v3565_v24  ;;  %v928_v24 = vld [vmem:[#allocation5 + $0x378] sm:$0xff] }
 0x1d5   : > { %1024 = vmatpush.msra.mxu3 %v838_v16  ;;  %v926_v16 = vld [vmem:[#allocation5 + $0x368] sm:$0xff] }
 0x1d6   : > { %1647 = vmatpush.bf16.msrb.mxu0 %v3545_v56  ;;  %v896_v56 = vld [vmem:[#allocation5 + $0x278] sm:$0xff] }
 0x1d7   : > { %1025 = vmatpush.msra.mxu3 %v834_v18  ;;  %1674 = vmatpush.bf16.msrb.mxu1 %v3705_v51  ;;  %v3517_v18 = vor.u32 %v4293_v17, %v3514_v9  ;;  %v912_v51 = vld [vmem:[#allocation5 + $0x2f8] sm:$0xff]  ;;  %v3634_v17 = vld [vmem:[#allocation2 + $0x110] sm:$0xf0]  ;;  %v4353_v9 = vld [vmem:[#allocation2 + $0x1ec] sm:$0xf] }
 0x1d8   : > { %1539 = vmatmul.bf16.gmra.mxu0 %v5164_v36  ;;  %1705 = vmatpush.bf16.msrb.mxu2 %v3549_v62  ;;  %v3746_v62 = vld [vmem:[#allocation2 + $0x1f0] sm:$0xf0] }
 0x1d9   : > { %1026 = vmatpush.msra.mxu3 %v830_v50  ;;  %1597 = vmatmul.bf16.gmra.mxu2 %v5164_v36  ;;  %v914_v50 = vld [vmem:[#allocation5 + $0x308] sm:$0xff] }
 0x1da   : > { %1648 = vmatpush.bf16.msrb.mxu0 %v3529_v27  ;;  %v4340_v27 = vld [vmem:[#allocation2 + $0x184] sm:$0xf] }
 0x1db   : > { %1027 = vmatpush.msra.mxu3 %v826_v52  ;;  %1675 = vmatpush.bf16.msrb.mxu1 %v3689_v0  ;;  %v902_v52 = vld [vmem:[#allocation5 + $0x2a8] sm:$0xff]  ;;  %v3730_v0 = vld [vmem:[#allocation2 + $0x1d0] sm:$0xf0]  ;;  %v3701_v7 = vor.u32 %v4340_v27, %v3698_v34 }
 0x1dc   : > { %1706 = vmatpush.bf16.msrb.mxu2 %v3533_v8  ;;  %v4336_v8 = vld [vmem:[#allocation2 + $0x164] sm:$0xf] }
 0x1dd   : > { %1028 = vmatpush.msra.mxu3 %v822_v57  ;;  %v932_v57 = vld [vmem:[#allocation5 + $0x398] sm:$0xff]  ;;  %v3685_v21 = vor.u32 %v4336_v8, %v3682_v10  ;;  %v4382_v8 = vld [vmem:[#allocation7 + $0xcc] sm:$0xf0]  ;;  %v4112_v10 = vld [vmem:[#allocation7 + $0x2c0] sm:$0xf] }
 0x1de   : > { %1568 = vmatmul.bf16.gmra.mxu1 %v5170_v53 }
 0x1df   : > { %1029 = vmatpush.msra.mxu3 %v818_v49  ;;  %1676 = vmatpush.bf16.msrb.mxu1 %v3673_v11  ;;  %v916_v49 = vld [vmem:[#allocation5 + $0x318] sm:$0xff] }
 0x1e0   : > { %1030 = vmatmul.f32.vlgmr.msra.gmra.mxu3 %v5139_v39  ;;  %v3512_v39 = vld [vmem:[#allocation2 + $0x8] sm:$0xf]  ;;  %1707 = vmatpush.bf16.msrb.mxu2 %v3517_v18  ;;  %v3754_v18 = vld [vmem:[#allocation2 + $0x1f8] sm:$0xf0] }
 0x1e1   : > { %1034 = vmatpush.msrb.mxu3 %v942_v19  ;;  %v3513_v61 = vor.u32 %v4295_v13, %v3512_v39  ;;  %v4352_v19 = vld [vmem:[#allocation2 + $0x1e4] sm:$0xf]  ;;  %v3650_v13 = vld [vmem:[#allocation2 + $0x130] sm:$0xf0]  ;;  %v3757_v60 = vor.u32 %v4353_v9, %v3754_v18 }
 0x1e2   : > { %v3749_v1 = vor.u32 %v4352_v19, %v3746_v62  ;;  %v4328_v39 = vld [vmem:[#allocation2 + $0x124] sm:$0xf] }
 0x1e3   : > { %1035 = vmatpush.msrb.mxu3 %v938_v2  ;;  %1649 = vmatpush.bf16.msrb.mxu0 %v3513_v61  ;;  %v4348_v2 = vld [vmem:[#allocation2 + $0x1c4] sm:$0xf] }
 0x1e4   : > { %1677 = vmatpush.bf16.msrb.mxu1 %v3657_v31  ;;  %v3733_v22 = vor.u32 %v4348_v2, %v3730_v0  ;;  %v4324_v61 = vld [vmem:[#allocation2 + $0x104] sm:$0xf]  ;;  %v3872_v0 = vld [vmem:[#allocation7 + $0xe0] sm:$0xf] }
 0x1e5   : > { %1036 = vmatpush.msrb.mxu3 %v934_v6  ;;  %v3714_v6 = vld [vmem:[#allocation2 + $0x1b0] sm:$0xf0] }
 0x1e7   : > { %1037 = vmatpush.msrb.mxu3 %v930_v26  ;;  %v3666_v26 = vld [vmem:[#allocation2 + $0x150] sm:$0xf0] }
 0x1e8   : > { %1544 = vmatmul.bf16.gmra.mxu0 %v5176_v15  ;;  %1678 = vmatpush.bf16.msrb.mxu1 %v3641_v37 }
 0x1e9   : > { %1038 = vmatpush.msrb.mxu3 %v926_v16  ;;  %1602 = vmatmul.bf16.gmra.mxu2 %v5176_v15  ;;  %v3653_v16 = vor.u32 %v4328_v39, %v3650_v13  ;;  %v4096_v13 = vld [vmem:[#allocation7 + $0x2a0] sm:$0xf] }
 0x1eb   : > { %1039 = vmatpush.msrb.mxu3 %v922_v28  ;;  %v3738_v28 = vld [vmem:[#allocation2 + $0x1d8] sm:$0xf0] }
 0x1ed   : > { %1040 = vmatpush.msrb.mxu3 %v918_v32  ;;  %v3741_v32 = vor.u32 %v4349_v20, %v3738_v28  ;;  %v4374_v20 = vld [vmem:[#allocation7 + $0x8c] sm:$0xf0]  ;;  %v4080_v28 = vld [vmem:[#allocation7 + $0x280] sm:$0xf] }
 0x1ee   : > { %1573 = vmatmul.bf16.gmra.mxu1 %v5182_v35 }
 0x1ef   : > { %1041 = vmatpush.msrb.mxu3 %v914_v50  ;;  %v3725_v50 = vor.u32 %v4345_v58, %v3722_v5  ;;  %v4438_v58 = vld [vmem:[#allocation7 + $0x28c] sm:$0xf0] }
 0x1f0   : > { %v4081_v5 = vor.u32 %v4438_v58, %v4080_v28 }
 0x1f1   : > { %1042 = vmatpush.msrb.mxu3 %v910_v38  ;;  %v3706_v38 = vld [vmem:[#allocation2 + $0x198] sm:$0xf0] }
 0x1f3   : > { %1043 = vmatpush.msrb.mxu3 %v906_v14 }
 0x1f5   : > { %1044 = vmatpush.msrb.mxu3 %v902_v52 }
 0x1f7   : > { %1045 = vmatpush.msrb.mxu3 %v898_v40  ;;  %v4337_v40 = vld [vmem:[#allocation2 + $0x16c] sm:$0xf] }
 0x1f8   : > { %1549 = vmatmul.bf16.gmra.mxu0 %v5131_v30 }
 0x1f9   : > { %1046 = vmatpush.msrb.mxu3 %v894_v41  ;;  %1607 = vmatmul.bf16.gmra.mxu2 %v5131_v30  ;;  %v3690_v41 = vld [vmem:[#allocation2 + $0x178] sm:$0xf0] }
 0x1fb   : > { %1047 = vmatpush.msrb.mxu3 %v890_v23  ;;  %v3693_v23 = vor.u32 %v4337_v40, %v3690_v41  ;;  %v4434_v40 = vld [vmem:[#allocation7 + $0x26c] sm:$0xf0] }
 0x1fd   : > { %1048 = vmatpush.msrb.mxu3 %v886_v33 }
 0x1fe   : > { %1578 = vmatmul.bf16.gmra.mxu1 %v5134_v25 }
 0x1ff   : > { %1049 = vmatpush.msrb.mxu3 %v882_v42  ;;  %v4333_v42 = vld [vmem:[#allocation2 + $0x14c] sm:$0xf] }
 0x200   : > { %1050 = vmatmul.f32.vlgmr.msrb.gmra.mxu3 %v5147_v46 }
 0x201   : > { %1114 = vmatpush.msra.mxu3 %v944_v44  ;;  %v3674_v44 = vld [vmem:[#allocation2 + $0x158] sm:$0xf0] }
 0x203   : > { %1115 = vmatpush.msra.mxu3 %v940_v45 }
 0x205   : > { %1116 = vmatpush.msra.mxu3 %v936_v43 }
 0x207   : > { %1117 = vmatpush.msra.mxu3 %v932_v57  ;;  %v3677_v57 = vor.u32 %v4333_v42, %v3674_v44  ;;  %v3792_v42 = vld [vmem:[#allocation7 + $0x40] sm:$0xf]  ;;  %v4366_v44 = vld [vmem:[#allocation7 + $0x4c] sm:$0xf0] }
 0x208   : > { %1650 = vmatmul.bf16.vlgmr.msrb.gmra.mxu0 %v5151_v47 }
 0x209   : > { %1118 = vmatpush.msra.mxu3 %v928_v24  ;;  %1708 = vmatmul.bf16.vlgmr.msrb.gmra.mxu2 %v5151_v47  ;;  %v888_v47 = vld [vmem:[#allocation5 + $0x238] sm:$0xff]  ;;  %v4329_v24 = vld [vmem:[#allocation2 + $0x12c] sm:$0xf] }
 0x20b   : > { %1119 = vmatpush.msra.mxu3 %v924_v3  ;;  %v3658_v3 = vld [vmem:[#allocation2 + $0x138] sm:$0xf0] }
 0x20d   : > { %1120 = vmatpush.msra.mxu3 %v920_v48  ;;  %v3661_v48 = vor.u32 %v4329_v24, %v3658_v3  ;;  %v4430_v24 = vld [vmem:[#allocation7 + $0x24c] sm:$0xf0] }
 0x20e   : > { %1679 = vmatmul.bf16.vlgmr.msrb.gmra.mxu1 %v5159_v59 }
 0x20f   : > { %1121 = vmatpush.msra.mxu3 %v916_v49 }
 0x211   : > { %1122 = vmatpush.msra.mxu3 %v912_v51  ;;  %v4325_v51 = vld [vmem:[#allocation2 + $0x10c] sm:$0xf] }
 0x213   : > { %1123 = vmatpush.msra.mxu3 %v908_v29  ;;  %v3642_v29 = vld [vmem:[#allocation2 + $0x118] sm:$0xf0] }
 0x215   : > { %1124 = vmatpush.msra.mxu3 %v904_v54 }
 0x217   : > { %1125 = vmatpush.msra.mxu3 %v900_v55  ;;  %v3645_v55 = vor.u32 %v4325_v51, %v3642_v29  ;;  %v4362_v51 = vld [vmem:[#allocation7 + $0x2c] sm:$0xf0]  ;;  %v4032_v29 = vld [vmem:[#allocation7 + $0x220] sm:$0xf] }
 0x218   : > { %1655 = vmatmul.bf16.gmra.mxu0 %v5164_v36 }
 0x219   : > { %1126 = vmatpush.msra.mxu3 %v896_v56  ;;  %1713 = vmatmul.bf16.gmra.mxu2 %v5164_v36  ;;  %v3717_v36 = vor.u32 %v4344_v4, %v3714_v6  ;;  %v4128_v4 = vld [vmem:[#allocation7 + $0x2e0] sm:$0xf] }
 0x21b   : > { %1127 = vmatpush.msra.mxu3 %v892_v12 }
 0x21d   : > { %1128 = vmatpush.msra.mxu3 %v888_v47 }
 0x21e   : > { %1684 = vmatmul.bf16.gmra.mxu1 %v5170_v53 }
 0x21f   : > { %1129 = vmatpush.msra.mxu3 %v884_v63 }
 0x220   : > { %1130 = vmatmul.f32.vlgmr.msra.gmra.mxu3 %v5147_v46  ;;  %v4332_v46 = vld [vmem:[#allocation2 + $0x144] sm:$0xf] }
 0x221   : > { %1613 = vmatpush.bf16.msrb.mxu3 %v3749_v1  ;;  %v3669_v11 = vor.u32 %v4332_v46, %v3666_v26  ;;  %v4446_v46 = vld [vmem:[#allocation7 + $0x2cc] sm:$0xf0]  ;;  %v3840_v26 = vld [vmem:[#allocation7 + $0xa0] sm:$0xf] }
 0x222   : > { %v4113_v39 = vor.u32 %v4446_v46, %v4112_v10  ;;  %v4000_v10 = vld [vmem:[#allocation7 + $0x1e0] sm:$0xf] }
 0x225   : > { %1614 = vmatpush.bf16.msrb.mxu3 %v3733_v22  ;;  %v4386_v22 = vld [vmem:[#allocation7 + $0xec] sm:$0xf0] }
 0x226   : > { %v3873_v6 = vor.u32 %v4386_v22, %v3872_v0  ;;  %v3760_v0 = vld [vmem:[#allocation7] sm:$0xf]  ;;  %v4358_v22 = vld [vmem:[#allocation7 + $0xc] sm:$0xf0] }
 0x228   : > { %1660 = vmatmul.bf16.gmra.mxu0 %v5176_v15 }
 0x229   : > { %1615 = vmatpush.bf16.msrb.mxu3 %v3717_v36  ;;  %1718 = vmatmul.bf16.gmra.mxu2 %v5176_v15  ;;  %v3637_v15 = vor.u32 %v4324_v61, %v3634_v17  ;;  %v4450_v36 = vld [vmem:[#allocation7 + $0x2ec] sm:$0xf0] }
 0x22a   : > { %v4129_v27 = vor.u32 %v4450_v36, %v4128_v4  ;;  %2677 = vmatpush.bf16.msra.mxu0 %v3873_v6  ;;  %v4016_v4 = vld [vmem:[#allocation7 + $0x200] sm:$0xf] }
 0x22c   : > { %2735 = vmatpush.bf16.msra.mxu2 %v4129_v27  ;;  %v3761_v27 = vor.u32 %v4358_v22, %v3760_v0  ;;  %v3920_v22 = vld [vmem:[#allocation7 + $0x140] sm:$0xf] }
 0x22d   : > { %1616 = vmatpush.bf16.msrb.mxu3 %v3701_v7  ;;  %v3856_v7 = vld [vmem:[#allocation7 + $0xc0] sm:$0xf] }
 0x22e   : > { %1689 = vmatmul.bf16.gmra.mxu1 %v5182_v35 }
 0x230   : > { %2736 = vmatpush.bf16.msra.mxu2 %v4113_v39  ;;  %v3984_v39 = vld [vmem:[#allocation7 + $0x1c0] sm:$0xf] }
 0x231   : > { %1617 = vmatpush.bf16.msrb.mxu3 %v3685_v21  ;;  %v3857_v21 = vor.u32 %v4382_v8, %v3856_v7  ;;  %v4422_v7 = vld [vmem:[#allocation7 + $0x20c] sm:$0xf0] }
 0x232   : > { %v4017_v8 = vor.u32 %v4422_v7, %v4016_v4  ;;  %v4398_v4 = vld [vmem:[#allocation7 + $0x14c] sm:$0xf0] }
 0x233   : > { %2678 = vmatpush.bf16.msra.mxu0 %v3857_v21  ;;  %v4418_v21 = vld [vmem:[#allocation7 + $0x1ec] sm:$0xf0] }
 0x235   : > { %1618 = vmatpush.bf16.msrb.mxu3 %v3669_v11  ;;  %v4378_v11 = vld [vmem:[#allocation7 + $0xac] sm:$0xf0] }
 0x236   : > { %v3841_v61 = vor.u32 %v4378_v11, %v3840_v26  ;;  %v4001_v26 = vor.u32 %v4418_v21, %v4000_v10 }
 0x238   : > { %1665 = vmatmul.bf16.gmra.mxu0 %v5131_v30  ;;  %2706 = vmatpush.bf16.msra.mxu1 %v4001_v26  ;;  %v3921_v26 = vor.u32 %v4398_v4, %v3920_v22  ;;  %v4482_v22 = vld [vmem:[#allocation7 + $0x3ec] sm:$0xf0] }
 0x239   : > { %1619 = vmatpush.bf16.msrb.mxu3 %v3653_v16  ;;  %1723 = vmatmul.bf16.gmra.mxu2 %v5131_v30  ;;  %v4341_v30 = vld [vmem:[#allocation2 + $0x18c] sm:$0xf]  ;;  %v4442_v16 = vld [vmem:[#allocation7 + $0x2ac] sm:$0xf0] }
 0x23a   : > { %v3709_v52 = vor.u32 %v4341_v30, %v3706_v38  ;;  %v4097_v17 = vor.u32 %v4442_v16, %v4096_v13  ;;  %2679 = vmatpush.bf16.msra.mxu0 %v3841_v61  ;;  %v3808_v30 = vld [vmem:[#allocation7 + $0x60] sm:$0xf]  ;;  %v4370_v38 = vld [vmem:[#allocation7 + $0x6c] sm:$0xf0] }
 0x23b   : > { %v4414_v13 = vld [vmem:[#allocation7 + $0x1cc] sm:$0xf0] }
 0x23c   : > { %2737 = vmatpush.bf16.msra.mxu2 %v4097_v17  ;;  %v3985_v16 = vor.u32 %v4414_v13, %v3984_v39 }
 0x23d   : > { %1620 = vmatpush.bf16.msrb.mxu3 %v3637_v15  ;;  %v5201_v31 = vpop.f32.mrf.mxu0 }
 0x23e   : > { %1694 = vmatmul.bf16.gmra.mxu1 %v5134_v25 }
 0x23f   : > { %2707 = vmatpush.bf16.msra.mxu1 %v3985_v16 }
 0x240   : > { %1621 = vmatmul.bf16.vlgmr.msrb.gmra.mxu3 %v5159_v59  ;;  %2738 = vmatpush.bf16.msra.mxu2 %v4081_v5 }
 0x241   : > { %1729 = vmatpush.bf16.msra.mxu3 %v3757_v60  ;;  %v3824_v60 = vld [vmem:[#allocation7 + $0x80] sm:$0xf] }
 0x243   : > { %v5205_v37 = vpop.f32.mrf.mxu1 }
 0x244   : > { %v1111_v6 = vpop.f32.mrf.mxu2 }
 0x245   : > { %1730 = vmatpush.bf16.msra.mxu3 %v3741_v32  ;;  %v1535_v14 = vpop.f32.mrf.mxu0  ;;  %v3825_v32 = vor.u32 %v4374_v20, %v3824_v60  ;;  %v4410_v60 = vld [vmem:[#allocation7 + $0x1ac] sm:$0xf0] }
 0x247   : > { %2680 = vmatpush.bf16.msra.mxu0 %v3825_v32 }
 0x249   : > { %1731 = vmatpush.bf16.msra.mxu3 %v3725_v50  ;;  %v5231_v50 = vpop.f32.mrf.mxu3 }
 0x24b   : > { %v1564_v33 = vpop.f32.mrf.mxu1 }
 0x24c   : > { %v5207_v45 = vadd.f32 %v1564_v33, %v1535_v14  ;;  %v4064_v14 = vld [vmem:[#allocation7 + $0x260] sm:$0xf]  ;;  %v5242_v61 = vpop.f32.mrf.mxu2 }
 0x24d   : > { %1732 = vmatpush.bf16.msra.mxu3 %v3709_v52  ;;  %v5209_v43 = vpop.f32.mrf.mxu0  ;;  %v3809_v52 = vor.u32 %v4370_v38, %v3808_v30  ;;  %v3952_v30 = vld [vmem:[#allocation7 + $0x180] sm:$0xf]  ;;  %v4406_v38 = vld [vmem:[#allocation7 + $0x18c] sm:$0xf0] }
 0x24f   : > { %2681 = vmatpush.bf16.msra.mxu0 %v3809_v52 }
 0x250   : > { %1626 = vmatmul.bf16.gmra.mxu3 %v5170_v53 }
 0x251   : > { %1733 = vmatpush.bf16.msra.mxu3 %v3693_v23  ;;  %v4065_v23 = vor.u32 %v4434_v40, %v4064_v14  ;;  %v3953_v14 = vor.u32 %v4406_v38, %v3952_v30  ;;  %v4390_v30 = vld [vmem:[#allocation7 + $0x10c] sm:$0xf0] }
 0x253   : > { %v5212_v49 = vpop.f32.mrf.mxu1  ;;  %2739 = vmatpush.bf16.msra.mxu2 %v4065_v23 }
 0x254   : > { %v1567_v10 = vadd.f32 %v5212_v49, %v5209_v43  ;;  %v3904_v43 = vld [vmem:[#allocation7 + $0x120] sm:$0xf]  ;;  %v4394_v49 = vld [vmem:[#allocation7 + $0x12c] sm:$0xf0] }
 0x255   : > { %1734 = vmatpush.bf16.msra.mxu3 %v3677_v57  ;;  %v1540_v54 = vpop.f32.mrf.mxu0  ;;  %v4048_v57 = vld [vmem:[#allocation7 + $0x240] sm:$0xf] }
 0x256   : > { %v4049_v3 = vor.u32 %v4430_v24, %v4048_v57 }
 0x258   : > { %2740 = vmatpush.bf16.msra.mxu2 %v4049_v3 }
 0x259   : > { %1735 = vmatpush.bf16.msra.mxu3 %v3661_v48  ;;  %v3776_v48 = vld [vmem:[#allocation7 + $0x20] sm:$0xf] }
 0x25b   : > { %v1569_v56 = vpop.f32.mrf.mxu1 }
 0x25c   : > { %v5214_v12 = vadd.f32 %v1569_v56, %v1540_v54  ;;  %v1011_v54 = vpop.f32.mrf.mxu3  ;;  %v4426_v56 = vld [vmem:[#allocation7 + $0x22c] sm:$0xf0] }
 0x25d   : > { %1736 = vmatpush.bf16.msra.mxu3 %v3645_v55  ;;  %v5216_v47 = vpop.f32.mrf.mxu0  ;;  %v3777_v55 = vor.u32 %v4362_v51, %v3776_v48 }
 0x260   : > { %1631 = vmatmul.bf16.gmra.mxu3 %v5182_v35 }
 0x263   : > { %v5219_v19 = vpop.f32.mrf.mxu1 }
 0x264   : > { %v1031_v46 = vpop.f32.mrf.mxu3 }
 0x265   : > { %v1545_v62 = vpop.f32.mrf.mxu0 }
 0x26b   : > { %v1574_v63 = vpop.f32.mrf.mxu1 }
 0x26c   : > { %v5221_v1 = vadd.f32 %v1574_v63, %v1545_v62  ;;  %v4033_v63 = vor.u32 %v4426_v56, %v4032_v29 }
 0x26d   : > { %v5224_v2 = vpop.f32.mrf.mxu0 }
 0x26e   : > { %2741 = vmatpush.bf16.msra.mxu2 %v4033_v63 }
 0x270   : > { %1636 = vmatmul.bf16.gmra.mxu3 %v5134_v25 }
 0x272   : > { %2742 = vmatpush.bf16.msra.mxu2 %v4017_v8 }
 0x273   : > { %v5226_v34 = vpop.f32.mrf.mxu1 }
 0x275   : > { %v1550_v9 = vpop.f32.mrf.mxu0 }
 0x27b   : > { %v1579_v18 = vpop.f32.mrf.mxu1 }
 0x27c   : > { %v5228_v15 = vadd.f32 %v1579_v18, %v1550_v9  ;;  %v945_v9 = vld [vmem:[%s5767_s7] sm:$0xf] }
 0x27d   : > { %v5235_v33 = vpop.f32.mrf.mxu0  ;;  %v3968_v18 = vld [vmem:[#allocation7 + $0x1a0] sm:$0xf]  ;;  %v949_v32 = vperm.slane %v945_v9, 2  ;;  %v950_v58 = vperm.slane %v945_v9, 3  ;;  %v947_v40 = vperm.slane %v945_v9, 0 }
 0x27e   : > { %v3969_v28 = vor.u32 %v4410_v60, %v3968_v18 }
 0x27f   : > { %v1072_v52 = vadd.f32 %v5201_v31, %v949_v32  ;;  %v1112_v57 = vadd.f32 %v1111_v6, %v950_v58  ;;  %v992_v48 = vadd.f32 %v5231_v50, %v947_v40  ;;  %v3936_v31 = vld [vmem:[#allocation7 + $0x160] sm:$0xf]  ;;  %v3905_v32 = vor.u32 %v4394_v49, %v3904_v43  ;;  %v4440_v43 = vld [vmem:[#allocation7 + $0x2a4] sm:$0xf] }
 0x280   : > { %1737 = vmatmul.bf16.vlgmr.msra.gmra.mxu3 %v5159_v59  ;;  %v3793_v59 = vor.u32 %v4366_v44, %v3792_v42  ;;  %2708 = vmatpush.bf16.msra.mxu1 %v3969_v28  ;;  %v3888_v58 = vld [vmem:[#allocation7 + $0x100] sm:$0xf] }
 0x281   : > { %v1092_v44 = vadd.f32 %v5205_v37, %v1072_v52  ;;  %v3889_v38 = vor.u32 %v4390_v30, %v3888_v58 }
 0x282   : > { %2682 = vmatpush.bf16.msra.mxu0 %v3793_v59  ;;  %v5252_v59 = vpop.f32.mrf.mxu2 }
 0x283   : > { %v5233_v41 = vpop.f32.mrf.mxu1  ;;  %v1051_v20 = vpop.f32.mrf.mxu3  ;;  %v5257_v63 = vrot.slane %v1092_v44, 6 }
 0x284   : > { %2709 = vmatpush.bf16.msra.mxu1 %v3953_v14 }
 0x285   : > { %v5239_v36 = vpop.f32.mrf.mxu0 }
 0x286   : > { %2683 = vmatpush.bf16.msra.mxu0 %v3777_v55  ;;  %v4402_v55 = vld [vmem:[#allocation7 + $0x16c] sm:$0xf0] }
 0x287   : > { %v3937_v56 = vor.u32 %v4402_v55, %v3936_v31  ;;  %v4448_v55 = vld [vmem:[#allocation7 + $0x2e4] sm:$0xf] }
 0x289   : > { %2710 = vmatpush.bf16.msra.mxu1 %v3937_v56  ;;  %v4130_v56 = vld [vmem:[#allocation7 + $0x2f0] sm:$0xf0] }
 0x28a   : > { %2684 = vmatpush.bf16.msra.mxu0 %v3761_v27  ;;  %v5279_v39 = vpop.f32.mrf.mxu2  ;;  %v4133_v4 = vor.u32 %v4448_v55, %v4130_v56 }
 0x28b   : > { %v5237_v62 = vpop.f32.mrf.mxu1 }
 0x28c   : > { %v1681_v21 = vadd.f32 %v5237_v62, %v5239_v36  ;;  %2851 = vmatpush.bf16.msrb.mxu2 %v4133_v4  ;;  %v1577_v4 = vadd.f32 %v5226_v34, %v5224_v2 }
 0x28d   : > { %v1653_v17 = vpop.f32.mrf.mxu0  ;;  %2711 = vmatpush.bf16.msra.mxu1 %v3921_v26 }
 0x290   : > { %1742 = vmatmul.bf16.gmra.mxu3 %v5170_v53  ;;  %v948_v53 = vperm.slane %v945_v9, 1 }
 0x291   : > { %2712 = vmatpush.bf16.msra.mxu1 %v3905_v32 }
 0x292   : > { %v1032_v5 = vadd.f32 %v1031_v46, %v948_v53 }
 0x293   : > { %v1682_v11 = vpop.f32.mrf.mxu1 }
 0x294   : > { %v1052_v23 = vadd.f32 %v1051_v20, %v1032_v5  ;;  %v1683_v46 = vadd.f32 %v1682_v11, %v1653_v17 }
 0x295   : > { %v1656_v24 = vpop.f32.mrf.mxu0  ;;  %2713 = vmatpush.bf16.msra.mxu1 %v3889_v38  ;;  %v4240_v38 = vld [vmem:[#allocation7 + $0x3c0] sm:$0xf] }
 0x296   : > { %v5255_v51 = vrot.slane %v1052_v23, 7 }
 0x29b   : > { %v5248_v42 = vpop.f32.mrf.mxu1 }
 0x29c   : > { %v1686_v23 = vadd.f32 %v5248_v42, %v1656_v24 }
 0x29d   : > { %v1658_v16 = vpop.f32.mrf.mxu0 }
 0x2a0   : > { %1747 = vmatmul.bf16.gmra.mxu3 %v5182_v35  ;;  %v5259_v35 = vadd.f32 %v1011_v54, %v992_v48  ;;  %v1572_v48 = vadd.f32 %v5219_v19, %v5216_v47  ;;  %v4114_v19 = vld [vmem:[#allocation7 + $0x2d0] sm:$0xf0] }
 0x2a2   : > { %v1766_v37 = vsel %vm1765_vm5, %v5259_v35, %v5255_v51  ;;  %v1770_v13 = vsel %vm963_vm2, %v5259_v35, %v5255_v51 }
 0x2a3   : > { %v1131_v3 = vpop.f32.mrf.mxu3  ;;  %v1687_v27 = vpop.f32.mrf.mxu1 }
 0x2a4   : > { %v1132_v29 = vadd.f32 %v1131_v3, %v1112_v57  ;;  %v4384_v57 = vld [vmem:[#allocation7 + $0xe4] sm:$0xf]  ;;  %v3874_v3 = vld [vmem:[#allocation7 + $0xf0] sm:$0xf0] }
 0x2a5   : > { %v5301_v44 = vpop.f32.mrf.mxu0  ;;  %v3877_v31 = vor.u32 %v4384_v57, %v3874_v3  ;;  %v3826_v3 = vld [vmem:[#allocation7 + $0x90] sm:$0xf0] }
 0x2a6   : > { %v5261_v0 = vrot.slane %v1132_v29, 5  ;;  %v1688_v29 = vadd.f32 %v1687_v27, %v1658_v16 }
 0x2a7   : > { %2793 = vmatpush.bf16.msrb.mxu0 %v3877_v31 }
 0x2a8   : > { %v1767_v50 = vsel %vm965_vm3, %v5257_v63, %v5261_v0  ;;  %v1771_v54 = vsel %vm967_vm4, %v5257_v63, %v5261_v0  ;;  %v1777_v27 = vsel %vm1776_vm8, %v5257_v63, %v5261_v0 }
 0x2a9   : > { %v5268_v6 = vsel %vm1768_vm6, %v1766_v37, %v1767_v50  ;;  %v1773_v53 = vsel %vm1772_vm7, %v1770_v13, %v1771_v54  ;;  %v4256_v50 = vld [vmem:[#allocation7 + $0x3e0] sm:$0xf] }
 0x2aa   : > { %v1787_v7 = vperm.slane %v5268_v6, 0  ;;  %v1789_v8 = vperm.slane %v5268_v6, 2  ;;  %v5285_v17 = vrot.slane %v1773_v53, 1 }
 0x2ab   : > { %v5295_v52 = vpop.f32.mrf.mxu1 }
 0x2ac   : > { %v1819_v9 = vadd.f32 %v1787_v7, %v5207_v45  ;;  %v1823_v18 = vadd.f32 %v1787_v7, %v1567_v10  ;;  %v1821_v60 = vadd.f32 %v1789_v8, %v1681_v21  ;;  %v1825_v20 = vadd.f32 %v1789_v8, %v1683_v46  ;;  %v4380_v8 = vld [vmem:[#allocation7 + $0xc4] sm:$0xf]  ;;  %v3858_v10 = vld [vmem:[#allocation7 + $0xd0] sm:$0xf0] }
 0x2ad   : > { %v1793_v14 = vperm.slane %v5285_v17, 2  ;;  %v1791_v40 = vperm.slane %v5285_v17, 0  ;;  %v4257_v7 = vor.u32 %v4482_v22, %v4256_v50  ;;  %v4444_v21 = vld [vmem:[#allocation7 + $0x2c4] sm:$0xf]  ;;  %v3861_v47 = vor.u32 %v4380_v8, %v3858_v10  ;;  %v4224_v10 = vld [vmem:[#allocation7 + $0x3a0] sm:$0xf] }
 0x2ae   : > { %v1851_v28 = vmax.f32 %v1819_v9, 0.0  ;;  %v1855_v62 = vmax.f32 %v1823_v18, 0.0  ;;  %v1853_v36 = vmax.f32 %v1821_v60, 0.0  ;;  %v1857_v11 = vmax.f32 %v1825_v20, 0.0  ;;  %v4376_v60 = vld [vmem:[#allocation7 + $0xa4] sm:$0xf] }
 0x2af   : > { %v1829_v37 = vadd.f32 %v1793_v14, %v1686_v23  ;;  %v1833_v54 = vadd.f32 %v1793_v14, %v1688_v29  ;;  %v1827_v42 = vadd.f32 %v1791_v40, %v5214_v12  ;;  %v1831_v24 = vadd.f32 %v1791_v40, %v1572_v48  ;;  %2764 = vmatpush.bf16.msrb.mxu3 %v4257_v7  ;;  %v3842_v20 = vld [vmem:[#allocation7 + $0xb0] sm:$0xf0]  ;;  %v4478_v14 = vld [vmem:[#allocation7 + $0x3cc] sm:$0xf0]  ;;  %v4372_v40 = vld [vmem:[#allocation7 + $0x84] sm:$0xf] }
 0x2b0   : > { %1752 = vmatmul.bf16.gmra.mxu3 %v5134_v25  ;;  %v5288_v5 = vpack.c.bf16 %v1855_v62, %v1851_v28  ;;  %v5290_v45 = vpack.c.bf16 %v1857_v11, %v1853_v36  ;;  %v5298_v25 = vpop.f32.mrf.mxu2  ;;  %v4117_v46 = vor.u32 %v4444_v21, %v4114_v19  ;;  %v1775_v12 = vsel %vm965_vm3, %v5259_v35, %v5255_v51  ;;  %v4098_v28 = vld [vmem:[#allocation7 + $0x2b0] sm:$0xf0]  ;;  %v1663_v36 = vpop.f32.mrf.mxu0  ;;  %v4436_v48 = vld [vmem:[#allocation7 + $0x284] sm:$0xf]  ;;  %v4474_v21 = vld [vmem:[#allocation7 + $0x3ac] sm:$0xf0] }
 0x2b1   : > { %v1861_v26 = vmax.f32 %v1829_v37, 0.0  ;;  %v1865_v13 = vmax.f32 %v1833_v54, 0.0  ;;  %v1859_v16 = vmax.f32 %v1827_v42, 0.0  ;;  %v1863_v9 = vmax.f32 %v1831_v24, 0.0  ;;  %2794 = vmatpush.bf16.msrb.mxu0 %v3861_v47  ;;  %v4082_v29 = vld [vmem:[#allocation7 + $0x290] sm:$0xf0] }
 0x2b2   : > { %2685 = vmatmul.bf16.vlgmr.msra.gmra.mxu0 %v5288_v5  ;;  %2743 = vmatmul.bf16.vlgmr.msra.gmra.mxu2 %v5290_v45  ;;  %v1779_v53 = vsel %vm1778_vm9, %v1775_v12, %v1777_v27  ;;  %v3845_v49 = vor.u32 %v4376_v60, %v3842_v20  ;;  %v4101_v11 = vor.u32 %v4440_v43, %v4098_v28  ;;  %v4368_v54 = vld [vmem:[#allocation7 + $0x64] sm:$0xf]  ;;  %v3810_v42 = vld [vmem:[#allocation7 + $0x70] sm:$0xf0] }
 0x2b3   : > { %v1692_v18 = vpop.f32.mrf.mxu1  ;;  %2852 = vmatpush.bf16.msrb.mxu2 %v4117_v46  ;;  %v5314_v32 = vpack.c.bf16 %v1865_v13, %v1861_v26  ;;  %v5316_v58 = vrot.slane %v1779_v53, 2  ;;  %v5318_v30 = vpack.c.bf16 %v1863_v9, %v1859_v16  ;;  %v4241_v57 = vor.u32 %v4478_v14, %v4240_v38  ;;  %v4432_v24 = vld [vmem:[#allocation7 + $0x264] sm:$0xf]  ;;  %v4066_v46 = vld [vmem:[#allocation7 + $0x270] sm:$0xf0] }
 0x2b4   : > { %v3829_v31 = vor.u32 %v4372_v40, %v3826_v3  ;;  %v4085_v55 = vor.u32 %v4436_v48, %v4082_v29  ;;  %v1693_v56 = vadd.f32 %v1692_v18, %v1663_v36  ;;  %v1691_v50 = vadd.f32 %v5295_v52, %v5301_v44  ;;  %v4364_v12 = vld [vmem:[#allocation7 + $0x44] sm:$0xf]  ;;  %v3794_v26 = vld [vmem:[#allocation7 + $0x50] sm:$0xf0] }
 0x2b5   : > { %2795 = vmatpush.bf16.msrb.mxu0 %v3845_v49  ;;  %v1795_v37 = vperm.slane %v5316_v58, 0  ;;  %2765 = vmatpush.bf16.msrb.mxu3 %v4241_v57  ;;  %v1797_v22 = vperm.slane %v5316_v58, 2  ;;  %v3813_v47 = vor.u32 %v4368_v54, %v3810_v42  ;;  %v4225_v27 = vor.u32 %v4474_v21, %v4224_v10  ;;  %v4428_v53 = vld [vmem:[#allocation7 + $0x244] sm:$0xf]  ;;  %v4050_v18 = vld [vmem:[#allocation7 + $0x250] sm:$0xf0] }
 0x2b6   : > { %v1788_v16 = vperm.slane %v5268_v6, 1  ;;  %v4069_v9 = vor.u32 %v4432_v24, %v4066_v46  ;;  %v4053_v49 = vor.u32 %v4428_v53, %v4050_v18  ;;  %v1781_v28 = vsel %vm967_vm4, %v5259_v35, %v5255_v51  ;;  %v4424_v57 = vld [vmem:[#allocation7 + $0x224] sm:$0xf]  ;;  %v4034_v29 = vld [vmem:[#allocation7 + $0x230] sm:$0xf0] }
 0x2b7   : > { %2853 = vmatpush.bf16.msrb.mxu2 %v4101_v11  ;;  %v1841_v19 = vadd.f32 %v1797_v22, %v1693_v56  ;;  %v1835_v52 = vadd.f32 %v1795_v37, %v5221_v1  ;;  %v1839_v44 = vadd.f32 %v1795_v37, %v1577_v4  ;;  %v1837_v34 = vadd.f32 %v1797_v22, %v1691_v50  ;;  %v4208_v50 = vld [vmem:[#allocation7 + $0x380] sm:$0xf]  ;;  %v4470_v22 = vld [vmem:[#allocation7 + $0x38c] sm:$0xf0]  ;;  %v4356_v4 = vld [vmem:[#allocation7 + $0x4] sm:$0xf] }
 0x2b8   : > { %v5312_v62 = vpop.f32.mrf.mxu2  ;;  %v1666_v13 = vpop.f32.mrf.mxu0  ;;  %v1783_v1 = vsel %vm1782_vm10, %v5257_v63, %v5261_v0  ;;  %v4360_v63 = vld [vmem:[#allocation7 + $0x24] sm:$0xf]  ;;  %v3778_v0 = vld [vmem:[#allocation7 + $0x30] sm:$0xf0]  ;;  %v4037_v35 = vor.u32 %v4424_v57, %v4034_v29  ;;  %v4209_v42 = vor.u32 %v4470_v22, %v4208_v50  ;;  %v1582_v46 = vadd.f32 %v5233_v41, %v5235_v33 }
 0x2b9   : > { %2796 = vmatpush.bf16.msrb.mxu0 %v3829_v31  ;;  %2766 = vmatpush.bf16.msrb.mxu3 %v4225_v27  ;;  %v1873_v36 = vmax.f32 %v1841_v19, 0.0  ;;  %v1867_v11 = vmax.f32 %v1835_v52, 0.0  ;;  %v1871_v38 = vmax.f32 %v1839_v44, 0.0  ;;  %v1785_v14 = vsel %vm1784_vm11, %v1781_v28, %v1783_v1  ;;  %v3762_v24 = vld [vmem:[#allocation7 + $0x10] sm:$0xf0] }
 0x2ba   : > { %v1869_v40 = vmax.f32 %v1837_v34, 0.0  ;;  %v4018_v10 = vld [vmem:[#allocation7 + $0x210] sm:$0xf0]  ;;  %v3765_v19 = vor.u32 %v4356_v4, %v3762_v24  ;;  %v4404_v50 = vld [vmem:[#allocation7 + $0x184] sm:$0xf] }
 0x2bb   : > { %2854 = vmatpush.bf16.msrb.mxu2 %v4085_v55  ;;  %v5328_v7 = vpop.f32.mrf.mxu1  ;;  %v5344_v55 = vrot.slane %v1785_v14, 3  ;;  %v5346_v51 = vpack.c.bf16 %v1871_v38, %v1867_v11  ;;  %v3986_v33 = vld [vmem:[#allocation7 + $0x1d0] sm:$0xf0] }
 0x2bc   : > { %v5342_v31 = vpack.c.bf16 %v1873_v36, %v1869_v40 }
 0x2bd   : > { %2797 = vmatpush.bf16.msrb.mxu0 %v3813_v47  ;;  %v1799_v27 = vperm.slane %v5344_v55, 0  ;;  %2767 = vmatpush.bf16.msrb.mxu3 %v4209_v42 }
 0x2bf   : > { %2855 = vmatpush.bf16.msrb.mxu2 %v4069_v9  ;;  %v4466_v9 = vld [vmem:[#allocation7 + $0x36c] sm:$0xf0]  ;;  %v1843_v53 = vadd.f32 %v1799_v27, %v5228_v15  ;;  %v1847_v18 = vadd.f32 %v1799_v27, %v1582_v46  ;;  %v1796_v27 = vperm.slane %v5316_v58, 1 }
 0x2c0   : > { %v5332_v2 = vpop.f32.mrf.mxu2  ;;  %v1668_v47 = vpop.f32.mrf.mxu0 }
 0x2c1   : > { %v1875_v38 = vmax.f32 %v1843_v53, 0.0  ;;  %v1879_v15 = vmax.f32 %v1847_v18, 0.0 }
 0x2c2   : > { %2690 = vmatmul.bf16.gmra.mxu0 %v5318_v30  ;;  %2748 = vmatmul.bf16.gmra.mxu2 %v5314_v32 }
 0x2c3   : > { %v1622_v23 = vpop.f32.mrf.mxu3  ;;  %2856 = vmatpush.bf16.msrb.mxu2 %v4053_v49  ;;  %v1697_v56 = vpop.f32.mrf.mxu1  ;;  %v1792_v49 = vperm.slane %v5285_v17, 1 }
 0x2c4   : > { %v1623_v8 = vadd.f32 %v1622_v23, %v5242_v61  ;;  %v3797_v61 = vor.u32 %v4364_v12, %v3794_v26  ;;  %v1698_v44 = vadd.f32 %v1697_v56, %v1668_v47  ;;  %v1696_v12 = vadd.f32 %v5328_v7, %v1666_v13  ;;  %v4458_v47 = vld [vmem:[#allocation7 + $0x32c] sm:$0xf0] }
 0x2c5   : > { %v1801_v26 = vperm.slane %v5344_v55, 2 }
 0x2c6   : > { %v1820_v20 = vadd.f32 %v1788_v16, %v1623_v8  ;;  %2798 = vmatpush.bf16.msrb.mxu0 %v3797_v61  ;;  %v4420_v8 = vld [vmem:[#allocation7 + $0x204] sm:$0xf] }
 0x2c7   : > { %2857 = vmatpush.bf16.msrb.mxu2 %v4037_v35  ;;  %v4021_v52 = vor.u32 %v4420_v8, %v4018_v10  ;;  %v1849_v61 = vadd.f32 %v1801_v26, %v1698_v44  ;;  %v1845_v7 = vadd.f32 %v1801_v26, %v1696_v12  ;;  %v4462_v35 = vld [vmem:[#allocation7 + $0x34c] sm:$0xf0]  ;;  %v4160_v10 = vld [vmem:[#allocation7 + $0x320] sm:$0xf]  ;;  %v3938_v44 = vld [vmem:[#allocation7 + $0x170] sm:$0xf0] }
 0x2c8   : > { %v1852_v3 = vmax.f32 %v1820_v20, 0.0  ;;  %v5352_v21 = vpop.f32.mrf.mxu2  ;;  %v4002_v20 = vld [vmem:[#allocation7 + $0x1f0] sm:$0xf0]  ;;  %v4396_v12 = vld [vmem:[#allocation7 + $0x144] sm:$0xf] }
 0x2c9   : > { %v1881_v11 = vmax.f32 %v1849_v61, 0.0  ;;  %v3922_v26 = vld [vmem:[#allocation7 + $0x150] sm:$0xf0] }
 0x2ca   : > { %v3925_v61 = vor.u32 %v4396_v12, %v3922_v26  ;;  %v4476_v26 = vld [vmem:[#allocation7 + $0x3c4] sm:$0xf] }
 0x2cb   : > { %v1624_v60 = vpop.f32.mrf.mxu3  ;;  %2858 = vmatpush.bf16.msrb.mxu2 %v4021_v52  ;;  %v4400_v52 = vld [vmem:[#allocation7 + $0x164] sm:$0xf] }
 0x2cc   : > { %v1625_v43 = vadd.f32 %v1624_v60, %v5252_v59  ;;  %v3781_v59 = vor.u32 %v4360_v63, %v3778_v0  ;;  %v4416_v60 = vld [vmem:[#allocation7 + $0x1e4] sm:$0xf]  ;;  %v3941_v46 = vor.u32 %v4400_v52, %v3938_v44  ;;  %v3848_v44 = vld [vmem:[#allocation7 + $0xa8] sm:$0xf] }
 0x2cd   : > { %v4005_v41 = vor.u32 %v4416_v60, %v4002_v20  ;;  %v3906_v60 = vld [vmem:[#allocation7 + $0x130] sm:$0xf0] }
 0x2ce   : > { %v1824_v23 = vadd.f32 %v1788_v16, %v1625_v43  ;;  %2799 = vmatpush.bf16.msrb.mxu0 %v3781_v59  ;;  %v4192_v16 = vld [vmem:[#allocation7 + $0x360] sm:$0xf]  ;;  %v4412_v43 = vld [vmem:[#allocation7 + $0x1c4] sm:$0xf]  ;;  %v3970_v59 = vld [vmem:[#allocation7 + $0x1b0] sm:$0xf0] }
 0x2cf   : > { %v4193_v1 = vor.u32 %v4466_v9, %v4192_v16  ;;  %2822 = vmatpush.bf16.msrb.mxu1 %v4005_v41  ;;  %v3989_v36 = vor.u32 %v4412_v43, %v3986_v33  ;;  %v4454_v41 = vld [vmem:[#allocation7 + $0x30c] sm:$0xf0] }
 0x2d0   : > { %v1856_v48 = vmax.f32 %v1824_v23, 0.0  ;;  %v5364_v14 = vpop.f32.mrf.mxu2  ;;  %v1877_v23 = vmax.f32 %v1845_v7, 0.0  ;;  %v4388_v7 = vld [vmem:[#allocation7 + $0x104] sm:$0xf] }
 0x2d1   : > { %2768 = vmatpush.bf16.msrb.mxu3 %v4193_v1  ;;  %v4392_v1 = vld [vmem:[#allocation7 + $0x124] sm:$0xf] }
 0x2d2   : > { %v5348_v37 = vpack.c.bf16 %v1856_v48, %v1852_v3  ;;  %2695 = vmatmul.bf16.gmra.mxu0 %v5346_v51  ;;  %2753 = vmatmul.bf16.gmra.mxu2 %v5342_v31  ;;  %v5366_v57 = vpack.c.bf16 %v1881_v11, %v1877_v23  ;;  %v5368_v3 = vpack.c.bf16 %v1879_v15, %v1875_v38  ;;  %v4408_v48 = vld [vmem:[#allocation7 + $0x1a4] sm:$0xf]  ;;  %v1800_v11 = vperm.slane %v5344_v55, 1  ;;  %v4258_v15 = vld [vmem:[#allocation7 + $0x3f0] sm:$0xf0] }
 0x2d3   : > { %v1627_v54 = vpop.f32.mrf.mxu3  ;;  %2800 = vmatpush.bf16.msrb.mxu0 %v3765_v19  ;;  %2823 = vmatpush.bf16.msrb.mxu1 %v3989_v36  ;;  %v3973_v56 = vor.u32 %v4408_v48, %v3970_v59  ;;  %v4161_v19 = vor.u32 %v4458_v47, %v4160_v10  ;;  %v3909_v33 = vor.u32 %v4392_v1, %v3906_v60  ;;  %v4480_v38 = vld [vmem:[#allocation7 + $0x3e4] sm:$0xf]  ;;  %v3880_v23 = vld [vmem:[#allocation7 + $0xe8] sm:$0xf]  ;;  %v4451_v59 = vld [vmem:[#allocation7 + $0x2f4] sm:$0xf0] }
 0x2d4   : > { %2714 = vmatmul.bf16.vlgmr.msra.gmra.mxu1 %v5348_v37  ;;  %v1628_v34 = vadd.f32 %v1627_v54, %v5279_v39  ;;  %v3954_v54 = vld [vmem:[#allocation7 + $0x190] sm:$0xf0]  ;;  %v4088_v1 = vld [vmem:[#allocation7 + $0x288] sm:$0xf] }
 0x2d5   : > { %v3957_v42 = vor.u32 %v4404_v50, %v3954_v54 }
 0x2d6   : > { %v1828_v28 = vadd.f32 %v1792_v49, %v1628_v34 }
 0x2d7   : > { %2824 = vmatpush.bf16.msrb.mxu1 %v3973_v56 }
 0x2d8   : > { %v1860_v63 = vmax.f32 %v1828_v28, 0.0  ;;  %v5375_v24 = vpop.f32.mrf.mxu2  ;;  %v3890_v28 = vld [vmem:[#allocation7 + $0x110] sm:$0xf0] }
 0x2db   : > { %v1629_v13 = vpop.f32.mrf.mxu3  ;;  %2825 = vmatpush.bf16.msrb.mxu1 %v3957_v42 }
 0x2dc   : > { %v1630_v39 = vadd.f32 %v1629_v13, %v5298_v25  ;;  %v4176_v25 = vld [vmem:[#allocation7 + $0x340] sm:$0xf] }
 0x2dd   : > { %v4177_v4 = vor.u32 %v4462_v35, %v4176_v25  ;;  %v3864_v25 = vld [vmem:[#allocation7 + $0xc8] sm:$0xf]  ;;  %v4383_v35 = vld [vmem:[#allocation7 + $0xd4] sm:$0xf0] }
 0x2de   : > { %v1832_v40 = vadd.f32 %v1792_v49, %v1630_v39  ;;  %v4144_v49 = vld [vmem:[#allocation7 + $0x300] sm:$0xf]  ;;  %v3893_v39 = vor.u32 %v4388_v7, %v3890_v28  ;;  %v4226_v28 = vld [vmem:[#allocation7 + $0x3b0] sm:$0xf0] }
 0x2df   : > { %2769 = vmatpush.bf16.msrb.mxu3 %v4177_v4  ;;  %2826 = vmatpush.bf16.msrb.mxu1 %v3941_v46  ;;  %v4447_v4 = vld [vmem:[#allocation7 + $0x2d4] sm:$0xf0]  ;;  %v4104_v46 = vld [vmem:[#allocation7 + $0x2a8] sm:$0xf] }
 0x2e0   : > { %v1864_v0 = vmax.f32 %v1832_v40, 0.0  ;;  %v5380_v20 = vpop.f32.mrf.mxu2  ;;  %v4261_v40 = vor.u32 %v4480_v38, %v4258_v15  ;;  %v4072_v38 = vld [vmem:[#allocation7 + $0x268] sm:$0xf] }
 0x2e2   : > { %v5370_v29 = vpack.c.bf16 %v1864_v0, %v1860_v63  ;;  %2700 = vmatmul.bf16.gmra.mxu0 %v5368_v3  ;;  %2758 = vmatmul.bf16.gmra.mxu2 %v5366_v57  ;;  %v4387_v63 = vld [vmem:[#allocation7 + $0xf4] sm:$0xf0]  ;;  %v4136_v0 = vld [vmem:[#allocation7 + $0x2e8] sm:$0xf] }
 0x2e3   : > { %v1632_v22 = vpop.f32.mrf.mxu3  ;;  %2770 = vmatpush.bf16.msrb.mxu3 %v4161_v19  ;;  %2827 = vmatpush.bf16.msrb.mxu1 %v3925_v61  ;;  %v3881_v48 = vor.u32 %v4387_v63, %v3880_v23  ;;  %v4137_v50 = vor.u32 %v4451_v59, %v4136_v0  ;;  %v3800_v23 = vld [vmem:[#allocation7 + $0x48] sm:$0xf]  ;;  %v4367_v63 = vld [vmem:[#allocation7 + $0x54] sm:$0xf0] }
 0x2e4   : > { %2719 = vmatmul.bf16.gmra.mxu1 %v5370_v29  ;;  %v1633_v8 = vadd.f32 %v1632_v22, %v5312_v62  ;;  %v4120_v22 = vld [vmem:[#allocation7 + $0x2c8] sm:$0xf] }
 0x2e5   : > { %2909 = vmatpush.bf16.msra.mxu0 %v3881_v48  ;;  %2967 = vmatpush.bf16.msra.mxu2 %v4137_v50  ;;  %v4121_v10 = vor.u32 %v4447_v4, %v4120_v22  ;;  %v4056_v59 = vld [vmem:[#allocation7 + $0x248] sm:$0xf] }
 0x2e6   : > { %v1836_v16 = vadd.f32 %v1796_v27, %v1633_v8  ;;  %v3865_v8 = vor.u32 %v4383_v35, %v3864_v25  ;;  %v4431_v25 = vld [vmem:[#allocation7 + $0x254] sm:$0xf0]  ;;  %v3801_v35 = vor.u32 %v4367_v63, %v3800_v23 }
 0x2e7   : > { %2828 = vmatpush.bf16.msrb.mxu1 %v3909_v33 }
 0x2e8   : > { %v1868_v62 = vmax.f32 %v1836_v16, 0.0  ;;  %v5389_v54 = vpop.f32.mrf.mxu2 }
 0x2e9   : > { %2910 = vmatpush.bf16.msra.mxu0 %v3865_v8  ;;  %2968 = vmatpush.bf16.msra.mxu2 %v4121_v10  ;;  %v4468_v8 = vld [vmem:[#allocation7 + $0x384] sm:$0xf]  ;;  %v4210_v10 = vld [vmem:[#allocation7 + $0x390] sm:$0xf0] }
 0x2eb   : > { %v1634_v34 = vpop.f32.mrf.mxu3  ;;  %2829 = vmatpush.bf16.msrb.mxu1 %v3893_v39 }
 0x2ec   : > { %v1635_v9 = vadd.f32 %v1634_v34, %v5332_v2  ;;  %v4145_v2 = vor.u32 %v4454_v41, %v4144_v49  ;;  %v4242_v34 = vld [vmem:[#allocation7 + $0x3d0] sm:$0xf0]  ;;  %v4439_v49 = vld [vmem:[#allocation7 + $0x294] sm:$0xf0] }
 0x2ed   : > { %v4089_v41 = vor.u32 %v4439_v49, %v4088_v1  ;;  %v4194_v1 = vld [vmem:[#allocation7 + $0x370] sm:$0xf0]  ;;  %v4008_v49 = vld [vmem:[#allocation7 + $0x1e8] sm:$0xf] }
 0x2ee   : > { %v1840_v53 = vadd.f32 %v1796_v27, %v1635_v9  ;;  %2771 = vmatpush.bf16.msrb.mxu3 %v4145_v2  ;;  %v4379_v27 = vld [vmem:[#allocation7 + $0xb4] sm:$0xf0]  ;;  %v4472_v2 = vld [vmem:[#allocation7 + $0x3a4] sm:$0xf] }
 0x2ef   : > { %v3849_v16 = vor.u32 %v4379_v27, %v3848_v44  ;;  %v4443_v9 = vld [vmem:[#allocation7 + $0x2b4] sm:$0xf0]  ;;  %v4229_v39 = vor.u32 %v4472_v2, %v4226_v28  ;;  %v4040_v44 = vld [vmem:[#allocation7 + $0x228] sm:$0xf]  ;;  %v1794_v2 = vperm.slane %v5285_v17, 3 }
 0x2f0   : > { %v1872_v18 = vmax.f32 %v1840_v53, 0.0  ;;  %v4105_v53 = vor.u32 %v4443_v9, %v4104_v46  ;;  %v5397_v33 = vpop.f32.mrf.mxu2  ;;  %v4427_v27 = vld [vmem:[#allocation7 + $0x234] sm:$0xf0]  ;;  %v4024_v9 = vld [vmem:[#allocation7 + $0x208] sm:$0xf] }
 0x2f1   : > { %2911 = vmatpush.bf16.msra.mxu0 %v3849_v16  ;;  %v4359_v16 = vld [vmem:[#allocation7 + $0x14] sm:$0xf0]  ;;  %v3976_v17 = vld [vmem:[#allocation7 + $0x1a8] sm:$0xf] }
 0x2f2   : > { %v5382_v43 = vpack.c.bf16 %v1872_v18, %v1868_v62  ;;  %2801 = vmatmul.bf16.vlgmr.msrb.gmra.mxu0 %v5288_v5  ;;  %2859 = vmatmul.bf16.vlgmr.msrb.gmra.mxu2 %v5290_v45  ;;  %v3832_v62 = vld [vmem:[#allocation7 + $0x88] sm:$0xf]  ;;  %v4375_v18 = vld [vmem:[#allocation7 + $0x94] sm:$0xf0] }
 0x2f3   : > { %v1637_v13 = vpop.f32.mrf.mxu3  ;;  %2880 = vmatpush.bf16.msra.mxu3 %v4261_v40  ;;  %v3833_v60 = vor.u32 %v4375_v18, %v3832_v62  ;;  %2969 = vmatpush.bf16.msra.mxu2 %v4105_v53  ;;  %v4435_v40 = vld [vmem:[#allocation7 + $0x274] sm:$0xf0]  ;;  %v4464_v18 = vld [vmem:[#allocation7 + $0x364] sm:$0xf] }
 0x2f4   : > { %2724 = vmatmul.bf16.gmra.mxu1 %v5382_v43  ;;  %v1638_v36 = vadd.f32 %v1637_v13, %v5352_v21  ;;  %v1790_v13 = vperm.slane %v5268_v6, 3  ;;  %v4073_v48 = vor.u32 %v4435_v40, %v4072_v38 }
 0x2f5   : > { %2912 = vmatpush.bf16.msra.mxu0 %v3833_v60  ;;  %v4197_v60 = vor.u32 %v4464_v18, %v4194_v1  ;;  %v3912_v18 = vld [vmem:[#allocation7 + $0x128] sm:$0xf] }
 0x2f6   : > { %v1844_v21 = vadd.f32 %v1800_v11, %v1638_v36  ;;  %v3816_v36 = vld [vmem:[#allocation7 + $0x68] sm:$0xf] }
 0x2f7   : > { %2970 = vmatpush.bf16.msra.mxu2 %v4089_v41  ;;  %v4419_v41 = vld [vmem:[#allocation7 + $0x1f4] sm:$0xf0] }
 0x2f8   : > { %v1876_v19 = vmax.f32 %v1844_v21, 0.0  ;;  %v5402_v22 = vpop.f32.mrf.mxu2  ;;  %v4009_v28 = vor.u32 %v4419_v41, %v4008_v49 }
 0x2fa   : > { %2938 = vmatpush.bf16.msra.mxu1 %v4009_v28  ;;  %v4264_v28 = vld [vmem:[#allocation7 + $0x3e8] sm:$0xf] }
 0x2fb   : > { %v1639_v56 = vpop.f32.mrf.mxu3  ;;  %2971 = vmatpush.bf16.msra.mxu2 %v4073_v48  ;;  %v4178_v48 = vld [vmem:[#allocation7 + $0x350] sm:$0xf0] }
 0x2fc   : > { %v1640_v42 = vadd.f32 %v1639_v56, %v5364_v14  ;;  %v4245_v14 = vor.u32 %v4476_v26, %v4242_v34  ;;  %v4057_v56 = vor.u32 %v4431_v25, %v4056_v59  ;;  %v4041_v26 = vor.u32 %v4427_v27, %v4040_v44  ;;  %v3768_v34 = vld [vmem:[#allocation7 + $0x8] sm:$0xf]  ;;  %v4146_v27 = vld [vmem:[#allocation7 + $0x310] sm:$0xf0] }
 0x2fe   : > { %v1848_v47 = vadd.f32 %v1800_v11, %v1640_v42  ;;  %2881 = vmatpush.bf16.msra.mxu3 %v4245_v14  ;;  %v4371_v11 = vld [vmem:[#allocation7 + $0x74] sm:$0xf0]  ;;  %v3769_v14 = vor.u32 %v4359_v16, %v3768_v34 }
 0x2ff   : > { %v3817_v15 = vor.u32 %v4371_v11, %v3816_v36  ;;  %2972 = vmatpush.bf16.msra.mxu2 %v4057_v56  ;;  %v4399_v34 = vld [vmem:[#allocation7 + $0x154] sm:$0xf0] }
 0x300   : > { %v1880_v52 = vmax.f32 %v1848_v47, 0.0  ;;  %v3784_v47 = vld [vmem:[#allocation7 + $0x28] sm:$0xf] }
 0x301   : > { %2913 = vmatpush.bf16.msra.mxu0 %v3817_v15 }
 0x302   : > { %v5392_v12 = vpack.c.bf16 %v1880_v52, %v1876_v19  ;;  %2806 = vmatmul.bf16.gmra.mxu0 %v5318_v30  ;;  %2864 = vmatmul.bf16.gmra.mxu2 %v5314_v32  ;;  %v4363_v52 = vld [vmem:[#allocation7 + $0x34] sm:$0xf0] }
 0x303   : > { %v1738_v61 = vpop.f32.mrf.mxu3  ;;  %2882 = vmatpush.bf16.msra.mxu3 %v4229_v39  ;;  %v3785_v46 = vor.u32 %v4363_v52, %v3784_v47  ;;  %2973 = vmatpush.bf16.msra.mxu2 %v4041_v26  ;;  %v4415_v39 = vld [vmem:[#allocation7 + $0x1d4] sm:$0xf0]  ;;  %v1798_v52 = vperm.slane %v5316_v58, 3  ;;  %v3928_v26 = vld [vmem:[#allocation7 + $0x148] sm:$0xf] }
 0x304   : > { %2729 = vmatmul.bf16.gmra.mxu1 %v5392_v12  ;;  %v1739_v7 = vadd.f32 %v1738_v61, %v5375_v24  ;;  %v4423_v61 = vld [vmem:[#allocation7 + $0x214] sm:$0xf0] }
 0x305   : > { %2914 = vmatpush.bf16.msra.mxu0 %v3801_v35  ;;  %v4025_v53 = vor.u32 %v4423_v61, %v4024_v9  ;;  %v4403_v47 = vld [vmem:[#allocation7 + $0x174] sm:$0xf0] }
 0x306   : > { %v1822_v24 = vadd.f32 %v1790_v13, %v1739_v7  ;;  %v3992_v7 = vld [vmem:[#allocation7 + $0x1c8] sm:$0xf] }
 0x307   : > { %2974 = vmatpush.bf16.msra.mxu2 %v4025_v53 }
 0x308   : > { %v1854_v4 = vmax.f32 %v1822_v24, 0.0  ;;  %v4411_v24 = vld [vmem:[#allocation7 + $0x1b4] sm:$0xf0] }
 0x309   : > { %2915 = vmatpush.bf16.msra.mxu0 %v3785_v46  ;;  %v3977_v56 = vor.u32 %v4411_v24, %v3976_v17  ;;  %v4381_v24 = vld [vmem:[#allocation7 + $0xcc] sm:$0xf] }
 0x30b   : > { %v1740_v0 = vpop.f32.mrf.mxu3 }
 0x30c   : > { %v1741_v6 = vadd.f32 %v1740_v0, %v5380_v20  ;;  %v4213_v20 = vor.u32 %v4468_v8, %v4210_v10  ;;  %v4460_v0 = vld [vmem:[#allocation7 + $0x344] sm:$0xf]  ;;  %v3944_v10 = vld [vmem:[#allocation7 + $0x168] sm:$0xf] }
 0x30d   : > { %2916 = vmatpush.bf16.msra.mxu0 %v3769_v14  ;;  %v4181_v25 = vor.u32 %v4460_v0, %v4178_v48  ;;  %v3945_v44 = vor.u32 %v4403_v47, %v3944_v10 }
 0x30e   : > { %v1826_v50 = vadd.f32 %v1790_v13, %v1741_v6  ;;  %2883 = vmatpush.bf16.msra.mxu3 %v4213_v20  ;;  %v1721_v13 = vpop.f32.mrf.mxu2  ;;  %v3960_v6 = vld [vmem:[#allocation7 + $0x188] sm:$0xf]  ;;  %v4452_v20 = vld [vmem:[#allocation7 + $0x304] sm:$0xf] }
 0x30f   : > { %v4149_v16 = vor.u32 %v4452_v20, %v4146_v27  ;;  %v3850_v20 = vld [vmem:[#allocation7 + $0xb8] sm:$0xf0] }
 0x310   : > { %v1858_v21 = vmax.f32 %v1826_v50, 0.0  ;;  %v4456_v50 = vld [vmem:[#allocation7 + $0x324] sm:$0xf]  ;;  %v4106_v27 = vld [vmem:[#allocation7 + $0x2b8] sm:$0xf0] }
 0x312   : > { %v5404_v42 = vpack.c.bf16 %v1858_v21, %v1854_v4  ;;  %2811 = vmatmul.bf16.gmra.mxu0 %v5346_v51  ;;  %2869 = vmatmul.bf16.gmra.mxu2 %v5342_v31  ;;  %v4162_v4 = vld [vmem:[#allocation7 + $0x330] sm:$0xf0] }
 0x313   : > { %v1743_v19 = vpop.f32.mrf.mxu3  ;;  %2884 = vmatpush.bf16.msra.mxu3 %v4197_v60  ;;  %v4165_v21 = vor.u32 %v4456_v50, %v4162_v4  ;;  %v4122_v50 = vld [vmem:[#allocation7 + $0x2d8] sm:$0xf0]  ;;  %v4248_v4 = vld [vmem:[#allocation7 + $0x3c8] sm:$0xf] }
 0x314   : > { %2772 = vmatmul.bf16.vlgmr.msrb.gmra.mxu3 %v5404_v42  ;;  %2830 = vmatmul.bf16.vlgmr.msrb.gmra.mxu1 %v5348_v37  ;;  %v1744_v62 = vadd.f32 %v1743_v19, %v5389_v54  ;;  %v3993_v54 = vor.u32 %v4415_v39, %v3992_v7  ;;  %v4483_v39 = vld [vmem:[#allocation7 + $0x3f4] sm:$0xf0] }
 0x316   : > { %v1830_v11 = vadd.f32 %v1794_v2, %v1744_v62  ;;  %2939 = vmatpush.bf16.msra.mxu1 %v3993_v54  ;;  %v1724_v35 = vpop.f32.mrf.mxu2  ;;  %v3929_v62 = vor.u32 %v4399_v34, %v3928_v26  ;;  %v4449_v54 = vld [vmem:[#allocation7 + $0x2ec] sm:$0xf] }
 0x317   : > { %2885 = vmatpush.bf16.msra.mxu3 %v4181_v25 }
 0x318   : > { %v1862_v40 = vmax.f32 %v1830_v11, 0.0  ;;  %v4265_v11 = vor.u32 %v4483_v39, %v4264_v28  ;;  %v3818_v28 = vld [vmem:[#allocation7 + $0x78] sm:$0xf0]  ;;  %v4433_v39 = vld [vmem:[#allocation7 + $0x26c] sm:$0xf] }
 0x31a   : > { %2940 = vmatpush.bf16.msra.mxu1 %v3977_v56 }
 0x31b   : > { %v1745_v36 = vpop.f32.mrf.mxu3  ;;  %2886 = vmatpush.bf16.msra.mxu3 %v4165_v21  ;;  %v4479_v21 = vld [vmem:[#allocation7 + $0x3d4] sm:$0xf0] }
 0x31c   : > { %v1746_v38 = vadd.f32 %v1745_v36, %v5397_v33  ;;  %v4407_v33 = vld [vmem:[#allocation7 + $0x194] sm:$0xf0]  ;;  %v4385_v36 = vld [vmem:[#allocation7 + $0xec] sm:$0xf]  ;;  %v4249_v47 = vor.u32 %v4479_v21, %v4248_v4  ;;  %v3786_v21 = vld [vmem:[#allocation7 + $0x38] sm:$0xf0] }
 0x31d   : > { %v3961_v8 = vor.u32 %v4407_v33, %v3960_v6  ;;  %v3866_v6 = vld [vmem:[#allocation7 + $0xd8] sm:$0xf0]  ;;  %v4445_v33 = vld [vmem:[#allocation7 + $0x2cc] sm:$0xf] }
 0x31e   : > { %v1834_v15 = vadd.f32 %v1794_v2, %v1746_v38  ;;  %v1726_v14 = vpop.f32.mrf.mxu2  ;;  %v4391_v2 = vld [vmem:[#allocation7 + $0x114] sm:$0xf0]  ;;  %v3882_v38 = vld [vmem:[#allocation7 + $0xf8] sm:$0xf0]  ;;  %v3869_v56 = vor.u32 %v4381_v24, %v3866_v6  ;;  %v4125_v10 = vor.u32 %v4445_v33, %v4122_v50  ;;  %v4216_v6 = vld [vmem:[#allocation7 + $0x388] sm:$0xf] }
 0x31f   : > { %2941 = vmatpush.bf16.msra.mxu1 %v3961_v8  ;;  %2887 = vmatpush.bf16.msra.mxu3 %v4149_v16  ;;  %v3885_v0 = vor.u32 %v4385_v36, %v3882_v38  ;;  %v4074_v36 = vld [vmem:[#allocation7 + $0x278] sm:$0xf0]  ;;  %v4471_v33 = vld [vmem:[#allocation7 + $0x394] sm:$0xf0]  ;;  %v4361_v4 = vld [vmem:[#allocation7 + $0x2c] sm:$0xf] }
 0x320   : > { %v1866_v23 = vmax.f32 %v1834_v15, 0.0  ;;  %v4138_v15 = vld [vmem:[#allocation7 + $0x2f8] sm:$0xf0]  ;;  %v4217_v50 = vor.u32 %v4471_v33, %v4216_v6 }
 0x321   : > { %v4141_v48 = vor.u32 %v4449_v54, %v4138_v15  ;;  %3025 = vmatpush.bf16.msrb.mxu0 %v3885_v0  ;;  %v4077_v54 = vor.u32 %v4433_v39, %v4074_v36  ;;  %v5449_v15 = vld [vmem:[%s5769_s9] sm:$0xf]  ;;  %v4365_v0 = vld [vmem:[#allocation7 + $0x4c] sm:$0xf]  ;;  %v4058_v24 = vld [vmem:[#allocation7 + $0x258] sm:$0xf0] }
 0x322   : > { %v5413_v63 = vpack.c.bf16 %v1866_v23, %v1862_v40  ;;  %2816 = vmatmul.bf16.gmra.mxu0 %v5368_v3  ;;  %2874 = vmatmul.bf16.gmra.mxu2 %v5366_v57 }
 0x323   : > { %v1748_v59 = vpop.f32.mrf.mxu3  ;;  %2942 = vmatpush.bf16.msra.mxu1 %v3945_v44  ;;  %2996 = vmatpush.bf16.msrb.mxu3 %v4265_v11 }
 0x324   : > { %2777 = vmatmul.bf16.gmra.mxu3 %v5413_v63  ;;  %2835 = vmatmul.bf16.gmra.mxu1 %v5370_v29  ;;  %v1749_v19 = vadd.f32 %v1748_v59, %v5402_v22  ;;  %v4395_v22 = vld [vmem:[#allocation7 + $0x134] sm:$0xf0]  ;;  %v1802_v59 = vperm.slane %v5344_v55, 3 }
 0x325   : > { %v3913_v41 = vor.u32 %v4395_v22, %v3912_v18  ;;  %3083 = vmatpush.bf16.msrb.mxu2 %v4141_v48  ;;  %3026 = vmatpush.bf16.msrb.mxu0 %v3869_v56  ;;  %v4437_v18 = vld [vmem:[#allocation7 + $0x28c] sm:$0xf]  ;;  %v3802_v48 = vld [vmem:[#allocation7 + $0x58] sm:$0xf0] }
 0x326   : > { %v1838_v9 = vadd.f32 %v1798_v52, %v1749_v19  ;;  %v4377_v19 = vld [vmem:[#allocation7 + $0xac] sm:$0xf] }
 0x327   : > { %2943 = vmatpush.bf16.msra.mxu1 %v3929_v62  ;;  %v3853_v44 = vor.u32 %v4377_v19, %v3850_v20  ;;  %2997 = vmatpush.bf16.msrb.mxu3 %v4249_v47  ;;  %v3834_v62 = vld [vmem:[#allocation7 + $0x98] sm:$0xf0]  ;;  %v3789_v19 = vor.u32 %v4361_v4, %v3786_v21 }
 0x328   : > { %v1870_v1 = vmax.f32 %v1838_v9, 0.0  ;;  %v4042_v47 = vld [vmem:[#allocation7 + $0x238] sm:$0xf0] }
 0x329   : > { %3084 = vmatpush.bf16.msrb.mxu2 %v4125_v10  ;;  %3027 = vmatpush.bf16.msrb.mxu0 %v3853_v44  ;;  %v5454_v10 = vperm.slane %v5449_v15, 0 }
 0x32b   : > { %v1750_v46 = vpop.f32.mrf.mxu3  ;;  %2944 = vmatpush.bf16.msra.mxu1 %v3913_v41  ;;  %v4232_v41 = vld [vmem:[#allocation7 + $0x3a8] sm:$0xf] }
 0x32c   : > { %v1751_v61 = vadd.f32 %v1750_v46, %v1721_v13  ;;  %v3896_v13 = vld [vmem:[#allocation7 + $0x108] sm:$0xf] }
 0x32d   : > { %v3897_v23 = vor.u32 %v4391_v2, %v3896_v13  ;;  %v4369_v13 = vld [vmem:[#allocation7 + $0x6c] sm:$0xf] }
 0x32e   : > { %v1842_v53 = vadd.f32 %v1798_v52, %v1751_v61  ;;  %v3821_v38 = vor.u32 %v4369_v13, %v3818_v28 }
 0x32f   : > { %v5421_v49 = vpop.f32.mrf.mxu0  ;;  %2945 = vmatpush.bf16.msra.mxu1 %v3897_v23 }
 0x330   : > { %v1874_v60 = vmax.f32 %v1842_v53, 0.0  ;;  %v4373_v53 = vld [vmem:[#allocation7 + $0x8c] sm:$0xf] }
 0x332   : > { %v5423_v58 = vpack.c.bf16 %v1874_v60, %v1870_v1  ;;  %2917 = vmatmul.bf16.vlgmr.msra.gmra.mxu0 %v5288_v5  ;;  %2975 = vmatmul.bf16.vlgmr.msra.gmra.mxu2 %v5290_v45  ;;  %v4090_v1 = vld [vmem:[#allocation7 + $0x298] sm:$0xf0] }
 0x333   : > { %v1753_v7 = vpop.f32.mrf.mxu3  ;;  %v4093_v60 = vor.u32 %v4437_v18, %v4090_v1  ;;  %v4467_v18 = vld [vmem:[#allocation7 + $0x374] sm:$0xf0] }
 0x334   : > { %2782 = vmatmul.bf16.gmra.mxu3 %v5423_v58  ;;  %2840 = vmatmul.bf16.gmra.mxu1 %v5382_v43  ;;  %v1754_v17 = vadd.f32 %v1753_v7, %v1724_v35  ;;  %v4441_v35 = vld [vmem:[#allocation7 + $0x2ac] sm:$0xf]  ;;  %v4475_v7 = vld [vmem:[#allocation7 + $0x3b4] sm:$0xf0] }
 0x335   : > { %v5429_v40 = vpop.f32.mrf.mxu2  ;;  %v4109_v46 = vor.u32 %v4441_v35, %v4106_v27  ;;  %v4233_v2 = vor.u32 %v4475_v7, %v4232_v41  ;;  %v4357_v27 = vld [vmem:[#allocation7 + $0xc] sm:$0xf]  ;;  %v4010_v41 = vld [vmem:[#allocation7 + $0x1f8] sm:$0xf0] }
 0x336   : > { %v1846_v52 = vadd.f32 %v1802_v59, %v1754_v17  ;;  %v4429_v17 = vld [vmem:[#allocation7 + $0x24c] sm:$0xf] }
 0x337   : > { %v5432_v25 = vpop.f32.mrf.mxu0  ;;  %3085 = vmatpush.bf16.msrb.mxu2 %v4109_v46  ;;  %2998 = vmatpush.bf16.msrb.mxu3 %v4233_v2  ;;  %v4061_v56 = vor.u32 %v4429_v17, %v4058_v24  ;;  %v3770_v46 = vld [vmem:[#allocation7 + $0x18] sm:$0xf0]  ;;  %v4409_v17 = vld [vmem:[#allocation7 + $0x1ac] sm:$0xf] }
 0x338   : > { %v1878_v16 = vmax.f32 %v1846_v52, 0.0  ;;  %v2687_v52 = vadd.f32 %v5421_v49, %v5454_v10  ;;  %v4200_v49 = vld [vmem:[#allocation7 + $0x368] sm:$0xf]  ;;  %v2689_v2 = vadd.f32 %v5432_v25, %v5454_v10 }
 0x33b   : > { %v1755_v8 = vpop.f32.mrf.mxu3  ;;  %3086 = vmatpush.bf16.msrb.mxu2 %v4093_v60  ;;  %2999 = vmatpush.bf16.msrb.mxu3 %v4217_v50  ;;  %v4201_v60 = vor.u32 %v4467_v18, %v4200_v49  ;;  %v4397_v49 = vld [vmem:[#allocation7 + $0x14c] sm:$0xf]  ;;  %v3930_v18 = vld [vmem:[#allocation7 + $0x158] sm:$0xf0] }
 0x33c   : > { %v1756_v55 = vadd.f32 %v1755_v8, %v1726_v14  ;;  %v3837_v14 = vor.u32 %v4373_v53, %v3834_v62  ;;  %v4425_v8 = vld [vmem:[#allocation7 + $0x22c] sm:$0xf]  ;;  %v4026_v53 = vld [vmem:[#allocation7 + $0x218] sm:$0xf0] }
 0x33d   : > { %v5434_v34 = vpop.f32.mrf.mxu2  ;;  %v4045_v20 = vor.u32 %v4425_v8, %v4042_v47  ;;  %v4405_v8 = vld [vmem:[#allocation7 + $0x18c] sm:$0xf]  ;;  %v3962_v47 = vld [vmem:[#allocation7 + $0x198] sm:$0xf0] }
 0x33e   : > { %v1850_v26 = vadd.f32 %v1802_v59, %v1756_v55  ;;  %3028 = vmatpush.bf16.msrb.mxu0 %v3837_v14  ;;  %v3805_v59 = vor.u32 %v4365_v0, %v3802_v48  ;;  %v4417_v14 = vld [vmem:[#allocation7 + $0x1ec] sm:$0xf]  ;;  %v4463_v48 = vld [vmem:[#allocation7 + $0x354] sm:$0xf0] }
 0x33f   : > { %v5436_v61 = vpop.f32.mrf.mxu0  ;;  %3087 = vmatpush.bf16.msrb.mxu2 %v4077_v54  ;;  %v4013_v13 = vor.u32 %v4417_v14, %v4010_v41  ;;  %3000 = vmatpush.bf16.msrb.mxu3 %v4201_v60  ;;  %v3994_v54 = vld [vmem:[#allocation7 + $0x1d8] sm:$0xf0]  ;;  %v4152_v14 = vld [vmem:[#allocation7 + $0x308] sm:$0xf]  ;;  %v3933_v60 = vor.u32 %v4397_v49, %v3930_v18  ;;  %v4455_v41 = vld [vmem:[#allocation7 + $0x314] sm:$0xf0] }
 0x340   : > { %v1882_v9 = vmax.f32 %v1850_v26, 0.0  ;;  %v4421_v26 = vld [vmem:[#allocation7 + $0x20c] sm:$0xf]  ;;  %v2692_v25 = vadd.f32 %v5436_v61, %v5454_v10 }
 0x341   : > { %v4029_v62 = vor.u32 %v4421_v26, %v4026_v53  ;;  %3054 = vmatpush.bf16.msrb.mxu1 %v4013_v13  ;;  %v3914_v13 = vld [vmem:[#allocation7 + $0x138] sm:$0xf0]  ;;  %v4473_v49 = vld [vmem:[#allocation7 + $0x3ac] sm:$0xf] }
 0x342   : > { %v5438_v22 = vpack.c.bf16 %v1882_v9, %v1878_v16  ;;  %2922 = vmatmul.bf16.gmra.mxu0 %v5318_v30  ;;  %2980 = vmatmul.bf16.gmra.mxu2 %v5314_v32  ;;  %v3773_v9 = vor.u32 %v4357_v27, %v3770_v46  ;;  %v3946_v27 = vld [vmem:[#allocation7 + $0x178] sm:$0xf0]  ;;  %v4469_v18 = vld [vmem:[#allocation7 + $0x38c] sm:$0xf] }
 0x343   : > { %3029 = vmatpush.bf16.msrb.mxu0 %v3821_v38  ;;  %3088 = vmatpush.bf16.msrb.mxu2 %v4061_v56  ;;  %v4413_v38 = vld [vmem:[#allocation7 + $0x1cc] sm:$0xf] }
 0x344   : > { %2787 = vmatmul.bf16.gmra.mxu3 %v5438_v22  ;;  %2845 = vmatmul.bf16.gmra.mxu1 %v5392_v12  ;;  %v3997_v0 = vor.u32 %v4413_v38, %v3994_v54 }
 0x345   : > { %v5444_v11 = vpop.f32.mrf.mxu2 }
 0x346   : > { %3055 = vmatpush.bf16.msrb.mxu1 %v3997_v0 }
 0x347   : > { %v5451_v23 = vpop.f32.mrf.mxu0  ;;  %3030 = vmatpush.bf16.msrb.mxu0 %v3805_v59  ;;  %3089 = vmatpush.bf16.msrb.mxu2 %v4045_v20  ;;  %v3978_v59 = vld [vmem:[#allocation7 + $0x1b8] sm:$0xf0]  ;;  %v4459_v20 = vld [vmem:[#allocation7 + $0x334] sm:$0xf0] }
 0x348   : > { %v3981_v33 = vor.u32 %v4409_v17, %v3978_v59  ;;  %v3898_v17 = vld [vmem:[#allocation7 + $0x118] sm:$0xf0]  ;;  %v4481_v59 = vld [vmem:[#allocation7 + $0x3ec] sm:$0xf] }
 0x34a   : > { %3056 = vmatpush.bf16.msrb.mxu1 %v3981_v33 }
 0x34b   : > { %3031 = vmatpush.bf16.msrb.mxu0 %v3789_v19  ;;  %3090 = vmatpush.bf16.msrb.mxu2 %v4029_v62  ;;  %v4168_v19 = vld [vmem:[#allocation7 + $0x328] sm:$0xf] }
 0x34d   : > { %v5456_v35 = vpop.f32.mrf.mxu2 }
 0x34f   : > { %v5460_v55 = vpop.f32.mrf.mxu0  ;;  %3032 = vmatpush.bf16.msrb.mxu0 %v3773_v9 }
 0x351   : > { %v2715_v44 = vpop.f32.mrf.mxu1 }
 0x352   : > { %v2716_v16 = vadd.f32 %v2715_v44, %v2687_v52  ;;  %2927 = vmatmul.bf16.gmra.mxu0 %v5346_v51  ;;  %2985 = vmatmul.bf16.gmra.mxu2 %v5342_v31  ;;  %v4401_v52 = vld [vmem:[#allocation7 + $0x16c] sm:$0xf]  ;;  %v4169_v44 = vor.u32 %v4459_v20, %v4168_v19 }
 0x353   : > { %v3949_v26 = vor.u32 %v4401_v52, %v3946_v27 }
 0x354   : > { %2888 = vmatmul.bf16.vlgmr.msra.gmra.mxu3 %v5404_v42  ;;  %2946 = vmatmul.bf16.vlgmr.msra.gmra.mxu1 %v5348_v37  ;;  %v5467_v1 = vadd.f32 %v5429_v40, %v2716_v16  ;;  %v4184_v40 = vld [vmem:[#allocation7 + $0x348] sm:$0xf]  ;;  %v2694_v16 = vadd.f32 %v5451_v23, %v5454_v10  ;;  %v2697_v23 = vadd.f32 %v5460_v55, %v5454_v10 }
 0x355   : > { %v5469_v7 = vpop.f32.mrf.mxu2  ;;  %v4185_v24 = vor.u32 %v4463_v48, %v4184_v40  ;;  %v4389_v48 = vld [vmem:[#allocation7 + $0x10c] sm:$0xf] }
 0x357   : > { %v5473_v28 = vpop.f32.mrf.mxu0  ;;  %3001 = vmatpush.bf16.msrb.mxu3 %v4185_v24  ;;  %v4266_v24 = vld [vmem:[#allocation7 + $0x3f8] sm:$0xf0] }
 0x358   : > { %v4269_v33 = vor.u32 %v4481_v59, %v4266_v24 }
 0x359   : > { %v2717_v39 = vpop.f32.mrf.mxu1 }
 0x35a   : > { %v2718_v36 = vadd.f32 %v2717_v39, %v2689_v2  ;;  %v4153_v2 = vor.u32 %v4455_v41, %v4152_v14  ;;  %v4218_v14 = vld [vmem:[#allocation7 + $0x398] sm:$0xf0] }
 0x35b   : > { %3002 = vmatpush.bf16.msrb.mxu3 %v4169_v44 }
 0x35c   : > { %v5476_v6 = vadd.f32 %v5434_v34, %v2718_v36  ;;  %v3965_v34 = vor.u32 %v4405_v8, %v3962_v47  ;;  %v4477_v8 = vld [vmem:[#allocation7 + $0x3cc] sm:$0xf]  ;;  %v4250_v47 = vld [vmem:[#allocation7 + $0x3d8] sm:$0xf0] }
 0x35d   : > { %v5478_v56 = vpop.f32.mrf.mxu2 }
 0x35e   : > { %3057 = vmatpush.bf16.msrb.mxu1 %v3965_v34  ;;  %v4253_v34 = vor.u32 %v4477_v8, %v4250_v47 }
 0x35f   : > { %v5482_v50 = vpop.f32.mrf.mxu0  ;;  %3003 = vmatpush.bf16.msrb.mxu3 %v4153_v2 }
 0x360   : > { %v2702_v20 = vadd.f32 %v5482_v50, %v5454_v10 }
 0x361   : > { %v2720_v4 = vpop.f32.mrf.mxu1 }
 0x362   : > { %v2721_v21 = vadd.f32 %v2720_v4, %v2692_v25  ;;  %2932 = vmatmul.bf16.gmra.mxu0 %v5368_v3  ;;  %2990 = vmatmul.bf16.gmra.mxu2 %v5366_v57 }
 0x363   : > { %3058 = vmatpush.bf16.msrb.mxu1 %v3949_v26  ;;  %3112 = vmatpush.bf16.msra.mxu3 %v4269_v33 }
 0x364   : > { %2893 = vmatmul.bf16.gmra.mxu3 %v5413_v63  ;;  %2951 = vmatmul.bf16.gmra.mxu1 %v5370_v29  ;;  %v5489_v61 = vadd.f32 %v5444_v11, %v2721_v21  ;;  %v4393_v11 = vld [vmem:[#allocation7 + $0x12c] sm:$0xf] }
 0x365   : > { %v2759_v46 = vpop.f32.mrf.mxu2  ;;  %v3917_v36 = vor.u32 %v4393_v11, %v3914_v13 }
 0x367   : > { %v2703_v9 = vpop.f32.mrf.mxu0  ;;  %3059 = vmatpush.bf16.msrb.mxu1 %v3933_v60  ;;  %3113 = vmatpush.bf16.msra.mxu3 %v4253_v34 }
 0x369   : > { %v2722_v53 = vpop.f32.mrf.mxu1 }
 0x36a   : > { %v2723_v62 = vadd.f32 %v2722_v53, %v2694_v16 }
 0x36b   : > { %3060 = vmatpush.bf16.msrb.mxu1 %v3917_v36  ;;  %v4465_v36 = vld [vmem:[#allocation7 + $0x36c] sm:$0xf] }
 0x36c   : > { %v5494_v39 = vadd.f32 %v5456_v35, %v2723_v62  ;;  %v3901_v35 = vor.u32 %v4389_v48, %v3898_v17 }
 0x36d   : > { %v2761_v38 = vpop.f32.mrf.mxu2 }
 0x36f   : > { %v5498_v54 = vpop.f32.mrf.mxu0  ;;  %3061 = vmatpush.bf16.msrb.mxu1 %v3901_v35 }
 0x371   : > { %v2725_v40 = vpop.f32.mrf.mxu1 }
 0x372   : > { %v2726_v0 = vadd.f32 %v2725_v40, %v2697_v23  ;;  %3033 = vmatmul.bf16.vlgmr.msrb.gmra.mxu0 %v5288_v5  ;;  %3091 = vmatmul.bf16.vlgmr.msrb.gmra.mxu2 %v5290_v45  ;;  %v2699_v5 = vadd.f32 %v5473_v28, %v5454_v10  ;;  %v4461_v23 = vld [vmem:[#allocation7 + $0x34c] sm:$0xf] }
 0x374   : > { %2898 = vmatmul.bf16.gmra.mxu3 %v5423_v58  ;;  %2956 = vmatmul.bf16.gmra.mxu1 %v5382_v43  ;;  %v5505_v55 = vadd.f32 %v5469_v7, %v2726_v0 }
 0x375   : > { %v5507_v25 = vpop.f32.mrf.mxu2 }
 0x377   : > { %v5511_v4 = vpop.f32.mrf.mxu0 }
 0x379   : > { %v2727_v45 = vpop.f32.mrf.mxu1 }
 0x37a   : > { %v2728_v21 = vadd.f32 %v2727_v45, %v2699_v5  ;;  %v4457_v5 = vld [vmem:[#allocation7 + $0x32c] sm:$0xf]  ;;  %v4170_v45 = vld [vmem:[#allocation7 + $0x338] sm:$0xf0] }
 0x37b   : > { %v4173_v8 = vor.u32 %v4457_v5, %v4170_v45 }
 0x37c   : > { %v5514_v19 = vadd.f32 %v5478_v56, %v2728_v21  ;;  %v2704_v56 = vadd.f32 %v2703_v9, %v5454_v10  ;;  %v4453_v21 = vld [vmem:[#allocation7 + $0x30c] sm:$0xf] }
 0x37d   : > { %v5516_v7 = vpop.f32.mrf.mxu2 }
 0x37f   : > { %v5520_v27 = vpop.f32.mrf.mxu0 }
 0x381   : > { %v2730_v52 = vpop.f32.mrf.mxu1 }
 0x382   : > { %v2731_v44 = vadd.f32 %v2730_v52, %v2702_v20  ;;  %3038 = vmatmul.bf16.gmra.mxu0 %v5318_v30  ;;  %3096 = vmatmul.bf16.gmra.mxu2 %v5314_v32  ;;  %v4234_v30 = vld [vmem:[#allocation7 + $0x3b8] sm:$0xf0] }
 0x383   : > { %v4237_v32 = vor.u32 %v4473_v49, %v4234_v30 }
 0x384   : > { %2903 = vmatmul.bf16.gmra.mxu3 %v5438_v22  ;;  %2961 = vmatmul.bf16.gmra.mxu1 %v5392_v12  ;;  %v5526_v28 = vadd.f32 %v2759_v46, %v2731_v44  ;;  %v4221_v46 = vor.u32 %v4469_v18, %v4218_v14 }
 0x385   : > { %v5529_v26 = vpop.f32.mrf.mxu2  ;;  %3114 = vmatpush.bf16.msra.mxu3 %v4237_v32 }
 0x387   : > { %v5533_v62 = vpop.f32.mrf.mxu0 }
 0x389   : > { %v2732_v16 = vpop.f32.mrf.mxu1  ;;  %3115 = vmatpush.bf16.msra.mxu3 %v4221_v46 }
 0x38a   : > { %v2733_v50 = vadd.f32 %v2732_v16, %v2704_v56 }
 0x38c   : > { %v5531_v53 = vadd.f32 %v2761_v38, %v2733_v50  ;;  %v4202_v38 = vld [vmem:[#allocation7 + $0x378] sm:$0xf0] }
 0x38d   : > { %v5537_v41 = vpop.f32.mrf.mxu2  ;;  %v4205_v40 = vor.u32 %v4465_v36, %v4202_v38 }
 0x38f   : > { %v5543_v10 = vpop.f32.mrf.mxu0  ;;  %3116 = vmatpush.bf16.msra.mxu3 %v4205_v40 }
 0x391   : > { %v5535_v60 = vpop.f32.mrf.mxu1 }
 0x392   : > { %3043 = vmatmul.bf16.gmra.mxu0 %v5346_v51  ;;  %3101 = vmatmul.bf16.gmra.mxu2 %v5342_v31  ;;  %v4186_v31 = vld [vmem:[#allocation7 + $0x358] sm:$0xf0] }
 0x393   : > { %v4189_v17 = vor.u32 %v4461_v23, %v4186_v31 }
 0x394   : > { %3004 = vmatmul.bf16.vlgmr.msrb.gmra.mxu3 %v5404_v42  ;;  %3062 = vmatmul.bf16.vlgmr.msrb.gmra.mxu1 %v5348_v37 }
 0x395   : > { %v5548_v2 = vpop.f32.mrf.mxu2  ;;  %3117 = vmatpush.bf16.msra.mxu3 %v4189_v17 }
 0x397   : > { %v2773_v9 = vpop.f32.mrf.mxu3  ;;  %v5551_v48 = vpop.f32.mrf.mxu0 }
 0x398   : > { %v2774_v11 = vadd.f32 %v2773_v9, %v5467_v1 }
 0x399   : > { %v5546_v13 = vpop.f32.mrf.mxu1  ;;  %3118 = vmatpush.bf16.msra.mxu3 %v4173_v8 }
 0x39d   : > { %v5561_v1 = vpop.f32.mrf.mxu2 }
 0x39f   : > { %v2775_v51 = vpop.f32.mrf.mxu3  ;;  %v5566_v33 = vpop.f32.mrf.mxu0 }
 0x3a0   : > { %v2776_v0 = vadd.f32 %v2775_v51, %v5476_v6 }
 0x3a1   : > { %v5553_v37 = vpop.f32.mrf.mxu1 }
 0x3a2   : > { %v5555_v35 = vmax.f32 %v2774_v11, %v2776_v0  ;;  %3048 = vmatmul.bf16.gmra.mxu0 %v5368_v3  ;;  %3106 = vmatmul.bf16.gmra.mxu2 %v5366_v57  ;;  %v4154_v57 = vld [vmem:[#allocation7 + $0x318] sm:$0xf0]  ;;  %v5595_v11 = vperm.slane %v5449_v15, 2  ;;  %v5605_v0 = vperm.slane %v5449_v15, 1 }
 0x3a3   : > { %v4157_v20 = vor.u32 %v4453_v21, %v4154_v57 }
 0x3a4   : > { %3009 = vmatmul.bf16.gmra.mxu3 %v5413_v63  ;;  %3067 = vmatmul.bf16.gmra.mxu1 %v5370_v29  ;;  %v2803_v45 = vadd.f32 %v5498_v54, %v5605_v0 }
 0x3a5   : > { %v5569_v34 = vpop.f32.mrf.mxu2  ;;  %3119 = vmatpush.bf16.msra.mxu3 %v4157_v20 }
 0x3a7   : > { %v2778_v6 = vpop.f32.mrf.mxu3 }
 0x3a8   : > { %v2779_v59 = vadd.f32 %v2778_v6, %v5489_v61  ;;  %v5577_v61 = vpop.f32.mrf.mxu0  ;;  %v2805_v6 = vadd.f32 %v5511_v4, %v5605_v0 }
 0x3a9   : > { %v5564_v24 = vpop.f32.mrf.mxu1 }
 0x3aa   : > { %v2834_v21 = vadd.f32 %v5546_v13, %v2805_v6 }
 0x3af   : > { %v2780_v3 = vpop.f32.mrf.mxu3 }
 0x3b0   : > { %v2781_v47 = vadd.f32 %v2780_v3, %v5494_v39  ;;  %v5582_v39 = vpop.f32.mrf.mxu2  ;;  %v2918_v50 = vpop.f32.mrf.mxu0 }
 0x3b1   : > { %v5571_v29 = vpop.f32.mrf.mxu1  ;;  %v2919_v38 = vadd.f32 %v2918_v50, %v5595_v11 }
 0x3b2   : > { %v5573_v52 = vmax.f32 %v2779_v59, %v2781_v47  ;;  %v2863_v47 = vadd.f32 %v5516_v7, %v2834_v21  ;;  %v2808_v7 = vadd.f32 %v5520_v27, %v5605_v0 }
 0x3b4   : > { %3014 = vmatmul.bf16.gmra.mxu3 %v5423_v58  ;;  %3072 = vmatmul.bf16.gmra.mxu1 %v5382_v43 }
 0x3b7   : > { %v2783_v44 = vpop.f32.mrf.mxu3 }
 0x3b8   : > { %v2784_v56 = vadd.f32 %v2783_v44, %v5505_v55  ;;  %v2976_v43 = vpop.f32.mrf.mxu2  ;;  %v2920_v46 = vpop.f32.mrf.mxu0 }
 0x3b9   : > { %v5580_v16 = vpop.f32.mrf.mxu1  ;;  %v2921_v59 = vadd.f32 %v2920_v46, %v5595_v11 }
 0x3bf   : > { %v2785_v49 = vpop.f32.mrf.mxu3 }
 0x3c0   : > { %v2786_v30 = vadd.f32 %v2785_v49, %v5514_v19  ;;  %v2978_v36 = vpop.f32.mrf.mxu2  ;;  %v2923_v31 = vpop.f32.mrf.mxu0 }
 0x3c1   : > { %v5585_v18 = vpop.f32.mrf.mxu1  ;;  %v2924_v4 = vadd.f32 %v2923_v31, %v5595_v11  ;;  %v3142_v31 = vrot.slane %v5555_v35, 4 }
 0x3c2   : > { %v5587_v32 = vmax.f32 %v2784_v56, %v2786_v30 }
 0x3c4   : > { %3019 = vmatmul.bf16.gmra.mxu3 %v5438_v22  ;;  %3077 = vmatmul.bf16.gmra.mxu1 %v5392_v12 }
 0x3c7   : > { %v2788_v14 = vpop.f32.mrf.mxu3 }
 0x3c8   : > { %v2789_v55 = vadd.f32 %v2788_v14, %v5526_v28  ;;  %v2981_v5 = vpop.f32.mrf.mxu2  ;;  %v2925_v57 = vpop.f32.mrf.mxu0 }
 0x3c9   : > { %v5592_v9 = vpop.f32.mrf.mxu1 }
 0x3cf   : > { %v2790_v19 = vpop.f32.mrf.mxu3 }
 0x3d0   : > { %v2791_v23 = vadd.f32 %v2790_v19, %v5531_v53  ;;  %v2983_v54 = vpop.f32.mrf.mxu2  ;;  %v2837_v19 = vadd.f32 %v5553_v37, %v2808_v7 }
 0x3d1   : > { %v2947_v51 = vpop.f32.mrf.mxu1 }
 0x3d2   : > { %v5599_v40 = vmax.f32 %v2789_v55, %v2791_v23  ;;  %v2948_v12 = vadd.f32 %v2947_v51, %v2919_v38  ;;  %v2810_v55 = vadd.f32 %v5533_v62, %v5605_v0 }
 0x3d4   : > { %3120 = vmatmul.bf16.vlgmr.msra.gmra.mxu3 %v5404_v42  ;;  %v5602_v28 = vadd.f32 %v2976_v43, %v2948_v12  ;;  %v2832_v42 = vadd.f32 %v5535_v60, %v2803_v45  ;;  %v2928_v60 = vpop.f32.mrf.mxu0  ;;  %v2839_v38 = vadd.f32 %v5564_v24, %v2810_v55  ;;  %v3143_v45 = vmax.f32 %v5555_v35, %v3142_v31 }
 0x3d5   : > { %v2929_v37 = vadd.f32 %v2928_v60, %v5595_v11  ;;  %v2815_v35 = vadd.f32 %v5551_v48, %v5605_v0 }
 0x3d6   : > { %v2861_v44 = vadd.f32 %v5507_v25, %v2832_v42  ;;  %v2926_v25 = vadd.f32 %v2925_v57, %v5595_v11  ;;  %v2868_v62 = vadd.f32 %v5537_v41, %v2839_v38  ;;  %v3144_v41 = vrot.slane %v3143_v45, 2 }
 0x3d7   : > { %v2889_v17 = vpop.f32.mrf.mxu3  ;;  %v2844_v7 = vadd.f32 %v5580_v16, %v2815_v35 }
 0x3d8   : > { %v2890_v49 = vadd.f32 %v2889_v17, %v2861_v44  ;;  %v2986_v27 = vpop.f32.mrf.mxu2  ;;  %v2866_v17 = vadd.f32 %v5529_v26, %v2837_v19  ;;  %v2813_v44 = vadd.f32 %v5543_v10, %v5605_v0  ;;  %v3145_v60 = vmax.f32 %v3143_v45, %v3144_v41 }
 0x3d9   : > { %v2949_v53 = vpop.f32.mrf.mxu1  ;;  %v3198_v10 = vrot.slane %v5587_v32, 4  ;;  %v2873_v31 = vadd.f32 %v5561_v1, %v2844_v7  ;;  %v3226_v7 = vrot.slane %v5599_v40, 4 }
 0x3da   : > { %v2950_v3 = vadd.f32 %v2949_v53, %v2921_v59  ;;  %v3146_v48 = vrot.slane %v3145_v60, 1 }
 0x3dc   : > { %v5614_v8 = vadd.f32 %v2978_v36, %v2950_v3  ;;  %v2930_v21 = vpop.f32.mrf.mxu0 }
 0x3df   : > { %v2891_v20 = vpop.f32.mrf.mxu3 }
 0x3e0   : > { %v2892_v56 = vadd.f32 %v2891_v20, %v2863_v47 }
 0x3e1   : > { %v2952_v50 = vpop.f32.mrf.mxu1 }
 0x3e2   : > { %v2953_v30 = vadd.f32 %v2952_v50, %v2924_v4  ;;  %v3148_v43 = vmax.f32 %v2890_v49, %v2892_v56  ;;  %v2988_v50 = vpop.f32.mrf.mxu2 }
 0x3e4   : > { %3125 = vmatmul.bf16.gmra.mxu3 %v5413_v63  ;;  %v5620_v13 = vadd.f32 %v2981_v5, %v2953_v30  ;;  %v3149_v46 = vrot.slane %v3148_v43, 4  ;;  %v3170_v63 = vrot.slane %v5573_v52, 4  ;;  %v2931_v30 = vadd.f32 %v2930_v21, %v5595_v11 }
 0x3e6   : > { %v3150_v51 = vmax.f32 %v3148_v43, %v3149_v46  ;;  %v3171_v6 = vmax.f32 %v5573_v52, %v3170_v63 }
 0x3e7   : > { %v2894_v14 = vpop.f32.mrf.mxu3 }
 0x3e8   : > { %v3151_v5 = vrot.slane %v3150_v51, 2  ;;  %v2895_v24 = vadd.f32 %v2894_v14, %v2866_v17  ;;  %v3172_v47 = vrot.slane %v3171_v6, 2 }
 0x3e9   : > { %v2954_v36 = vpop.f32.mrf.mxu1 }
 0x3ea   : > { %v2955_v23 = vadd.f32 %v2954_v36, %v2926_v25  ;;  %v3152_v20 = vmax.f32 %v3150_v51, %v3151_v5  ;;  %v3173_v56 = vmax.f32 %v3171_v6, %v3172_v47  ;;  %v2933_v36 = vpop.f32.mrf.mxu0  ;;  %v2991_v5 = vpop.f32.mrf.mxu2 }
 0x3eb   : > { %v2934_v16 = vadd.f32 %v2933_v36, %v5595_v11 }
 0x3ec   : > { %v5630_v12 = vadd.f32 %v2983_v54, %v2955_v23  ;;  %v3153_v54 = vrot.slane %v3152_v20, 1  ;;  %v3174_v46 = vrot.slane %v3173_v56, 1 }
 0x3ee   : > { %v3154_v19 = vmax.f32 %v3152_v20, %v3153_v54 }
 0x3ef   : > { %v2896_v59 = vpop.f32.mrf.mxu3 }
 0x3f0   : > { %v2897_v53 = vadd.f32 %v2896_v59, %v2868_v62  ;;  %v3269_v62 = vrot.slane %v3154_v19, 4 }
 0x3f1   : > { %v2957_v3 = vpop.f32.mrf.mxu1 }
 0x3f2   : > { %v3176_v42 = vmax.f32 %v2895_v24, %v2897_v53  ;;  %v2958_v57 = vadd.f32 %v2957_v3, %v2929_v37  ;;  %v3147_v53 = vmax.f32 %v3145_v60, %v3146_v48  ;;  %v2935_v47 = vpop.f32.mrf.mxu0 }
 0x3f4   : > { %v3177_v4 = vrot.slane %v3176_v42, 4  ;;  %3130 = vmatmul.bf16.gmra.mxu3 %v5423_v58  ;;  %v5639_v26 = vadd.f32 %v2986_v27, %v2958_v57  ;;  %v2842_v58 = vadd.f32 %v5571_v29, %v2813_v44  ;;  %v3175_v27 = vmax.f32 %v3173_v56, %v3174_v46 }
 0x3f5   : > { %v3199_v29 = vmax.f32 %v5587_v32, %v3198_v10  ;;  %v3277_v1 = vsel %vm468_vm0, %v3147_v53, %v3269_v62  ;;  %v2818_v56 = vadd.f32 %v5566_v33, %v5605_v0  ;;  %v3227_v10 = vmax.f32 %v5599_v40, %v3226_v7 }
 0x3f6   : > { %v3178_v52 = vmax.f32 %v3176_v42, %v3177_v4  ;;  %v2871_v51 = vadd.f32 %v5548_v2, %v2842_v58  ;;  %v2993_v58 = vpop.f32.mrf.mxu2 }
 0x3f7   : > { %v2899_v49 = vpop.f32.mrf.mxu3  ;;  %v3200_v2 = vrot.slane %v3199_v29, 2 }
 0x3f8   : > { %v3179_v43 = vrot.slane %v3178_v52, 2  ;;  %v2900_v59 = vadd.f32 %v2899_v49, %v2871_v51  ;;  %v2936_v49 = vadd.f32 %v2935_v47, %v5595_v11 }
 0x3f9   : > { %v2959_v14 = vpop.f32.mrf.mxu1 }
 0x3fa   : > { %v3180_v55 = vmax.f32 %v3178_v52, %v3179_v43  ;;  %v2960_v25 = vadd.f32 %v2959_v14, %v2931_v30  ;;  %v3201_v52 = vmax.f32 %v3199_v29, %v3200_v2  ;;  %v2847_v30 = vadd.f32 %v5585_v18, %v2818_v56 }
 0x3fc   : > { %v3181_v38 = vrot.slane %v3180_v55, 1  ;;  %v5649_v23 = vadd.f32 %v2988_v50, %v2960_v25  ;;  %v2820_v50 = vadd.f32 %v5577_v61, %v5605_v0  ;;  %v3202_v14 = vrot.slane %v3201_v52, 1 }
 0x3fd   : > { %v2876_v46 = vadd.f32 %v5569_v34, %v2847_v30 }
 0x3fe   : > { %v3182_v63 = vmax.f32 %v3180_v55, %v3181_v38  ;;  %v2849_v54 = vadd.f32 %v5592_v9, %v2820_v50  ;;  %v3203_v11 = vmax.f32 %v3201_v52, %v3202_v14 }
 0x3ff   : > { %v2901_v17 = vpop.f32.mrf.mxu3 }
 0x400   : > { %v3271_v6 = vrot.slane %v3182_v63, 4  ;;  %v2902_v37 = vadd.f32 %v2901_v17, %v2873_v31  ;;  %v2878_v61 = vadd.f32 %v5582_v39, %v2849_v54  ;;  %v3228_v63 = vrot.slane %v3227_v10, 2 }
 0x401   : > { %v2962_v24 = vpop.f32.mrf.mxu1 }
 0x402   : > { %v3279_v45 = vsel %vm468_vm0, %v3175_v27, %v3271_v6  ;;  %v3204_v21 = vmax.f32 %v2900_v59, %v2902_v37  ;;  %v2963_v3 = vadd.f32 %v2962_v24, %v2934_v16  ;;  %v3229_v29 = vmax.f32 %v3227_v10, %v3228_v63 }
 0x403   : > { %v3285_v42 = vrot.slane %v3279_v45, 7 }
 0x404   : > { %v3205_v57 = vrot.slane %v3204_v21, 4  ;;  %3135 = vmatmul.bf16.gmra.mxu3 %v5438_v22  ;;  %v5658_v32 = vadd.f32 %v2991_v5, %v2963_v3  ;;  %v3230_v62 = vrot.slane %v3229_v29, 1 }
 0x405   : > { %v3286_v20 = vsel %vm963_vm2, %v3285_v42, %v3277_v1 }
 0x406   : > { %v3287_v4 = vsel %vm1782_vm10, %v3285_v42, %v3286_v20  ;;  %v3206_v41 = vmax.f32 %v3204_v21, %v3205_v57  ;;  %v3231_v5 = vmax.f32 %v3229_v29, %v3230_v62 }
 0x407   : > { %v2904_v44 = vpop.f32.mrf.mxu3 }
 0x408   : > { %v3207_v35 = vrot.slane %v3206_v41, 2  ;;  %v2905_v36 = vadd.f32 %v2904_v44, %v2876_v46 }
 0x409   : > { %v2964_v22 = vpop.f32.mrf.mxu1 }
 0x40a   : > { %v3208_v43 = vmax.f32 %v3206_v41, %v3207_v35  ;;  %v2965_v60 = vadd.f32 %v2964_v22, %v2936_v49  ;;  %v3034_v41 = vpop.f32.mrf.mxu0  ;;  %v3092_v49 = vpop.f32.mrf.mxu2 }
 0x40c   : > { %v3209_v55 = vrot.slane %v3208_v43, 1  ;;  %v2994_v25 = vadd.f32 %v2993_v58, %v2965_v60  ;;  %v5699_v58 = vperm.slane %v5449_v15, 3 }
 0x40e   : > { %v3210_v33 = vmax.f32 %v3208_v43, %v3209_v55  ;;  %v3035_v55 = vadd.f32 %v3034_v41, %v5699_v58 }
 0x40f   : > { %v2906_v0 = vpop.f32.mrf.mxu3 }
 0x410   : > { %v3273_v18 = vrot.slane %v3210_v33, 4  ;;  %v2907_v9 = vadd.f32 %v2906_v0, %v2878_v61 }
 0x411   : > { %v3063_v56 = vpop.f32.mrf.mxu1 }
 0x412   : > { %v3281_v19 = vsel %vm468_vm0, %v3203_v11, %v3273_v18  ;;  %v3232_v38 = vmax.f32 %v2905_v36, %v2907_v9  ;;  %v3036_v30 = vpop.f32.mrf.mxu0 }
 0x413   : > { %v3288_v48 = vrot.slane %v3281_v19, 6  ;;  %v3037_v7 = vadd.f32 %v3036_v30, %v5699_v58 }
 0x414   : > { %v3233_v51 = vrot.slane %v3232_v38, 4 }
 0x415   : > { %v3289_v31 = vsel %vm965_vm3, %v3288_v48, %v3287_v4 }
 0x416   : > { %v3234_v34 = vmax.f32 %v3232_v38, %v3233_v51  ;;  %v3291_v39 = vsel %vm3290_vm12, %v3288_v48, %v3289_v31 }
 0x417   : > { %v3005_v27 = vpop.f32.mrf.mxu3 }
 0x418   : > { %v3235_v40 = vrot.slane %v3234_v34, 2  ;;  %v3006_v16 = vadd.f32 %v3005_v27, %v5602_v28 }
 0x41a   : > { %v3236_v17 = vmax.f32 %v3234_v34, %v3235_v40  ;;  %v3039_v14 = vpop.f32.mrf.mxu0 }
 0x41b   : > { %v3040_v48 = vadd.f32 %v3039_v14, %v5699_v58 }
 0x41c   : > { %v3237_v6 = vrot.slane %v3236_v17, 1 }
 0x41e   : > { %v3238_v59 = vmax.f32 %v3236_v17, %v3237_v6 }
 0x41f   : > { %v3007_v37 = vpop.f32.mrf.mxu3 }
 0x420   : > { %v3275_v24 = vrot.slane %v3238_v59, 4  ;;  %v3008_v53 = vadd.f32 %v3007_v37, %v5614_v8 }
 0x422   : > { %v3283_v45 = vsel %vm468_vm0, %v3231_v5, %v3275_v24  ;;  %v5682_v21 = vmax.f32 %v3006_v16, %v3008_v53  ;;  %v3041_v61 = vpop.f32.mrf.mxu0 }
 0x423   : > { %v3292_v3 = vrot.slane %v3283_v45, 5  ;;  %v3042_v63 = vadd.f32 %v3041_v61, %v5699_v58 }
 0x424   : > { %v3156_v40 = vrot.slane %v5682_v21, 4 }
 0x425   : > { %v3293_v28 = vsel %vm967_vm4, %v3292_v3, %v3291_v39 }
 0x426   : > { %v3295_v2 = vsel %vm3294_vm13, %v3292_v3, %v3293_v28  ;;  %v3157_v45 = vmax.f32 %v5682_v21, %v3156_v40 }
 0x427   : > { %v3010_v42 = vpop.f32.mrf.mxu3  ;;  %3307 = vst [vmem:[%s5686_s25] sm:$0xff] %v3295_v2 }
 0x428   : > { %v3011_v1 = vadd.f32 %v3010_v42, %v5620_v13  ;;  %v3065_v13 = vpop.f32.mrf.mxu1 }
 0x429   : > { %v3066_v33 = vadd.f32 %v3065_v13, %v3037_v7 }
 0x42a   : > { %v3044_v38 = vpop.f32.mrf.mxu0 }
 0x42b   : > { %v3045_v41 = vadd.f32 %v3044_v38, %v5699_v58 }
 0x42f   : > { %v3012_v8 = vpop.f32.mrf.mxu3 }
 0x430   : > { %v3013_v57 = vadd.f32 %v3012_v8, %v5630_v12  ;;  %v3094_v12 = vpop.f32.mrf.mxu2  ;;  %v3158_v8 = vrot.slane %v3157_v45, 2 }
 0x431   : > { %v3095_v11 = vadd.f32 %v3094_v12, %v3066_v33 }
 0x432   : > { %v3183_v47 = vmax.f32 %v3011_v1, %v3013_v57  ;;  %v3046_v53 = vpop.f32.mrf.mxu0 }
 0x434   : > { %v3184_v27 = vrot.slane %v3183_v47, 4 }
 0x436   : > { %v3185_v6 = vmax.f32 %v3183_v47, %v3184_v27  ;;  %v3047_v47 = vadd.f32 %v3046_v53, %v5699_v58 }
 0x437   : > { %v3015_v20 = vpop.f32.mrf.mxu3 }
 0x438   : > { %v3016_v4 = vadd.f32 %v3015_v20, %v5639_v26  ;;  %v3068_v26 = vpop.f32.mrf.mxu1  ;;  %v3097_v46 = vpop.f32.mrf.mxu2  ;;  %v3186_v28 = vrot.slane %v3185_v6, 2 }
 0x439   : > { %v3069_v34 = vadd.f32 %v3068_v26, %v3040_v48 }
 0x43a   : > { %v3187_v20 = vmax.f32 %v3185_v6, %v3186_v28  ;;  %v3049_v30 = vpop.f32.mrf.mxu0 }
 0x43b   : > { %v3098_v16 = vadd.f32 %v3097_v46, %v3069_v34 }
 0x43c   : > { %v3188_v13 = vrot.slane %v3187_v20, 1 }
 0x43e   : > { %v3189_v33 = vmax.f32 %v3187_v20, %v3188_v13 }
 0x43f   : > { %v3017_v52 = vpop.f32.mrf.mxu3 }
 0x440   : > { %v3018_v44 = vadd.f32 %v3017_v52, %v5649_v23  ;;  %v3070_v0 = vpop.f32.mrf.mxu1  ;;  %v3099_v19 = vpop.f32.mrf.mxu2 }
 0x441   : > { %v3071_v39 = vadd.f32 %v3070_v0, %v3042_v63 }
 0x442   : > { %v5693_v50 = vmax.f32 %v3016_v4, %v3018_v44  ;;  %v3051_v63 = vpop.f32.mrf.mxu0 }
 0x443   : > { %v3100_v17 = vadd.f32 %v3099_v19, %v3071_v39  ;;  %v3052_v40 = vadd.f32 %v3051_v63, %v5699_v58 }
 0x447   : > { %v3020_v35 = vpop.f32.mrf.mxu3 }
 0x448   : > { %v3021_v22 = vadd.f32 %v3020_v35, %v5658_v32  ;;  %v3064_v32 = vadd.f32 %v3063_v56, %v3035_v55  ;;  %v3073_v31 = vpop.f32.mrf.mxu1  ;;  %v3102_v62 = vpop.f32.mrf.mxu2 }
 0x449   : > { %v3074_v35 = vadd.f32 %v3073_v31, %v3045_v41 }
 0x44a   : > { %v3093_v10 = vadd.f32 %v3092_v49, %v3064_v32  ;;  %v3159_v49 = vmax.f32 %v3157_v45, %v3158_v8 }
 0x44b   : > { %v3103_v7 = vadd.f32 %v3102_v62, %v3074_v35 }
 0x44c   : > { %v3160_v26 = vrot.slane %v3159_v49, 1 }
 0x44f   : > { %v3022_v54 = vpop.f32.mrf.mxu3 }
 0x450   : > { %v3023_v43 = vadd.f32 %v3022_v54, %v2994_v25  ;;  %v3075_v2 = vpop.f32.mrf.mxu1  ;;  %v3104_v56 = vpop.f32.mrf.mxu2  ;;  %v3212_v54 = vrot.slane %v5693_v50, 4 }
 0x452   : > { %v5696_v60 = vmax.f32 %v3021_v22, %v3023_v43  ;;  %v3076_v22 = vadd.f32 %v3075_v2, %v3047_v47  ;;  %v3213_v46 = vmax.f32 %v5693_v50, %v3212_v54 }
 0x454   : > { %v3105_v55 = vadd.f32 %v3104_v56, %v3076_v22  ;;  %v3214_v19 = vrot.slane %v3213_v46, 2 }
 0x456   : > { %v3215_v34 = vmax.f32 %v3213_v46, %v3214_v19 }
 0x457   : > { %v3121_v23 = vpop.f32.mrf.mxu3 }
 0x458   : > { %v3122_v36 = vadd.f32 %v3121_v23, %v3093_v10  ;;  %v3078_v14 = vpop.f32.mrf.mxu1  ;;  %v3161_v10 = vmax.f32 %v3159_v49, %v3160_v26 }
 0x45f   : > { %v3123_v25 = vpop.f32.mrf.mxu3 }
 0x460   : > { %v3124_v18 = vadd.f32 %v3123_v25, %v3095_v11  ;;  %v3080_v39 = vpop.f32.mrf.mxu1 }
 0x461   : > { %v3081_v62 = vadd.f32 %v3080_v39, %v3052_v40 }
 0x462   : > { %v3162_v9 = vmax.f32 %v3122_v36, %v3124_v18 }
 0x464   : > { %v3163_v51 = vrot.slane %v3162_v9, 4 }
 0x466   : > { %v3164_v29 = vmax.f32 %v3162_v9, %v3163_v51  ;;  %v3107_v9 = vpop.f32.mrf.mxu2 }
 0x467   : > { %v3126_v15 = vpop.f32.mrf.mxu3 }
 0x468   : > { %v3165_v37 = vrot.slane %v3164_v29, 2  ;;  %v3127_v5 = vadd.f32 %v3126_v15, %v3098_v16 }
 0x46a   : > { %v3166_v42 = vmax.f32 %v3164_v29, %v3165_v37  ;;  %v3050_v29 = vadd.f32 %v3049_v30, %v5699_v58  ;;  %v3240_v37 = vrot.slane %v5696_v60, 4 }
 0x46c   : > { %v3167_v52 = vrot.slane %v3166_v42, 1 }
 0x46e   : > { %v3168_v43 = vmax.f32 %v3166_v42, %v3167_v52  ;;  %v3241_v42 = vmax.f32 %v5696_v60, %v3240_v37 }
 0x46f   : > { %v3128_v59 = vpop.f32.mrf.mxu3 }
 0x470   : > { %v3129_v24 = vadd.f32 %v3128_v59, %v3100_v17  ;;  %v3270_v61 = vrot.slane %v3168_v43, 4  ;;  %v3079_v17 = vadd.f32 %v3078_v14, %v3050_v29  ;;  %v3216_v59 = vrot.slane %v3215_v34, 1 }
 0x471   : > { %v3242_v41 = vrot.slane %v3241_v42, 2 }
 0x472   : > { %v3190_v3 = vmax.f32 %v3127_v5, %v3129_v24  ;;  %v3278_v15 = vsel %vm468_vm0, %v3161_v10, %v3270_v61  ;;  %v3109_v24 = vpop.f32.mrf.mxu2  ;;  %v3108_v45 = vadd.f32 %v3107_v9, %v3079_v17  ;;  %v3217_v28 = vmax.f32 %v3215_v34, %v3216_v59 }
 0x473   : > { %v3243_v49 = vmax.f32 %v3241_v42, %v3242_v41 }
 0x474   : > { %v3191_v1 = vrot.slane %v3190_v3, 4 }
 0x475   : > { %v3244_v60 = vrot.slane %v3243_v49, 1 }
 0x476   : > { %v3192_v57 = vmax.f32 %v3190_v3, %v3191_v1  ;;  %v3110_v3 = vadd.f32 %v3109_v24, %v3081_v62 }
 0x477   : > { %v3131_v4 = vpop.f32.mrf.mxu3  ;;  %v3245_v13 = vmax.f32 %v3243_v49, %v3244_v60 }
 0x478   : > { %v3193_v44 = vrot.slane %v3192_v57, 2  ;;  %v3132_v0 = vadd.f32 %v3131_v4, %v3103_v7 }
 0x47a   : > { %v3194_v21 = vmax.f32 %v3192_v57, %v3193_v44 }
 0x47c   : > { %v3195_v12 = vrot.slane %v3194_v21, 1 }
 0x47e   : > { %v3196_v23 = vmax.f32 %v3194_v21, %v3195_v12 }
 0x47f   : > { %v3133_v32 = vpop.f32.mrf.mxu3 }
 0x480   : > { %v3272_v11 = vrot.slane %v3196_v23, 4  ;;  %v3134_v25 = vadd.f32 %v3133_v32, %v3105_v55 }
 0x482   : > { %v3280_v18 = vsel %vm468_vm0, %v3189_v33, %v3272_v11  ;;  %v3218_v36 = vmax.f32 %v3132_v0, %v3134_v25 }
 0x483   : > { %v3296_v38 = vrot.slane %v3280_v18, 7 }
 0x484   : > { %v3219_v48 = vrot.slane %v3218_v36, 4 }
 0x485   : > { %v3297_v51 = vsel %vm963_vm2, %v3296_v38, %v3278_v15 }
 0x486   : > { %v3298_v50 = vsel %vm1782_vm10, %v3296_v38, %v3297_v51  ;;  %v3220_v31 = vmax.f32 %v3218_v36, %v3219_v48 }
 0x487   : > { %v3136_v27 = vpop.f32.mrf.mxu3 }
 0x488   : > { %v3221_v16 = vrot.slane %v3220_v31, 2  ;;  %v3137_v8 = vadd.f32 %v3136_v27, %v3108_v45 }
 0x48a   : > { %v3222_v6 = vmax.f32 %v3220_v31, %v3221_v16 }
 0x48c   : > { %v3223_v5 = vrot.slane %v3222_v6, 1 }
 0x48e   : > { %v3224_v53 = vmax.f32 %v3222_v6, %v3223_v5 }
 0x48f   : > { %v3138_v2 = vpop.f32.mrf.mxu3 }
 0x490   : > { %v3274_v1 = vrot.slane %v3224_v53, 4  ;;  %v3139_v58 = vadd.f32 %v3138_v2, %v3110_v3 }
 0x492   : > { %v3282_v57 = vsel %vm468_vm0, %v3217_v28, %v3274_v1  ;;  %v3246_v20 = vmax.f32 %v3137_v8, %v3139_v58 }
 0x493   : > { %v3299_v4 = vrot.slane %v3282_v57, 6 }
 0x494   : > { %v3247_v47 = vrot.slane %v3246_v20, 4 }
 0x495   : > { %v3300_v52 = vsel %vm965_vm3, %v3299_v4, %v3298_v50 }
 0x496   : > { %v3248_v44 = vmax.f32 %v3246_v20, %v3247_v47  ;;  %v3301_v56 = vsel %vm3290_vm12, %v3299_v4, %v3300_v52 }
 0x498   : > { %v3249_v35 = vrot.slane %v3248_v44, 2 }
 0x49a   : > { %v3250_v22 = vmax.f32 %v3248_v44, %v3249_v35 }
 0x49c   : > { %v3251_v21 = vrot.slane %v3250_v22, 1 }
 0x49e   : > { %v3252_v30 = vmax.f32 %v3250_v22, %v3251_v21 }
 0x4a0   : > { %v3276_v54 = vrot.slane %v3252_v30, 4 }
 0x4a2   : > { %v3284_v43 = vsel %vm468_vm0, %v3245_v13, %v3276_v54 }
 0x4a3   : > { %v3302_v12 = vrot.slane %v3284_v43, 5 }
 0x4a5   : > { %v3303_v14 = vsel %vm967_vm4, %v3302_v12, %v3301_v56 }
 0x4a6   : > { %v3304_v26 = vsel %vm3294_vm13, %v3302_v12, %v3303_v14 }
 0x4a7   : > { %3308 = vst [vmem:[%s5686_s25 + $0x8] sm:$0xff] %v3304_v26 }
 0x4a8   : > { %4677 = shalt.err (!%p4674_p8)
}
 0x4a9   : > { %4497 = dma.vmem_to_hbm [thread:$0]  (%p4822_p5), %s3324_s21, 256, %s3326_s26, %s3310_s17  }
 0x4aa PF: > { %p4519_p9 = scmp.ge.s32.totalorder %s4720_s16, 2  ;;  %s3337_s6 = sand.u32 1, %s4708_s13  }
 0x4ab   : > { %s3338_s19 = scalar_lea.sflag [#allocation4], %s3337_s6 }
 0x4ac   : > { %p4510_p10 = pnand %p4519_p9, %p4826_p6 }
 0x4ae   : > { %p4511_p11 = pneg %p4510_p10 }
 0x4b0   : > { %4703 = dma.done.wait (%p4511_p11), %s3338_s19, 256  }
 0x4b1   : > { %4705 = vsyncadd (%p4511_p11), %s3338_s19, 4294967040  ;;  %s5785_s16 = sld [smem:[#allocation13_spill]]  ;;  %s5788_s13 = smov %s4712_s14 }
 0x4b2   : > { %s5786_s25 = sld [smem:[#allocation12_spill]] }
 0x4b3   : > { %s5787_s15 = sld [smem:[#allocation14_spill]] }
 0x4b7   : > { %p22_p12 = scmp.ge.s32.totalorder %s5785_s16, 4  }
 0x4b8   : > { %s5789_s14 = smov %s5786_s25 }
 0x4b9   :  { %24 = sbr.rel (!%p22_p12) target bundleno = 8 (0x8), region = 108 }
 0x4be   :  { %3344 = vsyncpa [#allocation3], 1 }
 0x4bf   :  { %3346 = vsyncpa [#allocation3 + $0x1], 1 }
 0x4c0   :  { %3347 = vsyncpa [#allocation6], 1 }
 0x4c1   :  { %3348 = vsyncpa [#allocation4], 1 }
 0x4c2   :  { %3350 = vsyncpa [#allocation4 + $0x1], 1 }

// kernel: tpu_custom_call.1
= control target key start
LH: loop header
LB: loop body
LE: loop exit
PB: predicated region body
PF: predicated region fallthrough
CT: control target
= control target key end

     0   :  { %s5760_s0 = inlined_call_operand.vmem [shape: f32[8,32,8], index: 0, kind: input, shape index: {}]   ;;  %s5761_s1 = inlined_call_operand.vmem [shape: bf16[8,128], index: 1, kind: input, shape index: {}]   ;;  %s5762_s2 = inlined_call_operand.vmem [shape: f32[1,128], index: 2, kind: input, shape index: {}]   ;;  %s5763_s3 = inlined_call_operand.vmem [shape: bf16[128,256], index: 3, kind: input, shape index: {}]   ;;  %s5764_s4 = inlined_call_operand.vmem [shape: f32[1,256], index: 4, kind: input, shape index: {}]   ;;  %s5765_s5 = inlined_call_operand.hbm [shape: bf16[256,512], index: 5, kind: input, shape index: {}]   ;;  %s5766_s6 = inlined_call_operand.hbm [shape: f32[256,512], index: 6, kind: input, shape index: {}]   ;;  %s5767_s7 = inlined_call_operand.vmem [shape: f32[1,512], index: 7, kind: input, shape index: {}]   ;;  %s5768_s8 = inlined_call_operand.hbm [shape: bf16[512,512], index: 8, kind: input, shape index: {}]   ;;  %s5769_s9 = inlined_call_operand.vmem [shape: f32[1,512], index: 9, kind: input, shape index: {}]   ;;  %s5770_s10 = inlined_call_operand.hbm [shape: f32[2,4,512], index: 10, kind: output, shape index: {}]  }
   0x1   :  { %5774 = sst [smem:[#allocation15_spill]] %s5765_s5 }
   0x2   :  { %5775 = sst [smem:[#allocation16_spill]] %s5766_s6 }
   0x3   :  { %15 = vsyncpa [#allocation3], 0 }
   0x4   :  { %16 = vsyncpa [#allocation6], 0 }
   0x5   :  { %17 = vsyncpa [#allocation4], 0 }
   0x6   :  { %19 = vsyncpa [#allocation4 + $0x1], 0  ;;  %s4784_s13 = smov 0   ;;  %s4786_s14 = smov 0  }
   0x7   :  { %s4788_s15 = smov 0   ;;  %s4790_s16 = smov 0  }
   0x8 LB: > { %5776 = sst [smem:[#allocation12_spill]] %s4716_s15  ;;  %s4805_s17 = sadd.s32 4294967295, %s4720_s16   ;;  %s4720_s16 = sphi %s4790_s16, %s5785_s16   ;;  %s4716_s15 = sphi %s4788_s15, %s5787_s15   ;;  %s4712_s14 = sphi %s4786_s14, %s5789_s14   ;;  %s4708_s13 = sphi %s4784_s13, %s5788_s13  }
   0x9   : > { %s3416_s18 = sadd.s32 4294967294, %s4720_s16   ;;  %s4809_s19 = sadd.s32 1, %s4720_s16  }
   0xa   : > { %5777 = sst [smem:[#allocation13_spill]] %s4809_s19  ;;  %s247_s20 = sadd.s32 1, %s4716_s15 }
   0xb   : > { %s244_s21 = ssub.s32 %s4720_s16, %s4809_s19  ;;  %p257_p0 = scmp.ne.s32.totalorder %s4716_s15, %s4712_s14 }
   0xc   : > { %p245_p1 = scmp.eq.s32.totalorder %s244_s21, 0  ;;  %p258_p2 = scmp.eq.s32.totalorder %s4805_s17, 1 }
   0xd   : > { %p263_p3 = scmp.ne.s32.totalorder %s4712_s14, %s4708_s13  ;;  %p264_p4 = scmp.eq.s32.totalorder %s3416_s18, 1 }
   0xe   : > { %s4820_s22 = scalar_select %p245_p1, %s4716_s15, %s247_s20  }
   0xf   : > { %p4822_p5 = por %p258_p2, %p257_p0  ;;  %p4826_p6 = por %p264_p4, %p263_p3 }
  0x10   : > { %5778 = sst [smem:[#allocation14_spill]] %s4820_s22  ;;  %p3417_p7 = scmp.ge.s32.totalorder %s4720_s16, 1 }
  0x11   : > { %p271_p8 = scmp.lt.s32.totalorder %s4720_s16, 3  ;;  %p4513_p9 = scmp.eq.s32.totalorder %s4805_s17, 0 }
  0x12   : > { %s5782_s6 = sld [smem:[#allocation16_spill]]  ;;  %s4722_s29 = smov [#allocation5]  }
  0x13   : > { %p4833_p10 = pnand %p3417_p7, %p271_p8  ;;  %s310_s30 = sshll.u32 %s4722_s29, 4  ;;  %s311_s30 = int_to_ptr.vmem [resolvable:$true] %s310_s30 }
  0x14   : > { %s5784_s5 = sld [smem:[#allocation15_spill]]  ;;  %s4723_s21 = smov 512  }
  0x15   : > { %p4499_p11 = pneg %p4833_p10  ;;  %s4724_s26 = smov 32  }
  0x16   : > { %s4725_s27 = smov [#allocation2]   ;;  %s4727_s22 = smov 16  }
  0x17   : > { %p4844_p12 = pnand %p4513_p9, %p4499_p11  ;;  %s296_s29 = sshll.u32 %s4725_s27, 4  ;;  %s297_s29 = int_to_ptr.vmem [resolvable:$true] %s296_s29 }
  0x18   : > { %s308_s28 = sshll.u32 %s5782_s6, 4  ;;  %s4726_s6 = smov 256   ;;  %s309_s28 = int_to_ptr.hbm [resolvable:$true] %s308_s28 }
  0x19   : > { %4505 = dma.hbm_to_vmem [thread:$0]  (!%p4844_p12), %s309_s28, 16384, %s311_s30, [#allocation6], %s4723_s21, %s4723_s21, %s4724_s26  }
  0x1a   : > { %s294_s20 = sshll.u32 %s5784_s5, 4  ;;  %s325_s12 = sshll.u32 %s5768_s8, 4  ;;  %s295_s20 = int_to_ptr.hbm [resolvable:$true] %s294_s20  ;;  %s326_s12 = int_to_ptr.hbm [resolvable:$true] %s325_s12 }
  0x1b   : > { %4502 = dma.hbm_to_vmem [thread:$0]  (!%p4844_p12), %s295_s20, 8192, %s297_s29, [#allocation3], %s4726_s6, %s4726_s6, %s4727_s22  }
  0x1c   : > { %s4728_s18 = smov [#allocation7]   ;;  %356 = sbr.rel (%p4833_p10) target bundleno = 1194 (0x4aa), region = 60 }
  0x1d   : > { %s327_s5 = sshll.u32 %s4728_s18, 4  ;;  %s328_s5 = int_to_ptr.vmem [resolvable:$true] %s327_s5 }
  0x1e   : > { %4508 = dma.hbm_to_vmem [thread:$0]  (!%p4844_p12), %s326_s12, 16384, %s328_s5, [#allocation6], %s4726_s6, %s4726_s6, %s4727_s22  }
  0x21   : > { %4695 = dma.done.wait (%p4513_p9), [#allocation3], 8192  }
  0x22   : > { %4697 = vsyncadd (%p4513_p9), [#allocation3], 4294959104 }
  0x23   : > { %4699 = dma.done.wait (%p4513_p9), [#allocation6], 32768  }
  0x24   : > { %4701 = vsyncadd (%p4513_p9), [#allocation6], 4294934528  ;;  %s3427_s15 = sshll.u32 %s4805_s17, 2  ;;  %vm468_vm0 = vcmask 1043456   ;;  %v438_v0 = vld [vmem:[%s5761_s1] sm:$0xf] }
  0x25   : > { %p407_p13 = scmp.lt.s32.totalorder %s3427_s15, 7  ;;  %v470_v3 = vsel %vm468_vm0, %v438_v0, 0  ;;  %vm443_vm1 = vcmask 64512   ;;  %v3496_v17 = vld [vmem:[%s5763_s3 + $0x70] sm:$0xf]  ;;  %vm963_vm2 = vcmask 1041409  }
  0x26   : > { %479 = vmatpush.bf16.msra.mxu0 %v470_v3  ;;  %v4291_v18 = vld [vmem:[%s5763_s3 + $0x74] sm:$0xf0]  ;;  %v4290_v19 = vld [vmem:[%s5763_s3 + $0x74] sm:$0xf]  ;;  %v3498_v21 = vld [vmem:[%s5763_s3 + $0x78] sm:$0xf0] }
  0x27   : > { %s5791_s15 = smov (!%p407_p13, %s3427_s15), 7  ;;  %v3497_v20 = vor.u32 %v4291_v18, %v3496_v17  ;;  %v3501_v22 = vor.u32 %v4290_v19, %v3498_v21  ;;  %v3488_v26 = vld [vmem:[%s5763_s3 + $0x60] sm:$0xf]  ;;  %v4289_v27 = vld [vmem:[%s5763_s3 + $0x64] sm:$0xf0]  ;;  %vm965_vm3 = vcmask 1042434  }
  0x28   : > { %s4275_s5 = sshll.u32 %s5791_s15, 5  ;;  %v4288_v28 = vld [vmem:[%s5763_s3 + $0x64] sm:$0xf]  ;;  %v3489_v29 = vor.u32 %v4289_v27, %v3488_v26  ;;  %v3490_v30 = vld [vmem:[%s5763_s3 + $0x68] sm:$0xf0]  ;;  %vm967_vm4 = vcmask 1043459  }
  0x29   : > { %s4874_s22 = scalar_lea.vmem %s5760_s0, %s4275_s5  ;;  %647 = vmatpush.bf16.msra.mxu1 %v3497_v20  ;;  %696 = vmatpush.bf16.msra.mxu2 %v3501_v22  ;;  %v3493_v31 = vor.u32 %v4288_v28, %v3490_v30  ;;  %v3480_v32 = vld [vmem:[%s5763_s3 + $0x50] sm:$0xf]  ;;  %v4287_v33 = vld [vmem:[%s5763_s3 + $0x54] sm:$0xf0]  ;;  %v4286_v34 = vld [vmem:[%s5763_s3 + $0x54] sm:$0xf] }
  0x2a   : > { %v414_v1 = vld [vmem:[%s4874_s22] sm:$0xff]  ;;  %v415_v2 = vld [vmem:[%s4874_s22 + $0x8] sm:$0xff]  ;;  %v416_v5 = vld [vmem:[%s4874_s22 + $0x10] sm:$0xff]  ;;  %v3481_v35 = vor.u32 %v4287_v33, %v3480_v32  ;;  %vm1765_vm5 = vcmask 1040384   ;;  %vm1768_vm6 = vcmask 1041408   ;;  %vm1772_vm7 = vcmask 1042433  }
  0x2b   : > { %v430_v4 = vpack.c.bf16 %v415_v2, %v414_v1  ;;  %v417_v6 = vld [vmem:[%s4874_s22 + $0x18] sm:$0xff]  ;;  %v418_v8 = vld [vmem:[%s4874_s22 + $0x20] sm:$0xff]  ;;  %v419_v9 = vld [vmem:[%s4874_s22 + $0x28] sm:$0xff]  ;;  %vm1776_vm8 = vcmask 1044484   ;;  %vm1778_vm9 = vcmask 1043458   ;;  %vm1782_vm10 = vcmask 1045509  }
  0x2c   : > { %v431_v7 = vpack.c.bf16 %v417_v6, %v416_v5  ;;  %v432_v10 = vpack.c.bf16 %v419_v9, %v418_v8  ;;  %v420_v11 = vld [vmem:[%s4874_s22 + $0x30] sm:$0xff]  ;;  %v421_v12 = vld [vmem:[%s4874_s22 + $0x38] sm:$0xff]  ;;  %v422_v14 = vld [vmem:[%s4874_s22 + $0x40] sm:$0xff]  ;;  %vm1784_vm11 = vcmask 1044483   ;;  %vm3290_vm12 = vcmask 1046534   ;;  %s403_s6 = sand.u32 1, %s4712_s14  }
  0x2d   : > { %3430 = vmatmul.msk.bf16.vlgmr.msra.gmra.mxu0 %vm443_vm1, %v430_v4  ;;  %v433_v13 = vpack.c.bf16 %v421_v12, %v420_v11  ;;  %v423_v15 = vld [vmem:[%s4874_s22 + $0x48] sm:$0xff]  ;;  %v424_v23 = vld [vmem:[%s4874_s22 + $0x50] sm:$0xff]  ;;  %v425_v24 = vld [vmem:[%s4874_s22 + $0x58] sm:$0xff]  ;;  %648 = vmatpush.bf16.msra.mxu1 %v3489_v29  ;;  %s3426_s19 = sshll.u32 %s403_s6, 4  ;;  %vm3294_vm13 = vcmask 1047559   ;;  %s4484_s28 = sshll.u32 %s4805_s17, 4 }
  0x2e   : > { %v434_v16 = vpack.c.bf16 %v423_v15, %v422_v14  ;;  %v435_v25 = vpack.c.bf16 %v425_v24, %v424_v23  ;;  %v3482_v36 = vld [vmem:[%s5763_s3 + $0x58] sm:$0xf0]  ;;  %697 = vmatpush.bf16.msra.mxu2 %v3493_v31  ;;  %v3472_v38 = vld [vmem:[%s5763_s3 + $0x40] sm:$0xf]  ;;  %v4285_v39 = vld [vmem:[%s5763_s3 + $0x44] sm:$0xf0]  ;;  %s3321_s20 = scalar_lea.hbm %s5770_s10, %s4484_s28 }
  0x2f   : > { %v3485_v37 = vor.u32 %v4286_v34, %v3482_v36  ;;  %v4284_v40 = vld [vmem:[%s5763_s3 + $0x44] sm:$0xf]  ;;  %v3474_v41 = vld [vmem:[%s5763_s3 + $0x48] sm:$0xf0]  ;;  %v3473_v42 = vor.u32 %v4285_v39, %v3472_v38  ;;  %v3464_v46 = vld [vmem:[%s5763_s3 + $0x30] sm:$0xf] }
  0x30   : > { %v3477_v43 = vor.u32 %v4284_v40, %v3474_v41  ;;  %v426_v44 = vld [vmem:[%s4874_s22 + $0x60] sm:$0xff]  ;;  %v427_v45 = vld [vmem:[%s4874_s22 + $0x68] sm:$0xff]  ;;  %v4283_v47 = vld [vmem:[%s5763_s3 + $0x34] sm:$0xf0]  ;;  %s5686_s25 = scalar_lea.vmem [#allocation8], %s3426_s19  ;;  %s3325_s26 = sshll.u32 %s3321_s20, 4  ;;  %s3326_s26 = int_to_ptr.hbm [resolvable:$true] %s3325_s26 }
  0x31   : > { %649 = vmatpush.bf16.msra.mxu1 %v3481_v35  ;;  %v4282_v48 = vld [vmem:[%s5763_s3 + $0x34] sm:$0xf]  ;;  %v3465_v49 = vor.u32 %v4283_v47, %v3464_v46  ;;  %v3466_v50 = vld [vmem:[%s5763_s3 + $0x38] sm:$0xf0]  ;;  %v436_v51 = vpack.c.bf16 %v427_v45, %v426_v44  ;;  %v3456_v53 = vld [vmem:[%s5763_s3 + $0x20] sm:$0xf] }
  0x32   : > { %698 = vmatpush.bf16.msra.mxu2 %v3485_v37  ;;  %v3469_v52 = vor.u32 %v4282_v48, %v3466_v50  ;;  %v4281_v54 = vld [vmem:[%s5763_s3 + $0x24] sm:$0xf0]  ;;  %v4280_v55 = vld [vmem:[%s5763_s3 + $0x24] sm:$0xf]  ;;  %v3458_v57 = vld [vmem:[%s5763_s3 + $0x28] sm:$0xf0] }
  0x33   : > { %v3457_v56 = vor.u32 %v4281_v54, %v3456_v53  ;;  %v3461_v58 = vor.u32 %v4280_v55, %v3458_v57  ;;  %v3448_v59 = vld [vmem:[%s5763_s3 + $0x10] sm:$0xf]  ;;  %v4279_v60 = vld [vmem:[%s5763_s3 + $0x14] sm:$0xf0]  ;;  %v4278_v61 = vld [vmem:[%s5763_s3 + $0x14] sm:$0xf] }
  0x34   : > { %v3449_v62 = vor.u32 %v4279_v60, %v3448_v59  ;;  %v3450_v63 = vld [vmem:[%s5763_s3 + $0x18] sm:$0xf0]  ;;  %v3440_v1 = vld [vmem:[%s5763_s3] sm:$0xf]  ;;  %v4277_v2 = vld [vmem:[%s5763_s3 + $0x4] sm:$0xf0] }
  0x35   : > { %650 = vmatpush.bf16.msra.mxu1 %v3473_v42  ;;  %v3453_v0 = vor.u32 %v4278_v61, %v3450_v63  ;;  %v4276_v3 = vld [vmem:[%s5763_s3 + $0x4] sm:$0xf]  ;;  %v3441_v4 = vor.u32 %v4277_v2, %v3440_v1  ;;  %v3442_v5 = vld [vmem:[%s5763_s3 + $0x8] sm:$0xf0]  ;;  %v429_v8 = vld [vmem:[%s4874_s22 + $0x78] sm:$0xff]  ;;  %s3323_s21 = sshll.u32 %s5686_s25, 4  ;;  %s3324_s21 = int_to_ptr.vmem [resolvable:$true] %s3323_s21 }
  0x36   : > { %699 = vmatpush.bf16.msra.mxu2 %v3477_v43  ;;  %v3445_v6 = vor.u32 %v4276_v3, %v3442_v5  ;;  %v5003_v11 = vld [vmem:[%s5762_s2] ss:$0 sm:$0xff]  ;;  %s3310_s17 = scalar_lea.sflag [#allocation4], %s403_s6  ;;  %s4664_s27 = sshra.s32 %s3326_s26, 4  ;;  %s4665_s27 = int_to_ptr.hbm [resolvable:$true] %s4664_s27 }
  0x37   : > { %s4670_s18 = scalar_lea.hbm %s5770_s10, 32  ;;  %p4671_p3 = scmp.lt.s32.totalorder %s4665_s27, %s5770_s10 }
  0x39   : > { %651 = vmatpush.bf16.msra.mxu1 %v3465_v49 }
  0x3a   : > { %700 = vmatpush.bf16.msra.mxu2 %v3469_v52 }
  0x3d   : > { %3431 = vmatmul.msk.bf16.gmra.mxu0 %vm443_vm1, %v431_v7  ;;  %652 = vmatpush.bf16.msra.mxu1 %v3457_v56  ;;  %v428_v7 = vld [vmem:[%s4874_s22 + $0x70] sm:$0xff]  ;;  %s4666_s22 = scalar_lea.hbm %s4665_s27, 16 }
  0x3e   : > { %701 = vmatpush.bf16.msra.mxu2 %v3461_v58  ;;  %v437_v9 = vpack.c.bf16 %v429_v8, %v428_v7  ;;  %p4667_p0 = scmp.ne.s32.totalorder %s4665_s27, %s4666_s22  ;;  %p4672_p4 = scmp.lt.s32.totalorder %s4670_s18, %s4666_s22 }
  0x40   : > { %p4668_p1 = pnand %p4667_p0, %p4822_p5  ;;  %p4673_p7 = por %p4672_p4, %p4671_p3 }
  0x41   : > { %653 = vmatpush.bf16.msra.mxu1 %v3449_v62 }
  0x42   : > { %702 = vmatpush.bf16.msra.mxu2 %v3453_v0  ;;  %p4669_p2 = pneg %p4668_p1 }
  0x44   : > { %p4674_p8 = pnand %p4673_p7, %p4669_p2 }
  0x45   : > { %654 = vmatpush.bf16.msra.mxu1 %v3441_v4 }
  0x46   : > { %703 = vmatpush.bf16.msra.mxu2 %v3445_v6  ;;  %v561_v6 = vld [vmem:[%s5764_s4] sm:$0x3] }
  0x4d   : > { %3432 = vmatmul.msk.bf16.gmra.mxu0 %vm443_vm1, %v432_v10 }
  0x5d   : > { %3433 = vmatmul.msk.bf16.gmra.mxu0 %vm443_vm1, %v433_v13 }
  0x6d   : > { %3434 = vmatmul.msk.bf16.gmra.mxu0 %vm443_vm1, %v434_v16 }
  0x7d   : > { %3435 = vmatmul.msk.bf16.gmra.mxu0 %vm443_vm1, %v435_v25 }
  0x8d   : > { %3436 = vmatmul.msk.bf16.gmra.mxu0 %vm443_vm1, %v436_v51 }
  0x9d   : > { %3437 = vmatmul.msk.bf16.gmra.mxu0 %vm443_vm1, %v437_v9  ;;  %v5024_v9 = vperm.slane %v561_v6, 0 }
  0xaa   : > { %v481_v10 = vpop.f32.mrf.mxu0 }
  0xab   : > { %v482_v12 = vadd.f32 %v5003_v11, %v481_v10 }
  0xad   : > { %v521_v15 = vmax.f32 %v482_v12, 0.0 }
  0xb2   : > { %v483_v13 = vpop.f32.mrf.mxu0 }
  0xb3   : > { %v484_v14 = vadd.f32 %v5003_v11, %v483_v13 }
  0xb5   : > { %v522_v16 = vmax.f32 %v484_v14, 0.0  ;;  %v5031_v14 = vperm.slane %v561_v6, 1 }
  0xb7   : > { %v537_v17 = vpack.c.bf16 %v522_v16, %v521_v15 }
  0xb9   : > { %655 = vmatmul.bf16.vlgmr.msra.gmra.mxu1 %v537_v17  ;;  %704 = vmatmul.bf16.vlgmr.msra.gmra.mxu2 %v537_v17 }
  0xba   : > { %v486_v18 = vpop.f32.mrf.mxu0 }
  0xbb   : > { %v487_v19 = vadd.f32 %v5003_v11, %v486_v18 }
  0xbd   : > { %v523_v22 = vmax.f32 %v487_v19, 0.0 }
  0xc2   : > { %v488_v20 = vpop.f32.mrf.mxu0 }
  0xc3   : > { %v489_v21 = vadd.f32 %v5003_v11, %v488_v20 }
  0xc5   : > { %v524_v23 = vmax.f32 %v489_v21, 0.0 }
  0xc7   : > { %v538_v24 = vpack.c.bf16 %v524_v23, %v523_v22 }
  0xc9   : > { %660 = vmatmul.bf16.gmra.mxu1 %v538_v24  ;;  %709 = vmatmul.bf16.gmra.mxu2 %v538_v24 }
  0xca   : > { %v491_v25 = vpop.f32.mrf.mxu0 }
  0xcb   : > { %v492_v26 = vadd.f32 %v5003_v11, %v491_v25 }
  0xcd   : > { %v525_v29 = vmax.f32 %v492_v26, 0.0 }
  0xd2   : > { %v493_v27 = vpop.f32.mrf.mxu0 }
  0xd3   : > { %v494_v28 = vadd.f32 %v5003_v11, %v493_v27 }
  0xd5   : > { %v526_v30 = vmax.f32 %v494_v28, 0.0 }
  0xd7   : > { %v539_v31 = vpack.c.bf16 %v526_v30, %v525_v29 }
  0xd9   : > { %665 = vmatmul.bf16.gmra.mxu1 %v539_v31  ;;  %714 = vmatmul.bf16.gmra.mxu2 %v539_v31  ;;  %v877_v31 = vld [vmem:[#allocation5 + $0x1e0] sm:$0xff] }
  0xda   : > { %v496_v32 = vpop.f32.mrf.mxu0  ;;  %974 = vmatpush.msra.mxu3 %v877_v31 }
  0xdb   : > { %v497_v33 = vadd.f32 %v5003_v11, %v496_v32  ;;  %v873_v32 = vld [vmem:[#allocation5 + $0x1c0] sm:$0xff] }
  0xdc   : > { %975 = vmatpush.msra.mxu3 %v873_v32  ;;  %v833_v32 = vld [vmem:[#allocation5 + $0x80] sm:$0xff] }
  0xdd   : > { %v527_v36 = vmax.f32 %v497_v33, 0.0 }
  0xe2   : > { %v498_v34 = vpop.f32.mrf.mxu0 }
  0xe3   : > { %v499_v35 = vadd.f32 %v5003_v11, %v498_v34  ;;  %v869_v34 = vld [vmem:[#allocation5 + $0x1a0] sm:$0xff] }
  0xe4   : > { %976 = vmatpush.msra.mxu3 %v869_v34  ;;  %v927_v34 = vld [vmem:[#allocation5 + $0x370] sm:$0xff] }
  0xe5   : > { %v528_v37 = vmax.f32 %v499_v35, 0.0 }
  0xe7   : > { %v540_v38 = vpack.c.bf16 %v528_v37, %v527_v36  ;;  %v865_v36 = vld [vmem:[#allocation5 + $0x180] sm:$0xff] }
  0xe8   : > { %977 = vmatpush.msra.mxu3 %v865_v36 }
  0xe9   : > { %670 = vmatmul.bf16.gmra.mxu1 %v540_v38  ;;  %719 = vmatmul.bf16.gmra.mxu2 %v540_v38 }
  0xea   : > { %v501_v39 = vpop.f32.mrf.mxu0 }
  0xeb   : > { %v502_v40 = vadd.f32 %v5003_v11, %v501_v39  ;;  %v861_v39 = vld [vmem:[#allocation5 + $0x160] sm:$0xff] }
  0xec   : > { %978 = vmatpush.msra.mxu3 %v861_v39  ;;  %v829_v39 = vld [vmem:[#allocation5 + $0x60] sm:$0xff] }
  0xed   : > { %v529_v43 = vmax.f32 %v502_v40, 0.0  ;;  %v879_v40 = vld [vmem:[#allocation5 + $0x1f0] sm:$0xff] }
  0xee   : > { %1054 = vmatpush.msrb.mxu0 %v879_v40  ;;  %v847_v40 = vld [vmem:[#allocation5 + $0xf0] sm:$0xff] }
  0xf2   : > { %v503_v41 = vpop.f32.mrf.mxu0 }
  0xf3   : > { %v504_v42 = vadd.f32 %v5003_v11, %v503_v41  ;;  %v880_v41 = vld [vmem:[#allocation5 + $0x1f8] sm:$0xff] }
  0xf4   : > { %1094 = vmatpush.msrb.mxu2 %v880_v41  ;;  %v923_v41 = vld [vmem:[#allocation5 + $0x350] sm:$0xff] }
  0xf5   : > { %v530_v44 = vmax.f32 %v504_v42, 0.0 }
  0xf7   : > { %v541_v45 = vpack.c.bf16 %v530_v44, %v529_v43  ;;  %v857_v44 = vld [vmem:[#allocation5 + $0x140] sm:$0xff] }
  0xf8   : > { %979 = vmatpush.msra.mxu3 %v857_v44 }
  0xf9   : > { %675 = vmatmul.bf16.gmra.mxu1 %v541_v45  ;;  %724 = vmatmul.bf16.gmra.mxu2 %v541_v45  ;;  %v875_v45 = vld [vmem:[#allocation5 + $0x1d0] sm:$0xff] }
  0xfa   : > { %v506_v46 = vpop.f32.mrf.mxu0  ;;  %1055 = vmatpush.msrb.mxu0 %v875_v45 }
  0xfb   : > { %v507_v47 = vadd.f32 %v5003_v11, %v506_v46  ;;  %v876_v46 = vld [vmem:[#allocation5 + $0x1d8] sm:$0xff] }
  0xfc   : > { %1095 = vmatpush.msrb.mxu2 %v876_v46 }
  0xfd   : > { %v531_v50 = vmax.f32 %v507_v47, 0.0 }
 0x102   : > { %v508_v48 = vpop.f32.mrf.mxu0 }
 0x103   : > { %v509_v49 = vadd.f32 %v5003_v11, %v508_v48 }
 0x105   : > { %v532_v51 = vmax.f32 %v509_v49, 0.0 }
 0x107   : > { %v542_v52 = vpack.c.bf16 %v532_v51, %v531_v50  ;;  %v853_v50 = vld [vmem:[#allocation5 + $0x120] sm:$0xff]  ;;  %v871_v51 = vld [vmem:[#allocation5 + $0x1b0] sm:$0xff] }
 0x108   : > { %980 = vmatpush.msra.mxu3 %v853_v50  ;;  %1056 = vmatpush.msrb.mxu0 %v871_v51  ;;  %v844_v51 = vld [vmem:[#allocation5 + $0xd8] sm:$0xff] }
 0x109   : > { %680 = vmatmul.bf16.gmra.mxu1 %v542_v52  ;;  %729 = vmatmul.bf16.gmra.mxu2 %v542_v52  ;;  %v872_v52 = vld [vmem:[#allocation5 + $0x1b8] sm:$0xff] }
 0x10a   : > { %v511_v53 = vpop.f32.mrf.mxu0  ;;  %1096 = vmatpush.msrb.mxu2 %v872_v52 }
 0x10b   : > { %v512_v54 = vadd.f32 %v5003_v11, %v511_v53 }
 0x10d   : > { %v533_v57 = vmax.f32 %v512_v54, 0.0 }
 0x112   : > { %v513_v55 = vpop.f32.mrf.mxu0 }
 0x113   : > { %v514_v56 = vadd.f32 %v5003_v11, %v513_v55 }
 0x115   : > { %v534_v58 = vmax.f32 %v514_v56, 0.0 }
 0x117   : > { %v543_v59 = vpack.c.bf16 %v534_v58, %v533_v57  ;;  %v849_v58 = vld [vmem:[#allocation5 + $0x100] sm:$0xff] }
 0x118   : > { %981 = vmatpush.msra.mxu3 %v849_v58  ;;  %v915_v58 = vld [vmem:[#allocation5 + $0x310] sm:$0xff] }
 0x119   : > { %685 = vmatmul.bf16.gmra.mxu1 %v543_v59  ;;  %734 = vmatmul.bf16.gmra.mxu2 %v543_v59  ;;  %v867_v59 = vld [vmem:[#allocation5 + $0x190] sm:$0xff] }
 0x11a   : > { %v516_v60 = vpop.f32.mrf.mxu0  ;;  %1057 = vmatpush.msrb.mxu0 %v867_v59 }
 0x11b   : > { %v517_v61 = vadd.f32 %v5003_v11, %v516_v60  ;;  %v943_v60 = vld [vmem:[#allocation5 + $0x3f0] sm:$0xff] }
 0x11c   : > { %1074 = vmatpush.msrb.mxu1 %v943_v60  ;;  %v840_v60 = vld [vmem:[#allocation5 + $0xb8] sm:$0xff] }
 0x11d   : > { %v535_v0 = vmax.f32 %v517_v61, 0.0 }
 0x122   : > { %v518_v62 = vpop.f32.mrf.mxu0 }
 0x123   : > { %v519_v63 = vadd.f32 %v5003_v11, %v518_v62  ;;  %v868_v62 = vld [vmem:[#allocation5 + $0x198] sm:$0xff] }
 0x124   : > { %1097 = vmatpush.msrb.mxu2 %v868_v62 }
 0x125   : > { %v536_v1 = vmax.f32 %v519_v63, 0.0 }
 0x127   : > { %v544_v2 = vpack.c.bf16 %v536_v1, %v535_v0 }
 0x129   : > { %690 = vmatmul.bf16.gmra.mxu1 %v544_v2  ;;  %739 = vmatmul.bf16.gmra.mxu2 %v544_v2  ;;  %v845_v2 = vld [vmem:[#allocation5 + $0xe0] sm:$0xff] }
 0x12a   : > { %982 = vmatpush.msra.mxu3 %v845_v2  ;;  %v911_v2 = vld [vmem:[#allocation5 + $0x2f0] sm:$0xff] }
 0x136   : > { %v656_v3 = vpop.f32.mrf.mxu1 }
 0x137   : > { %v657_v11 = vadd.f32 %v656_v3, %v5024_v9  ;;  %v863_v3 = vld [vmem:[#allocation5 + $0x170] sm:$0xff] }
 0x138   : > { %1058 = vmatpush.msrb.mxu0 %v863_v3 }
 0x13c   : > { %v705_v4 = vpop.f32.mrf.mxu2 }
 0x13d   : > { %v706_v20 = vadd.f32 %v705_v4, %v5031_v14  ;;  %v939_v4 = vld [vmem:[#allocation5 + $0x3d0] sm:$0xff] }
 0x13e   : > { %v658_v5 = vpop.f32.mrf.mxu1  ;;  %1075 = vmatpush.msrb.mxu1 %v939_v4  ;;  %v836_v4 = vld [vmem:[#allocation5 + $0x98] sm:$0xff] }
 0x13f   : > { %v659_v10 = vadd.f32 %v658_v5, %v5024_v9  ;;  %v864_v5 = vld [vmem:[#allocation5 + $0x178] sm:$0xff] }
 0x140   : > { %1098 = vmatpush.msrb.mxu2 %v864_v5  ;;  %v941_v5 = vld [vmem:[#allocation5 + $0x3e0] sm:$0xff] }
 0x141   : > { %v745_v15 = vmax.f32 %v657_v11, %v659_v10  ;;  %v841_v10 = vld [vmem:[#allocation5 + $0xc0] sm:$0xff]  ;;  %v859_v11 = vld [vmem:[#allocation5 + $0x150] sm:$0xff] }
 0x142   : > { %983 = vmatpush.msra.mxu3 %v841_v10  ;;  %1059 = vmatpush.msrb.mxu0 %v859_v11  ;;  %v832_v10 = vld [vmem:[#allocation5 + $0x78] sm:$0xff]  ;;  %v937_v11 = vld [vmem:[#allocation5 + $0x3c0] sm:$0xff] }
 0x144   : > { %v707_v7 = vpop.f32.mrf.mxu2 }
 0x145   : > { %v708_v17 = vadd.f32 %v707_v7, %v5031_v14 }
 0x146   : > { %v661_v8 = vpop.f32.mrf.mxu1 }
 0x147   : > { %v5029_v12 = vadd.f32 %v661_v8, %v5024_v9  ;;  %v754_v23 = vmax.f32 %v706_v20, %v708_v17  ;;  %v860_v17 = vld [vmem:[#allocation5 + $0x158] sm:$0xff] }
 0x148   : > { %1099 = vmatpush.msrb.mxu2 %v860_v17  ;;  %v903_v17 = vld [vmem:[#allocation5 + $0x2b0] sm:$0xff] }
 0x149   : > { %v746_v18 = vmax.f32 %v745_v15, %v5029_v12 }
 0x14c   : > { %v710_v13 = vpop.f32.mrf.mxu2 }
 0x14d   : > { %v5040_v21 = vadd.f32 %v710_v13, %v5031_v14  ;;  %v935_v13 = vld [vmem:[#allocation5 + $0x3b0] sm:$0xff] }
 0x14e   : > { %v663_v16 = vpop.f32.mrf.mxu1  ;;  %1076 = vmatpush.msrb.mxu1 %v935_v13 }
 0x14f   : > { %v5036_v19 = vadd.f32 %v663_v16, %v5024_v9  ;;  %v755_v25 = vmax.f32 %v754_v23, %v5040_v21  ;;  %v837_v23 = vld [vmem:[#allocation5 + $0xa0] sm:$0xff] }
 0x150   : > { %984 = vmatpush.msra.mxu3 %v837_v23  ;;  %v933_v23 = vld [vmem:[#allocation5 + $0x3a0] sm:$0xff] }
 0x151   : > { %v747_v22 = vmax.f32 %v746_v18, %v5036_v19 }
 0x152   : > { %985 = vmatpush.msra.mxu3 %v833_v32  ;;  %v3616_v32 = vld [vmem:[#allocation2 + $0xe0] sm:$0xf] }
 0x153   : > { %v748_v37 = vrot.slane %v747_v22, 4 }
 0x154   : > { %v712_v24 = vpop.f32.mrf.mxu2  ;;  %986 = vmatpush.msra.mxu3 %v829_v39  ;;  %v4320_v39 = vld [vmem:[#allocation2 + $0xe4] sm:$0xf] }
 0x155   : > { %v5045_v26 = vadd.f32 %v712_v24, %v5031_v14  ;;  %v749_v47 = vmax.f32 %v747_v22, %v748_v37  ;;  %v855_v24 = vld [vmem:[#allocation5 + $0x130] sm:$0xff] }
 0x156   : > { %v666_v27 = vpop.f32.mrf.mxu1  ;;  %1060 = vmatpush.msrb.mxu0 %v855_v24  ;;  %v823_v24 = vld [vmem:[#allocation5 + $0x30] sm:$0xff] }
 0x157   : > { %v756_v28 = vmax.f32 %v755_v25, %v5045_v26  ;;  %v667_v42 = vadd.f32 %v666_v27, %v5024_v9  ;;  %v750_v61 = vrot.slane %v749_v47, 2  ;;  %v931_v25 = vld [vmem:[#allocation5 + $0x390] sm:$0xff] }
 0x158   : > { %1077 = vmatpush.msrb.mxu1 %v931_v25  ;;  %v899_v25 = vld [vmem:[#allocation5 + $0x290] sm:$0xff] }
 0x159   : > { %v757_v54 = vrot.slane %v756_v28, 4  ;;  %v751_v15 = vmax.f32 %v749_v47, %v750_v61  ;;  %v825_v47 = vld [vmem:[#allocation5 + $0x40] sm:$0xff] }
 0x15a   : > { %1078 = vmatpush.msrb.mxu1 %v927_v34  ;;  %987 = vmatpush.msra.mxu3 %v825_v47  ;;  %v819_v34 = vld [vmem:[#allocation5 + $0x10] sm:$0xff]  ;;  %v4316_v47 = vld [vmem:[#allocation2 + $0xc4] sm:$0xf] }
 0x15b   : > { %v758_v6 = vmax.f32 %v756_v28, %v757_v54  ;;  %v856_v28 = vld [vmem:[#allocation5 + $0x138] sm:$0xff]  ;;  %v752_v36 = vrot.slane %v751_v15, 1 }
 0x15c   : > { %v715_v29 = vpop.f32.mrf.mxu2  ;;  %1100 = vmatpush.msrb.mxu2 %v856_v28  ;;  %1079 = vmatpush.msrb.mxu1 %v923_v41  ;;  %v824_v28 = vld [vmem:[#allocation5 + $0x38] sm:$0xff] }
 0x15d   : > { %v716_v63 = vadd.f32 %v715_v29, %v5031_v14  ;;  %v759_v29 = vrot.slane %v758_v6, 2  ;;  %v753_v52 = vmax.f32 %v751_v15, %v752_v36  ;;  %v820_v36 = vld [vmem:[#allocation5 + $0x18] sm:$0xff] }
 0x15e   : > { %v668_v30 = vpop.f32.mrf.mxu1 }
 0x15f   : > { %v669_v38 = vadd.f32 %v668_v30, %v5024_v9  ;;  %v760_v44 = vmax.f32 %v758_v6, %v759_v29 }
 0x161   : > { %v763_v49 = vmax.f32 %v667_v42, %v669_v38  ;;  %v848_v42 = vld [vmem:[#allocation5 + $0xf8] sm:$0xff]  ;;  %v761_v61 = vrot.slane %v760_v44, 1 }
 0x163   : > { %v762_v13 = vmax.f32 %v760_v44, %v761_v61  ;;  %v921_v44 = vld [vmem:[#allocation5 + $0x340] sm:$0xff] }
 0x164   : > { %v717_v33 = vpop.f32.mrf.mxu2 }
 0x165   : > { %v718_v55 = vadd.f32 %v717_v33, %v5031_v14  ;;  %v851_v33 = vld [vmem:[#allocation5 + $0x110] sm:$0xff] }
 0x166   : > { %v671_v35 = vpop.f32.mrf.mxu1  ;;  %1061 = vmatpush.msrb.mxu0 %v851_v33  ;;  %v4322_v33 = vld [vmem:[#allocation2 + $0xec] sm:$0xf0] }
 0x167   : > { %v5051_v43 = vadd.f32 %v671_v35, %v5024_v9  ;;  %v772_v7 = vmax.f32 %v716_v63, %v718_v55  ;;  %v852_v35 = vld [vmem:[#allocation5 + $0x118] sm:$0xff]  ;;  %v821_v55 = vld [vmem:[#allocation5 + $0x20] sm:$0xff] }
 0x168   : > { %1101 = vmatpush.msrb.mxu2 %v852_v35  ;;  %1062 = vmatpush.msrb.mxu0 %v847_v40  ;;  %v817_v63 = vld [vmem:[#allocation5] sm:$0xff]  ;;  %v895_v35 = vld [vmem:[#allocation5 + $0x270] sm:$0xff] }
 0x169   : > { %v764_v56 = vmax.f32 %v763_v49, %v5051_v43  ;;  %v919_v49 = vld [vmem:[#allocation5 + $0x330] sm:$0xff]  ;;  %988 = vmatpush.msra.mxu3 %v821_v55  ;;  %v3744_v55 = vld [vmem:[#allocation2 + $0x1e0] sm:$0xf] }
 0x16a   : > { %1102 = vmatpush.msrb.mxu2 %v848_v42  ;;  %1080 = vmatpush.msrb.mxu1 %v919_v49  ;;  %v3618_v40 = vld [vmem:[#allocation2 + $0xf0] sm:$0xf0] }
 0x16b   : > { %989 = vmatpush.msra.mxu3 %v817_v63  ;;  %v3621_v41 = vor.u32 %v4320_v39, %v3618_v40  ;;  %v891_v42 = vld [vmem:[#allocation5 + $0x250] sm:$0xff]  ;;  %v3584_v63 = vld [vmem:[#allocation2 + $0xa0] sm:$0xf] }
 0x16c   : > { %v720_v48 = vpop.f32.mrf.mxu2  ;;  %1103 = vmatpush.msrb.mxu2 %v844_v51  ;;  %1081 = vmatpush.msrb.mxu1 %v915_v58  ;;  %v3602_v51 = vld [vmem:[#allocation2 + $0xd0] sm:$0xf0]  ;;  %v893_v40 = vld [vmem:[#allocation5 + $0x260] sm:$0xff] }
 0x16d   : > { %v5060_v0 = vadd.f32 %v720_v48, %v5031_v14  ;;  %v843_v48 = vld [vmem:[#allocation5 + $0xd0] sm:$0xff]  ;;  %994 = vmatpush.msrb.mxu3 %v941_v5 }
 0x16e   : > { %v673_v53 = vpop.f32.mrf.mxu1  ;;  %1063 = vmatpush.msrb.mxu0 %v843_v48  ;;  %1104 = vmatpush.msrb.mxu2 %v840_v60  ;;  %v887_v48 = vld [vmem:[#allocation5 + $0x230] sm:$0xff] }
 0x16f   : > { %v5056_v57 = vadd.f32 %v673_v53, %v5024_v9  ;;  %v773_v18 = vmax.f32 %v772_v7, %v5060_v0  ;;  %1082 = vmatpush.msrb.mxu1 %v911_v2  ;;  %v831_v7 = vld [vmem:[#allocation5 + $0x70] sm:$0xff]  ;;  %995 = vmatpush.msrb.mxu3 %v937_v11 }
 0x170   : > { %1105 = vmatpush.msrb.mxu2 %v836_v4  ;;  %v883_v58 = vld [vmem:[#allocation5 + $0x210] sm:$0xff]  ;;  %v4312_v4 = vld [vmem:[#allocation2 + $0xa4] sm:$0xf] }
 0x171   : > { %v765_v1 = vmax.f32 %v764_v56, %v5056_v57  ;;  %v839_v56 = vld [vmem:[#allocation5 + $0xb0] sm:$0xff]  ;;  %996 = vmatpush.msrb.mxu3 %v933_v23 }
 0x172   : > { %1064 = vmatpush.msrb.mxu0 %v839_v56  ;;  %1106 = vmatpush.msrb.mxu2 %v832_v10  ;;  %v4354_v56 = vld [vmem:[#allocation2 + $0x1ec] sm:$0xf0]  ;;  %v3586_v5 = vld [vmem:[#allocation2 + $0xb0] sm:$0xf0] }
 0x173   : > { %v766_v8 = vrot.slane %v765_v1, 4  ;;  %v3745_v60 = vor.u32 %v4354_v56, %v3744_v55  ;;  %v4350_v10 = vld [vmem:[#allocation2 + $0x1cc] sm:$0xf0]  ;;  %v3570_v23 = vld [vmem:[#allocation2 + $0x90] sm:$0xf0] }
 0x174   : > { %v722_v16 = vpop.f32.mrf.mxu2  ;;  %v3554_v39 = vld [vmem:[#allocation2 + $0x70] sm:$0xf0] }
 0x175   : > { %v767_v20 = vmax.f32 %v765_v1, %v766_v8  ;;  %v5065_v22 = vadd.f32 %v722_v16, %v5031_v14  ;;  %v835_v1 = vld [vmem:[#allocation5 + $0x90] sm:$0xff] }
 0x176   : > { %v5067_v27 = vpop.f32.mrf.mxu1  ;;  %1065 = vmatpush.msrb.mxu0 %v835_v1  ;;  %v907_v8 = vld [vmem:[#allocation5 + $0x2d0] sm:$0xff] }
 0x177   : > { %v768_v30 = vrot.slane %v767_v20, 2  ;;  %v774_v31 = vmax.f32 %v773_v18, %v5065_v22  ;;  %1083 = vmatpush.msrb.mxu1 %v907_v8  ;;  %v827_v16 = vld [vmem:[#allocation5 + $0x50] sm:$0xff]  ;;  %v828_v18 = vld [vmem:[#allocation5 + $0x58] sm:$0xff]  ;;  %v3728_v8 = vld [vmem:[#allocation2 + $0x1c0] sm:$0xf]  ;;  %v677_v56 = vadd.f32 %v5067_v27, %v5024_v9 }
 0x178   : > { %1066 = vmatpush.msrb.mxu0 %v831_v7  ;;  %1107 = vmatpush.msrb.mxu2 %v828_v18  ;;  %v4314_v1 = vld [vmem:[#allocation2 + $0xac] sm:$0xf0]  ;;  %v3589_v7 = vor.u32 %v4312_v4, %v3586_v5  ;;  %v3729_v11 = vor.u32 %v4350_v10, %v3728_v8  ;;  %v4308_v18 = vld [vmem:[#allocation2 + $0x84] sm:$0xf]  ;;  %v3538_v55 = vld [vmem:[#allocation2 + $0x50] sm:$0xf0] }
 0x179   : > { %v769_v37 = vmax.f32 %v767_v20, %v768_v30  ;;  %v775_v38 = vrot.slane %v774_v31, 4  ;;  %1084 = vmatpush.msrb.mxu1 %v903_v17  ;;  %v3585_v2 = vor.u32 %v4314_v1, %v3584_v63  ;;  %v3680_v63 = vld [vmem:[#allocation2 + $0x160] sm:$0xf]  ;;  %v4338_v1 = vld [vmem:[#allocation2 + $0x16c] sm:$0xf0] }
 0x17a   : > { %1067 = vmatpush.msrb.mxu0 %v827_v16  ;;  %1108 = vmatpush.msrb.mxu2 %v824_v28  ;;  %v4310_v16 = vld [vmem:[#allocation2 + $0x8c] sm:$0xf0]  ;;  %v3573_v28 = vor.u32 %v4308_v18, %v3570_v23  ;;  %v881_v27 = vld [vmem:[#allocation5 + $0x200] sm:$0xff] }
 0x17b   : > { %v770_v45 = vrot.slane %v769_v37, 1  ;;  %v776_v46 = vmax.f32 %v774_v31, %v775_v38  ;;  %v929_v31 = vld [vmem:[#allocation5 + $0x380] sm:$0xff]  ;;  %1085 = vmatpush.msrb.mxu1 %v899_v25 }
 0x17c   : > { %v5070_v50 = vpop.f32.mrf.mxu2  ;;  %1068 = vmatpush.msrb.mxu0 %v823_v24  ;;  %997 = vmatpush.msrb.mxu3 %v929_v31  ;;  %v925_v38 = vld [vmem:[#allocation5 + $0x360] sm:$0xff] }
 0x17d   : > { %v771_v53 = vmax.f32 %v769_v37, %v770_v45  ;;  %v777_v54 = vrot.slane %v776_v46, 2  ;;  %v3617_v37 = vor.u32 %v4322_v33, %v3616_v32  ;;  %1086 = vmatpush.msrb.mxu1 %v895_v35  ;;  %1109 = vmatpush.msrb.mxu2 %v820_v36  ;;  %v3600_v45 = vld [vmem:[#allocation2 + $0xc0] sm:$0xf]  ;;  %v4346_v32 = vld [vmem:[#allocation2 + $0x1ac] sm:$0xf0]  ;;  %v726_v18 = vadd.f32 %v5070_v50, %v5031_v14 }
 0x17e   : > { %v5072_v59 = vpop.f32.mrf.mxu1  ;;  %1069 = vmatpush.msrb.mxu0 %v819_v34  ;;  %998 = vmatpush.msrb.mxu3 %v925_v38  ;;  %v901_v25 = vld [vmem:[#allocation5 + $0x2a0] sm:$0xff] }
 0x17f   : > { %v778_v62 = vmax.f32 %v776_v46, %v777_v54  ;;  %v5075_v3 = vsel %vm963_vm2, %v771_v53, %v753_v52  ;;  %v4318_v46 = vld [vmem:[#allocation2 + $0xcc] sm:$0xf0]  ;;  %1584 = vmatpush.bf16.msra.mxu2 %v3621_v41  ;;  %1087 = vmatpush.msrb.mxu1 %v891_v42  ;;  %v917_v53 = vld [vmem:[#allocation5 + $0x320] sm:$0xff]  ;;  %v3605_v54 = vor.u32 %v4316_v47, %v3602_v51 }
 0x180   : > { %1526 = vmatpush.bf16.msra.mxu0 %v3617_v37  ;;  %v3601_v49 = vor.u32 %v4318_v46, %v3600_v45  ;;  %999 = vmatpush.msrb.mxu3 %v921_v44  ;;  %v3712_v31 = vld [vmem:[#allocation2 + $0x1a0] sm:$0xf]  ;;  %v4306_v37 = vld [vmem:[#allocation2 + $0x6c] sm:$0xf0]  ;;  %v4304_v38 = vld [vmem:[#allocation2 + $0x64] sm:$0xf]  ;;  %v679_v47 = vadd.f32 %v5072_v59, %v5024_v9 }
 0x181   : > { %v779_v6 = vrot.slane %v778_v62, 1  ;;  %1088 = vmatpush.msrb.mxu1 %v887_v48  ;;  %v3713_v33 = vor.u32 %v4346_v32, %v3712_v31  ;;  %v897_v35 = vld [vmem:[#allocation5 + $0x280] sm:$0xff]  ;;  %v3557_v42 = vor.u32 %v4304_v38, %v3554_v39  ;;  %v4342_v45 = vld [vmem:[#allocation2 + $0x18c] sm:$0xf0] }
 0x182   : > { %1000 = vmatpush.msrb.mxu3 %v917_v53  ;;  %v3552_v36 = vld [vmem:[#allocation2 + $0x60] sm:$0xf]  ;;  %v4302_v51 = vld [vmem:[#allocation2 + $0x4c] sm:$0xf0]  ;;  %v781_v4 = vmax.f32 %v677_v56, %v679_v47  ;;  %v4292_v50 = vld [vmem:[#allocation2 + $0x4] sm:$0xf] }
 0x183   : > { %v780_v15 = vmax.f32 %v778_v62, %v779_v6  ;;  %v913_v62 = vld [vmem:[#allocation5 + $0x300] sm:$0xff]  ;;  %1585 = vmatpush.bf16.msra.mxu2 %v3605_v54  ;;  %1089 = vmatpush.msrb.mxu1 %v883_v58  ;;  %v3553_v41 = vor.u32 %v4306_v37, %v3552_v36  ;;  %v4294_v31 = vld [vmem:[#allocation2 + $0xc] sm:$0xf0]  ;;  %v3506_v37 = vld [vmem:[#allocation2 + $0x10] sm:$0xf0] }
 0x184   : > { %v5077_v20 = vpop.f32.mrf.mxu2  ;;  %1527 = vmatpush.bf16.msra.mxu0 %v3601_v49  ;;  %1001 = vmatpush.msrb.mxu3 %v913_v62  ;;  %v909_v6 = vld [vmem:[#allocation5 + $0x2e0] sm:$0xff]  ;;  %v3509_v38 = vor.u32 %v4292_v50, %v3506_v37  ;;  %v4330_v39 = vld [vmem:[#allocation2 + $0x12c] sm:$0xf0] }
 0x185   : > { %v5080_v29 = vsel %vm963_vm2, %v780_v15, %v762_v13  ;;  %1555 = vmatpush.bf16.msra.mxu1 %v3745_v60  ;;  %v905_v13 = vld [vmem:[#allocation5 + $0x2c0] sm:$0xff]  ;;  %v728_v8 = vadd.f32 %v5077_v20, %v5031_v14  ;;  %v4326_v47 = vld [vmem:[#allocation2 + $0x10c] sm:$0xf0] }
 0x186   : > { %v5082_v30 = vpop.f32.mrf.mxu1  ;;  %1002 = vmatpush.msrb.mxu3 %v909_v6  ;;  %v3568_v15 = vld [vmem:[#allocation2 + $0x80] sm:$0xf]  ;;  %v4300_v54 = vld [vmem:[#allocation2 + $0x44] sm:$0xf] }
 0x187   : > { %1586 = vmatpush.bf16.msra.mxu2 %v3589_v7  ;;  %v3569_v17 = vor.u32 %v4310_v16, %v3568_v15  ;;  %v3696_v44 = vld [vmem:[#allocation2 + $0x180] sm:$0xf]  ;;  %v5098_v58 = vadd.f32 %v5082_v30, %v5024_v9  ;;  %v3541_v62 = vor.u32 %v4300_v54, %v3538_v55  ;;  %v4298_v7 = vld [vmem:[#allocation2 + $0x2c] sm:$0xf0]  ;;  %v3522_v15 = vld [vmem:[#allocation2 + $0x30] sm:$0xf0]  ;;  %v790_v32 = vmax.f32 %v726_v18, %v728_v8 }
 0x188   : > { %1528 = vmatpush.bf16.msra.mxu0 %v3585_v2  ;;  %1003 = vmatpush.msrb.mxu3 %v905_v13  ;;  %v3697_v46 = vor.u32 %v4342_v45, %v3696_v44  ;;  %v889_v48 = vld [vmem:[#allocation5 + $0x240] sm:$0xff]  ;;  %v3681_v2 = vor.u32 %v4338_v1, %v3680_v63 }
 0x189   : > { %1556 = vmatpush.bf16.msra.mxu1 %v3729_v11  ;;  %v3536_v49 = vld [vmem:[#allocation2 + $0x40] sm:$0xf]  ;;  %v782_v10 = vmax.f32 %v781_v4, %v5098_v58  ;;  %v4296_v13 = vld [vmem:[#allocation2 + $0x24] sm:$0xf] }
 0x18a   : > { %1004 = vmatpush.msrb.mxu3 %v901_v25  ;;  %v3537_v53 = vor.u32 %v4302_v51, %v3536_v49  ;;  %v885_v59 = vld [vmem:[#allocation5 + $0x220] sm:$0xff]  ;;  %v3525_v16 = vor.u32 %v4296_v13, %v3522_v15 }
 0x18b   : > { %1587 = vmatpush.bf16.msra.mxu2 %v3573_v28  ;;  %v3520_v30 = vld [vmem:[#allocation2 + $0x20] sm:$0xf] }
 0x18c   : > { %v5084_v52 = vpop.f32.mrf.mxu2  ;;  %1529 = vmatpush.bf16.msra.mxu0 %v3569_v17  ;;  %1005 = vmatpush.msrb.mxu3 %v897_v35  ;;  %v3521_v11 = vor.u32 %v4298_v7, %v3520_v30  ;;  %v4334_v17 = vld [vmem:[#allocation2 + $0x14c] sm:$0xf0]  ;;  %v3504_v28 = vld [vmem:[#allocation2] sm:$0xf] }
 0x18d   : > { %1557 = vmatpush.bf16.msra.mxu1 %v3713_v33  ;;  %v5113_v23 = vadd.f32 %v5084_v52, %v5031_v14  ;;  %v3505_v36 = vor.u32 %v4294_v31, %v3504_v28  ;;  %v3648_v52 = vld [vmem:[#allocation2 + $0x120] sm:$0xf] }
 0x18e   : > { %v5086_v61 = vpop.f32.mrf.mxu1  ;;  %1006 = vmatpush.msrb.mxu3 %v893_v40  ;;  %v3649_v44 = vor.u32 %v4330_v39, %v3648_v52 }
 0x18f   : > { %1588 = vmatpush.bf16.msra.mxu2 %v3557_v42  ;;  %v5104_v5 = vadd.f32 %v5086_v61, %v5024_v9  ;;  %v3664_v61 = vld [vmem:[#allocation2 + $0x140] sm:$0xf]  ;;  %v791_v40 = vmax.f32 %v790_v32, %v5113_v23 }
 0x190   : > { %1530 = vmatpush.bf16.msra.mxu0 %v3553_v41  ;;  %1007 = vmatpush.msrb.mxu3 %v889_v48  ;;  %v3665_v20 = vor.u32 %v4334_v17, %v3664_v61 }
 0x191   : > { %1558 = vmatpush.bf16.msra.mxu1 %v3697_v46  ;;  %v783_v25 = vmax.f32 %v782_v10, %v5104_v5  ;;  %v3632_v46 = vld [vmem:[#allocation2 + $0x100] sm:$0xf] }
 0x192   : > { %1008 = vmatpush.msrb.mxu3 %v885_v59  ;;  %v3633_v49 = vor.u32 %v4326_v47, %v3632_v46  ;;  %v5151_v47 = vpack.c.bf16 %v5036_v19, %v5029_v12  ;;  %v850_v19 = vld [vmem:[#allocation5 + $0x108] sm:$0xff] }
 0x193   : > { %1589 = vmatpush.bf16.msra.mxu2 %v3541_v62  ;;  %v784_v41 = vrot.slane %v783_v25, 4 }
 0x194   : > { %v5088_v24 = vpop.f32.mrf.mxu2  ;;  %1531 = vmatpush.bf16.msra.mxu0 %v3537_v53  ;;  %1009 = vmatpush.msrb.mxu3 %v881_v27 }
 0x195   : > { %1559 = vmatpush.bf16.msra.mxu1 %v3681_v2  ;;  %v5118_v33 = vadd.f32 %v5088_v24, %v5031_v14  ;;  %v785_v48 = vmax.f32 %v783_v25, %v784_v41  ;;  %v874_v41 = vld [vmem:[#allocation5 + $0x1c8] sm:$0xff] }
 0x196   : > { %v5090_v34 = vpop.f32.mrf.mxu1 }
 0x197   : > { %1590 = vmatpush.bf16.msra.mxu2 %v3525_v16  ;;  %v792_v45 = vmax.f32 %v791_v40, %v5118_v33  ;;  %v687_v51 = vadd.f32 %v5090_v34, %v5024_v9  ;;  %v786_v59 = vrot.slane %v785_v48, 2 }
 0x198   : > { %1532 = vmatpush.bf16.msra.mxu0 %v3521_v11 }
 0x199   : > { %1560 = vmatpush.bf16.msra.mxu1 %v3665_v20  ;;  %v793_v54 = vrot.slane %v792_v45, 4  ;;  %v787_v7 = vmax.f32 %v785_v48, %v786_v59  ;;  %v862_v48 = vld [vmem:[#allocation5 + $0x168] sm:$0xff]  ;;  %v5159_v59 = vpack.c.bf16 %v5045_v26, %v5040_v21  ;;  %v4315_v26 = vld [vmem:[#allocation2 + $0xb4] sm:$0xf0] }
 0x19a   : > { %v3592_v21 = vld [vmem:[#allocation2 + $0xa8] sm:$0xf] }
 0x19b   : > { %1591 = vmatpush.bf16.msra.mxu2 %v3509_v38  ;;  %v794_v4 = vmax.f32 %v792_v45, %v793_v54  ;;  %v788_v17 = vrot.slane %v787_v7, 1 }
 0x19c   : > { %v5100_v60 = vpop.f32.mrf.mxu2  ;;  %1533 = vmatpush.bf16.msra.mxu0 %v3505_v36 }
 0x19d   : > { %1561 = vmatpush.bf16.msra.mxu1 %v3649_v44  ;;  %v795_v11 = vrot.slane %v794_v4, 2  ;;  %v789_v31 = vmax.f32 %v787_v7, %v788_v17  ;;  %v870_v44 = vld [vmem:[#allocation5 + $0x1a8] sm:$0xff]  ;;  %v4355_v7 = vld [vmem:[#allocation2 + $0x1f4] sm:$0xf0] }
 0x19e   : > { %v688_v6 = vpop.f32.mrf.mxu1  ;;  %v3736_v17 = vld [vmem:[#allocation2 + $0x1c8] sm:$0xf] }
 0x19f   : > { %v689_v24 = vadd.f32 %v688_v6, %v5024_v9  ;;  %v736_v6 = vadd.f32 %v5100_v60, %v5031_v14  ;;  %v796_v60 = vmax.f32 %v794_v4, %v795_v11  ;;  %v966_v38 = vsel %vm965_vm3, %v789_v31, %v5075_v3  ;;  %v3610_v4 = vld [vmem:[#allocation2 + $0xd8] sm:$0xf0]  ;;  %v4313_v11 = vld [vmem:[#allocation2 + $0xac] sm:$0xf] }
 0x1a0   : > { %v4309_v31 = vld [vmem:[#allocation2 + $0x8c] sm:$0xf] }
 0x1a1   : > { %1562 = vmatpush.bf16.msra.mxu1 %v3633_v49  ;;  %v799_v56 = vmax.f32 %v687_v51, %v689_v24  ;;  %v797_v36 = vrot.slane %v796_v60, 1  ;;  %v866_v24 = vld [vmem:[#allocation5 + $0x188] sm:$0xff] }
 0x1a2   : > { %v858_v49 = vld [vmem:[#allocation5 + $0x148] sm:$0xff] }
 0x1a3   : > { %v798_v40 = vmax.f32 %v796_v60, %v797_v36  ;;  %v3624_v51 = vld [vmem:[#allocation2 + $0xe8] sm:$0xf]  ;;  %v5164_v36 = vpack.c.bf16 %v5056_v57, %v5051_v43  ;;  %v3562_v43 = vld [vmem:[#allocation2 + $0x78] sm:$0xf0] }
 0x1a4   : > { %v737_v35 = vpop.f32.mrf.mxu2  ;;  %v822_v57 = vld [vmem:[#allocation5 + $0x28] sm:$0xff] }
 0x1a5   : > { %v738_v63 = vadd.f32 %v737_v35, %v5031_v14  ;;  %v970_v3 = vsel %vm965_vm3, %v798_v40, %v5080_v29  ;;  %v4321_v29 = vld [vmem:[#allocation2 + $0xec] sm:$0xf] }
 0x1a6   : > { %v691_v42 = vpop.f32.mrf.mxu1 }
 0x1a7   : > { %v692_v53 = vadd.f32 %v691_v42, %v5024_v9  ;;  %v808_v8 = vmax.f32 %v736_v6, %v738_v63  ;;  %v4319_v63 = vld [vmem:[#allocation2 + $0xd4] sm:$0xf0]  ;;  %v846_v6 = vld [vmem:[#allocation5 + $0xe8] sm:$0xff] }
 0x1a9   : > { %v800_v1 = vmax.f32 %v799_v56, %v692_v53  ;;  %v854_v56 = vld [vmem:[#allocation5 + $0x128] sm:$0xff] }
 0x1ac   : > { %v740_v55 = vpop.f32.mrf.mxu2 }
 0x1ad   : > { %v741_v27 = vadd.f32 %v740_v55, %v5031_v14  ;;  %v3626_v55 = vld [vmem:[#allocation2 + $0xf8] sm:$0xf0] }
 0x1ae   : > { %v693_v62 = vpop.f32.mrf.mxu1  ;;  %v3629_v12 = vor.u32 %v4321_v29, %v3626_v55  ;;  %v3544_v29 = vld [vmem:[#allocation2 + $0x48] sm:$0xf]  ;;  %v4301_v55 = vld [vmem:[#allocation2 + $0x4c] sm:$0xf] }
 0x1af   : > { %v694_v2 = vadd.f32 %v693_v62, %v5024_v9  ;;  %v809_v15 = vmax.f32 %v808_v8, %v741_v27  ;;  %v3608_v62 = vld [vmem:[#allocation2 + $0xc8] sm:$0xf] }
 0x1b0   : > { %v842_v8 = vld [vmem:[#allocation5 + $0xc8] sm:$0xff] }
 0x1b1   : > { %v801_v34 = vmax.f32 %v800_v1, %v694_v2  ;;  %v5131_v30 = vpack.c.bf16 %v694_v2, %v692_v53  ;;  %v4323_v53 = vld [vmem:[#allocation2 + $0xf4] sm:$0xf0]  ;;  %v4317_v1 = vld [vmem:[#allocation2 + $0xcc] sm:$0xf]  ;;  %v3609_v2 = vor.u32 %v4319_v63, %v3608_v62  ;;  %v3688_v63 = vld [vmem:[#allocation2 + $0x168] sm:$0xf] }
 0x1b2   : > { %v3625_v54 = vor.u32 %v4323_v53, %v3624_v51  ;;  %v5170_v53 = vpack.c.bf16 %v5065_v22, %v5060_v0  ;;  %v3528_v22 = vld [vmem:[#allocation2 + $0x28] sm:$0xf] }
 0x1b3   : > { %v802_v10 = vrot.slane %v801_v34, 4 }
 0x1b4   : > { %v742_v13 = vpop.f32.mrf.mxu2 }
 0x1b5   : > { %v803_v16 = vmax.f32 %v801_v34, %v802_v10  ;;  %v743_v61 = vadd.f32 %v742_v13, %v5031_v14  ;;  %v878_v14 = vld [vmem:[#allocation5 + $0x1e8] sm:$0xff]  ;;  %v3593_v13 = vor.u32 %v4315_v26, %v3592_v21  ;;  %v4335_v21 = vld [vmem:[#allocation2 + $0x154] sm:$0xf0] }
 0x1b6   : > { %v3752_v34 = vld [vmem:[#allocation2 + $0x1e8] sm:$0xf] }
 0x1b7   : > { %v804_v9 = vrot.slane %v803_v16, 2  ;;  %v810_v18 = vmax.f32 %v809_v15, %v743_v61  ;;  %v5134_v25 = vpack.c.bf16 %v743_v61, %v741_v27  ;;  %v3613_v27 = vor.u32 %v4317_v1, %v3610_v4  ;;  %v3594_v15 = vld [vmem:[#allocation2 + $0xb8] sm:$0xf0]  ;;  %v4339_v1 = vld [vmem:[#allocation2 + $0x174] sm:$0xf0]  ;;  %v930_v26 = vld [vmem:[#allocation5 + $0x388] sm:$0xff] }
 0x1b8   : > { %v3753_v10 = vor.u32 %v4355_v7, %v3752_v34  ;;  %v3597_v61 = vor.u32 %v4313_v11, %v3594_v15  ;;  %v3689_v0 = vor.u32 %v4339_v1, %v3688_v63  ;;  %v4299_v4 = vld [vmem:[#allocation2 + $0x34] sm:$0xf0]  ;;  %v4297_v34 = vld [vmem:[#allocation2 + $0x2c] sm:$0xf]  ;;  %v3530_v7 = vld [vmem:[#allocation2 + $0x38] sm:$0xf0]  ;;  %v5176_v15 = vpack.c.bf16 %v5104_v5, %v5098_v58 }
 0x1b9   : > { %v805_v20 = vmax.f32 %v803_v16, %v804_v9  ;;  %v811_v28 = vrot.slane %v810_v18, 4  ;;  %v838_v16 = vld [vmem:[#allocation5 + $0xa8] sm:$0xff]  ;;  %v4351_v9 = vld [vmem:[#allocation2 + $0x1d4] sm:$0xf0] }
 0x1ba   : > { %v3737_v60 = vor.u32 %v4351_v9, %v3736_v17  ;;  %v4293_v17 = vld [vmem:[#allocation2 + $0xc] sm:$0xf]  ;;  %v3514_v9 = vld [vmem:[#allocation2 + $0x18] sm:$0xf0]  ;;  %v3640_v58 = vld [vmem:[#allocation2 + $0x108] sm:$0xf] }
 0x1bb   : > { %v806_v32 = vrot.slane %v805_v20, 1  ;;  %v812_v35 = vmax.f32 %v810_v18, %v811_v28  ;;  %v834_v18 = vld [vmem:[#allocation5 + $0x88] sm:$0xff]  ;;  %v4311_v28 = vld [vmem:[#allocation2 + $0x94] sm:$0xf0] }
 0x1bc   : > { %v4327_v5 = vld [vmem:[#allocation2 + $0x114] sm:$0xf0] }
 0x1bd   : > { %v813_v50 = vrot.slane %v812_v35, 2  ;;  %v807_v37 = vmax.f32 %v805_v20, %v806_v32  ;;  %v3576_v20 = vld [vmem:[#allocation2 + $0x88] sm:$0xf]  ;;  %v884_v63 = vld [vmem:[#allocation5 + $0x218] sm:$0xff] }
 0x1be   : > { %v3577_v32 = vor.u32 %v4311_v28, %v3576_v20  ;;  %v4331_v20 = vld [vmem:[#allocation2 + $0x134] sm:$0xf0]  ;;  %v922_v28 = vld [vmem:[#allocation5 + $0x348] sm:$0xff] }
 0x1bf   : > { %v814_v52 = vmax.f32 %v812_v35, %v813_v50  ;;  %v5139_v39 = vsel %vm967_vm4, %v807_v37, %v966_v38  ;;  %v3578_v35 = vld [vmem:[#allocation2 + $0x98] sm:$0xf0]  ;;  %v830_v50 = vld [vmem:[#allocation5 + $0x68] sm:$0xff] }
 0x1c0   : > { %990 = vmatmul.f32.vlgmr.msra.gmra.mxu3 %v5139_v39  ;;  %1070 = vmatmul.f32.vlgmr.msrb.gmra.mxu0 %v5139_v39  ;;  %v3581_v37 = vor.u32 %v4309_v31, %v3578_v35  ;;  %v3720_v38 = vld [vmem:[#allocation2 + $0x1a8] sm:$0xf]  ;;  %v5182_v35 = vpack.c.bf16 %v5118_v33, %v5113_v23 }
 0x1c1   : > { %v815_v42 = vrot.slane %v814_v52, 1  ;;  %1014 = vmatpush.msra.mxu3 %v878_v14  ;;  %1110 = vmatmul.f32.vlgmr.msrb.gmra.mxu2 %v5139_v39  ;;  %v4347_v14 = vld [vmem:[#allocation2 + $0x1b4] sm:$0xf0]  ;;  %v890_v23 = vld [vmem:[#allocation5 + $0x248] sm:$0xff] }
 0x1c2   : > { %1642 = vmatpush.bf16.msrb.mxu0 %v3625_v54  ;;  %1700 = vmatpush.bf16.msrb.mxu2 %v3629_v12  ;;  %v3721_v40 = vor.u32 %v4347_v14, %v3720_v38  ;;  %v4303_v54 = vld [vmem:[#allocation2 + $0x54] sm:$0xf0]  ;;  %v3546_v12 = vld [vmem:[#allocation2 + $0x58] sm:$0xf0]  ;;  %v910_v38 = vld [vmem:[#allocation5 + $0x2e8] sm:$0xff] }
 0x1c3   : > { %1015 = vmatpush.msra.mxu3 %v874_v41  ;;  %v816_v45 = vmax.f32 %v814_v52, %v815_v42  ;;  %v826_v52 = vld [vmem:[#allocation5 + $0x48] sm:$0xff]  ;;  %v4307_v42 = vld [vmem:[#allocation2 + $0x74] sm:$0xf0]  ;;  %v3549_v62 = vor.u32 %v4301_v55, %v3546_v12 }
 0x1c4   : > { %v3560_v41 = vld [vmem:[#allocation2 + $0x68] sm:$0xf]  ;;  %v900_v55 = vld [vmem:[#allocation5 + $0x298] sm:$0xff] }
 0x1c5   : > { %1016 = vmatpush.msra.mxu3 %v870_v44  ;;  %v5147_v46 = vsel %vm967_vm4, %v816_v45, %v970_v3  ;;  %v4305_v44 = vld [vmem:[#allocation2 + $0x6c] sm:$0xf]  ;;  %v3561_v45 = vor.u32 %v4307_v42, %v3560_v41  ;;  %v3704_v3 = vld [vmem:[#allocation2 + $0x188] sm:$0xf]  ;;  %v892_v12 = vld [vmem:[#allocation5 + $0x258] sm:$0xff] }
 0x1c6   : > { %1090 = vmatmul.f32.vlgmr.msrb.gmra.mxu1 %v5147_v46  ;;  %1643 = vmatpush.bf16.msrb.mxu0 %v3609_v2  ;;  %v938_v2 = vld [vmem:[#allocation5 + $0x3c8] sm:$0xff] }
 0x1c7   : > { %1017 = vmatpush.msra.mxu3 %v866_v24  ;;  %1701 = vmatpush.bf16.msrb.mxu2 %v3613_v27  ;;  %v3565_v24 = vor.u32 %v4305_v44, %v3562_v43  ;;  %v3529_v27 = vor.u32 %v4299_v4, %v3528_v22  ;;  %v906_v14 = vld [vmem:[#allocation5 + $0x2c8] sm:$0xff]  ;;  %v944_v44 = vld [vmem:[#allocation5 + $0x3f8] sm:$0xff]  ;;  %v4344_v4 = vld [vmem:[#allocation2 + $0x1a4] sm:$0xf] }
 0x1c8   : > { %1010 = vmatmul.f32.vlgmr.msrb.gmra.mxu3 %v5147_v46  ;;  %1534 = vmatmul.bf16.vlgmr.msra.gmra.mxu0 %v5151_v47  ;;  %v894_v41 = vld [vmem:[#allocation5 + $0x268] sm:$0xff]  ;;  %v936_v43 = vld [vmem:[#allocation5 + $0x3b8] sm:$0xff] }
 0x1c9   : > { %1018 = vmatpush.msra.mxu3 %v862_v48  ;;  %1592 = vmatmul.bf16.vlgmr.msra.gmra.mxu2 %v5151_v47  ;;  %v4343_v48 = vld [vmem:[#allocation2 + $0x194] sm:$0xf0]  ;;  %v886_v33 = vld [vmem:[#allocation5 + $0x228] sm:$0xff] }
 0x1ca   : > { %1671 = vmatpush.bf16.msrb.mxu1 %v3753_v10  ;;  %1644 = vmatpush.bf16.msrb.mxu0 %v3593_v13  ;;  %v3705_v51 = vor.u32 %v4343_v48, %v3704_v3  ;;  %v3672_v10 = vld [vmem:[#allocation2 + $0x148] sm:$0xf]  ;;  %v4295_v13 = vld [vmem:[#allocation2 + $0x14] sm:$0xf0] }
 0x1cb   : > { %1019 = vmatpush.msra.mxu3 %v858_v49  ;;  %1702 = vmatpush.bf16.msrb.mxu2 %v3597_v61  ;;  %v818_v49 = vld [vmem:[#allocation5 + $0x8] sm:$0xff]  ;;  %v3673_v11 = vor.u32 %v4335_v21, %v3672_v10  ;;  %v924_v3 = vld [vmem:[#allocation5 + $0x358] sm:$0xff]  ;;  %v3682_v10 = vld [vmem:[#allocation2 + $0x170] sm:$0xf0] }
 0x1cc   : > { %v882_v42 = vld [vmem:[#allocation5 + $0x208] sm:$0xff]  ;;  %v920_v48 = vld [vmem:[#allocation5 + $0x338] sm:$0xff] }
 0x1cd   : > { %1020 = vmatpush.msra.mxu3 %v854_v56  ;;  %v3545_v56 = vor.u32 %v4303_v54, %v3544_v29  ;;  %v908_v29 = vld [vmem:[#allocation5 + $0x2d8] sm:$0xff] }
 0x1ce   : > { %1563 = vmatmul.bf16.vlgmr.msra.gmra.mxu1 %v5159_v59  ;;  %1645 = vmatpush.bf16.msrb.mxu0 %v3577_v32  ;;  %v918_v32 = vld [vmem:[#allocation5 + $0x328] sm:$0xff]  ;;  %v904_v54 = vld [vmem:[#allocation5 + $0x2b8] sm:$0xff] }
 0x1cf   : > { %1021 = vmatpush.msra.mxu3 %v850_v19  ;;  %1672 = vmatpush.bf16.msrb.mxu1 %v3737_v60  ;;  %v942_v19 = vld [vmem:[#allocation5 + $0x3e8] sm:$0xff] }
 0x1d0   : > { %1703 = vmatpush.bf16.msrb.mxu2 %v3581_v37  ;;  %v3656_v60 = vld [vmem:[#allocation2 + $0x128] sm:$0xf]  ;;  %v3641_v37 = vor.u32 %v4327_v5, %v3640_v58  ;;  %v4345_v58 = vld [vmem:[#allocation2 + $0x1ac] sm:$0xf]  ;;  %v3722_v5 = vld [vmem:[#allocation2 + $0x1b8] sm:$0xf0] }
 0x1d1   : > { %1022 = vmatpush.msra.mxu3 %v846_v6  ;;  %v934_v6 = vld [vmem:[#allocation5 + $0x3a8] sm:$0xff]  ;;  %v3657_v31 = vor.u32 %v4331_v20, %v3656_v60 }
 0x1d2   : > { %1646 = vmatpush.bf16.msrb.mxu0 %v3561_v45  ;;  %v940_v45 = vld [vmem:[#allocation5 + $0x3d8] sm:$0xff]  ;;  %v4349_v20 = vld [vmem:[#allocation2 + $0x1cc] sm:$0xf] }
 0x1d3   : > { %1023 = vmatpush.msra.mxu3 %v842_v8  ;;  %1673 = vmatpush.bf16.msrb.mxu1 %v3721_v40  ;;  %v3533_v8 = vor.u32 %v4297_v34, %v3530_v7  ;;  %v898_v40 = vld [vmem:[#allocation5 + $0x288] sm:$0xff]  ;;  %v3698_v34 = vld [vmem:[#allocation2 + $0x190] sm:$0xf0] }
 0x1d4   : > { %1704 = vmatpush.bf16.msrb.mxu2 %v3565_v24  ;;  %v928_v24 = vld [vmem:[#allocation5 + $0x378] sm:$0xff] }
 0x1d5   : > { %1024 = vmatpush.msra.mxu3 %v838_v16  ;;  %v926_v16 = vld [vmem:[#allocation5 + $0x368] sm:$0xff] }
 0x1d6   : > { %1647 = vmatpush.bf16.msrb.mxu0 %v3545_v56  ;;  %v896_v56 = vld [vmem:[#allocation5 + $0x278] sm:$0xff] }
 0x1d7   : > { %1025 = vmatpush.msra.mxu3 %v834_v18  ;;  %1674 = vmatpush.bf16.msrb.mxu1 %v3705_v51  ;;  %v3517_v18 = vor.u32 %v4293_v17, %v3514_v9  ;;  %v912_v51 = vld [vmem:[#allocation5 + $0x2f8] sm:$0xff]  ;;  %v3634_v17 = vld [vmem:[#allocation2 + $0x110] sm:$0xf0]  ;;  %v4353_v9 = vld [vmem:[#allocation2 + $0x1ec] sm:$0xf] }
 0x1d8   : > { %1539 = vmatmul.bf16.gmra.mxu0 %v5164_v36  ;;  %1705 = vmatpush.bf16.msrb.mxu2 %v3549_v62  ;;  %v3746_v62 = vld [vmem:[#allocation2 + $0x1f0] sm:$0xf0] }
 0x1d9   : > { %1026 = vmatpush.msra.mxu3 %v830_v50  ;;  %1597 = vmatmul.bf16.gmra.mxu2 %v5164_v36  ;;  %v914_v50 = vld [vmem:[#allocation5 + $0x308] sm:$0xff] }
 0x1da   : > { %1648 = vmatpush.bf16.msrb.mxu0 %v3529_v27  ;;  %v4340_v27 = vld [vmem:[#allocation2 + $0x184] sm:$0xf] }
 0x1db   : > { %1027 = vmatpush.msra.mxu3 %v826_v52  ;;  %1675 = vmatpush.bf16.msrb.mxu1 %v3689_v0  ;;  %v902_v52 = vld [vmem:[#allocation5 + $0x2a8] sm:$0xff]  ;;  %v3730_v0 = vld [vmem:[#allocation2 + $0x1d0] sm:$0xf0]  ;;  %v3701_v7 = vor.u32 %v4340_v27, %v3698_v34 }
 0x1dc   : > { %1706 = vmatpush.bf16.msrb.mxu2 %v3533_v8  ;;  %v4336_v8 = vld [vmem:[#allocation2 + $0x164] sm:$0xf] }
 0x1dd   : > { %1028 = vmatpush.msra.mxu3 %v822_v57  ;;  %v932_v57 = vld [vmem:[#allocation5 + $0x398] sm:$0xff]  ;;  %v3685_v21 = vor.u32 %v4336_v8, %v3682_v10  ;;  %v4382_v8 = vld [vmem:[#allocation7 + $0xcc] sm:$0xf0]  ;;  %v4112_v10 = vld [vmem:[#allocation7 + $0x2c0] sm:$0xf] }
 0x1de   : > { %1568 = vmatmul.bf16.gmra.mxu1 %v5170_v53 }
 0x1df   : > { %1029 = vmatpush.msra.mxu3 %v818_v49  ;;  %1676 = vmatpush.bf16.msrb.mxu1 %v3673_v11  ;;  %v916_v49 = vld [vmem:[#allocation5 + $0x318] sm:$0xff] }
 0x1e0   : > { %1030 = vmatmul.f32.vlgmr.msra.gmra.mxu3 %v5139_v39  ;;  %v3512_v39 = vld [vmem:[#allocation2 + $0x8] sm:$0xf]  ;;  %1707 = vmatpush.bf16.msrb.mxu2 %v3517_v18  ;;  %v3754_v18 = vld [vmem:[#allocation2 + $0x1f8] sm:$0xf0] }
 0x1e1   : > { %1034 = vmatpush.msrb.mxu3 %v942_v19  ;;  %v3513_v61 = vor.u32 %v4295_v13, %v3512_v39  ;;  %v4352_v19 = vld [vmem:[#allocation2 + $0x1e4] sm:$0xf]  ;;  %v3650_v13 = vld [vmem:[#allocation2 + $0x130] sm:$0xf0]  ;;  %v3757_v60 = vor.u32 %v4353_v9, %v3754_v18 }
 0x1e2   : > { %v3749_v1 = vor.u32 %v4352_v19, %v3746_v62  ;;  %v4328_v39 = vld [vmem:[#allocation2 + $0x124] sm:$0xf] }
 0x1e3   : > { %1035 = vmatpush.msrb.mxu3 %v938_v2  ;;  %1649 = vmatpush.bf16.msrb.mxu0 %v3513_v61  ;;  %v4348_v2 = vld [vmem:[#allocation2 + $0x1c4] sm:$0xf] }
 0x1e4   : > { %1677 = vmatpush.bf16.msrb.mxu1 %v3657_v31  ;;  %v3733_v22 = vor.u32 %v4348_v2, %v3730_v0  ;;  %v4324_v61 = vld [vmem:[#allocation2 + $0x104] sm:$0xf]  ;;  %v3872_v0 = vld [vmem:[#allocation7 + $0xe0] sm:$0xf] }
 0x1e5   : > { %1036 = vmatpush.msrb.mxu3 %v934_v6  ;;  %v3714_v6 = vld [vmem:[#allocation2 + $0x1b0] sm:$0xf0] }
 0x1e7   : > { %1037 = vmatpush.msrb.mxu3 %v930_v26  ;;  %v3666_v26 = vld [vmem:[#allocation2 + $0x150] sm:$0xf0] }
 0x1e8   : > { %1544 = vmatmul.bf16.gmra.mxu0 %v5176_v15  ;;  %1678 = vmatpush.bf16.msrb.mxu1 %v3641_v37 }
 0x1e9   : > { %1038 = vmatpush.msrb.mxu3 %v926_v16  ;;  %1602 = vmatmul.bf16.gmra.mxu2 %v5176_v15  ;;  %v3653_v16 = vor.u32 %v4328_v39, %v3650_v13  ;;  %v4096_v13 = vld [vmem:[#allocation7 + $0x2a0] sm:$0xf] }
 0x1eb   : > { %1039 = vmatpush.msrb.mxu3 %v922_v28  ;;  %v3738_v28 = vld [vmem:[#allocation2 + $0x1d8] sm:$0xf0] }
 0x1ed   : > { %1040 = vmatpush.msrb.mxu3 %v918_v32  ;;  %v3741_v32 = vor.u32 %v4349_v20, %v3738_v28  ;;  %v4374_v20 = vld [vmem:[#allocation7 + $0x8c] sm:$0xf0]  ;;  %v4080_v28 = vld [vmem:[#allocation7 + $0x280] sm:$0xf] }
 0x1ee   : > { %1573 = vmatmul.bf16.gmra.mxu1 %v5182_v35 }
 0x1ef   : > { %1041 = vmatpush.msrb.mxu3 %v914_v50  ;;  %v3725_v50 = vor.u32 %v4345_v58, %v3722_v5  ;;  %v4438_v58 = vld [vmem:[#allocation7 + $0x28c] sm:$0xf0] }
 0x1f0   : > { %v4081_v5 = vor.u32 %v4438_v58, %v4080_v28 }
 0x1f1   : > { %1042 = vmatpush.msrb.mxu3 %v910_v38  ;;  %v3706_v38 = vld [vmem:[#allocation2 + $0x198] sm:$0xf0] }
 0x1f3   : > { %1043 = vmatpush.msrb.mxu3 %v906_v14 }
 0x1f5   : > { %1044 = vmatpush.msrb.mxu3 %v902_v52 }
 0x1f7   : > { %1045 = vmatpush.msrb.mxu3 %v898_v40  ;;  %v4337_v40 = vld [vmem:[#allocation2 + $0x16c] sm:$0xf] }
 0x1f8   : > { %1549 = vmatmul.bf16.gmra.mxu0 %v5131_v30 }
 0x1f9   : > { %1046 = vmatpush.msrb.mxu3 %v894_v41  ;;  %1607 = vmatmul.bf16.gmra.mxu2 %v5131_v30  ;;  %v3690_v41 = vld [vmem:[#allocation2 + $0x178] sm:$0xf0] }
 0x1fb   : > { %1047 = vmatpush.msrb.mxu3 %v890_v23  ;;  %v3693_v23 = vor.u32 %v4337_v40, %v3690_v41  ;;  %v4434_v40 = vld [vmem:[#allocation7 + $0x26c] sm:$0xf0] }
 0x1fd   : > { %1048 = vmatpush.msrb.mxu3 %v886_v33 }
 0x1fe   : > { %1578 = vmatmul.bf16.gmra.mxu1 %v5134_v25 }
 0x1ff   : > { %1049 = vmatpush.msrb.mxu3 %v882_v42  ;;  %v4333_v42 = vld [vmem:[#allocation2 + $0x14c] sm:$0xf] }
 0x200   : > { %1050 = vmatmul.f32.vlgmr.msrb.gmra.mxu3 %v5147_v46 }
 0x201   : > { %1114 = vmatpush.msra.mxu3 %v944_v44  ;;  %v3674_v44 = vld [vmem:[#allocation2 + $0x158] sm:$0xf0] }
 0x203   : > { %1115 = vmatpush.msra.mxu3 %v940_v45 }
 0x205   : > { %1116 = vmatpush.msra.mxu3 %v936_v43 }
 0x207   : > { %1117 = vmatpush.msra.mxu3 %v932_v57  ;;  %v3677_v57 = vor.u32 %v4333_v42, %v3674_v44  ;;  %v3792_v42 = vld [vmem:[#allocation7 + $0x40] sm:$0xf]  ;;  %v4366_v44 = vld [vmem:[#allocation7 + $0x4c] sm:$0xf0] }
 0x208   : > { %1650 = vmatmul.bf16.vlgmr.msrb.gmra.mxu0 %v5151_v47 }
 0x209   : > { %1118 = vmatpush.msra.mxu3 %v928_v24  ;;  %1708 = vmatmul.bf16.vlgmr.msrb.gmra.mxu2 %v5151_v47  ;;  %v888_v47 = vld [vmem:[#allocation5 + $0x238] sm:$0xff]  ;;  %v4329_v24 = vld [vmem:[#allocation2 + $0x12c] sm:$0xf] }
 0x20b   : > { %1119 = vmatpush.msra.mxu3 %v924_v3  ;;  %v3658_v3 = vld [vmem:[#allocation2 + $0x138] sm:$0xf0] }
 0x20d   : > { %1120 = vmatpush.msra.mxu3 %v920_v48  ;;  %v3661_v48 = vor.u32 %v4329_v24, %v3658_v3  ;;  %v4430_v24 = vld [vmem:[#allocation7 + $0x24c] sm:$0xf0] }
 0x20e   : > { %1679 = vmatmul.bf16.vlgmr.msrb.gmra.mxu1 %v5159_v59 }
 0x20f   : > { %1121 = vmatpush.msra.mxu3 %v916_v49 }
 0x211   : > { %1122 = vmatpush.msra.mxu3 %v912_v51  ;;  %v4325_v51 = vld [vmem:[#allocation2 + $0x10c] sm:$0xf] }
 0x213   : > { %1123 = vmatpush.msra.mxu3 %v908_v29  ;;  %v3642_v29 = vld [vmem:[#allocation2 + $0x118] sm:$0xf0] }
 0x215   : > { %1124 = vmatpush.msra.mxu3 %v904_v54 }
 0x217   : > { %1125 = vmatpush.msra.mxu3 %v900_v55  ;;  %v3645_v55 = vor.u32 %v4325_v51, %v3642_v29  ;;  %v4362_v51 = vld [vmem:[#allocation7 + $0x2c] sm:$0xf0]  ;;  %v4032_v29 = vld [vmem:[#allocation7 + $0x220] sm:$0xf] }
 0x218   : > { %1655 = vmatmul.bf16.gmra.mxu0 %v5164_v36 }
 0x219   : > { %1126 = vmatpush.msra.mxu3 %v896_v56  ;;  %1713 = vmatmul.bf16.gmra.mxu2 %v5164_v36  ;;  %v3717_v36 = vor.u32 %v4344_v4, %v3714_v6  ;;  %v4128_v4 = vld [vmem:[#allocation7 + $0x2e0] sm:$0xf] }
 0x21b   : > { %1127 = vmatpush.msra.mxu3 %v892_v12 }
 0x21d   : > { %1128 = vmatpush.msra.mxu3 %v888_v47 }
 0x21e   : > { %1684 = vmatmul.bf16.gmra.mxu1 %v5170_v53 }
 0x21f   : > { %1129 = vmatpush.msra.mxu3 %v884_v63 }
 0x220   : > { %1130 = vmatmul.f32.vlgmr.msra.gmra.mxu3 %v5147_v46  ;;  %v4332_v46 = vld [vmem:[#allocation2 + $0x144] sm:$0xf] }
 0x221   : > { %1613 = vmatpush.bf16.msrb.mxu3 %v3749_v1  ;;  %v3669_v11 = vor.u32 %v4332_v46, %v3666_v26  ;;  %v4446_v46 = vld [vmem:[#allocation7 + $0x2cc] sm:$0xf0]  ;;  %v3840_v26 = vld [vmem:[#allocation7 + $0xa0] sm:$0xf] }
 0x222   : > { %v4113_v39 = vor.u32 %v4446_v46, %v4112_v10  ;;  %v4000_v10 = vld [vmem:[#allocation7 + $0x1e0] sm:$0xf] }
 0x225   : > { %1614 = vmatpush.bf16.msrb.mxu3 %v3733_v22  ;;  %v4386_v22 = vld [vmem:[#allocation7 + $0xec] sm:$0xf0] }
 0x226   : > { %v3873_v6 = vor.u32 %v4386_v22, %v3872_v0  ;;  %v3760_v0 = vld [vmem:[#allocation7] sm:$0xf]  ;;  %v4358_v22 = vld [vmem:[#allocation7 + $0xc] sm:$0xf0] }
 0x228   : > { %1660 = vmatmul.bf16.gmra.mxu0 %v5176_v15 }
 0x229   : > { %1615 = vmatpush.bf16.msrb.mxu3 %v3717_v36  ;;  %1718 = vmatmul.bf16.gmra.mxu2 %v5176_v15  ;;  %v3637_v15 = vor.u32 %v4324_v61, %v3634_v17  ;;  %v4450_v36 = vld [vmem:[#allocation7 + $0x2ec] sm:$0xf0] }
 0x22a   : > { %v4129_v27 = vor.u32 %v4450_v36, %v4128_v4  ;;  %2677 = vmatpush.bf16.msra.mxu0 %v3873_v6  ;;  %v4016_v4 = vld [vmem:[#allocation7 + $0x200] sm:$0xf] }
 0x22c   : > { %2735 = vmatpush.bf16.msra.mxu2 %v4129_v27  ;;  %v3761_v27 = vor.u32 %v4358_v22, %v3760_v0  ;;  %v3920_v22 = vld [vmem:[#allocation7 + $0x140] sm:$0xf] }
 0x22d   : > { %1616 = vmatpush.bf16.msrb.mxu3 %v3701_v7  ;;  %v3856_v7 = vld [vmem:[#allocation7 + $0xc0] sm:$0xf] }
 0x22e   : > { %1689 = vmatmul.bf16.gmra.mxu1 %v5182_v35 }
 0x230   : > { %2736 = vmatpush.bf16.msra.mxu2 %v4113_v39  ;;  %v3984_v39 = vld [vmem:[#allocation7 + $0x1c0] sm:$0xf] }
 0x231   : > { %1617 = vmatpush.bf16.msrb.mxu3 %v3685_v21  ;;  %v3857_v21 = vor.u32 %v4382_v8, %v3856_v7  ;;  %v4422_v7 = vld [vmem:[#allocation7 + $0x20c] sm:$0xf0] }
 0x232   : > { %v4017_v8 = vor.u32 %v4422_v7, %v4016_v4  ;;  %v4398_v4 = vld [vmem:[#allocation7 + $0x14c] sm:$0xf0] }
 0x233   : > { %2678 = vmatpush.bf16.msra.mxu0 %v3857_v21  ;;  %v4418_v21 = vld [vmem:[#allocation7 + $0x1ec] sm:$0xf0] }
 0x235   : > { %1618 = vmatpush.bf16.msrb.mxu3 %v3669_v11  ;;  %v4378_v11 = vld [vmem:[#allocation7 + $0xac] sm:$0xf0] }
 0x236   : > { %v3841_v61 = vor.u32 %v4378_v11, %v3840_v26  ;;  %v4001_v26 = vor.u32 %v4418_v21, %v4000_v10 }
 0x238   : > { %1665 = vmatmul.bf16.gmra.mxu0 %v5131_v30  ;;  %2706 = vmatpush.bf16.msra.mxu1 %v4001_v26  ;;  %v3921_v26 = vor.u32 %v4398_v4, %v3920_v22  ;;  %v4482_v22 = vld [vmem:[#allocation7 + $0x3ec] sm:$0xf0] }
 0x239   : > { %1619 = vmatpush.bf16.msrb.mxu3 %v3653_v16  ;;  %1723 = vmatmul.bf16.gmra.mxu2 %v5131_v30  ;;  %v4341_v30 = vld [vmem:[#allocation2 + $0x18c] sm:$0xf]  ;;  %v4442_v16 = vld [vmem:[#allocation7 + $0x2ac] sm:$0xf0] }
 0x23a   : > { %v3709_v52 = vor.u32 %v4341_v30, %v3706_v38  ;;  %v4097_v17 = vor.u32 %v4442_v16, %v4096_v13  ;;  %2679 = vmatpush.bf16.msra.mxu0 %v3841_v61  ;;  %v3808_v30 = vld [vmem:[#allocation7 + $0x60] sm:$0xf]  ;;  %v4370_v38 = vld [vmem:[#allocation7 + $0x6c] sm:$0xf0] }
 0x23b   : > { %v4414_v13 = vld [vmem:[#allocation7 + $0x1cc] sm:$0xf0] }
 0x23c   : > { %2737 = vmatpush.bf16.msra.mxu2 %v4097_v17  ;;  %v3985_v16 = vor.u32 %v4414_v13, %v3984_v39 }
 0x23d   : > { %1620 = vmatpush.bf16.msrb.mxu3 %v3637_v15  ;;  %v5201_v31 = vpop.f32.mrf.mxu0 }
 0x23e   : > { %1694 = vmatmul.bf16.gmra.mxu1 %v5134_v25 }
 0x23f   : > { %2707 = vmatpush.bf16.msra.mxu1 %v3985_v16 }
 0x240   : > { %1621 = vmatmul.bf16.vlgmr.msrb.gmra.mxu3 %v5159_v59  ;;  %2738 = vmatpush.bf16.msra.mxu2 %v4081_v5 }
 0x241   : > { %1729 = vmatpush.bf16.msra.mxu3 %v3757_v60  ;;  %v3824_v60 = vld [vmem:[#allocation7 + $0x80] sm:$0xf] }
 0x243   : > { %v5205_v37 = vpop.f32.mrf.mxu1 }
 0x244   : > { %v1111_v6 = vpop.f32.mrf.mxu2 }
 0x245   : > { %1730 = vmatpush.bf16.msra.mxu3 %v3741_v32  ;;  %v1535_v14 = vpop.f32.mrf.mxu0  ;;  %v3825_v32 = vor.u32 %v4374_v20, %v3824_v60  ;;  %v4410_v60 = vld [vmem:[#allocation7 + $0x1ac] sm:$0xf0] }
 0x247   : > { %2680 = vmatpush.bf16.msra.mxu0 %v3825_v32 }
 0x249   : > { %1731 = vmatpush.bf16.msra.mxu3 %v3725_v50  ;;  %v5231_v50 = vpop.f32.mrf.mxu3 }
 0x24b   : > { %v1564_v33 = vpop.f32.mrf.mxu1 }
 0x24c   : > { %v5207_v45 = vadd.f32 %v1564_v33, %v1535_v14  ;;  %v4064_v14 = vld [vmem:[#allocation7 + $0x260] sm:$0xf]  ;;  %v5242_v61 = vpop.f32.mrf.mxu2 }
 0x24d   : > { %1732 = vmatpush.bf16.msra.mxu3 %v3709_v52  ;;  %v5209_v43 = vpop.f32.mrf.mxu0  ;;  %v3809_v52 = vor.u32 %v4370_v38, %v3808_v30  ;;  %v3952_v30 = vld [vmem:[#allocation7 + $0x180] sm:$0xf]  ;;  %v4406_v38 = vld [vmem:[#allocation7 + $0x18c] sm:$0xf0] }
 0x24f   : > { %2681 = vmatpush.bf16.msra.mxu0 %v3809_v52 }
 0x250   : > { %1626 = vmatmul.bf16.gmra.mxu3 %v5170_v53 }
 0x251   : > { %1733 = vmatpush.bf16.msra.mxu3 %v3693_v23  ;;  %v4065_v23 = vor.u32 %v4434_v40, %v4064_v14  ;;  %v3953_v14 = vor.u32 %v4406_v38, %v3952_v30  ;;  %v4390_v30 = vld [vmem:[#allocation7 + $0x10c] sm:$0xf0] }
 0x253   : > { %v5212_v49 = vpop.f32.mrf.mxu1  ;;  %2739 = vmatpush.bf16.msra.mxu2 %v4065_v23 }
 0x254   : > { %v1567_v10 = vadd.f32 %v5212_v49, %v5209_v43  ;;  %v3904_v43 = vld [vmem:[#allocation7 + $0x120] sm:$0xf]  ;;  %v4394_v49 = vld [vmem:[#allocation7 + $0x12c] sm:$0xf0] }
 0x255   : > { %1734 = vmatpush.bf16.msra.mxu3 %v3677_v57  ;;  %v1540_v54 = vpop.f32.mrf.mxu0  ;;  %v4048_v57 = vld [vmem:[#allocation7 + $0x240] sm:$0xf] }
 0x256   : > { %v4049_v3 = vor.u32 %v4430_v24, %v4048_v57 }
 0x258   : > { %2740 = vmatpush.bf16.msra.mxu2 %v4049_v3 }
 0x259   : > { %1735 = vmatpush.bf16.msra.mxu3 %v3661_v48  ;;  %v3776_v48 = vld [vmem:[#allocation7 + $0x20] sm:$0xf] }
 0x25b   : > { %v1569_v56 = vpop.f32.mrf.mxu1 }
 0x25c   : > { %v5214_v12 = vadd.f32 %v1569_v56, %v1540_v54  ;;  %v1011_v54 = vpop.f32.mrf.mxu3  ;;  %v4426_v56 = vld [vmem:[#allocation7 + $0x22c] sm:$0xf0] }
 0x25d   : > { %1736 = vmatpush.bf16.msra.mxu3 %v3645_v55  ;;  %v5216_v47 = vpop.f32.mrf.mxu0  ;;  %v3777_v55 = vor.u32 %v4362_v51, %v3776_v48 }
 0x260   : > { %1631 = vmatmul.bf16.gmra.mxu3 %v5182_v35 }
 0x263   : > { %v5219_v19 = vpop.f32.mrf.mxu1 }
 0x264   : > { %v1031_v46 = vpop.f32.mrf.mxu3 }
 0x265   : > { %v1545_v62 = vpop.f32.mrf.mxu0 }
 0x26b   : > { %v1574_v63 = vpop.f32.mrf.mxu1 }
 0x26c   : > { %v5221_v1 = vadd.f32 %v1574_v63, %v1545_v62  ;;  %v4033_v63 = vor.u32 %v4426_v56, %v4032_v29 }
 0x26d   : > { %v5224_v2 = vpop.f32.mrf.mxu0 }
 0x26e   : > { %2741 = vmatpush.bf16.msra.mxu2 %v4033_v63 }
 0x270   : > { %1636 = vmatmul.bf16.gmra.mxu3 %v5134_v25 }
 0x272   : > { %2742 = vmatpush.bf16.msra.mxu2 %v4017_v8 }
 0x273   : > { %v5226_v34 = vpop.f32.mrf.mxu1 }
 0x275   : > { %v1550_v9 = vpop.f32.mrf.mxu0 }
 0x27b   : > { %v1579_v18 = vpop.f32.mrf.mxu1 }
 0x27c   : > { %v5228_v15 = vadd.f32 %v1579_v18, %v1550_v9  ;;  %v945_v9 = vld [vmem:[%s5767_s7] sm:$0xf] }
 0x27d   : > { %v5235_v33 = vpop.f32.mrf.mxu0  ;;  %v3968_v18 = vld [vmem:[#allocation7 + $0x1a0] sm:$0xf]  ;;  %v949_v32 = vperm.slane %v945_v9, 2  ;;  %v950_v58 = vperm.slane %v945_v9, 3  ;;  %v947_v40 = vperm.slane %v945_v9, 0 }
 0x27e   : > { %v3969_v28 = vor.u32 %v4410_v60, %v3968_v18 }
 0x27f   : > { %v1072_v52 = vadd.f32 %v5201_v31, %v949_v32  ;;  %v1112_v57 = vadd.f32 %v1111_v6, %v950_v58  ;;  %v992_v48 = vadd.f32 %v5231_v50, %v947_v40  ;;  %v3936_v31 = vld [vmem:[#allocation7 + $0x160] sm:$0xf]  ;;  %v3905_v32 = vor.u32 %v4394_v49, %v3904_v43  ;;  %v4440_v43 = vld [vmem:[#allocation7 + $0x2a4] sm:$0xf] }
 0x280   : > { %1737 = vmatmul.bf16.vlgmr.msra.gmra.mxu3 %v5159_v59  ;;  %v3793_v59 = vor.u32 %v4366_v44, %v3792_v42  ;;  %2708 = vmatpush.bf16.msra.mxu1 %v3969_v28  ;;  %v3888_v58 = vld [vmem:[#allocation7 + $0x100] sm:$0xf] }
 0x281   : > { %v1092_v44 = vadd.f32 %v5205_v37, %v1072_v52  ;;  %v3889_v38 = vor.u32 %v4390_v30, %v3888_v58 }
 0x282   : > { %2682 = vmatpush.bf16.msra.mxu0 %v3793_v59  ;;  %v5252_v59 = vpop.f32.mrf.mxu2 }
 0x283   : > { %v5233_v41 = vpop.f32.mrf.mxu1  ;;  %v1051_v20 = vpop.f32.mrf.mxu3  ;;  %v5257_v63 = vrot.slane %v1092_v44, 6 }
 0x284   : > { %2709 = vmatpush.bf16.msra.mxu1 %v3953_v14 }
 0x285   : > { %v5239_v36 = vpop.f32.mrf.mxu0 }
 0x286   : > { %2683 = vmatpush.bf16.msra.mxu0 %v3777_v55  ;;  %v4402_v55 = vld [vmem:[#allocation7 + $0x16c] sm:$0xf0] }
 0x287   : > { %v3937_v56 = vor.u32 %v4402_v55, %v3936_v31  ;;  %v4448_v55 = vld [vmem:[#allocation7 + $0x2e4] sm:$0xf] }
 0x289   : > { %2710 = vmatpush.bf16.msra.mxu1 %v3937_v56  ;;  %v4130_v56 = vld [vmem:[#allocation7 + $0x2f0] sm:$0xf0] }
 0x28a   : > { %2684 = vmatpush.bf16.msra.mxu0 %v3761_v27  ;;  %v5279_v39 = vpop.f32.mrf.mxu2  ;;  %v4133_v4 = vor.u32 %v4448_v55, %v4130_v56 }
 0x28b   : > { %v5237_v62 = vpop.f32.mrf.mxu1 }
 0x28c   : > { %v1681_v21 = vadd.f32 %v5237_v62, %v5239_v36  ;;  %2851 = vmatpush.bf16.msrb.mxu2 %v4133_v4  ;;  %v1577_v4 = vadd.f32 %v5226_v34, %v5224_v2 }
 0x28d   : > { %v1653_v17 = vpop.f32.mrf.mxu0  ;;  %2711 = vmatpush.bf16.msra.mxu1 %v3921_v26 }
 0x290   : > { %1742 = vmatmul.bf16.gmra.mxu3 %v5170_v53  ;;  %v948_v53 = vperm.slane %v945_v9, 1 }
 0x291   : > { %2712 = vmatpush.bf16.msra.mxu1 %v3905_v32 }
 0x292   : > { %v1032_v5 = vadd.f32 %v1031_v46, %v948_v53 }
 0x293   : > { %v1682_v11 = vpop.f32.mrf.mxu1 }
 0x294   : > { %v1052_v23 = vadd.f32 %v1051_v20, %v1032_v5  ;;  %v1683_v46 = vadd.f32 %v1682_v11, %v1653_v17 }
 0x295   : > { %v1656_v24 = vpop.f32.mrf.mxu0  ;;  %2713 = vmatpush.bf16.msra.mxu1 %v3889_v38  ;;  %v4240_v38 = vld [vmem:[#allocation7 + $0x3c0] sm:$0xf] }
 0x296   : > { %v5255_v51 = vrot.slane %v1052_v23, 7 }
 0x29b   : > { %v5248_v42 = vpop.f32.mrf.mxu1 }
 0x29c   : > { %v1686_v23 = vadd.f32 %v5248_v42, %v1656_v24 }
 0x29d   : > { %v1658_v16 = vpop.f32.mrf.mxu0 }
 0x2a0   : > { %1747 = vmatmul.bf16.gmra.mxu3 %v5182_v35  ;;  %v5259_v35 = vadd.f32 %v1011_v54, %v992_v48  ;;  %v1572_v48 = vadd.f32 %v5219_v19, %v5216_v47  ;;  %v4114_v19 = vld [vmem:[#allocation7 + $0x2d0] sm:$0xf0] }
 0x2a2   : > { %v1766_v37 = vsel %vm1765_vm5, %v5259_v35, %v5255_v51  ;;  %v1770_v13 = vsel %vm963_vm2, %v5259_v35, %v5255_v51 }
 0x2a3   : > { %v1131_v3 = vpop.f32.mrf.mxu3  ;;  %v1687_v27 = vpop.f32.mrf.mxu1 }
 0x2a4   : > { %v1132_v29 = vadd.f32 %v1131_v3, %v1112_v57  ;;  %v4384_v57 = vld [vmem:[#allocation7 + $0xe4] sm:$0xf]  ;;  %v3874_v3 = vld [vmem:[#allocation7 + $0xf0] sm:$0xf0] }
 0x2a5   : > { %v5301_v44 = vpop.f32.mrf.mxu0  ;;  %v3877_v31 = vor.u32 %v4384_v57, %v3874_v3  ;;  %v3826_v3 = vld [vmem:[#allocation7 + $0x90] sm:$0xf0] }
 0x2a6   : > { %v5261_v0 = vrot.slane %v1132_v29, 5  ;;  %v1688_v29 = vadd.f32 %v1687_v27, %v1658_v16 }
 0x2a7   : > { %2793 = vmatpush.bf16.msrb.mxu0 %v3877_v31 }
 0x2a8   : > { %v1767_v50 = vsel %vm965_vm3, %v5257_v63, %v5261_v0  ;;  %v1771_v54 = vsel %vm967_vm4, %v5257_v63, %v5261_v0  ;;  %v1777_v27 = vsel %vm1776_vm8, %v5257_v63, %v5261_v0 }
 0x2a9   : > { %v5268_v6 = vsel %vm1768_vm6, %v1766_v37, %v1767_v50  ;;  %v1773_v53 = vsel %vm1772_vm7, %v1770_v13, %v1771_v54  ;;  %v4256_v50 = vld [vmem:[#allocation7 + $0x3e0] sm:$0xf] }
 0x2aa   : > { %v1787_v7 = vperm.slane %v5268_v6, 0  ;;  %v1789_v8 = vperm.slane %v5268_v6, 2  ;;  %v5285_v17 = vrot.slane %v1773_v53, 1 }
 0x2ab   : > { %v5295_v52 = vpop.f32.mrf.mxu1 }
 0x2ac   : > { %v1819_v9 = vadd.f32 %v1787_v7, %v5207_v45  ;;  %v1823_v18 = vadd.f32 %v1787_v7, %v1567_v10  ;;  %v1821_v60 = vadd.f32 %v1789_v8, %v1681_v21  ;;  %v1825_v20 = vadd.f32 %v1789_v8, %v1683_v46  ;;  %v4380_v8 = vld [vmem:[#allocation7 + $0xc4] sm:$0xf]  ;;  %v3858_v10 = vld [vmem:[#allocation7 + $0xd0] sm:$0xf0] }
 0x2ad   : > { %v1793_v14 = vperm.slane %v5285_v17, 2  ;;  %v1791_v40 = vperm.slane %v5285_v17, 0  ;;  %v4257_v7 = vor.u32 %v4482_v22, %v4256_v50  ;;  %v4444_v21 = vld [vmem:[#allocation7 + $0x2c4] sm:$0xf]  ;;  %v3861_v47 = vor.u32 %v4380_v8, %v3858_v10  ;;  %v4224_v10 = vld [vmem:[#allocation7 + $0x3a0] sm:$0xf] }
 0x2ae   : > { %v1851_v28 = vmax.f32 %v1819_v9, 0.0  ;;  %v1855_v62 = vmax.f32 %v1823_v18, 0.0  ;;  %v1853_v36 = vmax.f32 %v1821_v60, 0.0  ;;  %v1857_v11 = vmax.f32 %v1825_v20, 0.0  ;;  %v4376_v60 = vld [vmem:[#allocation7 + $0xa4] sm:$0xf] }
 0x2af   : > { %v1829_v37 = vadd.f32 %v1793_v14, %v1686_v23  ;;  %v1833_v54 = vadd.f32 %v1793_v14, %v1688_v29  ;;  %v1827_v42 = vadd.f32 %v1791_v40, %v5214_v12  ;;  %v1831_v24 = vadd.f32 %v1791_v40, %v1572_v48  ;;  %2764 = vmatpush.bf16.msrb.mxu3 %v4257_v7  ;;  %v3842_v20 = vld [vmem:[#allocation7 + $0xb0] sm:$0xf0]  ;;  %v4478_v14 = vld [vmem:[#allocation7 + $0x3cc] sm:$0xf0]  ;;  %v4372_v40 = vld [vmem:[#allocation7 + $0x84] sm:$0xf] }
 0x2b0   : > { %1752 = vmatmul.bf16.gmra.mxu3 %v5134_v25  ;;  %v5288_v5 = vpack.c.bf16 %v1855_v62, %v1851_v28  ;;  %v5290_v45 = vpack.c.bf16 %v1857_v11, %v1853_v36  ;;  %v5298_v25 = vpop.f32.mrf.mxu2  ;;  %v4117_v46 = vor.u32 %v4444_v21, %v4114_v19  ;;  %v1775_v12 = vsel %vm965_vm3, %v5259_v35, %v5255_v51  ;;  %v4098_v28 = vld [vmem:[#allocation7 + $0x2b0] sm:$0xf0]  ;;  %v1663_v36 = vpop.f32.mrf.mxu0  ;;  %v4436_v48 = vld [vmem:[#allocation7 + $0x284] sm:$0xf]  ;;  %v4474_v21 = vld [vmem:[#allocation7 + $0x3ac] sm:$0xf0] }
 0x2b1   : > { %v1861_v26 = vmax.f32 %v1829_v37, 0.0  ;;  %v1865_v13 = vmax.f32 %v1833_v54, 0.0  ;;  %v1859_v16 = vmax.f32 %v1827_v42, 0.0  ;;  %v1863_v9 = vmax.f32 %v1831_v24, 0.0  ;;  %2794 = vmatpush.bf16.msrb.mxu0 %v3861_v47  ;;  %v4082_v29 = vld [vmem:[#allocation7 + $0x290] sm:$0xf0] }
 0x2b2   : > { %2685 = vmatmul.bf16.vlgmr.msra.gmra.mxu0 %v5288_v5  ;;  %2743 = vmatmul.bf16.vlgmr.msra.gmra.mxu2 %v5290_v45  ;;  %v1779_v53 = vsel %vm1778_vm9, %v1775_v12, %v1777_v27  ;;  %v3845_v49 = vor.u32 %v4376_v60, %v3842_v20  ;;  %v4101_v11 = vor.u32 %v4440_v43, %v4098_v28  ;;  %v4368_v54 = vld [vmem:[#allocation7 + $0x64] sm:$0xf]  ;;  %v3810_v42 = vld [vmem:[#allocation7 + $0x70] sm:$0xf0] }
 0x2b3   : > { %v1692_v18 = vpop.f32.mrf.mxu1  ;;  %2852 = vmatpush.bf16.msrb.mxu2 %v4117_v46  ;;  %v5314_v32 = vpack.c.bf16 %v1865_v13, %v1861_v26  ;;  %v5316_v58 = vrot.slane %v1779_v53, 2  ;;  %v5318_v30 = vpack.c.bf16 %v1863_v9, %v1859_v16  ;;  %v4241_v57 = vor.u32 %v4478_v14, %v4240_v38  ;;  %v4432_v24 = vld [vmem:[#allocation7 + $0x264] sm:$0xf]  ;;  %v4066_v46 = vld [vmem:[#allocation7 + $0x270] sm:$0xf0] }
 0x2b4   : > { %v3829_v31 = vor.u32 %v4372_v40, %v3826_v3  ;;  %v4085_v55 = vor.u32 %v4436_v48, %v4082_v29  ;;  %v1693_v56 = vadd.f32 %v1692_v18, %v1663_v36  ;;  %v1691_v50 = vadd.f32 %v5295_v52, %v5301_v44  ;;  %v4364_v12 = vld [vmem:[#allocation7 + $0x44] sm:$0xf]  ;;  %v3794_v26 = vld [vmem:[#allocation7 + $0x50] sm:$0xf0] }
 0x2b5   : > { %2795 = vmatpush.bf16.msrb.mxu0 %v3845_v49  ;;  %v1795_v37 = vperm.slane %v5316_v58, 0  ;;  %2765 = vmatpush.bf16.msrb.mxu3 %v4241_v57  ;;  %v1797_v22 = vperm.slane %v5316_v58, 2  ;;  %v3813_v47 = vor.u32 %v4368_v54, %v3810_v42  ;;  %v4225_v27 = vor.u32 %v4474_v21, %v4224_v10  ;;  %v4428_v53 = vld [vmem:[#allocation7 + $0x244] sm:$0xf]  ;;  %v4050_v18 = vld [vmem:[#allocation7 + $0x250] sm:$0xf0] }
 0x2b6   : > { %v1788_v16 = vperm.slane %v5268_v6, 1  ;;  %v4069_v9 = vor.u32 %v4432_v24, %v4066_v46  ;;  %v4053_v49 = vor.u32 %v4428_v53, %v4050_v18  ;;  %v1781_v28 = vsel %vm967_vm4, %v5259_v35, %v5255_v51  ;;  %v4424_v57 = vld [vmem:[#allocation7 + $0x224] sm:$0xf]  ;;  %v4034_v29 = vld [vmem:[#allocation7 + $0x230] sm:$0xf0] }
 0x2b7   : > { %2853 = vmatpush.bf16.msrb.mxu2 %v4101_v11  ;;  %v1841_v19 = vadd.f32 %v1797_v22, %v1693_v56  ;;  %v1835_v52 = vadd.f32 %v1795_v37, %v5221_v1  ;;  %v1839_v44 = vadd.f32 %v1795_v37, %v1577_v4  ;;  %v1837_v34 = vadd.f32 %v1797_v22, %v1691_v50  ;;  %v4208_v50 = vld [vmem:[#allocation7 + $0x380] sm:$0xf]  ;;  %v4470_v22 = vld [vmem:[#allocation7 + $0x38c] sm:$0xf0]  ;;  %v4356_v4 = vld [vmem:[#allocation7 + $0x4] sm:$0xf] }
 0x2b8   : > { %v5312_v62 = vpop.f32.mrf.mxu2  ;;  %v1666_v13 = vpop.f32.mrf.mxu0  ;;  %v1783_v1 = vsel %vm1782_vm10, %v5257_v63, %v5261_v0  ;;  %v4360_v63 = vld [vmem:[#allocation7 + $0x24] sm:$0xf]  ;;  %v3778_v0 = vld [vmem:[#allocation7 + $0x30] sm:$0xf0]  ;;  %v4037_v35 = vor.u32 %v4424_v57, %v4034_v29  ;;  %v4209_v42 = vor.u32 %v4470_v22, %v4208_v50  ;;  %v1582_v46 = vadd.f32 %v5233_v41, %v5235_v33 }
 0x2b9   : > { %2796 = vmatpush.bf16.msrb.mxu0 %v3829_v31  ;;  %2766 = vmatpush.bf16.msrb.mxu3 %v4225_v27  ;;  %v1873_v36 = vmax.f32 %v1841_v19, 0.0  ;;  %v1867_v11 = vmax.f32 %v1835_v52, 0.0  ;;  %v1871_v38 = vmax.f32 %v1839_v44, 0.0  ;;  %v1785_v14 = vsel %vm1784_vm11, %v1781_v28, %v1783_v1  ;;  %v3762_v24 = vld [vmem:[#allocation7 + $0x10] sm:$0xf0] }
 0x2ba   : > { %v1869_v40 = vmax.f32 %v1837_v34, 0.0  ;;  %v4018_v10 = vld [vmem:[#allocation7 + $0x210] sm:$0xf0]  ;;  %v3765_v19 = vor.u32 %v4356_v4, %v3762_v24  ;;  %v4404_v50 = vld [vmem:[#allocation7 + $0x184] sm:$0xf] }
 0x2bb   : > { %2854 = vmatpush.bf16.msrb.mxu2 %v4085_v55  ;;  %v5328_v7 = vpop.f32.mrf.mxu1  ;;  %v5344_v55 = vrot.slane %v1785_v14, 3  ;;  %v5346_v51 = vpack.c.bf16 %v1871_v38, %v1867_v11  ;;  %v3986_v33 = vld [vmem:[#allocation7 + $0x1d0] sm:$0xf0] }
 0x2bc   : > { %v5342_v31 = vpack.c.bf16 %v1873_v36, %v1869_v40 }
 0x2bd   : > { %2797 = vmatpush.bf16.msrb.mxu0 %v3813_v47  ;;  %v1799_v27 = vperm.slane %v5344_v55, 0  ;;  %2767 = vmatpush.bf16.msrb.mxu3 %v4209_v42 }
 0x2bf   : > { %2855 = vmatpush.bf16.msrb.mxu2 %v4069_v9  ;;  %v4466_v9 = vld [vmem:[#allocation7 + $0x36c] sm:$0xf0]  ;;  %v1843_v53 = vadd.f32 %v1799_v27, %v5228_v15  ;;  %v1847_v18 = vadd.f32 %v1799_v27, %v1582_v46  ;;  %v1796_v27 = vperm.slane %v5316_v58, 1 }
 0x2c0   : > { %v5332_v2 = vpop.f32.mrf.mxu2  ;;  %v1668_v47 = vpop.f32.mrf.mxu0 }
 0x2c1   : > { %v1875_v38 = vmax.f32 %v1843_v53, 0.0  ;;  %v1879_v15 = vmax.f32 %v1847_v18, 0.0 }
 0x2c2   : > { %2690 = vmatmul.bf16.gmra.mxu0 %v5318_v30  ;;  %2748 = vmatmul.bf16.gmra.mxu2 %v5314_v32 }
 0x2c3   : > { %v1622_v23 = vpop.f32.mrf.mxu3  ;;  %2856 = vmatpush.bf16.msrb.mxu2 %v4053_v49  ;;  %v1697_v56 = vpop.f32.mrf.mxu1  ;;  %v1792_v49 = vperm.slane %v5285_v17, 1 }
 0x2c4   : > { %v1623_v8 = vadd.f32 %v1622_v23, %v5242_v61  ;;  %v3797_v61 = vor.u32 %v4364_v12, %v3794_v26  ;;  %v1698_v44 = vadd.f32 %v1697_v56, %v1668_v47  ;;  %v1696_v12 = vadd.f32 %v5328_v7, %v1666_v13  ;;  %v4458_v47 = vld [vmem:[#allocation7 + $0x32c] sm:$0xf0] }
 0x2c5   : > { %v1801_v26 = vperm.slane %v5344_v55, 2 }
 0x2c6   : > { %v1820_v20 = vadd.f32 %v1788_v16, %v1623_v8  ;;  %2798 = vmatpush.bf16.msrb.mxu0 %v3797_v61  ;;  %v4420_v8 = vld [vmem:[#allocation7 + $0x204] sm:$0xf] }
 0x2c7   : > { %2857 = vmatpush.bf16.msrb.mxu2 %v4037_v35  ;;  %v4021_v52 = vor.u32 %v4420_v8, %v4018_v10  ;;  %v1849_v61 = vadd.f32 %v1801_v26, %v1698_v44  ;;  %v1845_v7 = vadd.f32 %v1801_v26, %v1696_v12  ;;  %v4462_v35 = vld [vmem:[#allocation7 + $0x34c] sm:$0xf0]  ;;  %v4160_v10 = vld [vmem:[#allocation7 + $0x320] sm:$0xf]  ;;  %v3938_v44 = vld [vmem:[#allocation7 + $0x170] sm:$0xf0] }
 0x2c8   : > { %v1852_v3 = vmax.f32 %v1820_v20, 0.0  ;;  %v5352_v21 = vpop.f32.mrf.mxu2  ;;  %v4002_v20 = vld [vmem:[#allocation7 + $0x1f0] sm:$0xf0]  ;;  %v4396_v12 = vld [vmem:[#allocation7 + $0x144] sm:$0xf] }
 0x2c9   : > { %v1881_v11 = vmax.f32 %v1849_v61, 0.0  ;;  %v3922_v26 = vld [vmem:[#allocation7 + $0x150] sm:$0xf0] }
 0x2ca   : > { %v3925_v61 = vor.u32 %v4396_v12, %v3922_v26  ;;  %v4476_v26 = vld [vmem:[#allocation7 + $0x3c4] sm:$0xf] }
 0x2cb   : > { %v1624_v60 = vpop.f32.mrf.mxu3  ;;  %2858 = vmatpush.bf16.msrb.mxu2 %v4021_v52  ;;  %v4400_v52 = vld [vmem:[#allocation7 + $0x164] sm:$0xf] }
 0x2cc   : > { %v1625_v43 = vadd.f32 %v1624_v60, %v5252_v59  ;;  %v3781_v59 = vor.u32 %v4360_v63, %v3778_v0  ;;  %v4416_v60 = vld [vmem:[#allocation7 + $0x1e4] sm:$0xf]  ;;  %v3941_v46 = vor.u32 %v4400_v52, %v3938_v44  ;;  %v3848_v44 = vld [vmem:[#allocation7 + $0xa8] sm:$0xf] }
 0x2cd   : > { %v4005_v41 = vor.u32 %v4416_v60, %v4002_v20  ;;  %v3906_v60 = vld [vmem:[#allocation7 + $0x130] sm:$0xf0] }
 0x2ce   : > { %v1824_v23 = vadd.f32 %v1788_v16, %v1625_v43  ;;  %2799 = vmatpush.bf16.msrb.mxu0 %v3781_v59  ;;  %v4192_v16 = vld [vmem:[#allocation7 + $0x360] sm:$0xf]  ;;  %v4412_v43 = vld [vmem:[#allocation7 + $0x1c4] sm:$0xf]  ;;  %v3970_v59 = vld [vmem:[#allocation7 + $0x1b0] sm:$0xf0] }
 0x2cf   : > { %v4193_v1 = vor.u32 %v4466_v9, %v4192_v16  ;;  %2822 = vmatpush.bf16.msrb.mxu1 %v4005_v41  ;;  %v3989_v36 = vor.u32 %v4412_v43, %v3986_v33  ;;  %v4454_v41 = vld [vmem:[#allocation7 + $0x30c] sm:$0xf0] }
 0x2d0   : > { %v1856_v48 = vmax.f32 %v1824_v23, 0.0  ;;  %v5364_v14 = vpop.f32.mrf.mxu2  ;;  %v1877_v23 = vmax.f32 %v1845_v7, 0.0  ;;  %v4388_v7 = vld [vmem:[#allocation7 + $0x104] sm:$0xf] }
 0x2d1   : > { %2768 = vmatpush.bf16.msrb.mxu3 %v4193_v1  ;;  %v4392_v1 = vld [vmem:[#allocation7 + $0x124] sm:$0xf] }
 0x2d2   : > { %v5348_v37 = vpack.c.bf16 %v1856_v48, %v1852_v3  ;;  %2695 = vmatmul.bf16.gmra.mxu0 %v5346_v51  ;;  %2753 = vmatmul.bf16.gmra.mxu2 %v5342_v31  ;;  %v5366_v57 = vpack.c.bf16 %v1881_v11, %v1877_v23  ;;  %v5368_v3 = vpack.c.bf16 %v1879_v15, %v1875_v38  ;;  %v4408_v48 = vld [vmem:[#allocation7 + $0x1a4] sm:$0xf]  ;;  %v1800_v11 = vperm.slane %v5344_v55, 1  ;;  %v4258_v15 = vld [vmem:[#allocation7 + $0x3f0] sm:$0xf0] }
 0x2d3   : > { %v1627_v54 = vpop.f32.mrf.mxu3  ;;  %2800 = vmatpush.bf16.msrb.mxu0 %v3765_v19  ;;  %2823 = vmatpush.bf16.msrb.mxu1 %v3989_v36  ;;  %v3973_v56 = vor.u32 %v4408_v48, %v3970_v59  ;;  %v4161_v19 = vor.u32 %v4458_v47, %v4160_v10  ;;  %v3909_v33 = vor.u32 %v4392_v1, %v3906_v60  ;;  %v4480_v38 = vld [vmem:[#allocation7 + $0x3e4] sm:$0xf]  ;;  %v3880_v23 = vld [vmem:[#allocation7 + $0xe8] sm:$0xf]  ;;  %v4451_v59 = vld [vmem:[#allocation7 + $0x2f4] sm:$0xf0] }
 0x2d4   : > { %2714 = vmatmul.bf16.vlgmr.msra.gmra.mxu1 %v5348_v37  ;;  %v1628_v34 = vadd.f32 %v1627_v54, %v5279_v39  ;;  %v3954_v54 = vld [vmem:[#allocation7 + $0x190] sm:$0xf0]  ;;  %v4088_v1 = vld [vmem:[#allocation7 + $0x288] sm:$0xf] }
 0x2d5   : > { %v3957_v42 = vor.u32 %v4404_v50, %v3954_v54 }
 0x2d6   : > { %v1828_v28 = vadd.f32 %v1792_v49, %v1628_v34 }
 0x2d7   : > { %2824 = vmatpush.bf16.msrb.mxu1 %v3973_v56 }
 0x2d8   : > { %v1860_v63 = vmax.f32 %v1828_v28, 0.0  ;;  %v5375_v24 = vpop.f32.mrf.mxu2  ;;  %v3890_v28 = vld [vmem:[#allocation7 + $0x110] sm:$0xf0] }
 0x2db   : > { %v1629_v13 = vpop.f32.mrf.mxu3  ;;  %2825 = vmatpush.bf16.msrb.mxu1 %v3957_v42 }
 0x2dc   : > { %v1630_v39 = vadd.f32 %v1629_v13, %v5298_v25  ;;  %v4176_v25 = vld [vmem:[#allocation7 + $0x340] sm:$0xf] }
 0x2dd   : > { %v4177_v4 = vor.u32 %v4462_v35, %v4176_v25  ;;  %v3864_v25 = vld [vmem:[#allocation7 + $0xc8] sm:$0xf]  ;;  %v4383_v35 = vld [vmem:[#allocation7 + $0xd4] sm:$0xf0] }
 0x2de   : > { %v1832_v40 = vadd.f32 %v1792_v49, %v1630_v39  ;;  %v4144_v49 = vld [vmem:[#allocation7 + $0x300] sm:$0xf]  ;;  %v3893_v39 = vor.u32 %v4388_v7, %v3890_v28  ;;  %v4226_v28 = vld [vmem:[#allocation7 + $0x3b0] sm:$0xf0] }
 0x2df   : > { %2769 = vmatpush.bf16.msrb.mxu3 %v4177_v4  ;;  %2826 = vmatpush.bf16.msrb.mxu1 %v3941_v46  ;;  %v4447_v4 = vld [vmem:[#allocation7 + $0x2d4] sm:$0xf0]  ;;  %v4104_v46 = vld [vmem:[#allocation7 + $0x2a8] sm:$0xf] }
 0x2e0   : > { %v1864_v0 = vmax.f32 %v1832_v40, 0.0  ;;  %v5380_v20 = vpop.f32.mrf.mxu2  ;;  %v4261_v40 = vor.u32 %v4480_v38, %v4258_v15  ;;  %v4072_v38 = vld [vmem:[#allocation7 + $0x268] sm:$0xf] }
 0x2e2   : > { %v5370_v29 = vpack.c.bf16 %v1864_v0, %v1860_v63  ;;  %2700 = vmatmul.bf16.gmra.mxu0 %v5368_v3  ;;  %2758 = vmatmul.bf16.gmra.mxu2 %v5366_v57  ;;  %v4387_v63 = vld [vmem:[#allocation7 + $0xf4] sm:$0xf0]  ;;  %v4136_v0 = vld [vmem:[#allocation7 + $0x2e8] sm:$0xf] }
 0x2e3   : > { %v1632_v22 = vpop.f32.mrf.mxu3  ;;  %2770 = vmatpush.bf16.msrb.mxu3 %v4161_v19  ;;  %2827 = vmatpush.bf16.msrb.mxu1 %v3925_v61  ;;  %v3881_v48 = vor.u32 %v4387_v63, %v3880_v23  ;;  %v4137_v50 = vor.u32 %v4451_v59, %v4136_v0  ;;  %v3800_v23 = vld [vmem:[#allocation7 + $0x48] sm:$0xf]  ;;  %v4367_v63 = vld [vmem:[#allocation7 + $0x54] sm:$0xf0] }
 0x2e4   : > { %2719 = vmatmul.bf16.gmra.mxu1 %v5370_v29  ;;  %v1633_v8 = vadd.f32 %v1632_v22, %v5312_v62  ;;  %v4120_v22 = vld [vmem:[#allocation7 + $0x2c8] sm:$0xf] }
 0x2e5   : > { %2909 = vmatpush.bf16.msra.mxu0 %v3881_v48  ;;  %2967 = vmatpush.bf16.msra.mxu2 %v4137_v50  ;;  %v4121_v10 = vor.u32 %v4447_v4, %v4120_v22  ;;  %v4056_v59 = vld [vmem:[#allocation7 + $0x248] sm:$0xf] }
 0x2e6   : > { %v1836_v16 = vadd.f32 %v1796_v27, %v1633_v8  ;;  %v3865_v8 = vor.u32 %v4383_v35, %v3864_v25  ;;  %v4431_v25 = vld [vmem:[#allocation7 + $0x254] sm:$0xf0]  ;;  %v3801_v35 = vor.u32 %v4367_v63, %v3800_v23 }
 0x2e7   : > { %2828 = vmatpush.bf16.msrb.mxu1 %v3909_v33 }
 0x2e8   : > { %v1868_v62 = vmax.f32 %v1836_v16, 0.0  ;;  %v5389_v54 = vpop.f32.mrf.mxu2 }
 0x2e9   : > { %2910 = vmatpush.bf16.msra.mxu0 %v3865_v8  ;;  %2968 = vmatpush.bf16.msra.mxu2 %v4121_v10  ;;  %v4468_v8 = vld [vmem:[#allocation7 + $0x384] sm:$0xf]  ;;  %v4210_v10 = vld [vmem:[#allocation7 + $0x390] sm:$0xf0] }
 0x2eb   : > { %v1634_v34 = vpop.f32.mrf.mxu3  ;;  %2829 = vmatpush.bf16.msrb.mxu1 %v3893_v39 }
 0x2ec   : > { %v1635_v9 = vadd.f32 %v1634_v34, %v5332_v2  ;;  %v4145_v2 = vor.u32 %v4454_v41, %v4144_v49  ;;  %v4242_v34 = vld [vmem:[#allocation7 + $0x3d0] sm:$0xf0]  ;;  %v4439_v49 = vld [vmem:[#allocation7 + $0x294] sm:$0xf0] }
 0x2ed   : > { %v4089_v41 = vor.u32 %v4439_v49, %v4088_v1  ;;  %v4194_v1 = vld [vmem:[#allocation7 + $0x370] sm:$0xf0]  ;;  %v4008_v49 = vld [vmem:[#allocation7 + $0x1e8] sm:$0xf] }
 0x2ee   : > { %v1840_v53 = vadd.f32 %v1796_v27, %v1635_v9  ;;  %2771 = vmatpush.bf16.msrb.mxu3 %v4145_v2  ;;  %v4379_v27 = vld [vmem:[#allocation7 + $0xb4] sm:$0xf0]  ;;  %v4472_v2 = vld [vmem:[#allocation7 + $0x3a4] sm:$0xf] }
 0x2ef   : > { %v3849_v16 = vor.u32 %v4379_v27, %v3848_v44  ;;  %v4443_v9 = vld [vmem:[#allocation7 + $0x2b4] sm:$0xf0]  ;;  %v4229_v39 = vor.u32 %v4472_v2, %v4226_v28  ;;  %v4040_v44 = vld [vmem:[#allocation7 + $0x228] sm:$0xf]  ;;  %v1794_v2 = vperm.slane %v5285_v17, 3 }
 0x2f0   : > { %v1872_v18 = vmax.f32 %v1840_v53, 0.0  ;;  %v4105_v53 = vor.u32 %v4443_v9, %v4104_v46  ;;  %v5397_v33 = vpop.f32.mrf.mxu2  ;;  %v4427_v27 = vld [vmem:[#allocation7 + $0x234] sm:$0xf0]  ;;  %v4024_v9 = vld [vmem:[#allocation7 + $0x208] sm:$0xf] }
 0x2f1   : > { %2911 = vmatpush.bf16.msra.mxu0 %v3849_v16  ;;  %v4359_v16 = vld [vmem:[#allocation7 + $0x14] sm:$0xf0]  ;;  %v3976_v17 = vld [vmem:[#allocation7 + $0x1a8] sm:$0xf] }
 0x2f2   : > { %v5382_v43 = vpack.c.bf16 %v1872_v18, %v1868_v62  ;;  %2801 = vmatmul.bf16.vlgmr.msrb.gmra.mxu0 %v5288_v5  ;;  %2859 = vmatmul.bf16.vlgmr.msrb.gmra.mxu2 %v5290_v45  ;;  %v3832_v62 = vld [vmem:[#allocation7 + $0x88] sm:$0xf]  ;;  %v4375_v18 = vld [vmem:[#allocation7 + $0x94] sm:$0xf0] }
 0x2f3   : > { %v1637_v13 = vpop.f32.mrf.mxu3  ;;  %2880 = vmatpush.bf16.msra.mxu3 %v4261_v40  ;;  %v3833_v60 = vor.u32 %v4375_v18, %v3832_v62  ;;  %2969 = vmatpush.bf16.msra.mxu2 %v4105_v53  ;;  %v4435_v40 = vld [vmem:[#allocation7 + $0x274] sm:$0xf0]  ;;  %v4464_v18 = vld [vmem:[#allocation7 + $0x364] sm:$0xf] }
 0x2f4   : > { %2724 = vmatmul.bf16.gmra.mxu1 %v5382_v43  ;;  %v1638_v36 = vadd.f32 %v1637_v13, %v5352_v21  ;;  %v1790_v13 = vperm.slane %v5268_v6, 3  ;;  %v4073_v48 = vor.u32 %v4435_v40, %v4072_v38 }
 0x2f5   : > { %2912 = vmatpush.bf16.msra.mxu0 %v3833_v60  ;;  %v4197_v60 = vor.u32 %v4464_v18, %v4194_v1  ;;  %v3912_v18 = vld [vmem:[#allocation7 + $0x128] sm:$0xf] }
 0x2f6   : > { %v1844_v21 = vadd.f32 %v1800_v11, %v1638_v36  ;;  %v3816_v36 = vld [vmem:[#allocation7 + $0x68] sm:$0xf] }
 0x2f7   : > { %2970 = vmatpush.bf16.msra.mxu2 %v4089_v41  ;;  %v4419_v41 = vld [vmem:[#allocation7 + $0x1f4] sm:$0xf0] }
 0x2f8   : > { %v1876_v19 = vmax.f32 %v1844_v21, 0.0  ;;  %v5402_v22 = vpop.f32.mrf.mxu2  ;;  %v4009_v28 = vor.u32 %v4419_v41, %v4008_v49 }
 0x2fa   : > { %2938 = vmatpush.bf16.msra.mxu1 %v4009_v28  ;;  %v4264_v28 = vld [vmem:[#allocation7 + $0x3e8] sm:$0xf] }
 0x2fb   : > { %v1639_v56 = vpop.f32.mrf.mxu3  ;;  %2971 = vmatpush.bf16.msra.mxu2 %v4073_v48  ;;  %v4178_v48 = vld [vmem:[#allocation7 + $0x350] sm:$0xf0] }
 0x2fc   : > { %v1640_v42 = vadd.f32 %v1639_v56, %v5364_v14  ;;  %v4245_v14 = vor.u32 %v4476_v26, %v4242_v34  ;;  %v4057_v56 = vor.u32 %v4431_v25, %v4056_v59  ;;  %v4041_v26 = vor.u32 %v4427_v27, %v4040_v44  ;;  %v3768_v34 = vld [vmem:[#allocation7 + $0x8] sm:$0xf]  ;;  %v4146_v27 = vld [vmem:[#allocation7 + $0x310] sm:$0xf0] }
 0x2fe   : > { %v1848_v47 = vadd.f32 %v1800_v11, %v1640_v42  ;;  %2881 = vmatpush.bf16.msra.mxu3 %v4245_v14  ;;  %v4371_v11 = vld [vmem:[#allocation7 + $0x74] sm:$0xf0]  ;;  %v3769_v14 = vor.u32 %v4359_v16, %v3768_v34 }
 0x2ff   : > { %v3817_v15 = vor.u32 %v4371_v11, %v3816_v36  ;;  %2972 = vmatpush.bf16.msra.mxu2 %v4057_v56  ;;  %v4399_v34 = vld [vmem:[#allocation7 + $0x154] sm:$0xf0] }
 0x300   : > { %v1880_v52 = vmax.f32 %v1848_v47, 0.0  ;;  %v3784_v47 = vld [vmem:[#allocation7 + $0x28] sm:$0xf] }
 0x301   : > { %2913 = vmatpush.bf16.msra.mxu0 %v3817_v15 }
 0x302   : > { %v5392_v12 = vpack.c.bf16 %v1880_v52, %v1876_v19  ;;  %2806 = vmatmul.bf16.gmra.mxu0 %v5318_v30  ;;  %2864 = vmatmul.bf16.gmra.mxu2 %v5314_v32  ;;  %v4363_v52 = vld [vmem:[#allocation7 + $0x34] sm:$0xf0] }
 0x303   : > { %v1738_v61 = vpop.f32.mrf.mxu3  ;;  %2882 = vmatpush.bf16.msra.mxu3 %v4229_v39  ;;  %v3785_v46 = vor.u32 %v4363_v52, %v3784_v47  ;;  %2973 = vmatpush.bf16.msra.mxu2 %v4041_v26  ;;  %v4415_v39 = vld [vmem:[#allocation7 + $0x1d4] sm:$0xf0]  ;;  %v1798_v52 = vperm.slane %v5316_v58, 3  ;;  %v3928_v26 = vld [vmem:[#allocation7 + $0x148] sm:$0xf] }
 0x304   : > { %2729 = vmatmul.bf16.gmra.mxu1 %v5392_v12  ;;  %v1739_v7 = vadd.f32 %v1738_v61, %v5375_v24  ;;  %v4423_v61 = vld [vmem:[#allocation7 + $0x214] sm:$0xf0] }
 0x305   : > { %2914 = vmatpush.bf16.msra.mxu0 %v3801_v35  ;;  %v4025_v53 = vor.u32 %v4423_v61, %v4024_v9  ;;  %v4403_v47 = vld [vmem:[#allocation7 + $0x174] sm:$0xf0] }
 0x306   : > { %v1822_v24 = vadd.f32 %v1790_v13, %v1739_v7  ;;  %v3992_v7 = vld [vmem:[#allocation7 + $0x1c8] sm:$0xf] }
 0x307   : > { %2974 = vmatpush.bf16.msra.mxu2 %v4025_v53 }
 0x308   : > { %v1854_v4 = vmax.f32 %v1822_v24, 0.0  ;;  %v4411_v24 = vld [vmem:[#allocation7 + $0x1b4] sm:$0xf0] }
 0x309   : > { %2915 = vmatpush.bf16.msra.mxu0 %v3785_v46  ;;  %v3977_v56 = vor.u32 %v4411_v24, %v3976_v17  ;;  %v4381_v24 = vld [vmem:[#allocation7 + $0xcc] sm:$0xf] }
 0x30b   : > { %v1740_v0 = vpop.f32.mrf.mxu3 }
 0x30c   : > { %v1741_v6 = vadd.f32 %v1740_v0, %v5380_v20  ;;  %v4213_v20 = vor.u32 %v4468_v8, %v4210_v10  ;;  %v4460_v0 = vld [vmem:[#allocation7 + $0x344] sm:$0xf]  ;;  %v3944_v10 = vld [vmem:[#allocation7 + $0x168] sm:$0xf] }
 0x30d   : > { %2916 = vmatpush.bf16.msra.mxu0 %v3769_v14  ;;  %v4181_v25 = vor.u32 %v4460_v0, %v4178_v48  ;;  %v3945_v44 = vor.u32 %v4403_v47, %v3944_v10 }
 0x30e   : > { %v1826_v50 = vadd.f32 %v1790_v13, %v1741_v6  ;;  %2883 = vmatpush.bf16.msra.mxu3 %v4213_v20  ;;  %v1721_v13 = vpop.f32.mrf.mxu2  ;;  %v3960_v6 = vld [vmem:[#allocation7 + $0x188] sm:$0xf]  ;;  %v4452_v20 = vld [vmem:[#allocation7 + $0x304] sm:$0xf] }
 0x30f   : > { %v4149_v16 = vor.u32 %v4452_v20, %v4146_v27  ;;  %v3850_v20 = vld [vmem:[#allocation7 + $0xb8] sm:$0xf0] }
 0x310   : > { %v1858_v21 = vmax.f32 %v1826_v50, 0.0  ;;  %v4456_v50 = vld [vmem:[#allocation7 + $0x324] sm:$0xf]  ;;  %v4106_v27 = vld [vmem:[#allocation7 + $0x2b8] sm:$0xf0] }
 0x312   : > { %v5404_v42 = vpack.c.bf16 %v1858_v21, %v1854_v4  ;;  %2811 = vmatmul.bf16.gmra.mxu0 %v5346_v51  ;;  %2869 = vmatmul.bf16.gmra.mxu2 %v5342_v31  ;;  %v4162_v4 = vld [vmem:[#allocation7 + $0x330] sm:$0xf0] }
 0x313   : > { %v1743_v19 = vpop.f32.mrf.mxu3  ;;  %2884 = vmatpush.bf16.msra.mxu3 %v4197_v60  ;;  %v4165_v21 = vor.u32 %v4456_v50, %v4162_v4  ;;  %v4122_v50 = vld [vmem:[#allocation7 + $0x2d8] sm:$0xf0]  ;;  %v4248_v4 = vld [vmem:[#allocation7 + $0x3c8] sm:$0xf] }
 0x314   : > { %2772 = vmatmul.bf16.vlgmr.msrb.gmra.mxu3 %v5404_v42  ;;  %2830 = vmatmul.bf16.vlgmr.msrb.gmra.mxu1 %v5348_v37  ;;  %v1744_v62 = vadd.f32 %v1743_v19, %v5389_v54  ;;  %v3993_v54 = vor.u32 %v4415_v39, %v3992_v7  ;;  %v4483_v39 = vld [vmem:[#allocation7 + $0x3f4] sm:$0xf0] }
 0x316   : > { %v1830_v11 = vadd.f32 %v1794_v2, %v1744_v62  ;;  %2939 = vmatpush.bf16.msra.mxu1 %v3993_v54  ;;  %v1724_v35 = vpop.f32.mrf.mxu2  ;;  %v3929_v62 = vor.u32 %v4399_v34, %v3928_v26  ;;  %v4449_v54 = vld [vmem:[#allocation7 + $0x2ec] sm:$0xf] }
 0x317   : > { %2885 = vmatpush.bf16.msra.mxu3 %v4181_v25 }
 0x318   : > { %v1862_v40 = vmax.f32 %v1830_v11, 0.0  ;;  %v4265_v11 = vor.u32 %v4483_v39, %v4264_v28  ;;  %v3818_v28 = vld [vmem:[#allocation7 + $0x78] sm:$0xf0]  ;;  %v4433_v39 = vld [vmem:[#allocation7 + $0x26c] sm:$0xf] }
 0x31a   : > { %2940 = vmatpush.bf16.msra.mxu1 %v3977_v56 }
 0x31b   : > { %v1745_v36 = vpop.f32.mrf.mxu3  ;;  %2886 = vmatpush.bf16.msra.mxu3 %v4165_v21  ;;  %v4479_v21 = vld [vmem:[#allocation7 + $0x3d4] sm:$0xf0] }
 0x31c   : > { %v1746_v38 = vadd.f32 %v1745_v36, %v5397_v33  ;;  %v4407_v33 = vld [vmem:[#allocation7 + $0x194] sm:$0xf0]  ;;  %v4385_v36 = vld [vmem:[#allocation7 + $0xec] sm:$0xf]  ;;  %v4249_v47 = vor.u32 %v4479_v21, %v4248_v4  ;;  %v3786_v21 = vld [vmem:[#allocation7 + $0x38] sm:$0xf0] }
 0x31d   : > { %v3961_v8 = vor.u32 %v4407_v33, %v3960_v6  ;;  %v3866_v6 = vld [vmem:[#allocation7 + $0xd8] sm:$0xf0]  ;;  %v4445_v33 = vld [vmem:[#allocation7 + $0x2cc] sm:$0xf] }
 0x31e   : > { %v1834_v15 = vadd.f32 %v1794_v2, %v1746_v38  ;;  %v1726_v14 = vpop.f32.mrf.mxu2  ;;  %v4391_v2 = vld [vmem:[#allocation7 + $0x114] sm:$0xf0]  ;;  %v3882_v38 = vld [vmem:[#allocation7 + $0xf8] sm:$0xf0]  ;;  %v3869_v56 = vor.u32 %v4381_v24, %v3866_v6  ;;  %v4125_v10 = vor.u32 %v4445_v33, %v4122_v50  ;;  %v4216_v6 = vld [vmem:[#allocation7 + $0x388] sm:$0xf] }
 0x31f   : > { %2941 = vmatpush.bf16.msra.mxu1 %v3961_v8  ;;  %2887 = vmatpush.bf16.msra.mxu3 %v4149_v16  ;;  %v3885_v0 = vor.u32 %v4385_v36, %v3882_v38  ;;  %v4074_v36 = vld [vmem:[#allocation7 + $0x278] sm:$0xf0]  ;;  %v4471_v33 = vld [vmem:[#allocation7 + $0x394] sm:$0xf0]  ;;  %v4361_v4 = vld [vmem:[#allocation7 + $0x2c] sm:$0xf] }
 0x320   : > { %v1866_v23 = vmax.f32 %v1834_v15, 0.0  ;;  %v4138_v15 = vld [vmem:[#allocation7 + $0x2f8] sm:$0xf0]  ;;  %v4217_v50 = vor.u32 %v4471_v33, %v4216_v6 }
 0x321   : > { %v4141_v48 = vor.u32 %v4449_v54, %v4138_v15  ;;  %3025 = vmatpush.bf16.msrb.mxu0 %v3885_v0  ;;  %v4077_v54 = vor.u32 %v4433_v39, %v4074_v36  ;;  %v5449_v15 = vld [vmem:[%s5769_s9] sm:$0xf]  ;;  %v4365_v0 = vld [vmem:[#allocation7 + $0x4c] sm:$0xf]  ;;  %v4058_v24 = vld [vmem:[#allocation7 + $0x258] sm:$0xf0] }
 0x322   : > { %v5413_v63 = vpack.c.bf16 %v1866_v23, %v1862_v40  ;;  %2816 = vmatmul.bf16.gmra.mxu0 %v5368_v3  ;;  %2874 = vmatmul.bf16.gmra.mxu2 %v5366_v57 }
 0x323   : > { %v1748_v59 = vpop.f32.mrf.mxu3  ;;  %2942 = vmatpush.bf16.msra.mxu1 %v3945_v44  ;;  %2996 = vmatpush.bf16.msrb.mxu3 %v4265_v11 }
 0x324   : > { %2777 = vmatmul.bf16.gmra.mxu3 %v5413_v63  ;;  %2835 = vmatmul.bf16.gmra.mxu1 %v5370_v29  ;;  %v1749_v19 = vadd.f32 %v1748_v59, %v5402_v22  ;;  %v4395_v22 = vld [vmem:[#allocation7 + $0x134] sm:$0xf0]  ;;  %v1802_v59 = vperm.slane %v5344_v55, 3 }
 0x325   : > { %v3913_v41 = vor.u32 %v4395_v22, %v3912_v18  ;;  %3083 = vmatpush.bf16.msrb.mxu2 %v4141_v48  ;;  %3026 = vmatpush.bf16.msrb.mxu0 %v3869_v56  ;;  %v4437_v18 = vld [vmem:[#allocation7 + $0x28c] sm:$0xf]  ;;  %v3802_v48 = vld [vmem:[#allocation7 + $0x58] sm:$0xf0] }
 0x326   : > { %v1838_v9 = vadd.f32 %v1798_v52, %v1749_v19  ;;  %v4377_v19 = vld [vmem:[#allocation7 + $0xac] sm:$0xf] }
 0x327   : > { %2943 = vmatpush.bf16.msra.mxu1 %v3929_v62  ;;  %v3853_v44 = vor.u32 %v4377_v19, %v3850_v20  ;;  %2997 = vmatpush.bf16.msrb.mxu3 %v4249_v47  ;;  %v3834_v62 = vld [vmem:[#allocation7 + $0x98] sm:$0xf0]  ;;  %v3789_v19 = vor.u32 %v4361_v4, %v3786_v21 }
 0x328   : > { %v1870_v1 = vmax.f32 %v1838_v9, 0.0  ;;  %v4042_v47 = vld [vmem:[#allocation7 + $0x238] sm:$0xf0] }
 0x329   : > { %3084 = vmatpush.bf16.msrb.mxu2 %v4125_v10  ;;  %3027 = vmatpush.bf16.msrb.mxu0 %v3853_v44  ;;  %v5454_v10 = vperm.slane %v5449_v15, 0 }
 0x32b   : > { %v1750_v46 = vpop.f32.mrf.mxu3  ;;  %2944 = vmatpush.bf16.msra.mxu1 %v3913_v41  ;;  %v4232_v41 = vld [vmem:[#allocation7 + $0x3a8] sm:$0xf] }
 0x32c   : > { %v1751_v61 = vadd.f32 %v1750_v46, %v1721_v13  ;;  %v3896_v13 = vld [vmem:[#allocation7 + $0x108] sm:$0xf] }
 0x32d   : > { %v3897_v23 = vor.u32 %v4391_v2, %v3896_v13  ;;  %v4369_v13 = vld [vmem:[#allocation7 + $0x6c] sm:$0xf] }
 0x32e   : > { %v1842_v53 = vadd.f32 %v1798_v52, %v1751_v61  ;;  %v3821_v38 = vor.u32 %v4369_v13, %v3818_v28 }
 0x32f   : > { %v5421_v49 = vpop.f32.mrf.mxu0  ;;  %2945 = vmatpush.bf16.msra.mxu1 %v3897_v23 }
 0x330   : > { %v1874_v60 = vmax.f32 %v1842_v53, 0.0  ;;  %v4373_v53 = vld [vmem:[#allocation7 + $0x8c] sm:$0xf] }
 0x332   : > { %v5423_v58 = vpack.c.bf16 %v1874_v60, %v1870_v1  ;;  %2917 = vmatmul.bf16.vlgmr.msra.gmra.mxu0 %v5288_v5  ;;  %2975 = vmatmul.bf16.vlgmr.msra.gmra.mxu2 %v5290_v45  ;;  %v4090_v1 = vld [vmem:[#allocation7 + $0x298] sm:$0xf0] }
 0x333   : > { %v1753_v7 = vpop.f32.mrf.mxu3  ;;  %v4093_v60 = vor.u32 %v4437_v18, %v4090_v1  ;;  %v4467_v18 = vld [vmem:[#allocation7 + $0x374] sm:$0xf0] }
 0x334   : > { %2782 = vmatmul.bf16.gmra.mxu3 %v5423_v58  ;;  %2840 = vmatmul.bf16.gmra.mxu1 %v5382_v43  ;;  %v1754_v17 = vadd.f32 %v1753_v7, %v1724_v35  ;;  %v4441_v35 = vld [vmem:[#allocation7 + $0x2ac] sm:$0xf]  ;;  %v4475_v7 = vld [vmem:[#allocation7 + $0x3b4] sm:$0xf0] }
 0x335   : > { %v5429_v40 = vpop.f32.mrf.mxu2  ;;  %v4109_v46 = vor.u32 %v4441_v35, %v4106_v27  ;;  %v4233_v2 = vor.u32 %v4475_v7, %v4232_v41  ;;  %v4357_v27 = vld [vmem:[#allocation7 + $0xc] sm:$0xf]  ;;  %v4010_v41 = vld [vmem:[#allocation7 + $0x1f8] sm:$0xf0] }
 0x336   : > { %v1846_v52 = vadd.f32 %v1802_v59, %v1754_v17  ;;  %v4429_v17 = vld [vmem:[#allocation7 + $0x24c] sm:$0xf] }
 0x337   : > { %v5432_v25 = vpop.f32.mrf.mxu0  ;;  %3085 = vmatpush.bf16.msrb.mxu2 %v4109_v46  ;;  %2998 = vmatpush.bf16.msrb.mxu3 %v4233_v2  ;;  %v4061_v56 = vor.u32 %v4429_v17, %v4058_v24  ;;  %v3770_v46 = vld [vmem:[#allocation7 + $0x18] sm:$0xf0]  ;;  %v4409_v17 = vld [vmem:[#allocation7 + $0x1ac] sm:$0xf] }
 0x338   : > { %v1878_v16 = vmax.f32 %v1846_v52, 0.0  ;;  %v2687_v52 = vadd.f32 %v5421_v49, %v5454_v10  ;;  %v4200_v49 = vld [vmem:[#allocation7 + $0x368] sm:$0xf]  ;;  %v2689_v2 = vadd.f32 %v5432_v25, %v5454_v10 }
 0x33b   : > { %v1755_v8 = vpop.f32.mrf.mxu3  ;;  %3086 = vmatpush.bf16.msrb.mxu2 %v4093_v60  ;;  %2999 = vmatpush.bf16.msrb.mxu3 %v4217_v50  ;;  %v4201_v60 = vor.u32 %v4467_v18, %v4200_v49  ;;  %v4397_v49 = vld [vmem:[#allocation7 + $0x14c] sm:$0xf]  ;;  %v3930_v18 = vld [vmem:[#allocation7 + $0x158] sm:$0xf0] }
 0x33c   : > { %v1756_v55 = vadd.f32 %v1755_v8, %v1726_v14  ;;  %v3837_v14 = vor.u32 %v4373_v53, %v3834_v62  ;;  %v4425_v8 = vld [vmem:[#allocation7 + $0x22c] sm:$0xf]  ;;  %v4026_v53 = vld [vmem:[#allocation7 + $0x218] sm:$0xf0] }
 0x33d   : > { %v5434_v34 = vpop.f32.mrf.mxu2  ;;  %v4045_v20 = vor.u32 %v4425_v8, %v4042_v47  ;;  %v4405_v8 = vld [vmem:[#allocation7 + $0x18c] sm:$0xf]  ;;  %v3962_v47 = vld [vmem:[#allocation7 + $0x198] sm:$0xf0] }
 0x33e   : > { %v1850_v26 = vadd.f32 %v1802_v59, %v1756_v55  ;;  %3028 = vmatpush.bf16.msrb.mxu0 %v3837_v14  ;;  %v3805_v59 = vor.u32 %v4365_v0, %v3802_v48  ;;  %v4417_v14 = vld [vmem:[#allocation7 + $0x1ec] sm:$0xf]  ;;  %v4463_v48 = vld [vmem:[#allocation7 + $0x354] sm:$0xf0] }
 0x33f   : > { %v5436_v61 = vpop.f32.mrf.mxu0  ;;  %3087 = vmatpush.bf16.msrb.mxu2 %v4077_v54  ;;  %v4013_v13 = vor.u32 %v4417_v14, %v4010_v41  ;;  %3000 = vmatpush.bf16.msrb.mxu3 %v4201_v60  ;;  %v3994_v54 = vld [vmem:[#allocation7 + $0x1d8] sm:$0xf0]  ;;  %v4152_v14 = vld [vmem:[#allocation7 + $0x308] sm:$0xf]  ;;  %v3933_v60 = vor.u32 %v4397_v49, %v3930_v18  ;;  %v4455_v41 = vld [vmem:[#allocation7 + $0x314] sm:$0xf0] }
 0x340   : > { %v1882_v9 = vmax.f32 %v1850_v26, 0.0  ;;  %v4421_v26 = vld [vmem:[#allocation7 + $0x20c] sm:$0xf]  ;;  %v2692_v25 = vadd.f32 %v5436_v61, %v5454_v10 }
 0x341   : > { %v4029_v62 = vor.u32 %v4421_v26, %v4026_v53  ;;  %3054 = vmatpush.bf16.msrb.mxu1 %v4013_v13  ;;  %v3914_v13 = vld [vmem:[#allocation7 + $0x138] sm:$0xf0]  ;;  %v4473_v49 = vld [vmem:[#allocation7 + $0x3ac] sm:$0xf] }
 0x342   : > { %v5438_v22 = vpack.c.bf16 %v1882_v9, %v1878_v16  ;;  %2922 = vmatmul.bf16.gmra.mxu0 %v5318_v30  ;;  %2980 = vmatmul.bf16.gmra.mxu2 %v5314_v32  ;;  %v3773_v9 = vor.u32 %v4357_v27, %v3770_v46  ;;  %v3946_v27 = vld [vmem:[#allocation7 + $0x178] sm:$0xf0]  ;;  %v4469_v18 = vld [vmem:[#allocation7 + $0x38c] sm:$0xf] }
 0x343   : > { %3029 = vmatpush.bf16.msrb.mxu0 %v3821_v38  ;;  %3088 = vmatpush.bf16.msrb.mxu2 %v4061_v56  ;;  %v4413_v38 = vld [vmem:[#allocation7 + $0x1cc] sm:$0xf] }
 0x344   : > { %2787 = vmatmul.bf16.gmra.mxu3 %v5438_v22  ;;  %2845 = vmatmul.bf16.gmra.mxu1 %v5392_v12  ;;  %v3997_v0 = vor.u32 %v4413_v38, %v3994_v54 }
 0x345   : > { %v5444_v11 = vpop.f32.mrf.mxu2 }
 0x346   : > { %3055 = vmatpush.bf16.msrb.mxu1 %v3997_v0 }
 0x347   : > { %v5451_v23 = vpop.f32.mrf.mxu0  ;;  %3030 = vmatpush.bf16.msrb.mxu0 %v3805_v59  ;;  %3089 = vmatpush.bf16.msrb.mxu2 %v4045_v20  ;;  %v3978_v59 = vld [vmem:[#allocation7 + $0x1b8] sm:$0xf0]  ;;  %v4459_v20 = vld [vmem:[#allocation7 + $0x334] sm:$0xf0] }
 0x348   : > { %v3981_v33 = vor.u32 %v4409_v17, %v3978_v59  ;;  %v3898_v17 = vld [vmem:[#allocation7 + $0x118] sm:$0xf0]  ;;  %v4481_v59 = vld [vmem:[#allocation7 + $0x3ec] sm:$0xf] }
 0x34a   : > { %3056 = vmatpush.bf16.msrb.mxu1 %v3981_v33 }
 0x34b   : > { %3031 = vmatpush.bf16.msrb.mxu0 %v3789_v19  ;;  %3090 = vmatpush.bf16.msrb.mxu2 %v4029_v62  ;;  %v4168_v19 = vld [vmem:[#allocation7 + $0x328] sm:$0xf] }
 0x34d   : > { %v5456_v35 = vpop.f32.mrf.mxu2 }
 0x34f   : > { %v5460_v55 = vpop.f32.mrf.mxu0  ;;  %3032 = vmatpush.bf16.msrb.mxu0 %v3773_v9 }
 0x351   : > { %v2715_v44 = vpop.f32.mrf.mxu1 }
 0x352   : > { %v2716_v16 = vadd.f32 %v2715_v44, %v2687_v52  ;;  %2927 = vmatmul.bf16.gmra.mxu0 %v5346_v51  ;;  %2985 = vmatmul.bf16.gmra.mxu2 %v5342_v31  ;;  %v4401_v52 = vld [vmem:[#allocation7 + $0x16c] sm:$0xf]  ;;  %v4169_v44 = vor.u32 %v4459_v20, %v4168_v19 }
 0x353   : > { %v3949_v26 = vor.u32 %v4401_v52, %v3946_v27 }
 0x354   : > { %2888 = vmatmul.bf16.vlgmr.msra.gmra.mxu3 %v5404_v42  ;;  %2946 = vmatmul.bf16.vlgmr.msra.gmra.mxu1 %v5348_v37  ;;  %v5467_v1 = vadd.f32 %v5429_v40, %v2716_v16  ;;  %v4184_v40 = vld [vmem:[#allocation7 + $0x348] sm:$0xf]  ;;  %v2694_v16 = vadd.f32 %v5451_v23, %v5454_v10  ;;  %v2697_v23 = vadd.f32 %v5460_v55, %v5454_v10 }
 0x355   : > { %v5469_v7 = vpop.f32.mrf.mxu2  ;;  %v4185_v24 = vor.u32 %v4463_v48, %v4184_v40  ;;  %v4389_v48 = vld [vmem:[#allocation7 + $0x10c] sm:$0xf] }
 0x357   : > { %v5473_v28 = vpop.f32.mrf.mxu0  ;;  %3001 = vmatpush.bf16.msrb.mxu3 %v4185_v24  ;;  %v4266_v24 = vld [vmem:[#allocation7 + $0x3f8] sm:$0xf0] }
 0x358   : > { %v4269_v33 = vor.u32 %v4481_v59, %v4266_v24 }
 0x359   : > { %v2717_v39 = vpop.f32.mrf.mxu1 }
 0x35a   : > { %v2718_v36 = vadd.f32 %v2717_v39, %v2689_v2  ;;  %v4153_v2 = vor.u32 %v4455_v41, %v4152_v14  ;;  %v4218_v14 = vld [vmem:[#allocation7 + $0x398] sm:$0xf0] }
 0x35b   : > { %3002 = vmatpush.bf16.msrb.mxu3 %v4169_v44 }
 0x35c   : > { %v5476_v6 = vadd.f32 %v5434_v34, %v2718_v36  ;;  %v3965_v34 = vor.u32 %v4405_v8, %v3962_v47  ;;  %v4477_v8 = vld [vmem:[#allocation7 + $0x3cc] sm:$0xf]  ;;  %v4250_v47 = vld [vmem:[#allocation7 + $0x3d8] sm:$0xf0] }
 0x35d   : > { %v5478_v56 = vpop.f32.mrf.mxu2 }
 0x35e   : > { %3057 = vmatpush.bf16.msrb.mxu1 %v3965_v34  ;;  %v4253_v34 = vor.u32 %v4477_v8, %v4250_v47 }
 0x35f   : > { %v5482_v50 = vpop.f32.mrf.mxu0  ;;  %3003 = vmatpush.bf16.msrb.mxu3 %v4153_v2 }
 0x360   : > { %v2702_v20 = vadd.f32 %v5482_v50, %v5454_v10 }
 0x361   : > { %v2720_v4 = vpop.f32.mrf.mxu1 }
 0x362   : > { %v2721_v21 = vadd.f32 %v2720_v4, %v2692_v25  ;;  %2932 = vmatmul.bf16.gmra.mxu0 %v5368_v3  ;;  %2990 = vmatmul.bf16.gmra.mxu2 %v5366_v57 }
 0x363   : > { %3058 = vmatpush.bf16.msrb.mxu1 %v3949_v26  ;;  %3112 = vmatpush.bf16.msra.mxu3 %v4269_v33 }
 0x364   : > { %2893 = vmatmul.bf16.gmra.mxu3 %v5413_v63  ;;  %2951 = vmatmul.bf16.gmra.mxu1 %v5370_v29  ;;  %v5489_v61 = vadd.f32 %v5444_v11, %v2721_v21  ;;  %v4393_v11 = vld [vmem:[#allocation7 + $0x12c] sm:$0xf] }
 0x365   : > { %v2759_v46 = vpop.f32.mrf.mxu2  ;;  %v3917_v36 = vor.u32 %v4393_v11, %v3914_v13 }
 0x367   : > { %v2703_v9 = vpop.f32.mrf.mxu0  ;;  %3059 = vmatpush.bf16.msrb.mxu1 %v3933_v60  ;;  %3113 = vmatpush.bf16.msra.mxu3 %v4253_v34 }
 0x369   : > { %v2722_v53 = vpop.f32.mrf.mxu1 }
 0x36a   : > { %v2723_v62 = vadd.f32 %v2722_v53, %v2694_v16 }
 0x36b   : > { %3060 = vmatpush.bf16.msrb.mxu1 %v3917_v36  ;;  %v4465_v36 = vld [vmem:[#allocation7 + $0x36c] sm:$0xf] }
 0x36c   : > { %v5494_v39 = vadd.f32 %v5456_v35, %v2723_v62  ;;  %v3901_v35 = vor.u32 %v4389_v48, %v3898_v17 }
 0x36d   : > { %v2761_v38 = vpop.f32.mrf.mxu2 }
 0x36f   : > { %v5498_v54 = vpop.f32.mrf.mxu0  ;;  %3061 = vmatpush.bf16.msrb.mxu1 %v3901_v35 }
 0x371   : > { %v2725_v40 = vpop.f32.mrf.mxu1 }
 0x372   : > { %v2726_v0 = vadd.f32 %v2725_v40, %v2697_v23  ;;  %3033 = vmatmul.bf16.vlgmr.msrb.gmra.mxu0 %v5288_v5  ;;  %3091 = vmatmul.bf16.vlgmr.msrb.gmra.mxu2 %v5290_v45  ;;  %v2699_v5 = vadd.f32 %v5473_v28, %v5454_v10  ;;  %v4461_v23 = vld [vmem:[#allocation7 + $0x34c] sm:$0xf] }
 0x374   : > { %2898 = vmatmul.bf16.gmra.mxu3 %v5423_v58  ;;  %2956 = vmatmul.bf16.gmra.mxu1 %v5382_v43  ;;  %v5505_v55 = vadd.f32 %v5469_v7, %v2726_v0 }
 0x375   : > { %v5507_v25 = vpop.f32.mrf.mxu2 }
 0x377   : > { %v5511_v4 = vpop.f32.mrf.mxu0 }
 0x379   : > { %v2727_v45 = vpop.f32.mrf.mxu1 }
 0x37a   : > { %v2728_v21 = vadd.f32 %v2727_v45, %v2699_v5  ;;  %v4457_v5 = vld [vmem:[#allocation7 + $0x32c] sm:$0xf]  ;;  %v4170_v45 = vld [vmem:[#allocation7 + $0x338] sm:$0xf0] }
 0x37b   : > { %v4173_v8 = vor.u32 %v4457_v5, %v4170_v45 }
 0x37c   : > { %v5514_v19 = vadd.f32 %v5478_v56, %v2728_v21  ;;  %v2704_v56 = vadd.f32 %v2703_v9, %v5454_v10  ;;  %v4453_v21 = vld [vmem:[#allocation7 + $0x30c] sm:$0xf] }
 0x37d   : > { %v5516_v7 = vpop.f32.mrf.mxu2 }
 0x37f   : > { %v5520_v27 = vpop.f32.mrf.mxu0 }
 0x381   : > { %v2730_v52 = vpop.f32.mrf.mxu1 }
 0x382   : > { %v2731_v44 = vadd.f32 %v2730_v52, %v2702_v20  ;;  %3038 = vmatmul.bf16.gmra.mxu0 %v5318_v30  ;;  %3096 = vmatmul.bf16.gmra.mxu2 %v5314_v32  ;;  %v4234_v30 = vld [vmem:[#allocation7 + $0x3b8] sm:$0xf0] }
 0x383   : > { %v4237_v32 = vor.u32 %v4473_v49, %v4234_v30 }
 0x384   : > { %2903 = vmatmul.bf16.gmra.mxu3 %v5438_v22  ;;  %2961 = vmatmul.bf16.gmra.mxu1 %v5392_v12  ;;  %v5526_v28 = vadd.f32 %v2759_v46, %v2731_v44  ;;  %v4221_v46 = vor.u32 %v4469_v18, %v4218_v14 }
 0x385   : > { %v5529_v26 = vpop.f32.mrf.mxu2  ;;  %3114 = vmatpush.bf16.msra.mxu3 %v4237_v32 }
 0x387   : > { %v5533_v62 = vpop.f32.mrf.mxu0 }
 0x389   : > { %v2732_v16 = vpop.f32.mrf.mxu1  ;;  %3115 = vmatpush.bf16.msra.mxu3 %v4221_v46 }
 0x38a   : > { %v2733_v50 = vadd.f32 %v2732_v16, %v2704_v56 }
 0x38c   : > { %v5531_v53 = vadd.f32 %v2761_v38, %v2733_v50  ;;  %v4202_v38 = vld [vmem:[#allocation7 + $0x378] sm:$0xf0] }
 0x38d   : > { %v5537_v41 = vpop.f32.mrf.mxu2  ;;  %v4205_v40 = vor.u32 %v4465_v36, %v4202_v38 }
 0x38f   : > { %v5543_v10 = vpop.f32.mrf.mxu0  ;;  %3116 = vmatpush.bf16.msra.mxu3 %v4205_v40 }
 0x391   : > { %v5535_v60 = vpop.f32.mrf.mxu1 }
 0x392   : > { %3043 = vmatmul.bf16.gmra.mxu0 %v5346_v51  ;;  %3101 = vmatmul.bf16.gmra.mxu2 %v5342_v31  ;;  %v4186_v31 = vld [vmem:[#allocation7 + $0x358] sm:$0xf0] }
 0x393   : > { %v4189_v17 = vor.u32 %v4461_v23, %v4186_v31 }
 0x394   : > { %3004 = vmatmul.bf16.vlgmr.msrb.gmra.mxu3 %v5404_v42  ;;  %3062 = vmatmul.bf16.vlgmr.msrb.gmra.mxu1 %v5348_v37 }
 0x395   : > { %v5548_v2 = vpop.f32.mrf.mxu2  ;;  %3117 = vmatpush.bf16.msra.mxu3 %v4189_v17 }
 0x397   : > { %v2773_v9 = vpop.f32.mrf.mxu3  ;;  %v5551_v48 = vpop.f32.mrf.mxu0 }
 0x398   : > { %v2774_v11 = vadd.f32 %v2773_v9, %v5467_v1 }
 0x399   : > { %v5546_v13 = vpop.f32.mrf.mxu1  ;;  %3118 = vmatpush.bf16.msra.mxu3 %v4173_v8 }
 0x39d   : > { %v5561_v1 = vpop.f32.mrf.mxu2 }
 0x39f   : > { %v2775_v51 = vpop.f32.mrf.mxu3  ;;  %v5566_v33 = vpop.f32.mrf.mxu0 }
 0x3a0   : > { %v2776_v0 = vadd.f32 %v2775_v51, %v5476_v6 }
 0x3a1   : > { %v5553_v37 = vpop.f32.mrf.mxu1 }
 0x3a2   : > { %v5555_v35 = vmax.f32 %v2774_v11, %v2776_v0  ;;  %3048 = vmatmul.bf16.gmra.mxu0 %v5368_v3  ;;  %3106 = vmatmul.bf16.gmra.mxu2 %v5366_v57  ;;  %v4154_v57 = vld [vmem:[#allocation7 + $0x318] sm:$0xf0]  ;;  %v5595_v11 = vperm.slane %v5449_v15, 2  ;;  %v5605_v0 = vperm.slane %v5449_v15, 1 }
 0x3a3   : > { %v4157_v20 = vor.u32 %v4453_v21, %v4154_v57 }
 0x3a4   : > { %3009 = vmatmul.bf16.gmra.mxu3 %v5413_v63  ;;  %3067 = vmatmul.bf16.gmra.mxu1 %v5370_v29  ;;  %v2803_v45 = vadd.f32 %v5498_v54, %v5605_v0 }
 0x3a5   : > { %v5569_v34 = vpop.f32.mrf.mxu2  ;;  %3119 = vmatpush.bf16.msra.mxu3 %v4157_v20 }
 0x3a7   : > { %v2778_v6 = vpop.f32.mrf.mxu3 }
 0x3a8   : > { %v2779_v59 = vadd.f32 %v2778_v6, %v5489_v61  ;;  %v5577_v61 = vpop.f32.mrf.mxu0  ;;  %v2805_v6 = vadd.f32 %v5511_v4, %v5605_v0 }
 0x3a9   : > { %v5564_v24 = vpop.f32.mrf.mxu1 }
 0x3aa   : > { %v2834_v21 = vadd.f32 %v5546_v13, %v2805_v6 }
 0x3af   : > { %v2780_v3 = vpop.f32.mrf.mxu3 }
 0x3b0   : > { %v2781_v47 = vadd.f32 %v2780_v3, %v5494_v39  ;;  %v5582_v39 = vpop.f32.mrf.mxu2  ;;  %v2918_v50 = vpop.f32.mrf.mxu0 }
 0x3b1   : > { %v5571_v29 = vpop.f32.mrf.mxu1  ;;  %v2919_v38 = vadd.f32 %v2918_v50, %v5595_v11 }
 0x3b2   : > { %v5573_v52 = vmax.f32 %v2779_v59, %v2781_v47  ;;  %v2863_v47 = vadd.f32 %v5516_v7, %v2834_v21  ;;  %v2808_v7 = vadd.f32 %v5520_v27, %v5605_v0 }
 0x3b4   : > { %3014 = vmatmul.bf16.gmra.mxu3 %v5423_v58  ;;  %3072 = vmatmul.bf16.gmra.mxu1 %v5382_v43 }
 0x3b7   : > { %v2783_v44 = vpop.f32.mrf.mxu3 }
 0x3b8   : > { %v2784_v56 = vadd.f32 %v2783_v44, %v5505_v55  ;;  %v2976_v43 = vpop.f32.mrf.mxu2  ;;  %v2920_v46 = vpop.f32.mrf.mxu0 }
 0x3b9   : > { %v5580_v16 = vpop.f32.mrf.mxu1  ;;  %v2921_v59 = vadd.f32 %v2920_v46, %v5595_v11 }
 0x3bf   : > { %v2785_v49 = vpop.f32.mrf.mxu3 }
 0x3c0   : > { %v2786_v30 = vadd.f32 %v2785_v49, %v5514_v19  ;;  %v2978_v36 = vpop.f32.mrf.mxu2  ;;  %v2923_v31 = vpop.f32.mrf.mxu0 }
 0x3c1   : > { %v5585_v18 = vpop.f32.mrf.mxu1  ;;  %v2924_v4 = vadd.f32 %v2923_v31, %v5595_v11  ;;  %v3142_v31 = vrot.slane %v5555_v35, 4 }
 0x3c2   : > { %v5587_v32 = vmax.f32 %v2784_v56, %v2786_v30 }
 0x3c4   : > { %3019 = vmatmul.bf16.gmra.mxu3 %v5438_v22  ;;  %3077 = vmatmul.bf16.gmra.mxu1 %v5392_v12 }
 0x3c7   : > { %v2788_v14 = vpop.f32.mrf.mxu3 }
 0x3c8   : > { %v2789_v55 = vadd.f32 %v2788_v14, %v5526_v28  ;;  %v2981_v5 = vpop.f32.mrf.mxu2  ;;  %v2925_v57 = vpop.f32.mrf.mxu0 }
 0x3c9   : > { %v5592_v9 = vpop.f32.mrf.mxu1 }
 0x3cf   : > { %v2790_v19 = vpop.f32.mrf.mxu3 }
 0x3d0   : > { %v2791_v23 = vadd.f32 %v2790_v19, %v5531_v53  ;;  %v2983_v54 = vpop.f32.mrf.mxu2  ;;  %v2837_v19 = vadd.f32 %v5553_v37, %v2808_v7 }
 0x3d1   : > { %v2947_v51 = vpop.f32.mrf.mxu1 }
 0x3d2   : > { %v5599_v40 = vmax.f32 %v2789_v55, %v2791_v23  ;;  %v2948_v12 = vadd.f32 %v2947_v51, %v2919_v38  ;;  %v2810_v55 = vadd.f32 %v5533_v62, %v5605_v0 }
 0x3d4   : > { %3120 = vmatmul.bf16.vlgmr.msra.gmra.mxu3 %v5404_v42  ;;  %v5602_v28 = vadd.f32 %v2976_v43, %v2948_v12  ;;  %v2832_v42 = vadd.f32 %v5535_v60, %v2803_v45  ;;  %v2928_v60 = vpop.f32.mrf.mxu0  ;;  %v2839_v38 = vadd.f32 %v5564_v24, %v2810_v55  ;;  %v3143_v45 = vmax.f32 %v5555_v35, %v3142_v31 }
 0x3d5   : > { %v2929_v37 = vadd.f32 %v2928_v60, %v5595_v11  ;;  %v2815_v35 = vadd.f32 %v5551_v48, %v5605_v0 }
 0x3d6   : > { %v2861_v44 = vadd.f32 %v5507_v25, %v2832_v42  ;;  %v2926_v25 = vadd.f32 %v2925_v57, %v5595_v11  ;;  %v2868_v62 = vadd.f32 %v5537_v41, %v2839_v38  ;;  %v3144_v41 = vrot.slane %v3143_v45, 2 }
 0x3d7   : > { %v2889_v17 = vpop.f32.mrf.mxu3  ;;  %v2844_v7 = vadd.f32 %v5580_v16, %v2815_v35 }
 0x3d8   : > { %v2890_v49 = vadd.f32 %v2889_v17, %v2861_v44  ;;  %v2986_v27 = vpop.f32.mrf.mxu2  ;;  %v2866_v17 = vadd.f32 %v5529_v26, %v2837_v19  ;;  %v2813_v44 = vadd.f32 %v5543_v10, %v5605_v0  ;;  %v3145_v60 = vmax.f32 %v3143_v45, %v3144_v41 }
 0x3d9   : > { %v2949_v53 = vpop.f32.mrf.mxu1  ;;  %v3198_v10 = vrot.slane %v5587_v32, 4  ;;  %v2873_v31 = vadd.f32 %v5561_v1, %v2844_v7  ;;  %v3226_v7 = vrot.slane %v5599_v40, 4 }
 0x3da   : > { %v2950_v3 = vadd.f32 %v2949_v53, %v2921_v59  ;;  %v3146_v48 = vrot.slane %v3145_v60, 1 }
 0x3dc   : > { %v5614_v8 = vadd.f32 %v2978_v36, %v2950_v3  ;;  %v2930_v21 = vpop.f32.mrf.mxu0 }
 0x3df   : > { %v2891_v20 = vpop.f32.mrf.mxu3 }
 0x3e0   : > { %v2892_v56 = vadd.f32 %v2891_v20, %v2863_v47 }
 0x3e1   : > { %v2952_v50 = vpop.f32.mrf.mxu1 }
 0x3e2   : > { %v2953_v30 = vadd.f32 %v2952_v50, %v2924_v4  ;;  %v3148_v43 = vmax.f32 %v2890_v49, %v2892_v56  ;;  %v2988_v50 = vpop.f32.mrf.mxu2 }
 0x3e4   : > { %3125 = vmatmul.bf16.gmra.mxu3 %v5413_v63  ;;  %v5620_v13 = vadd.f32 %v2981_v5, %v2953_v30  ;;  %v3149_v46 = vrot.slane %v3148_v43, 4  ;;  %v3170_v63 = vrot.slane %v5573_v52, 4  ;;  %v2931_v30 = vadd.f32 %v2930_v21, %v5595_v11 }
 0x3e6   : > { %v3150_v51 = vmax.f32 %v3148_v43, %v3149_v46  ;;  %v3171_v6 = vmax.f32 %v5573_v52, %v3170_v63 }
 0x3e7   : > { %v2894_v14 = vpop.f32.mrf.mxu3 }
 0x3e8   : > { %v3151_v5 = vrot.slane %v3150_v51, 2  ;;  %v2895_v24 = vadd.f32 %v2894_v14, %v2866_v17  ;;  %v3172_v47 = vrot.slane %v3171_v6, 2 }
 0x3e9   : > { %v2954_v36 = vpop.f32.mrf.mxu1 }
 0x3ea   : > { %v2955_v23 = vadd.f32 %v2954_v36, %v2926_v25  ;;  %v3152_v20 = vmax.f32 %v3150_v51, %v3151_v5  ;;  %v3173_v56 = vmax.f32 %v3171_v6, %v3172_v47  ;;  %v2933_v36 = vpop.f32.mrf.mxu0  ;;  %v2991_v5 = vpop.f32.mrf.mxu2 }
 0x3eb   : > { %v2934_v16 = vadd.f32 %v2933_v36, %v5595_v11 }
 0x3ec   : > { %v5630_v12 = vadd.f32 %v2983_v54, %v2955_v23  ;;  %v3153_v54 = vrot.slane %v3152_v20, 1  ;;  %v3174_v46 = vrot.slane %v3173_v56, 1 }
 0x3ee   : > { %v3154_v19 = vmax.f32 %v3152_v20, %v3153_v54 }
 0x3ef   : > { %v2896_v59 = vpop.f32.mrf.mxu3 }
 0x3f0   : > { %v2897_v53 = vadd.f32 %v2896_v59, %v2868_v62  ;;  %v3269_v62 = vrot.slane %v3154_v19, 4 }
 0x3f1   : > { %v2957_v3 = vpop.f32.mrf.mxu1 }
 0x3f2   : > { %v3176_v42 = vmax.f32 %v2895_v24, %v2897_v53  ;;  %v2958_v57 = vadd.f32 %v2957_v3, %v2929_v37  ;;  %v3147_v53 = vmax.f32 %v3145_v60, %v3146_v48  ;;  %v2935_v47 = vpop.f32.mrf.mxu0 }
 0x3f4   : > { %v3177_v4 = vrot.slane %v3176_v42, 4  ;;  %3130 = vmatmul.bf16.gmra.mxu3 %v5423_v58  ;;  %v5639_v26 = vadd.f32 %v2986_v27, %v2958_v57  ;;  %v2842_v58 = vadd.f32 %v5571_v29, %v2813_v44  ;;  %v3175_v27 = vmax.f32 %v3173_v56, %v3174_v46 }
 0x3f5   : > { %v3199_v29 = vmax.f32 %v5587_v32, %v3198_v10  ;;  %v3277_v1 = vsel %vm468_vm0, %v3147_v53, %v3269_v62  ;;  %v2818_v56 = vadd.f32 %v5566_v33, %v5605_v0  ;;  %v3227_v10 = vmax.f32 %v5599_v40, %v3226_v7 }
 0x3f6   : > { %v3178_v52 = vmax.f32 %v3176_v42, %v3177_v4  ;;  %v2871_v51 = vadd.f32 %v5548_v2, %v2842_v58  ;;  %v2993_v58 = vpop.f32.mrf.mxu2 }
 0x3f7   : > { %v2899_v49 = vpop.f32.mrf.mxu3  ;;  %v3200_v2 = vrot.slane %v3199_v29, 2 }
 0x3f8   : > { %v3179_v43 = vrot.slane %v3178_v52, 2  ;;  %v2900_v59 = vadd.f32 %v2899_v49, %v2871_v51  ;;  %v2936_v49 = vadd.f32 %v2935_v47, %v5595_v11 }
 0x3f9   : > { %v2959_v14 = vpop.f32.mrf.mxu1 }
 0x3fa   : > { %v3180_v55 = vmax.f32 %v3178_v52, %v3179_v43  ;;  %v2960_v25 = vadd.f32 %v2959_v14, %v2931_v30  ;;  %v3201_v52 = vmax.f32 %v3199_v29, %v3200_v2  ;;  %v2847_v30 = vadd.f32 %v5585_v18, %v2818_v56 }
 0x3fc   : > { %v3181_v38 = vrot.slane %v3180_v55, 1  ;;  %v5649_v23 = vadd.f32 %v2988_v50, %v2960_v25  ;;  %v2820_v50 = vadd.f32 %v5577_v61, %v5605_v0  ;;  %v3202_v14 = vrot.slane %v3201_v52, 1 }
 0x3fd   : > { %v2876_v46 = vadd.f32 %v5569_v34, %v2847_v30 }
 0x3fe   : > { %v3182_v63 = vmax.f32 %v3180_v55, %v3181_v38  ;;  %v2849_v54 = vadd.f32 %v5592_v9, %v2820_v50  ;;  %v3203_v11 = vmax.f32 %v3201_v52, %v3202_v14 }
 0x3ff   : > { %v2901_v17 = vpop.f32.mrf.mxu3 }
 0x400   : > { %v3271_v6 = vrot.slane %v3182_v63, 4  ;;  %v2902_v37 = vadd.f32 %v2901_v17, %v2873_v31  ;;  %v2878_v61 = vadd.f32 %v5582_v39, %v2849_v54  ;;  %v3228_v63 = vrot.slane %v3227_v10, 2 }
 0x401   : > { %v2962_v24 = vpop.f32.mrf.mxu1 }
 0x402   : > { %v3279_v45 = vsel %vm468_vm0, %v3175_v27, %v3271_v6  ;;  %v3204_v21 = vmax.f32 %v2900_v59, %v2902_v37  ;;  %v2963_v3 = vadd.f32 %v2962_v24, %v2934_v16  ;;  %v3229_v29 = vmax.f32 %v3227_v10, %v3228_v63 }
 0x403   : > { %v3285_v42 = vrot.slane %v3279_v45, 7 }
 0x404   : > { %v3205_v57 = vrot.slane %v3204_v21, 4  ;;  %3135 = vmatmul.bf16.gmra.mxu3 %v5438_v22  ;;  %v5658_v32 = vadd.f32 %v2991_v5, %v2963_v3  ;;  %v3230_v62 = vrot.slane %v3229_v29, 1 }
 0x405   : > { %v3286_v20 = vsel %vm963_vm2, %v3285_v42, %v3277_v1 }
 0x406   : > { %v3287_v4 = vsel %vm1782_vm10, %v3285_v42, %v3286_v20  ;;  %v3206_v41 = vmax.f32 %v3204_v21, %v3205_v57  ;;  %v3231_v5 = vmax.f32 %v3229_v29, %v3230_v62 }
 0x407   : > { %v2904_v44 = vpop.f32.mrf.mxu3 }
 0x408   : > { %v3207_v35 = vrot.slane %v3206_v41, 2  ;;  %v2905_v36 = vadd.f32 %v2904_v44, %v2876_v46 }
 0x409   : > { %v2964_v22 = vpop.f32.mrf.mxu1 }
 0x40a   : > { %v3208_v43 = vmax.f32 %v3206_v41, %v3207_v35  ;;  %v2965_v60 = vadd.f32 %v2964_v22, %v2936_v49  ;;  %v3034_v41 = vpop.f32.mrf.mxu0  ;;  %v3092_v49 = vpop.f32.mrf.mxu2 }
 0x40c   : > { %v3209_v55 = vrot.slane %v3208_v43, 1  ;;  %v2994_v25 = vadd.f32 %v2993_v58, %v2965_v60  ;;  %v5699_v58 = vperm.slane %v5449_v15, 3 }
 0x40e   : > { %v3210_v33 = vmax.f32 %v3208_v43, %v3209_v55  ;;  %v3035_v55 = vadd.f32 %v3034_v41, %v5699_v58 }
 0x40f   : > { %v2906_v0 = vpop.f32.mrf.mxu3 }
 0x410   : > { %v3273_v18 = vrot.slane %v3210_v33, 4  ;;  %v2907_v9 = vadd.f32 %v2906_v0, %v2878_v61 }
 0x411   : > { %v3063_v56 = vpop.f32.mrf.mxu1 }
 0x412   : > { %v3281_v19 = vsel %vm468_vm0, %v3203_v11, %v3273_v18  ;;  %v3232_v38 = vmax.f32 %v2905_v36, %v2907_v9  ;;  %v3036_v30 = vpop.f32.mrf.mxu0 }
 0x413   : > { %v3288_v48 = vrot.slane %v3281_v19, 6  ;;  %v3037_v7 = vadd.f32 %v3036_v30, %v5699_v58 }
 0x414   : > { %v3233_v51 = vrot.slane %v3232_v38, 4 }
 0x415   : > { %v3289_v31 = vsel %vm965_vm3, %v3288_v48, %v3287_v4 }
 0x416   : > { %v3234_v34 = vmax.f32 %v3232_v38, %v3233_v51  ;;  %v3291_v39 = vsel %vm3290_vm12, %v3288_v48, %v3289_v31 }
 0x417   : > { %v3005_v27 = vpop.f32.mrf.mxu3 }
 0x418   : > { %v3235_v40 = vrot.slane %v3234_v34, 2  ;;  %v3006_v16 = vadd.f32 %v3005_v27, %v5602_v28 }
 0x41a   : > { %v3236_v17 = vmax.f32 %v3234_v34, %v3235_v40  ;;  %v3039_v14 = vpop.f32.mrf.mxu0 }
 0x41b   : > { %v3040_v48 = vadd.f32 %v3039_v14, %v5699_v58 }
 0x41c   : > { %v3237_v6 = vrot.slane %v3236_v17, 1 }
 0x41e   : > { %v3238_v59 = vmax.f32 %v3236_v17, %v3237_v6 }
 0x41f   : > { %v3007_v37 = vpop.f32.mrf.mxu3 }
 0x420   : > { %v3275_v24 = vrot.slane %v3238_v59, 4  ;;  %v3008_v53 = vadd.f32 %v3007_v37, %v5614_v8 }
 0x422   : > { %v3283_v45 = vsel %vm468_vm0, %v3231_v5, %v3275_v24  ;;  %v5682_v21 = vmax.f32 %v3006_v16, %v3008_v53  ;;  %v3041_v61 = vpop.f32.mrf.mxu0 }
 0x423   : > { %v3292_v3 = vrot.slane %v3283_v45, 5  ;;  %v3042_v63 = vadd.f32 %v3041_v61, %v5699_v58 }
 0x424   : > { %v3156_v40 = vrot.slane %v5682_v21, 4 }
 0x425   : > { %v3293_v28 = vsel %vm967_vm4, %v3292_v3, %v3291_v39 }
 0x426   : > { %v3295_v2 = vsel %vm3294_vm13, %v3292_v3, %v3293_v28  ;;  %v3157_v45 = vmax.f32 %v5682_v21, %v3156_v40 }
 0x427   : > { %v3010_v42 = vpop.f32.mrf.mxu3  ;;  %3307 = vst [vmem:[%s5686_s25] sm:$0xff] %v3295_v2 }
 0x428   : > { %v3011_v1 = vadd.f32 %v3010_v42, %v5620_v13  ;;  %v3065_v13 = vpop.f32.mrf.mxu1 }
 0x429   : > { %v3066_v33 = vadd.f32 %v3065_v13, %v3037_v7 }
 0x42a   : > { %v3044_v38 = vpop.f32.mrf.mxu0 }
 0x42b   : > { %v3045_v41 = vadd.f32 %v3044_v38, %v5699_v58 }
 0x42f   : > { %v3012_v8 = vpop.f32.mrf.mxu3 }
 0x430   : > { %v3013_v57 = vadd.f32 %v3012_v8, %v5630_v12  ;;  %v3094_v12 = vpop.f32.mrf.mxu2  ;;  %v3158_v8 = vrot.slane %v3157_v45, 2 }
 0x431   : > { %v3095_v11 = vadd.f32 %v3094_v12, %v3066_v33 }
 0x432   : > { %v3183_v47 = vmax.f32 %v3011_v1, %v3013_v57  ;;  %v3046_v53 = vpop.f32.mrf.mxu0 }
 0x434   : > { %v3184_v27 = vrot.slane %v3183_v47, 4 }
 0x436   : > { %v3185_v6 = vmax.f32 %v3183_v47, %v3184_v27  ;;  %v3047_v47 = vadd.f32 %v3046_v53, %v5699_v58 }
 0x437   : > { %v3015_v20 = vpop.f32.mrf.mxu3 }
 0x438   : > { %v3016_v4 = vadd.f32 %v3015_v20, %v5639_v26  ;;  %v3068_v26 = vpop.f32.mrf.mxu1  ;;  %v3097_v46 = vpop.f32.mrf.mxu2  ;;  %v3186_v28 = vrot.slane %v3185_v6, 2 }
 0x439   : > { %v3069_v34 = vadd.f32 %v3068_v26, %v3040_v48 }
 0x43a   : > { %v3187_v20 = vmax.f32 %v3185_v6, %v3186_v28  ;;  %v3049_v30 = vpop.f32.mrf.mxu0 }
 0x43b   : > { %v3098_v16 = vadd.f32 %v3097_v46, %v3069_v34 }
 0x43c   : > { %v3188_v13 = vrot.slane %v3187_v20, 1 }
 0x43e   : > { %v3189_v33 = vmax.f32 %v3187_v20, %v3188_v13 }
 0x43f   : > { %v3017_v52 = vpop.f32.mrf.mxu3 }
 0x440   : > { %v3018_v44 = vadd.f32 %v3017_v52, %v5649_v23  ;;  %v3070_v0 = vpop.f32.mrf.mxu1  ;;  %v3099_v19 = vpop.f32.mrf.mxu2 }
 0x441   : > { %v3071_v39 = vadd.f32 %v3070_v0, %v3042_v63 }
 0x442   : > { %v5693_v50 = vmax.f32 %v3016_v4, %v3018_v44  ;;  %v3051_v63 = vpop.f32.mrf.mxu0 }
 0x443   : > { %v3100_v17 = vadd.f32 %v3099_v19, %v3071_v39  ;;  %v3052_v40 = vadd.f32 %v3051_v63, %v5699_v58 }
 0x447   : > { %v3020_v35 = vpop.f32.mrf.mxu3 }
 0x448   : > { %v3021_v22 = vadd.f32 %v3020_v35, %v5658_v32  ;;  %v3064_v32 = vadd.f32 %v3063_v56, %v3035_v55  ;;  %v3073_v31 = vpop.f32.mrf.mxu1  ;;  %v3102_v62 = vpop.f32.mrf.mxu2 }
 0x449   : > { %v3074_v35 = vadd.f32 %v3073_v31, %v3045_v41 }
 0x44a   : > { %v3093_v10 = vadd.f32 %v3092_v49, %v3064_v32  ;;  %v3159_v49 = vmax.f32 %v3157_v45, %v3158_v8 }
 0x44b   : > { %v3103_v7 = vadd.f32 %v3102_v62, %v3074_v35 }
 0x44c   : > { %v3160_v26 = vrot.slane %v3159_v49, 1 }
 0x44f   : > { %v3022_v54 = vpop.f32.mrf.mxu3 }
 0x450   : > { %v3023_v43 = vadd.f32 %v3022_v54, %v2994_v25  ;;  %v3075_v2 = vpop.f32.mrf.mxu1  ;;  %v3104_v56 = vpop.f32.mrf.mxu2  ;;  %v3212_v54 = vrot.slane %v5693_v50, 4 }
 0x452   : > { %v5696_v60 = vmax.f32 %v3021_v22, %v3023_v43  ;;  %v3076_v22 = vadd.f32 %v3075_v2, %v3047_v47  ;;  %v3213_v46 = vmax.f32 %v5693_v50, %v3212_v54 }
 0x454   : > { %v3105_v55 = vadd.f32 %v3104_v56, %v3076_v22  ;;  %v3214_v19 = vrot.slane %v3213_v46, 2 }
 0x456   : > { %v3215_v34 = vmax.f32 %v3213_v46, %v3214_v19 }
 0x457   : > { %v3121_v23 = vpop.f32.mrf.mxu3 }
 0x458   : > { %v3122_v36 = vadd.f32 %v3121_v23, %v3093_v10  ;;  %v3078_v14 = vpop.f32.mrf.mxu1  ;;  %v3161_v10 = vmax.f32 %v3159_v49, %v3160_v26 }
 0x45f   : > { %v3123_v25 = vpop.f32.mrf.mxu3 }
 0x460   : > { %v3124_v18 = vadd.f32 %v3123_v25, %v3095_v11  ;;  %v3080_v39 = vpop.f32.mrf.mxu1 }
 0x461   : > { %v3081_v62 = vadd.f32 %v3080_v39, %v3052_v40 }
 0x462   : > { %v3162_v9 = vmax.f32 %v3122_v36, %v3124_v18 }
 0x464   : > { %v3163_v51 = vrot.slane %v3162_v9, 4 }
 0x466   : > { %v3164_v29 = vmax.f32 %v3162_v9, %v3163_v51  ;;  %v3107_v9 = vpop.f32.mrf.mxu2 }
 0x467   : > { %v3126_v15 = vpop.f32.mrf.mxu3 }
 0x468   : > { %v3165_v37 = vrot.slane %v3164_v29, 2  ;;  %v3127_v5 = vadd.f32 %v3126_v15, %v3098_v16 }
 0x46a   : > { %v3166_v42 = vmax.f32 %v3164_v29, %v3165_v37  ;;  %v3050_v29 = vadd.f32 %v3049_v30, %v5699_v58  ;;  %v3240_v37 = vrot.slane %v5696_v60, 4 }
 0x46c   : > { %v3167_v52 = vrot.slane %v3166_v42, 1 }
 0x46e   : > { %v3168_v43 = vmax.f32 %v3166_v42, %v3167_v52  ;;  %v3241_v42 = vmax.f32 %v5696_v60, %v3240_v37 }
 0x46f   : > { %v3128_v59 = vpop.f32.mrf.mxu3 }
 0x470   : > { %v3129_v24 = vadd.f32 %v3128_v59, %v3100_v17  ;;  %v3270_v61 = vrot.slane %v3168_v43, 4  ;;  %v3079_v17 = vadd.f32 %v3078_v14, %v3050_v29  ;;  %v3216_v59 = vrot.slane %v3215_v34, 1 }
 0x471   : > { %v3242_v41 = vrot.slane %v3241_v42, 2 }
 0x472   : > { %v3190_v3 = vmax.f32 %v3127_v5, %v3129_v24  ;;  %v3278_v15 = vsel %vm468_vm0, %v3161_v10, %v3270_v61  ;;  %v3109_v24 = vpop.f32.mrf.mxu2  ;;  %v3108_v45 = vadd.f32 %v3107_v9, %v3079_v17  ;;  %v3217_v28 = vmax.f32 %v3215_v34, %v3216_v59 }
 0x473   : > { %v3243_v49 = vmax.f32 %v3241_v42, %v3242_v41 }
 0x474   : > { %v3191_v1 = vrot.slane %v3190_v3, 4 }
 0x475   : > { %v3244_v60 = vrot.slane %v3243_v49, 1 }
 0x476   : > { %v3192_v57 = vmax.f32 %v3190_v3, %v3191_v1  ;;  %v3110_v3 = vadd.f32 %v3109_v24, %v3081_v62 }
 0x477   : > { %v3131_v4 = vpop.f32.mrf.mxu3  ;;  %v3245_v13 = vmax.f32 %v3243_v49, %v3244_v60 }
 0x478   : > { %v3193_v44 = vrot.slane %v3192_v57, 2  ;;  %v3132_v0 = vadd.f32 %v3131_v4, %v3103_v7 }
 0x47a   : > { %v3194_v21 = vmax.f32 %v3192_v57, %v3193_v44 }
 0x47c   : > { %v3195_v12 = vrot.slane %v3194_v21, 1 }
 0x47e   : > { %v3196_v23 = vmax.f32 %v3194_v21, %v3195_v12 }
 0x47f   : > { %v3133_v32 = vpop.f32.mrf.mxu3 }
 0x480   : > { %v3272_v11 = vrot.slane %v3196_v23, 4  ;;  %v3134_v25 = vadd.f32 %v3133_v32, %v3105_v55 }
 0x482   : > { %v3280_v18 = vsel %vm468_vm0, %v3189_v33, %v3272_v11  ;;  %v3218_v36 = vmax.f32 %v3132_v0, %v3134_v25 }
 0x483   : > { %v3296_v38 = vrot.slane %v3280_v18, 7 }
 0x484   : > { %v3219_v48 = vrot.slane %v3218_v36, 4 }
 0x485   : > { %v3297_v51 = vsel %vm963_vm2, %v3296_v38, %v3278_v15 }
 0x486   : > { %v3298_v50 = vsel %vm1782_vm10, %v3296_v38, %v3297_v51  ;;  %v3220_v31 = vmax.f32 %v3218_v36, %v3219_v48 }
 0x487   : > { %v3136_v27 = vpop.f32.mrf.mxu3 }
 0x488   : > { %v3221_v16 = vrot.slane %v3220_v31, 2  ;;  %v3137_v8 = vadd.f32 %v3136_v27, %v3108_v45 }
 0x48a   : > { %v3222_v6 = vmax.f32 %v3220_v31, %v3221_v16 }
 0x48c   : > { %v3223_v5 = vrot.slane %v3222_v6, 1 }
 0x48e   : > { %v3224_v53 = vmax.f32 %v3222_v6, %v3223_v5 }
 0x48f   : > { %v3138_v2 = vpop.f32.mrf.mxu3 }
 0x490   : > { %v3274_v1 = vrot.slane %v3224_v53, 4  ;;  %v3139_v58 = vadd.f32 %v3138_v2, %v3110_v3 }
 0x492   : > { %v3282_v57 = vsel %vm468_vm0, %v3217_v28, %v3274_v1  ;;  %v3246_v20 = vmax.f32 %v3137_v8, %v3139_v58 }
 0x493   : > { %v3299_v4 = vrot.slane %v3282_v57, 6 }
 0x494   : > { %v3247_v47 = vrot.slane %v3246_v20, 4 }
 0x495   : > { %v3300_v52 = vsel %vm965_vm3, %v3299_v4, %v3298_v50 }
 0x496   : > { %v3248_v44 = vmax.f32 %v3246_v20, %v3247_v47  ;;  %v3301_v56 = vsel %vm3290_vm12, %v3299_v4, %v3300_v52 }
 0x498   : > { %v3249_v35 = vrot.slane %v3248_v44, 2 }
 0x49a   : > { %v3250_v22 = vmax.f32 %v3248_v44, %v3249_v35 }
 0x49c   : > { %v3251_v21 = vrot.slane %v3250_v22, 1 }
 0x49e   : > { %v3252_v30 = vmax.f32 %v3250_v22, %v3251_v21 }
 0x4a0   : > { %v3276_v54 = vrot.slane %v3252_v30, 4 }
 0x4a2   : > { %v3284_v43 = vsel %vm468_vm0, %v3245_v13, %v3276_v54 }
 0x4a3   : > { %v3302_v12 = vrot.slane %v3284_v43, 5 }
 0x4a5   : > { %v3303_v14 = vsel %vm967_vm4, %v3302_v12, %v3301_v56 }
 0x4a6   : > { %v3304_v26 = vsel %vm3294_vm13, %v3302_v12, %v3303_v14 }
 0x4a7   : > { %3308 = vst [vmem:[%s5686_s25 + $0x8] sm:$0xff] %v3304_v26 }
 0x4a8   : > { %4677 = shalt.err (!%p4674_p8)
}
 0x4a9   : > { %4497 = dma.vmem_to_hbm [thread:$0]  (%p4822_p5), %s3324_s21, 256, %s3326_s26, %s3310_s17  }
 0x4aa PF: > { %p4519_p9 = scmp.ge.s32.totalorder %s4720_s16, 2  ;;  %s3337_s6 = sand.u32 1, %s4708_s13  }
 0x4ab   : > { %s3338_s19 = scalar_lea.sflag [#allocation4], %s3337_s6 }
 0x4ac   : > { %p4510_p10 = pnand %p4519_p9, %p4826_p6 }
 0x4ae   : > { %p4511_p11 = pneg %p4510_p10 }
 0x4b0   : > { %4703 = dma.done.wait (%p4511_p11), %s3338_s19, 256  }
 0x4b1   : > { %4705 = vsyncadd (%p4511_p11), %s3338_s19, 4294967040  ;;  %s5785_s16 = sld [smem:[#allocation13_spill]]  ;;  %s5788_s13 = smov %s4712_s14 }
 0x4b2   : > { %s5786_s25 = sld [smem:[#allocation12_spill]] }
 0x4b3   : > { %s5787_s15 = sld [smem:[#allocation14_spill]] }
 0x4b7   : > { %p22_p12 = scmp.ge.s32.totalorder %s5785_s16, 4  }
 0x4b8   : > { %s5789_s14 = smov %s5786_s25 }
 0x4b9   :  { %24 = sbr.rel (!%p22_p12) target bundleno = 8 (0x8), region = 108 }
 0x4be   :  { %3344 = vsyncpa [#allocation3], 1 }
 0x4bf   :  { %3346 = vsyncpa [#allocation3 + $0x1], 1 }
 0x4c0   :  { %3347 = vsyncpa [#allocation6], 1 }
 0x4c1   :  { %3348 = vsyncpa [#allocation4], 1 }
 0x4c2   :  { %3350 = vsyncpa [#allocation4 + $0x1], 1 }

</bundles_post_ra>
